<compile_context>
chip_gen: v7x
topology: tpu7x:2x2x1
jax: 0.10.0
libtpu: 0.0.40
codegen_flags: <defaults>
</compile_context>

<pallas_src>
import math

import jax
import jax.numpy as jnp
from jax import lax
from jax.experimental import pallas as pl
from jax.experimental.pallas import tpu as pltpu


def _zero_halo(pad_ref, H, W, C):
    """Zero only the 1-element halo (rows 0 / H+1, cols 0 / W+1) of a (H+2, W+2, C) ref."""
    zr = jnp.zeros((1, W + 2, C), jnp.bfloat16)
    zc = jnp.zeros((H, 1, C), jnp.bfloat16)
    pad_ref[0:1, :, :] = zr
    pad_ref[H + 1:H + 2, :, :] = zr
    pad_ref[1:H + 1, 0:1, :] = zc
    pad_ref[1:H + 1, W + 1:W + 2, :] = zc


def _conv3x3_relu(pad_ref, w_ref, b_ref, H, W, cin, cout):
    """3x3 'same' conv + ReLU on a zero-padded (H+2, W+2, cin) bf16 VMEM ref.

    dx collapsed into the contraction dim (K = 3*cin): weights are (3, 3*cin, cout) with
    row index dx*cin + ci.  Returns (H*W, cout) f32 (post-ReLU).
    """
    patch = jnp.concatenate(
        [pad_ref[:, 0:W, :], pad_ref[:, 1:W + 1, :], pad_ref[:, 2:W + 2, :]],
        axis=-1)                                             # (H+2, W, 3*cin) bf16
    acc = jnp.dot(patch[0:H].reshape(H * W, 3 * cin), w_ref[0],
                  preferred_element_type=jnp.float32)        # dy=0 initializes acc
    for dy in (1, 2):
        acc = acc + jnp.dot(patch[dy:dy + H].reshape(H * W, 3 * cin), w_ref[dy],
                            preferred_element_type=jnp.float32)
    return jnp.maximum(acc + b_ref[...], 0.0)                # (H*W, cout) f32


def _unet_fused(x, w1, b1, w2, b2, wt, bt, w3, b3, w4t, b4):
    """Full UNet forward for one batch-grid: returns (N, Cout, H*W) f32 (lane-dense)."""
    N, H, W, Cin = x.shape
    assert H % 2 == 0 and W % 2 == 0, "MaxPool2d(2) path assumes even H, W"
    C = 64
    Hp, Wp = H // 2, W // 2
    Cout = w4t.shape[0]
    P = H * W

    def kernel(x_ref, w1_ref, b1_ref, w2_ref, b2_ref, wt_ref, bt_ref,
               w3_ref, b3_ref, w4t_ref, b4_ref, o_ref, pad_in, pad_c):
        # ---------------- encoder ----------------
        _zero_halo(pad_in, H, W, Cin)
        pad_in[1:H + 1, 1:W + 1, :] = x_ref[0].astype(jnp.bfloat16)
        h1 = _conv3x3_relu(pad_in, w1_ref, b1_ref, H, W, Cin, C)        # (H*W, 64) f32

        _zero_halo(pad_c, H, W, C)
        pad_c[1:H + 1, 1:W + 1, :] = h1.reshape(H, W, C).astype(jnp.bfloat16)
        h2 = _conv3x3_relu(pad_c, w2_ref, b2_ref, H, W, C, C)           # (H*W, 64) f32

        # 2x2 max-pool (lane-preserving reshapes only); z never leaves VMEM.
        hr = h2.reshape(Hp, 2, W, C)
        hm = jnp.maximum(hr[:, 0], hr[:, 1])                            # (Hp, W, 64)
        hw = hm.reshape(Hp, Wp, 2, C)
        z = jnp.maximum(hw[:, :, 0, :], hw[:, :, 1, :])                 # (Hp, Wp, 64) f32

        # ---------------- decoder ----------------
        # ConvTranspose2d(k=2, s=2) + ReLU as ONE N=256 matmul (cols = t*64 + cout).
        zm = z.astype(jnp.bfloat16).reshape(Hp * Wp, C)
        y = jnp.dot(zm, wt_ref[...], preferred_element_type=jnp.float32)  # (Hp*Wp, 256)
        y = jnp.maximum(y + bt_ref[...], 0.0).astype(jnp.bfloat16)
        sub = [y[:, t * C:(t + 1) * C].reshape(Hp, Wp, C) for t in range(4)]
        even = jnp.stack([sub[0], sub[1]], axis=2).reshape(Hp, W, C)     # output rows 2i
        odd = jnp.stack([sub[2], sub[3]], axis=2).reshape(Hp, W, C)      # output rows 2i+1
        up = jnp.stack([even, odd], axis=1).reshape(H, W, C)             # (H, W, 64) bf16

        # Decoder conv3x3 + ReLU; pad_c reused (halo is still zero, interior rewritten).
        pad_c[1:H + 1, 1:W + 1, :] = up
        d = _conv3x3_relu(pad_c, w3_ref, b3_ref, H, W, C, C)             # (H*W, 64) f32

        # Final 1x1 conv computed transposed -> (Cout, H*W): lane-dense store, no
        # 4/128-lane masked writes and no NCHW transpose in the wrapper.
        out_t = lax.dot_general(
            w4t_ref[...], d.astype(jnp.bfloat16),
            dimension_numbers=(((1,), (1,)), ((), ())),
            preferred_element_type=jnp.float32)                          # (Cout, H*W)
        o_ref[0] = out_t + b4_ref[...]

    return pl.pallas_call(
        kernel,
        out_shape=jax.ShapeDtypeStruct((N, Cout, P), jnp.float32),
        grid=(N,),
        in_specs=[
            pl.BlockSpec((1, H, W, Cin), lambda n: (n, 0, 0, 0)),
            pl.BlockSpec((3, 3 * Cin, C), lambda n: (0, 0, 0)),
            pl.BlockSpec((1, C), lambda n: (0, 0)),
            pl.BlockSpec((3, 3 * C, C), lambda n: (0, 0, 0)),
            pl.BlockSpec((1, C), lambda n: (0, 0)),
            pl.BlockSpec((C, 4 * C), lambda n: (0, 0)),
            pl.BlockSpec((1, 4 * C), lambda n: (0, 0)),
            pl.BlockSpec((3, 3 * C, C), lambda n: (0, 0, 0)),
            pl.BlockSpec((1, C), lambda n: (0, 0)),
            pl.BlockSpec((Cout, C), lambda n: (0, 0)),
            pl.BlockSpec((Cout, 1), lambda n: (0, 0)),
        ],
        out_specs=pl.BlockSpec((1, Cout, P), lambda n: (n, 0, 0)),
        scratch_shapes=[
            pltpu.VMEM((H + 2, W + 2, Cin), jnp.bfloat16),   # padded input
            pltpu.VMEM((H + 2, W + 2, C), jnp.bfloat16),     # padded 64-ch map (reused)
        ],
        compiler_params=pltpu.CompilerParams(
            dimension_semantics=("parallel",),
            vmem_limit_bytes=32 * 1024 * 1024),
    )(x, w1, b1, w2, b2, wt, bt, w3, b3, w4t, b4)


def init_params(key, n_channels):
    """Deterministic, PyTorch-default-style uniform init (bound = 1/sqrt(fan_in)).

    Conv weights stored as (kh, kw, cin, cout) (= torch weight.permute(2,3,1,0));
    ConvTranspose weight as (kh, kw, cin, cout) (= torch weight.permute(2,3,0,1)).
    """
    def uconv(k, kh, kw, cin, cout):
        fan_in = cin * kh * kw
        bound = 1.0 / math.sqrt(fan_in)
        kw_, kb_ = jax.random.split(k)
        w = jax.random.uniform(kw_, (kh, kw, cin, cout), jnp.float32, -bound, bound)
        b = jax.random.uniform(kb_, (cout,), jnp.float32, -bound, bound)
        return w, b

    k1, k2, k3, k4, k5 = jax.random.split(key, 5)
    p = {}
    p["enc1_w"], p["enc1_b"] = uconv(k1, 3, 3, n_channels, 64)   # Conv2d(n, 64, 3, pad=1)
    p["enc2_w"], p["enc2_b"] = uconv(k2, 3, 3, 64, 64)           # Conv2d(64, 64, 3, pad=1)
    p["up_w"], p["up_b"] = uconv(k3, 2, 2, 64, 64)               # ConvTranspose2d(64, 64, 2, s=2)
    p["dec1_w"], p["dec1_b"] = uconv(k4, 3, 3, 64, 64)           # Conv2d(64, 64, 3, pad=1)
    w5, b5 = uconv(k5, 1, 1, 64, n_channels)                     # Conv2d(64, n, 1)
    p["out_w"], p["out_b"] = w5.reshape(64, n_channels), b5
    return p


@jax.jit
def unet_forward(params, x_nhwc):
    """x_nhwc: (N, H, W, n_channels) -> (N, n_channels, H, W) (NCHW, like the PyTorch module)."""
    N, H, W, n_ch = x_nhwc.shape
    bf = lambda w: w.astype(jnp.bfloat16)
    # Weights in kernel-ready layouts (dx collapsed into K; convT concatenated to N=256).
    w1 = bf(params["enc1_w"]).reshape(3, 3 * n_ch, 64)
    b1 = params["enc1_b"].reshape(1, 64)
    w2 = bf(params["enc2_w"]).reshape(3, 3 * 64, 64)
    b2 = params["enc2_b"].reshape(1, 64)
    wt = jnp.transpose(bf(params["up_w"]).reshape(4, 64, 64), (1, 0, 2)).reshape(64, 256)
    bt = jnp.tile(params["up_b"], (4,)).reshape(1, 256)          # col = t*64 + cout
    w3 = bf(params["dec1_w"]).reshape(3, 3 * 64, 64)
    b3 = params["dec1_b"].reshape(1, 64)
    w4t = bf(params["out_w"]).T                                  # (n_ch, 64)
    b4 = params["out_b"].reshape(n_ch, 1)

    y = _unet_fused(x_nhwc, w1, b1, w2, b2, wt, bt, w3, b3, w4t, b4)  # (N, n_ch, H*W)
    return y.reshape(N, n_ch, H, W)                              # free reshape, already NCHW


if __name__ == "__main__":
    key = jax.random.PRNGKey(0)
    kx, kp = jax.random.split(key)

    N, H, W, C = 2, 16, 16, 4                   # module is fed NHWC (it permutes internally)
    x = jax.random.normal(kx, (N, H, W, C), jnp.float32)
    params = init_params(kp, C)

    y = unet_forward(params, x)
    y = jax.block_until_ready(y)

    assert y.shape == (N, C, H, W), y.shape
    assert bool(jnp.all(jnp.isfinite(y)))
    print("KERNEL_OK")
</pallas_src>

<mosaic_0001>
module attributes {stable_mosaic.version = 11 : i64} {
  func.func @kernel(%arg0: i32, %arg1: memref<1x16x16x4xf32, #tpu.memory_space<vmem>>, %arg2: memref<3x12x64xbf16, #tpu.memory_space<vmem>>, %arg3: memref<1x64xf32, #tpu.memory_space<vmem>>, %arg4: memref<3x192x64xbf16, #tpu.memory_space<vmem>>, %arg5: memref<1x64xf32, #tpu.memory_space<vmem>>, %arg6: memref<64x256xbf16, #tpu.memory_space<vmem>>, %arg7: memref<1x256xf32, #tpu.memory_space<vmem>>, %arg8: memref<3x192x64xbf16, #tpu.memory_space<vmem>>, %arg9: memref<1x64xf32, #tpu.memory_space<vmem>>, %arg10: memref<4x64xbf16, #tpu.memory_space<vmem>>, %arg11: memref<4x1xf32, #tpu.memory_space<vmem>>, %arg12: memref<1x4x256xf32, #tpu.memory_space<vmem>>, %arg13: memref<18x18x4xbf16, #tpu.memory_space<vmem>>, %arg14: memref<18x18x64xbf16, #tpu.memory_space<vmem>>) attributes {dimension_semantics = [#tpu.dimension_semantics<parallel>], iteration_bounds = array<i64: 2>, scalar_prefetch = 0 : i64, scratch_operands = 2 : i64, tpu.core_type = #tpu.core_type<tc>, window_params = [{transform_indices = @transform_0, window_bounds = array<i64: 1, 16, 16, 4>}, {pipeline_mode = #tpu.pipeline_mode<synchronous>, transform_indices = @transform_1, window_bounds = array<i64: 3, 12, 64>}, {pipeline_mode = #tpu.pipeline_mode<synchronous>, transform_indices = @transform_2, window_bounds = array<i64: 1, 64>}, {pipeline_mode = #tpu.pipeline_mode<synchronous>, transform_indices = @transform_3, window_bounds = array<i64: 3, 192, 64>}, {pipeline_mode = #tpu.pipeline_mode<synchronous>, transform_indices = @transform_4, window_bounds = array<i64: 1, 64>}, {pipeline_mode = #tpu.pipeline_mode<synchronous>, transform_indices = @transform_5, window_bounds = array<i64: 64, 256>}, {pipeline_mode = #tpu.pipeline_mode<synchronous>, transform_indices = @transform_6, window_bounds = array<i64: 1, 256>}, {pipeline_mode = #tpu.pipeline_mode<synchronous>, transform_indices = @transform_7, window_bounds = array<i64: 3, 192, 64>}, {pipeline_mode = #tpu.pipeline_mode<synchronous>, transform_indices = @transform_8, window_bounds = array<i64: 1, 64>}, {pipeline_mode = #tpu.pipeline_mode<synchronous>, transform_indices = @transform_9, window_bounds = array<i64: 4, 64>}, {pipeline_mode = #tpu.pipeline_mode<synchronous>, transform_indices = @transform_10, window_bounds = array<i64: 4, 1>}, {transform_indices = @transform_11, window_bounds = array<i64: 1, 4, 256>}]} {
    %cst = arith.constant 0.000000e+00 : bf16
    %0 = vector.broadcast %cst : bf16 to vector<1x18x4xbf16>
    %cst_0 = arith.constant 0.000000e+00 : bf16
    %1 = vector.broadcast %cst_0 : bf16 to vector<16x1x4xbf16>
    %c0 = arith.constant 0 : index
    %c0_1 = arith.constant 0 : index
    %c0_2 = arith.constant 0 : index
    %2 = vector.load %arg13[%c0, %c0_1, %c0_2] : memref<18x18x4xbf16, #tpu.memory_space<vmem>>, vector<1x18x4xbf16>
    tpu.vector_store %arg13[%c0, %c0_1, %c0_2], %0 {strides = array<i32>} : memref<18x18x4xbf16, #tpu.memory_space<vmem>>, vector<1x18x4xbf16>,
    %c17 = arith.constant 17 : index
    %c0_3 = arith.constant 0 : index
    %c0_4 = arith.constant 0 : index
    %3 = vector.load %arg13[%c17, %c0_3, %c0_4] : memref<18x18x4xbf16, #tpu.memory_space<vmem>>, vector<1x18x4xbf16>
    tpu.vector_store %arg13[%c17, %c0_3, %c0_4], %0 {strides = array<i32>} : memref<18x18x4xbf16, #tpu.memory_space<vmem>>, vector<1x18x4xbf16>,
    %c1 = arith.constant 1 : index
    %c0_5 = arith.constant 0 : index
    %c0_6 = arith.constant 0 : index
    %4 = vector.load %arg13[%c1, %c0_5, %c0_6] : memref<18x18x4xbf16, #tpu.memory_space<vmem>>, vector<16x1x4xbf16>
    tpu.vector_store %arg13[%c1, %c0_5, %c0_6], %1 {strides = array<i32>} : memref<18x18x4xbf16, #tpu.memory_space<vmem>>, vector<16x1x4xbf16>,
    %c1_7 = arith.constant 1 : index
    %c17_8 = arith.constant 17 : index
    %c0_9 = arith.constant 0 : index
    %5 = vector.load %arg13[%c1_7, %c17_8, %c0_9] : memref<18x18x4xbf16, #tpu.memory_space<vmem>>, vector<16x1x4xbf16>
    tpu.vector_store %arg13[%c1_7, %c17_8, %c0_9], %1 {strides = array<i32>} : memref<18x18x4xbf16, #tpu.memory_space<vmem>>, vector<16x1x4xbf16>,
    %c0_10 = arith.constant 0 : index
    %c0_11 = arith.constant 0 : index
    %c0_12 = arith.constant 0 : index
    %c0_13 = arith.constant 0 : index
    %6 = vector.load %arg1[%c0_10, %c0_11, %c0_12, %c0_13] : memref<1x16x16x4xf32, #tpu.memory_space<vmem>>, vector<1x16x16x4xf32>
    %7 = vector.shape_cast %6 : vector<1x16x16x4xf32> to vector<16x16x4xf32>
    %8 = arith.truncf %7 : vector<16x16x4xf32> to vector<16x16x4xbf16>
    %c1_14 = arith.constant 1 : index
    %c1_15 = arith.constant 1 : index
    %c0_16 = arith.constant 0 : index
    %9 = vector.load %arg13[%c1_14, %c1_15, %c0_16] : memref<18x18x4xbf16, #tpu.memory_space<vmem>>, vector<16x16x4xbf16>
    tpu.vector_store %arg13[%c1_14, %c1_15, %c0_16], %8 {strides = array<i32>} : memref<18x18x4xbf16, #tpu.memory_space<vmem>>, vector<16x16x4xbf16>,
    %c0_17 = arith.constant 0 : index
    %c0_18 = arith.constant 0 : index
    %c0_19 = arith.constant 0 : index
    %10 = vector.load %arg13[%c0_17, %c0_18, %c0_19] : memref<18x18x4xbf16, #tpu.memory_space<vmem>>, vector<18x16x4xbf16>
    %c0_20 = arith.constant 0 : index
    %c1_21 = arith.constant 1 : index
    %c0_22 = arith.constant 0 : index
    %11 = vector.load %arg13[%c0_20, %c1_21, %c0_22] : memref<18x18x4xbf16, #tpu.memory_space<vmem>>, vector<18x16x4xbf16>
    %c0_23 = arith.constant 0 : index
    %c2 = arith.constant 2 : index
    %c0_24 = arith.constant 0 : index
    %12 = vector.load %arg13[%c0_23, %c2, %c0_24] : memref<18x18x4xbf16, #tpu.memory_space<vmem>>, vector<18x16x4xbf16>
    %13 = tpu.concatenate %10, %11, %12 in 2 : vector<18x16x4xbf16>, vector<18x16x4xbf16>, vector<18x16x4xbf16> -> vector<18x16x12xbf16>
    %14 = vector.extract_strided_slice %13 {offsets = [0, 0, 0], sizes = [16, 16, 12], strides = [1, 1, 1]} : vector<18x16x12xbf16> to vector<16x16x12xbf16>
    %15 = vector.shape_cast %14 : vector<16x16x12xbf16> to vector<256x12xbf16>
    %c0_25 = arith.constant 0 : index
    %c0_26 = arith.constant 0 : index
    %c0_27 = arith.constant 0 : index
    %16 = vector.load %arg2[%c0_25, %c0_26, %c0_27] : memref<3x12x64xbf16, #tpu.memory_space<vmem>>, vector<1x12x64xbf16>
    %17 = vector.shape_cast %16 : vector<1x12x64xbf16> to vector<12x64xbf16>
    %cst_28 = arith.constant dense<0.000000e+00> : vector<256x64xf32>
    %18 = tpu.matmul %15, %17, %cst_28 {dimension_numbers = #tpu.dot_dimension_numbers<[1], [0], [0], [1], [0, 0, 1, 1], [], []>} : vector<256x12xbf16>, vector<12x64xbf16>, vector<256x64xf32> -> vector<256x64xf32>
    %19 = vector.extract_strided_slice %13 {offsets = [1, 0, 0], sizes = [16, 16, 12], strides = [1, 1, 1]} : vector<18x16x12xbf16> to vector<16x16x12xbf16>
    %20 = vector.shape_cast %19 : vector<16x16x12xbf16> to vector<256x12xbf16>
    %c1_29 = arith.constant 1 : index
    %c0_30 = arith.constant 0 : index
    %c0_31 = arith.constant 0 : index
    %21 = vector.load %arg2[%c1_29, %c0_30, %c0_31] : memref<3x12x64xbf16, #tpu.memory_space<vmem>>, vector<1x12x64xbf16>
    %22 = vector.shape_cast %21 : vector<1x12x64xbf16> to vector<12x64xbf16>
    %cst_32 = arith.constant dense<0.000000e+00> : vector<256x64xf32>
    %23 = tpu.matmul %20, %22, %cst_32 {dimension_numbers = #tpu.dot_dimension_numbers<[1], [0], [0], [1], [0, 0, 1, 1], [], []>} : vector<256x12xbf16>, vector<12x64xbf16>, vector<256x64xf32> -> vector<256x64xf32>
    %24 = arith.addf %18, %23 : vector<256x64xf32>
    %25 = vector.extract_strided_slice %13 {offsets = [2, 0, 0], sizes = [16, 16, 12], strides = [1, 1, 1]} : vector<18x16x12xbf16> to vector<16x16x12xbf16>
    %26 = vector.shape_cast %25 : vector<16x16x12xbf16> to vector<256x12xbf16>
    %c2_33 = arith.constant 2 : index
    %c0_34 = arith.constant 0 : index
    %c0_35 = arith.constant 0 : index
    %27 = vector.load %arg2[%c2_33, %c0_34, %c0_35] : memref<3x12x64xbf16, #tpu.memory_space<vmem>>, vector<1x12x64xbf16>
    %28 = vector.shape_cast %27 : vector<1x12x64xbf16> to vector<12x64xbf16>
    %cst_36 = arith.constant dense<0.000000e+00> : vector<256x64xf32>
    %29 = tpu.matmul %26, %28, %cst_36 {dimension_numbers = #tpu.dot_dimension_numbers<[1], [0], [0], [1], [0, 0, 1, 1], [], []>} : vector<256x12xbf16>, vector<12x64xbf16>, vector<256x64xf32> -> vector<256x64xf32>
    %30 = arith.addf %24, %29 : vector<256x64xf32>
    %c0_37 = arith.constant 0 : index
    %c0_38 = arith.constant 0 : index
    %31 = vector.load %arg3[%c0_37, %c0_38] : memref<1x64xf32, #tpu.memory_space<vmem>>, vector<1x64xf32>
    %32 = vector.broadcast %31 : vector<1x64xf32> to vector<256x64xf32>
    %33 = arith.addf %30, %32 : vector<256x64xf32>
    %cst_39 = arith.constant 0.000000e+00 : f32
    %34 = vector.broadcast %cst_39 : f32 to vector<256x64xf32>
    %35 = arith.maximumf %33, %34 : vector<256x64xf32>
    %cst_40 = arith.constant 0.000000e+00 : bf16
    %36 = vector.broadcast %cst_40 : bf16 to vector<1x18x64xbf16>
    %cst_41 = arith.constant 0.000000e+00 : bf16
    %37 = vector.broadcast %cst_41 : bf16 to vector<16x1x64xbf16>
    %c0_42 = arith.constant 0 : index
    %c0_43 = arith.constant 0 : index
    %c0_44 = arith.constant 0 : index
    %38 = vector.load %arg14[%c0_42, %c0_43, %c0_44] : memref<18x18x64xbf16, #tpu.memory_space<vmem>>, vector<1x18x64xbf16>
    tpu.vector_store %arg14[%c0_42, %c0_43, %c0_44], %36 {strides = array<i32>} : memref<18x18x64xbf16, #tpu.memory_space<vmem>>, vector<1x18x64xbf16>,
    %c17_45 = arith.constant 17 : index
    %c0_46 = arith.constant 0 : index
    %c0_47 = arith.constant 0 : index
    %39 = vector.load %arg14[%c17_45, %c0_46, %c0_47] : memref<18x18x64xbf16, #tpu.memory_space<vmem>>, vector<1x18x64xbf16>
    tpu.vector_store %arg14[%c17_45, %c0_46, %c0_47], %36 {strides = array<i32>} : memref<18x18x64xbf16, #tpu.memory_space<vmem>>, vector<1x18x64xbf16>,
    %c1_48 = arith.constant 1 : index
    %c0_49 = arith.constant 0 : index
    %c0_50 = arith.constant 0 : index
    %40 = vector.load %arg14[%c1_48, %c0_49, %c0_50] : memref<18x18x64xbf16, #tpu.memory_space<vmem>>, vector<16x1x64xbf16>
    tpu.vector_store %arg14[%c1_48, %c0_49, %c0_50], %37 {strides = array<i32>} : memref<18x18x64xbf16, #tpu.memory_space<vmem>>, vector<16x1x64xbf16>,
    %c1_51 = arith.constant 1 : index
    %c17_52 = arith.constant 17 : index
    %c0_53 = arith.constant 0 : index
    %41 = vector.load %arg14[%c1_51, %c17_52, %c0_53] : memref<18x18x64xbf16, #tpu.memory_space<vmem>>, vector<16x1x64xbf16>
    tpu.vector_store %arg14[%c1_51, %c17_52, %c0_53], %37 {strides = array<i32>} : memref<18x18x64xbf16, #tpu.memory_space<vmem>>, vector<16x1x64xbf16>,
    %42 = vector.shape_cast %35 : vector<256x64xf32> to vector<16x16x64xf32>
    %43 = arith.truncf %42 : vector<16x16x64xf32> to vector<16x16x64xbf16>
    %c1_54 = arith.constant 1 : index
    %c1_55 = arith.constant 1 : index
    %c0_56 = arith.constant 0 : index
    %44 = vector.load %arg14[%c1_54, %c1_55, %c0_56] : memref<18x18x64xbf16, #tpu.memory_space<vmem>>, vector<16x16x64xbf16>
    tpu.vector_store %arg14[%c1_54, %c1_55, %c0_56], %43 {strides = array<i32>} : memref<18x18x64xbf16, #tpu.memory_space<vmem>>, vector<16x16x64xbf16>,
    %c0_57 = arith.constant 0 : index
    %c0_58 = arith.constant 0 : index
    %c0_59 = arith.constant 0 : index
    %45 = vector.load %arg14[%c0_57, %c0_58, %c0_59] : memref<18x18x64xbf16, #tpu.memory_space<vmem>>, vector<18x16x64xbf16>
    %c0_60 = arith.constant 0 : index
    %c1_61 = arith.constant 1 : index
    %c0_62 = arith.constant 0 : index
    %46 = vector.load %arg14[%c0_60, %c1_61, %c0_62] : memref<18x18x64xbf16, #tpu.memory_space<vmem>>, vector<18x16x64xbf16>
    %c0_63 = arith.constant 0 : index
    %c2_64 = arith.constant 2 : index
    %c0_65 = arith.constant 0 : index
    %47 = vector.load %arg14[%c0_63, %c2_64, %c0_65] : memref<18x18x64xbf16, #tpu.memory_space<vmem>>, vector<18x16x64xbf16>
    %48 = tpu.concatenate %45, %46, %47 in 2 : vector<18x16x64xbf16>, vector<18x16x64xbf16>, vector<18x16x64xbf16> -> vector<18x16x192xbf16>
    %49 = vector.extract_strided_slice %48 {offsets = [0, 0, 0], sizes = [16, 16, 192], strides = [1, 1, 1]} : vector<18x16x192xbf16> to vector<16x16x192xbf16>
    %50 = vector.shape_cast %49 : vector<16x16x192xbf16> to vector<256x192xbf16>
    %c0_66 = arith.constant 0 : index
    %c0_67 = arith.constant 0 : index
    %c0_68 = arith.constant 0 : index
    %51 = vector.load %arg4[%c0_66, %c0_67, %c0_68] : memref<3x192x64xbf16, #tpu.memory_space<vmem>>, vector<1x192x64xbf16>
    %52 = vector.shape_cast %51 : vector<1x192x64xbf16> to vector<192x64xbf16>
    %cst_69 = arith.constant dense<0.000000e+00> : vector<256x64xf32>
    %53 = tpu.matmul %50, %52, %cst_69 {dimension_numbers = #tpu.dot_dimension_numbers<[1], [0], [0], [1], [0, 0, 1, 1], [], []>} : vector<256x192xbf16>, vector<192x64xbf16>, vector<256x64xf32> -> vector<256x64xf32>
    %54 = vector.extract_strided_slice %48 {offsets = [1, 0, 0], sizes = [16, 16, 192], strides = [1, 1, 1]} : vector<18x16x192xbf16> to vector<16x16x192xbf16>
    %55 = vector.shape_cast %54 : vector<16x16x192xbf16> to vector<256x192xbf16>
    %c1_70 = arith.constant 1 : index
    %c0_71 = arith.constant 0 : index
    %c0_72 = arith.constant 0 : index
    %56 = vector.load %arg4[%c1_70, %c0_71, %c0_72] : memref<3x192x64xbf16, #tpu.memory_space<vmem>>, vector<1x192x64xbf16>
    %57 = vector.shape_cast %56 : vector<1x192x64xbf16> to vector<192x64xbf16>
    %cst_73 = arith.constant dense<0.000000e+00> : vector<256x64xf32>
    %58 = tpu.matmul %55, %57, %cst_73 {dimension_numbers = #tpu.dot_dimension_numbers<[1], [0], [0], [1], [0, 0, 1, 1], [], []>} : vector<256x192xbf16>, vector<192x64xbf16>, vector<256x64xf32> -> vector<256x64xf32>
    %59 = arith.addf %53, %58 : vector<256x64xf32>
    %60 = vector.extract_strided_slice %48 {offsets = [2, 0, 0], sizes = [16, 16, 192], strides = [1, 1, 1]} : vector<18x16x192xbf16> to vector<16x16x192xbf16>
    %61 = vector.shape_cast %60 : vector<16x16x192xbf16> to vector<256x192xbf16>
    %c2_74 = arith.constant 2 : index
    %c0_75 = arith.constant 0 : index
    %c0_76 = arith.constant 0 : index
    %62 = vector.load %arg4[%c2_74, %c0_75, %c0_76] : memref<3x192x64xbf16, #tpu.memory_space<vmem>>, vector<1x192x64xbf16>
    %63 = vector.shape_cast %62 : vector<1x192x64xbf16> to vector<192x64xbf16>
    %cst_77 = arith.constant dense<0.000000e+00> : vector<256x64xf32>
    %64 = tpu.matmul %61, %63, %cst_77 {dimension_numbers = #tpu.dot_dimension_numbers<[1], [0], [0], [1], [0, 0, 1, 1], [], []>} : vector<256x192xbf16>, vector<192x64xbf16>, vector<256x64xf32> -> vector<256x64xf32>
    %65 = arith.addf %59, %64 : vector<256x64xf32>
    %c0_78 = arith.constant 0 : index
    %c0_79 = arith.constant 0 : index
    %66 = vector.load %arg5[%c0_78, %c0_79] : memref<1x64xf32, #tpu.memory_space<vmem>>, vector<1x64xf32>
    %67 = vector.broadcast %66 : vector<1x64xf32> to vector<256x64xf32>
    %68 = arith.addf %65, %67 : vector<256x64xf32>
    %cst_80 = arith.constant 0.000000e+00 : f32
    %69 = vector.broadcast %cst_80 : f32 to vector<256x64xf32>
    %70 = arith.maximumf %68, %69 : vector<256x64xf32>
    %71 = vector.shape_cast %70 : vector<256x64xf32> to vector<8x2x16x64xf32>
    %72 = vector.extract_strided_slice %71 {offsets = [0, 0, 0, 0], sizes = [8, 1, 16, 64], strides = [1, 1, 1, 1]} : vector<8x2x16x64xf32> to vector<8x1x16x64xf32>
    %73 = vector.shape_cast %72 : vector<8x1x16x64xf32> to vector<8x16x64xf32>
    %74 = vector.extract_strided_slice %71 {offsets = [0, 1, 0, 0], sizes = [8, 1, 16, 64], strides = [1, 1, 1, 1]} : vector<8x2x16x64xf32> to vector<8x1x16x64xf32>
    %75 = vector.shape_cast %74 : vector<8x1x16x64xf32> to vector<8x16x64xf32>
    %76 = arith.maximumf %73, %75 : vector<8x16x64xf32>
    %77 = vector.shape_cast %76 : vector<8x16x64xf32> to vector<8x8x2x64xf32>
    %78 = vector.extract_strided_slice %77 {offsets = [0, 0, 0, 0], sizes = [8, 8, 1, 64], strides = [1, 1, 1, 1]} : vector<8x8x2x64xf32> to vector<8x8x1x64xf32>
    %79 = vector.shape_cast %78 : vector<8x8x1x64xf32> to vector<8x8x64xf32>
    %80 = vector.extract_strided_slice %77 {offsets = [0, 0, 1, 0], sizes = [8, 8, 1, 64], strides = [1, 1, 1, 1]} : vector<8x8x2x64xf32> to vector<8x8x1x64xf32>
    %81 = vector.shape_cast %80 : vector<8x8x1x64xf32> to vector<8x8x64xf32>
    %82 = arith.maximumf %79, %81 : vector<8x8x64xf32>
    %83 = arith.truncf %82 : vector<8x8x64xf32> to vector<8x8x64xbf16>
    %84 = vector.shape_cast %83 : vector<8x8x64xbf16> to vector<64x64xbf16>
    %c0_81 = arith.constant 0 : index
    %c0_82 = arith.constant 0 : index
    %85 = vector.load %arg6[%c0_81, %c0_82] : memref<64x256xbf16, #tpu.memory_space<vmem>>, vector<64x256xbf16>
    %cst_83 = arith.constant dense<0.000000e+00> : vector<64x256xf32>
    %86 = tpu.matmul %84, %85, %cst_83 {dimension_numbers = #tpu.dot_dimension_numbers<[1], [0], [0], [1], [0, 0, 1, 1], [], []>} : vector<64x64xbf16>, vector<64x256xbf16>, vector<64x256xf32> -> vector<64x256xf32>
    %c0_84 = arith.constant 0 : index
    %c0_85 = arith.constant 0 : index
    %87 = vector.load %arg7[%c0_84, %c0_85] : memref<1x256xf32, #tpu.memory_space<vmem>>, vector<1x256xf32>
    %88 = vector.broadcast %87 : vector<1x256xf32> to vector<64x256xf32>
    %89 = arith.addf %86, %88 : vector<64x256xf32>
    %cst_86 = arith.constant 0.000000e+00 : f32
    %90 = vector.broadcast %cst_86 : f32 to vector<64x256xf32>
    %91 = arith.maximumf %89, %90 : vector<64x256xf32>
    %92 = arith.truncf %91 : vector<64x256xf32> to vector<64x256xbf16>
    %93 = vector.extract_strided_slice %92 {offsets = [0, 0], sizes = [64, 64], strides = [1, 1]} : vector<64x256xbf16> to vector<64x64xbf16>
    %94 = vector.shape_cast %93 : vector<64x64xbf16> to vector<8x8x64xbf16>
    %95 = vector.extract_strided_slice %92 {offsets = [0, 64], sizes = [64, 64], strides = [1, 1]} : vector<64x256xbf16> to vector<64x64xbf16>
    %96 = vector.shape_cast %95 : vector<64x64xbf16> to vector<8x8x64xbf16>
    %97 = vector.extract_strided_slice %92 {offsets = [0, 128], sizes = [64, 64], strides = [1, 1]} : vector<64x256xbf16> to vector<64x64xbf16>
    %98 = vector.shape_cast %97 : vector<64x64xbf16> to vector<8x8x64xbf16>
    %99 = vector.extract_strided_slice %92 {offsets = [0, 192], sizes = [64, 64], strides = [1, 1]} : vector<64x256xbf16> to vector<64x64xbf16>
    %100 = vector.shape_cast %99 : vector<64x64xbf16> to vector<8x8x64xbf16>
    %101 = vector.shape_cast %94 : vector<8x8x64xbf16> to vector<8x8x1x64xbf16>
    %102 = vector.shape_cast %96 : vector<8x8x64xbf16> to vector<8x8x1x64xbf16>
    %103 = tpu.concatenate %101, %102 in 2 : vector<8x8x1x64xbf16>, vector<8x8x1x64xbf16> -> vector<8x8x2x64xbf16>
    %104 = vector.shape_cast %103 : vector<8x8x2x64xbf16> to vector<8x16x64xbf16>
    %105 = vector.shape_cast %98 : vector<8x8x64xbf16> to vector<8x8x1x64xbf16>
    %106 = vector.shape_cast %100 : vector<8x8x64xbf16> to vector<8x8x1x64xbf16>
    %107 = tpu.concatenate %105, %106 in 2 : vector<8x8x1x64xbf16>, vector<8x8x1x64xbf16> -> vector<8x8x2x64xbf16>
    %108 = vector.shape_cast %107 : vector<8x8x2x64xbf16> to vector<8x16x64xbf16>
    %109 = vector.shape_cast %104 : vector<8x16x64xbf16> to vector<8x1x16x64xbf16>
    %110 = vector.shape_cast %108 : vector<8x16x64xbf16> to vector<8x1x16x64xbf16>
    %111 = tpu.concatenate %109, %110 in 1 : vector<8x1x16x64xbf16>, vector<8x1x16x64xbf16> -> vector<8x2x16x64xbf16>
    %112 = vector.shape_cast %111 : vector<8x2x16x64xbf16> to vector<16x16x64xbf16>
    %c1_87 = arith.constant 1 : index
    %c1_88 = arith.constant 1 : index
    %c0_89 = arith.constant 0 : index
    %113 = vector.load %arg14[%c1_87, %c1_88, %c0_89] : memref<18x18x64xbf16, #tpu.memory_space<vmem>>, vector<16x16x64xbf16>
    tpu.vector_store %arg14[%c1_87, %c1_88, %c0_89], %112 {strides = array<i32>} : memref<18x18x64xbf16, #tpu.memory_space<vmem>>, vector<16x16x64xbf16>,
    %c0_90 = arith.constant 0 : index
    %c0_91 = arith.constant 0 : index
    %c0_92 = arith.constant 0 : index
    %114 = vector.load %arg14[%c0_90, %c0_91, %c0_92] : memref<18x18x64xbf16, #tpu.memory_space<vmem>>, vector<18x16x64xbf16>
    %c0_93 = arith.constant 0 : index
    %c1_94 = arith.constant 1 : index
    %c0_95 = arith.constant 0 : index
    %115 = vector.load %arg14[%c0_93, %c1_94, %c0_95] : memref<18x18x64xbf16, #tpu.memory_space<vmem>>, vector<18x16x64xbf16>
    %c0_96 = arith.constant 0 : index
    %c2_97 = arith.constant 2 : index
    %c0_98 = arith.constant 0 : index
    %116 = vector.load %arg14[%c0_96, %c2_97, %c0_98] : memref<18x18x64xbf16, #tpu.memory_space<vmem>>, vector<18x16x64xbf16>
    %117 = tpu.concatenate %114, %115, %116 in 2 : vector<18x16x64xbf16>, vector<18x16x64xbf16>, vector<18x16x64xbf16> -> vector<18x16x192xbf16>
    %118 = vector.extract_strided_slice %117 {offsets = [0, 0, 0], sizes = [16, 16, 192], strides = [1, 1, 1]} : vector<18x16x192xbf16> to vector<16x16x192xbf16>
    %119 = vector.shape_cast %118 : vector<16x16x192xbf16> to vector<256x192xbf16>
    %c0_99 = arith.constant 0 : index
    %c0_100 = arith.constant 0 : index
    %c0_101 = arith.constant 0 : index
    %120 = vector.load %arg8[%c0_99, %c0_100, %c0_101] : memref<3x192x64xbf16, #tpu.memory_space<vmem>>, vector<1x192x64xbf16>
    %121 = vector.shape_cast %120 : vector<1x192x64xbf16> to vector<192x64xbf16>
    %cst_102 = arith.constant dense<0.000000e+00> : vector<256x64xf32>
    %122 = tpu.matmul %119, %121, %cst_102 {dimension_numbers = #tpu.dot_dimension_numbers<[1], [0], [0], [1], [0, 0, 1, 1], [], []>} : vector<256x192xbf16>, vector<192x64xbf16>, vector<256x64xf32> -> vector<256x64xf32>
    %123 = vector.extract_strided_slice %117 {offsets = [1, 0, 0], sizes = [16, 16, 192], strides = [1, 1, 1]} : vector<18x16x192xbf16> to vector<16x16x192xbf16>
    %124 = vector.shape_cast %123 : vector<16x16x192xbf16> to vector<256x192xbf16>
    %c1_103 = arith.constant 1 : index
    %c0_104 = arith.constant 0 : index
    %c0_105 = arith.constant 0 : index
    %125 = vector.load %arg8[%c1_103, %c0_104, %c0_105] : memref<3x192x64xbf16, #tpu.memory_space<vmem>>, vector<1x192x64xbf16>
    %126 = vector.shape_cast %125 : vector<1x192x64xbf16> to vector<192x64xbf16>
    %cst_106 = arith.constant dense<0.000000e+00> : vector<256x64xf32>
    %127 = tpu.matmul %124, %126, %cst_106 {dimension_numbers = #tpu.dot_dimension_numbers<[1], [0], [0], [1], [0, 0, 1, 1], [], []>} : vector<256x192xbf16>, vector<192x64xbf16>, vector<256x64xf32> -> vector<256x64xf32>
    %128 = arith.addf %122, %127 : vector<256x64xf32>
    %129 = vector.extract_strided_slice %117 {offsets = [2, 0, 0], sizes = [16, 16, 192], strides = [1, 1, 1]} : vector<18x16x192xbf16> to vector<16x16x192xbf16>
    %130 = vector.shape_cast %129 : vector<16x16x192xbf16> to vector<256x192xbf16>
    %c2_107 = arith.constant 2 : index
    %c0_108 = arith.constant 0 : index
    %c0_109 = arith.constant 0 : index
    %131 = vector.load %arg8[%c2_107, %c0_108, %c0_109] : memref<3x192x64xbf16, #tpu.memory_space<vmem>>, vector<1x192x64xbf16>
    %132 = vector.shape_cast %131 : vector<1x192x64xbf16> to vector<192x64xbf16>
    %cst_110 = arith.constant dense<0.000000e+00> : vector<256x64xf32>
    %133 = tpu.matmul %130, %132, %cst_110 {dimension_numbers = #tpu.dot_dimension_numbers<[1], [0], [0], [1], [0, 0, 1, 1], [], []>} : vector<256x192xbf16>, vector<192x64xbf16>, vector<256x64xf32> -> vector<256x64xf32>
    %134 = arith.addf %128, %133 : vector<256x64xf32>
    %c0_111 = arith.constant 0 : index
    %c0_112 = arith.constant 0 : index
    %135 = vector.load %arg9[%c0_111, %c0_112] : memref<1x64xf32, #tpu.memory_space<vmem>>, vector<1x64xf32>
    %136 = vector.broadcast %135 : vector<1x64xf32> to vector<256x64xf32>
    %137 = arith.addf %134, %136 : vector<256x64xf32>
    %cst_113 = arith.constant 0.000000e+00 : f32
    %138 = vector.broadcast %cst_113 : f32 to vector<256x64xf32>
    %139 = arith.maximumf %137, %138 : vector<256x64xf32>
    %c0_114 = arith.constant 0 : index
    %c0_115 = arith.constant 0 : index
    %140 = vector.load %arg10[%c0_114, %c0_115] : memref<4x64xbf16, #tpu.memory_space<vmem>>, vector<4x64xbf16>
    %141 = arith.truncf %139 : vector<256x64xf32> to vector<256x64xbf16>
    %cst_116 = arith.constant dense<0.000000e+00> : vector<4x256xf32>
    %142 = tpu.matmul %140, %141, %cst_116 {dimension_numbers = #tpu.dot_dimension_numbers<[1], [1], [0], [0], [0, 0, 1, 0], [], []>} : vector<4x64xbf16>, vector<256x64xbf16>, vector<4x256xf32> -> vector<4x256xf32>
    %c0_117 = arith.constant 0 : index
    %c0_118 = arith.constant 0 : index
    %143 = vector.load %arg11[%c0_117, %c0_118] : memref<4x1xf32, #tpu.memory_space<vmem>>, vector<4x1xf32>
    %144 = vector.broadcast %143 : vector<4x1xf32> to vector<4x256xf32>
    %145 = arith.addf %142, %144 : vector<4x256xf32>
    %c0_119 = arith.constant 0 : index
    %c0_120 = arith.constant 0 : index
    %c0_121 = arith.constant 0 : index
    %146 = vector.load %arg12[%c0_119, %c0_120, %c0_121] : memref<1x4x256xf32, #tpu.memory_space<vmem>>, vector<1x4x256xf32>
    %147 = vector.shape_cast %146 : vector<1x4x256xf32> to vector<4x256xf32>
    %148 = vector.shape_cast %145 : vector<4x256xf32> to vector<1x4x256xf32>
    tpu.vector_store %arg12[%c0_119, %c0_120, %c0_121], %148 {strides = array<i32>} : memref<1x4x256xf32, #tpu.memory_space<vmem>>, vector<1x4x256xf32>,
    return
  }
  func.func @transform_0(%arg0: i32) -> (i32, i32, i32, i32) {
    %c0_i32 = arith.constant 0 : i32
    %c0_i32_0 = arith.constant 0 : i32
    %c0_i32_1 = arith.constant 0 : i32
    %c0_i32_2 = arith.constant 0 : i32
    return %arg0, %c0_i32, %c0_i32_0, %c0_i32_1 : i32, i32, i32, i32
  }
  func.func @transform_1(%arg0: i32) -> (i32, i32, i32) {
    %c0_i32 = arith.constant 0 : i32
    %c0_i32_0 = arith.constant 0 : i32
    %c0_i32_1 = arith.constant 0 : i32
    %c0_i32_2 = arith.constant 0 : i32
    return %c0_i32, %c0_i32_0, %c0_i32_1 : i32, i32, i32
  }
  func.func @transform_2(%arg0: i32) -> (i32, i32) {
    %c0_i32 = arith.constant 0 : i32
    %c0_i32_0 = arith.constant 0 : i32
    %c0_i32_1 = arith.constant 0 : i32
    return %c0_i32, %c0_i32_0 : i32, i32
  }
  func.func @transform_3(%arg0: i32) -> (i32, i32, i32) {
    %c0_i32 = arith.constant 0 : i32
    %c0_i32_0 = arith.constant 0 : i32
    %c0_i32_1 = arith.constant 0 : i32
    %c0_i32_2 = arith.constant 0 : i32
    return %c0_i32, %c0_i32_0, %c0_i32_1 : i32, i32, i32
  }
  func.func @transform_4(%arg0: i32) -> (i32, i32) {
    %c0_i32 = arith.constant 0 : i32
    %c0_i32_0 = arith.constant 0 : i32
    %c0_i32_1 = arith.constant 0 : i32
    return %c0_i32, %c0_i32_0 : i32, i32
  }
  func.func @transform_5(%arg0: i32) -> (i32, i32) {
    %c0_i32 = arith.constant 0 : i32
    %c0_i32_0 = arith.constant 0 : i32
    %c0_i32_1 = arith.constant 0 : i32
    return %c0_i32, %c0_i32_0 : i32, i32
  }
  func.func @transform_6(%arg0: i32) -> (i32, i32) {
    %c0_i32 = arith.constant 0 : i32
    %c0_i32_0 = arith.constant 0 : i32
    %c0_i32_1 = arith.constant 0 : i32
    return %c0_i32, %c0_i32_0 : i32, i32
  }
  func.func @transform_7(%arg0: i32) -> (i32, i32, i32) {
    %c0_i32 = arith.constant 0 : i32
    %c0_i32_0 = arith.constant 0 : i32
    %c0_i32_1 = arith.constant 0 : i32
    %c0_i32_2 = arith.constant 0 : i32
    return %c0_i32, %c0_i32_0, %c0_i32_1 : i32, i32, i32
  }
  func.func @transform_8(%arg0: i32) -> (i32, i32) {
    %c0_i32 = arith.constant 0 : i32
    %c0_i32_0 = arith.constant 0 : i32
    %c0_i32_1 = arith.constant 0 : i32
    return %c0_i32, %c0_i32_0 : i32, i32
  }
  func.func @transform_9(%arg0: i32) -> (i32, i32) {
    %c0_i32 = arith.constant 0 : i32
    %c0_i32_0 = arith.constant 0 : i32
    %c0_i32_1 = arith.constant 0 : i32
    return %c0_i32, %c0_i32_0 : i32, i32
  }
  func.func @transform_10(%arg0: i32) -> (i32, i32) {
    %c0_i32 = arith.constant 0 : i32
    %c0_i32_0 = arith.constant 0 : i32
    %c0_i32_1 = arith.constant 0 : i32
    return %c0_i32, %c0_i32_0 : i32, i32
  }
  func.func @transform_11(%arg0: i32) -> (i32, i32, i32) {
    %c0_i32 = arith.constant 0 : i32
    %c0_i32_0 = arith.constant 0 : i32
    %c0_i32_1 = arith.constant 0 : i32
    return %arg0, %c0_i32, %c0_i32_0 : i32, i32, i32
  }
}

</mosaic_0001>

<bundles_post_ra>
// kernel: tile.8
= control target key start
LH: loop header
LB: loop body
LE: loop exit
PB: predicated region body
PF: predicated region fallthrough
CT: control target
= control target key end

     0   :  { %s22_s0 = inlined_call_operand.vmem [shape: f32[64], index: 0, kind: input, shape index: {}]   ;;  %s23_s1 = inlined_call_operand.vmem [shape: f32[4,64], index: 1, kind: output, shape index: {}]  }
   0x1   :  { %v4_v0 = vld [vmem:[%s22_s0] ss:$0 sm:$0xff] }
   0x2   :  { %5 = vst [vmem:[%s23_s1] sm:$0xf] %v4_v0 }

// kernel: tile.9
= control target key start
LH: loop header
LB: loop body
LE: loop exit
PB: predicated region body
PF: predicated region fallthrough
CT: control target
= control target key end

     0   :  { %s6_s8 = smov 3  ;;  %vm8_vm0 = vcmask 523264   ;;  %s30_s9 = smov 64   ;;  %vm15_vm1 = vcmask 1048064   ;;  %s50_s0 = inlined_call_operand.vmem [shape: f32[4,64], index: 0, kind: input, shape index: {}]   ;;  %s51_s1 = inlined_call_operand.vmem [shape: f32[1,256], index: 1, kind: output, shape index: {}]  }
   0x1   :  { %v4_v0 = vld [vmem:[%s50_s0] sm:$0xf]  ;;  %s11_s0 = smov 3 }
   0x2   :  { %5 = vst [vmem:[#allocation1] sm:$0xf] %v4_v0 }
   0x9   :  { %v12_v1 = vld [vmem:[#allocation1 + $0x1] ss:$2 sm:%s11_s0]   ;;  %v7_v2 = vld [vmem:[#allocation1] ss:$2 sm:%s6_s8]  }
   0xa   :  { %13 = vrot.lane.b32.xlu0 %v12_v1, %s30_s9  ;;  %9 = vst.msk [vmem:[#allocation0] ss:$8 sm:$0x3] %vm8_vm0, %v7_v2  }
  0x7c   :  { %v14_v3 = vpop.permute.xlu0 %13  }
  0x7d   :  { %16 = vst.msk [vmem:[#allocation0] ss:$8 sm:$0x3] %vm15_vm1, %v14_v3  }
  0x84   :  { %v20_v4 = vld [vmem:[#allocation0] sm:$0x1]  ;;  %v24_v5 = vld [vmem:[#allocation0 + $0x8] sm:$0x1] }
  0x85   :  { %22 = vst [vmem:[%s51_s1] sm:$0x1] %v20_v4  ;;  %28 = vst [vmem:[%s51_s1 + $0x1] sm:$0x1] %v24_v5 }

// kernel: unet_forward.1
= control target key start
LH: loop header
LB: loop body
LE: loop exit
PB: predicated region body
PF: predicated region fallthrough
CT: control target
= control target key end

     0   :  { %s11924_s17 = smov 0   ;;  %s16770_s0 = inlined_call_operand.vmem [shape: f32[2,16,16,4], index: 0, kind: input, shape index: {}]   ;;  %s16771_s1 = inlined_call_operand.vmem [shape: bf16[3,12,64], index: 1, kind: input, shape index: {}]   ;;  %s16772_s2 = inlined_call_operand.vmem [shape: f32[1,64], index: 2, kind: input, shape index: {}]   ;;  %s16773_s3 = inlined_call_operand.vmem [shape: bf16[3,192,64], index: 3, kind: input, shape index: {}]   ;;  %s16774_s4 = inlined_call_operand.vmem [shape: f32[1,64], index: 4, kind: input, shape index: {}]   ;;  %s16775_s5 = inlined_call_operand.vmem [shape: bf16[64,256], index: 5, kind: input, shape index: {}]   ;;  %s16776_s6 = inlined_call_operand.vmem [shape: f32[1,256], index: 6, kind: input, shape index: {}]   ;;  %s16777_s7 = inlined_call_operand.vmem [shape: bf16[3,192,64], index: 7, kind: input, shape index: {}]   ;;  %s16778_s8 = inlined_call_operand.vmem [shape: f32[1,64], index: 8, kind: input, shape index: {}]   ;;  %s16779_s9 = inlined_call_operand.vmem [shape: bf16[4,64], index: 9, kind: input, shape index: {}]   ;;  %s16780_s10 = inlined_call_operand.vmem [shape: f32[4,1], index: 10, kind: input, shape index: {}]   ;;  %s16781_s11 = inlined_call_operand.vmem [shape: f32[2,4,256], index: 11, kind: output, shape index: {}]  }
   0x1 LB: > { %s10588_s18 = sadd.s32 4294967295, %s11855_s17   ;;  %p10592_p0 = scmp.ge.s32.totalorder %s11855_s17, 1  ;;  %s11855_s17 = sphi %s11924_s17, %s21_s17  }
   0x2   : > { %p337_p1 = scmp.lt.s32.totalorder %s11855_s17, 3 }
   0x4   : > { %p338_p2 = pnand %p10592_p0, %p337_p1 }
   0x6   : > { %341 = sbr.rel (%p338_p2) target bundleno = 2426 (0x97a), region = 64 }
   0xd   : > { %vm388_vm0 = vcmask 27648   ;;  %vm391_vm1 = vcmask 24576   ;;  %vm399_vm2 = vsmask.f32 256  ;;  %v16782_v0 = vmov 0   ;;  %p377_p3 = scmp.lt.s32.totalorder %s10588_s18, 1 }
   0xe   : > { %389 = vst.msk [vmem:[#allocation2] sm:$0xf] %vm388_vm0, %v16782_v0  ;;  %390 = vst.msk [vmem:[#allocation2 + $0x4] sm:$0xf] %vm388_vm0, %v16782_v0  ;;  %vm449_vm4 = vsmask.f32 7938  ;;  %11623 = vset.pattern.permute.xlu0 %v16782_v0 }
   0xf   : > { %392 = vst.msk [vmem:[#allocation2 + $0x8] sm:$0x1] %vm391_vm1, %v16782_v0  ;;  %vm11938_vm3 = vmand %vm391_vm1, %vm399_vm2  ;;  %vm2407_vm5 = vcmask 519168   ;;  %vm2410_vm6 = vcmask 516096   ;;  %v401_v3 = vld [vmem:[#allocation2 + $0xc] sm:$0x1] }
  0x10   : > { %394 = vst.msk [vmem:[#allocation2 + $0xcc] sm:$0xf] %vm388_vm0, %v16782_v0  ;;  %395 = vst.msk [vmem:[#allocation2 + $0xd0] sm:$0xf] %vm388_vm0, %v16782_v0  ;;  %v402_v4 = vsel %vm11938_vm3, 0, %v401_v3  ;;  %s17153_s18 = smov (!%p377_p3, %s10588_s18), 1 }
  0x11   : > { %396 = vst.msk [vmem:[#allocation2 + $0xd4] sm:$0x1] %vm391_vm1, %v16782_v0  ;;  %vm11949_vm7 = vmand %vm391_vm1, %vm449_vm4  ;;  %v451_v5 = vld [vmem:[#allocation2 + $0x14] sm:$0x1]  ;;  %v407_v7 = vld [vmem:[#allocation2 + $0x24] sm:$0x1] }
  0x12   : > { %2408 = vst.msk [vmem:[#allocation3] sm:$0xf] %vm2407_vm5, %v16782_v0  ;;  %2409 = vst.msk [vmem:[#allocation3 + $0x4] sm:$0xf] %vm2407_vm5, %v16782_v0  ;;  %v452_v6 = vsel %vm11949_vm7, 0, %v451_v5  ;;  %v408_v9 = vsel %vm11938_vm3, 0, %v407_v7 }
  0x13   : > { %2411 = vst.msk [vmem:[#allocation3 + $0x8] sm:$0x1] %vm2410_vm6, %v16782_v0  ;;  %2415 = vst.msk [vmem:[#allocation3 + $0xd4] sm:$0x1] %vm2410_vm6, %v16782_v0  ;;  %v457_v8 = vld [vmem:[#allocation2 + $0x2c] sm:$0x1] }
  0x14   : > { %2413 = vst.msk [vmem:[#allocation3 + $0xcc] sm:$0xf] %vm2407_vm5, %v16782_v0  ;;  %2414 = vst.msk [vmem:[#allocation3 + $0xd0] sm:$0xf] %vm2407_vm5, %v16782_v0  ;;  %vm627_vm8 = vsmask.f32 4368 }
  0x15   : > { %403 = vst [vmem:[#allocation2 + $0xc] sm:$0x1] %v402_v4  ;;  %453 = vst [vmem:[#allocation2 + $0x14] sm:$0x1] %v452_v6  ;;  %v458_v10 = vsel %vm11949_vm7, 0, %v457_v8  ;;  %s11296_s19 = sshll.u32 %s17153_s18, 8 }
  0x16   : > { %v404_v11 = vld [vmem:[#allocation2 + $0x18] sm:$0x1]  ;;  %v454_v12 = vld [vmem:[#allocation2 + $0x20] sm:$0x1]  ;;  %409 = vst [vmem:[#allocation2 + $0x24] sm:$0x1] %v408_v9  ;;  %s11987_s22 = scalar_lea.vmem %s16770_s0, %s11296_s19  ;;  %vm12009_vm10 = vmand %vm388_vm0, %vm449_vm4 }
  0x17   : > { %459 = vst [vmem:[#allocation2 + $0x2c] sm:$0x1] %v458_v10  ;;  %v405_v13 = vsel %vm11938_vm3, 0, %v404_v11  ;;  %v455_v14 = vsel %vm11949_vm7, 0, %v454_v12  ;;  %v413_v15 = vld [vmem:[#allocation2 + $0x3c] sm:$0x1]  ;;  %vm12015_vm12 = vmor %vm399_vm2, %vm627_vm8 }
  0x18   : > { %vm1586_vm9 = vcmask 1046528   ;;  %406 = vst [vmem:[#allocation2 + $0x18] sm:$0x1] %v405_v13  ;;  %456 = vst [vmem:[#allocation2 + $0x20] sm:$0x1] %v455_v14  ;;  %v414_v16 = vsel %vm11938_vm3, 0, %v413_v15 }
  0x19   : > { %v463_v17 = vld [vmem:[#allocation2 + $0x44] sm:$0x1]  ;;  %v410_v18 = vld [vmem:[#allocation2 + $0x30] sm:$0x1]  ;;  %v1117_v20 = vld [vmem:[#allocation2] sm:$0xe] }
  0x1a   : > { %v1064_v19 = vld [vmem:[#allocation2 + $0x4] sm:$0xf]  ;;  %415 = vst [vmem:[#allocation2 + $0x3c] sm:$0x1] %v414_v16  ;;  %v1063_v23 = vld [vmem:[#allocation2] sm:$0xf] }
  0x1b   : > { %v11624_v21 = vld [vmem:[#allocation2 + $0x8] ss:$0 sps:$4 sm:$0x11]   ;;  %v10665_v22 = vcombine.low %v1117_v20, %v1064_v19  ;;  %v499_v24 = vld [vmem:[%s11987_s22] sm:$0xff]  ;;  %v11992_v25 = vcombine.low %v1063_v23, %v1064_v19  ;;  %v464_v28 = vsel %vm11949_vm7, 0, %v463_v17  ;;  %v411_v29 = vsel %vm11938_vm3, 0, %v410_v18 }
  0x1c   : > { %v500_v26 = vld [vmem:[%s11987_s22 + $0x8] sm:$0xff]  ;;  %v11298_v27 = vpack.c.bf16 %v499_v24, %v499_v24  ;;  %v1588_v31 = vrot.slane %v11624_v21, 1  ;;  %v1288_v32 = vshll.u32 %v11624_v21, 16  ;;  %v503_v34 = vld [vmem:[%s11987_s22 + $0x20] sm:$0xff]  ;;  %465 = vst [vmem:[#allocation2 + $0x44] sm:$0x1] %v464_v28 }
  0x1d   : > { %v1587_v30 = vrot.slane %v10665_v22, 1  ;;  %v11299_v33 = vpack.c.bf16 %v500_v26, %v500_v26  ;;  %v504_v35 = vld [vmem:[%s11987_s22 + $0x28] sm:$0xff]  ;;  %412 = vst [vmem:[#allocation2 + $0x30] sm:$0x1] %v411_v29  ;;  %v1281_v36 = vshrl.u32 %v11992_v25, 16  ;;  %v1283_v37 = vshll.u32 %v11992_v25, 16 }
  0x1e   : > { %v630_v38 = vshrl.u32 %v11298_v27, 16  ;;  %v633_v39 = vshll.u32 %v11298_v27, 16  ;;  %v501_v40 = vld [vmem:[%s11987_s22 + $0x10] sm:$0xff]  ;;  %v1290_v42 = vrot.slane %v1288_v32, 1  ;;  %v502_v45 = vld [vmem:[%s11987_s22 + $0x18] sm:$0xff]  ;;  %s11858_s23 = smov 8   ;;  %v11302_v48 = vpack.c.bf16 %v503_v34, %v503_v34 }
  0x1f   : > { %v1589_v41 = vsel %vm1586_vm9, %v1587_v30, %v1588_v31  ;;  %v638_v43 = vshrl.u32 %v11299_v33, 16  ;;  %v641_v44 = vshll.u32 %v11299_v33, 16  ;;  %v1285_v46 = vrot.slane %v1283_v37, 1  ;;  %v951_v52 = vld [vmem:[#allocation2 + $0xc] sm:$0xf]  ;;  %s11859_s24 = smov 4  }
  0x20   : > { %1641 = vrot.lane.b32.xlu1 %v1589_v41, %s11858_s23  ;;  %v632_v47 = vrot.slane %v630_v38, 7  ;;  %v11303_v49 = vpack.c.bf16 %v504_v35, %v504_v35  ;;  %vm1279_vm11 = vsmask.f32 7424  ;;  %v11300_v53 = vpack.c.bf16 %v501_v40, %v501_v40  ;;  %v955_v59 = vld [vmem:[#allocation2 + $0x14] sm:$0x1]  ;;  %v507_v13 = vld [vmem:[%s11987_s22 + $0x40] sm:$0xff] }
  0x21   : > { %v640_v51 = vrot.slane %v638_v43, 7  ;;  %v11301_v54 = vpack.c.bf16 %v502_v45, %v502_v45  ;;  %v1286_v55 = vor.u32 %v1285_v46, %v1281_v36  ;;  %v16895_v56 = vmov 0  ;;  %v965_v11 = vld [vmem:[#allocation2 + $0x24] sm:$0xf]  ;;  %v508_v14 = vld [vmem:[%s11987_s22 + $0x48] sm:$0xff]  ;;  %v505_v36 = vld [vmem:[%s11987_s22 + $0x30] sm:$0xff] }
  0x22   : > { %v16896_v56 = vsel %vm12015_vm12, 4294967295, %v16895_v56  ;;  %v635_v57 = vor.u32 %v633_v39, %v632_v47  ;;  %v636_v58 = vrot.slane %v632_v47, 4  ;;  %v664_v60 = vshrl.u32 %v11302_v48, 16  ;;  %v969_v17 = vld [vmem:[#allocation2 + $0x2c] sm:$0x1]  ;;  %v506_v37 = vld [vmem:[%s11987_s22 + $0x38] sm:$0xff] }
  0x23   : > { %16897 = vst [vmem:[#allocation4_spill] sm:$0xff] %v16896_v56  ;;  %v643_v61 = vor.u32 %v641_v44, %v640_v51  ;;  %v645_v62 = vrot.slane %v640_v51, 4  ;;  %v667_v63 = vshll.u32 %v11302_v48, 16  ;;  %v672_v3 = vshrl.u32 %v11303_v49, 16  ;;  %v958_v27 = vld [vmem:[#allocation2 + $0x18] sm:$0xf] }
  0x24   : > { %v1291_v4 = vsel %vm1279_vm11, %v1286_v55, %v1290_v42  ;;  %v952_v5 = vsel %vm12009_vm10, %v635_v57, %v951_v52  ;;  %v666_v6 = vrot.slane %v664_v60, 7  ;;  %v675_v7 = vshll.u32 %v11303_v49, 16  ;;  %v460_v30 = vld [vmem:[#allocation2 + $0x38] sm:$0x1]  ;;  %v962_v35 = vld [vmem:[#allocation2 + $0x20] sm:$0x1] }
  0x25   : > { %1496 = vrot.lane.b32.xlu0 %v1291_v4, %s11859_s24  ;;  %v644_v8 = vsel %vm12015_vm12, %v636_v58, %v643_v61  ;;  %953 = vst [vmem:[#allocation2 + $0xc] sm:$0xf] %v952_v5  ;;  %v956_v9 = vsel %vm11938_vm3, %v645_v62, %v955_v59  ;;  %v674_v10 = vrot.slane %v672_v3, 7  ;;  %v647_v12 = vshrl.u32 %v11300_v53, 16  ;;  %v419_v42 = vld [vmem:[#allocation2 + $0x54] sm:$0x1] }
  0x26   : > { %954 = vst.msk [vmem:[#allocation2 + $0x10] sm:$0xf] %vm388_vm0, %v644_v8  ;;  %957 = vst [vmem:[#allocation2 + $0x14] sm:$0x1] %v956_v9  ;;  %v669_v15 = vor.u32 %v667_v63, %v666_v6  ;;  %v670_v16 = vrot.slane %v666_v6, 4  ;;  %v650_v18 = vshll.u32 %v11300_v53, 16  ;;  %v11306_v28 = vpack.c.bf16 %v507_v13, %v507_v13 }
  0x27   : > { %v655_v19 = vshrl.u32 %v11301_v54, 16  ;;  %v677_v20 = vor.u32 %v675_v7, %v674_v10  ;;  %v679_v21 = vrot.slane %v674_v10, 4  ;;  %v649_v22 = vrot.slane %v647_v12, 7  ;;  %v511_v43 = vld [vmem:[%s11987_s22 + $0x60] sm:$0xff]  ;;  %v509_v12 = vld [vmem:[%s11987_s22 + $0x50] sm:$0xff]  ;;  %s11860_s30 = smov 64  }
  0x28   : > { %v658_v23 = vshll.u32 %v11301_v54, 16  ;;  %v966_v24 = vsel %vm12009_vm10, %v669_v15, %v965_v11  ;;  %v11307_v29 = vpack.c.bf16 %v508_v14, %v508_v14  ;;  %v698_v40 = vshrl.u32 %v11306_v28, 16  ;;  %v979_v54 = vld [vmem:[#allocation2 + $0x3c] sm:$0xf]  ;;  %v983_v6 = vld [vmem:[#allocation2 + $0x44] sm:$0x1] }
  0x29   : > { %v657_v26 = vrot.slane %v655_v19, 7  ;;  %v678_v31 = vsel %vm12015_vm12, %v670_v16, %v677_v20  ;;  %967 = vst [vmem:[#allocation2 + $0x24] sm:$0xf] %v966_v24  ;;  %v970_v32 = vsel %vm11938_vm3, %v679_v21, %v969_v17  ;;  %v652_v33 = vor.u32 %v650_v18, %v649_v22  ;;  %v512_v11 = vld [vmem:[%s11987_s22 + $0x68] sm:$0xff]  ;;  %s11297_s27 = sshll.u32 %s17153_s18, 3 }
  0x2a   : > { %v653_v34 = vrot.slane %v649_v22, 4  ;;  %968 = vst.msk [vmem:[#allocation2 + $0x28] sm:$0xf] %vm388_vm0, %v678_v31  ;;  %971 = vst [vmem:[#allocation2 + $0x2c] sm:$0x1] %v970_v32  ;;  %v701_v41 = vshll.u32 %v11306_v28, 16  ;;  %v11304_v55 = vpack.c.bf16 %v505_v36, %v505_v36  ;;  %v12049_v59 = vpack.c.bf16 %v506_v37, %v506_v37  ;;  %s386_s12 = scalar_lea.vmem %s16781_s11, %s11297_s27 }
  0x2b   : > { %v660_v38 = vor.u32 %v658_v23, %v657_v26  ;;  %v662_v39 = vrot.slane %v657_v26, 4  ;;  %v959_v44 = vsel %vm12009_vm10, %v652_v33, %v958_v27  ;;  %v706_v45 = vshrl.u32 %v11307_v29, 16 }
  0x2c   : > { %v709_v46 = vshll.u32 %v11307_v29, 16  ;;  %v461_v47 = vsel %vm11949_vm7, 0, %v460_v30  ;;  %v1118_v48 = vld [vmem:[#allocation2 + $0xc] sm:$0xe]  ;;  %960 = vst [vmem:[#allocation2 + $0x18] sm:$0xf] %v959_v44  ;;  %v12053_v61 = vpack.c.bf16 %v511_v43, %v511_v43  ;;  %v12071_v29 = vpack.c.bf16 %v512_v11, %v512_v11 }
  0x2d   : > { %v1065_v49 = vld [vmem:[#allocation2 + $0xc] sm:$0xf]  ;;  %v661_v51 = vsel %vm12015_vm12, %v653_v34, %v660_v38  ;;  %v963_v52 = vsel %vm11938_vm3, %v662_v39, %v962_v35  ;;  %v700_v53 = vrot.slane %v698_v40, 7  ;;  %462 = vst [vmem:[#allocation2 + $0x38] sm:$0x1] %v461_v47  ;;  %v708_v58 = vrot.slane %v706_v45, 7 }
  0x2e   : > { %v1066_v57 = vld [vmem:[#allocation2 + $0x10] sm:$0xf]  ;;  %961 = vst.msk [vmem:[#allocation2 + $0x1c] sm:$0xf] %vm388_vm0, %v661_v51  ;;  %964 = vst [vmem:[#allocation2 + $0x20] sm:$0x1] %v963_v52  ;;  %v12076_v35 = vpack.c.bf16 %v509_v12, %v509_v12 }
  0x2f   : > { %v420_v60 = vsel %vm11938_vm3, 0, %v419_v42  ;;  %v11627_v62 = vld [vmem:[#allocation2 + $0x14] ss:$0 sps:$4 sm:$0x11]   ;;  %v10666_v63 = vcombine.low %v1118_v48, %v1066_v57  ;;  %v12055_v3 = vcombine.low %v1065_v49, %v1066_v57  ;;  %v703_v4 = vor.u32 %v701_v41, %v700_v53  ;;  %v972_v51 = vld [vmem:[#allocation2 + $0x30] sm:$0xf] }
  0x30   : > { %v704_v5 = vrot.slane %v700_v53, 4  ;;  %421 = vst [vmem:[#allocation2 + $0x54] sm:$0x1] %v420_v60  ;;  %v711_v7 = vor.u32 %v709_v46, %v708_v58  ;;  %v713_v8 = vrot.slane %v708_v58, 4  ;;  %v681_v9 = vshrl.u32 %v11304_v55, 16  ;;  %v510_v52 = vld [vmem:[%s11987_s22 + $0x58] sm:$0xff] }
  0x31   : > { %v684_v10 = vshll.u32 %v11304_v55, 16  ;;  %v1590_v13 = vrot.slane %v10666_v63, 1  ;;  %v1591_v14 = vrot.slane %v11627_v62, 1  ;;  %v1293_v15 = vshrl.u32 %v12055_v3, 16  ;;  %v1069_v17 = vld [vmem:[#allocation2 + $0x24] sm:$0xf] }
  0x32   : > { %v1295_v16 = vshll.u32 %v12055_v3, 16  ;;  %v1300_v18 = vshll.u32 %v11627_v62, 16  ;;  %v1070_v19 = vld [vmem:[#allocation2 + $0x28] sm:$0xf]  ;;  %v712_v20 = vsel %vm12015_vm12, %v704_v5, %v711_v7  ;;  %v980_v21 = vsel %vm12009_vm10, %v703_v4, %v979_v54  ;;  %v1120_v28 = vld [vmem:[#allocation2 + $0x24] sm:$0xe] }
  0x33   : > { %v984_v22 = vsel %vm11938_vm3, %v713_v8, %v983_v6  ;;  %v1592_v23 = vsel %vm1586_vm9, %v1590_v13, %v1591_v14  ;;  %v12068_v26 = vcombine.low %v1069_v17, %v1070_v19  ;;  %v11631_v27 = vld [vmem:[#allocation2 + $0x2c] ss:$0 sps:$4 sm:$0x11]   ;;  %981 = vst [vmem:[#allocation2 + $0x3c] sm:$0xf] %v980_v21  ;;  %v10668_v32 = vcombine.low %v1120_v28, %v1070_v19 }
  0x34   : > { %v1297_v24 = vrot.slane %v1295_v16, 1  ;;  %982 = vst.msk [vmem:[#allocation2 + $0x40] sm:$0xf] %vm388_vm0, %v712_v20  ;;  %985 = vst [vmem:[#allocation2 + $0x44] sm:$0x1] %v984_v22  ;;  %1643 = vrot.lane.b32.xlu1 %v1592_v23, %s11858_s23  ;;  %v1302_v30 = vrot.slane %v1300_v18, 1 }
  0x35   : > { %v1067_v31 = vld [vmem:[#allocation2 + $0x18] sm:$0xf]  ;;  %v12074_v34 = vrot.slane %v681_v9, 7  ;;  %v1317_v37 = vshrl.u32 %v12068_v26, 16  ;;  %v1319_v38 = vshll.u32 %v12068_v26, 16  ;;  %v1324_v39 = vshll.u32 %v11631_v27, 16 }
  0x36   : > { %v1119_v33 = vld [vmem:[#allocation2 + $0x18] sm:$0xe]  ;;  %v1298_v36 = vor.u32 %v1297_v24, %v1293_v15  ;;  %v1068_v40 = vld [vmem:[#allocation2 + $0x1c] sm:$0xf]  ;;  %v1596_v43 = vrot.slane %v10668_v32, 1  ;;  %v1597_v49 = vrot.slane %v11631_v27, 1 }
  0x37   : > { %v12080_v41 = vcombine.low %v1067_v31, %v1068_v40  ;;  %v11633_v42 = vld [vmem:[#allocation2 + $0x20] ss:$0 sps:$4 sm:$0x11]   ;;  %v10667_v44 = vcombine.low %v1119_v33, %v1068_v40  ;;  %v686_v45 = vor.u32 %v684_v10, %v12074_v34  ;;  %v1321_v47 = vrot.slane %v1319_v38, 1  ;;  %v469_v4 = vld [vmem:[#allocation2 + $0x5c] sm:$0x1] }
  0x38   : > { %v1303_v46 = vsel %vm1279_vm11, %v1298_v36, %v1302_v30  ;;  %v1326_v48 = vrot.slane %v1324_v39, 1  ;;  %v1312_v55 = vshll.u32 %v11633_v42, 16  ;;  %v1598_v60 = vsel %vm1586_vm9, %v1596_v43, %v1597_v49  ;;  %v976_v28 = vld [vmem:[#allocation2 + $0x38] sm:$0x1]  ;;  %v466_v43 = vld [vmem:[#allocation2 + $0x50] sm:$0x1] }
  0x39   : > { %1498 = vrot.lane.b32.xlu0 %v1303_v46, %s11859_s24  ;;  %v1305_v53 = vshrl.u32 %v12080_v41, 16  ;;  %v1307_v54 = vshll.u32 %v12080_v41, 16  ;;  %v1593_v57 = vrot.slane %v10667_v44, 1  ;;  %v1322_v58 = vor.u32 %v1321_v47, %v1317_v37  ;;  %v416_v37 = vld [vmem:[#allocation2 + $0x48] sm:$0x1] }
  0x3a   : > { %v1594_v62 = vrot.slane %v11633_v42, 1  ;;  %v687_v63 = vrot.slane %v12074_v34, 4  ;;  %v1314_v6 = vrot.slane %v1312_v55, 1  ;;  %v1073_v7 = vld [vmem:[#allocation2 + $0x3c] sm:$0xf]  ;;  %v973_v9 = vsel %vm12009_vm10, %v686_v45, %v972_v51 }
  0x3b   : > { %v1309_v5 = vrot.slane %v1307_v54, 1  ;;  %v1074_v8 = vld [vmem:[#allocation2 + $0x40] sm:$0xf]  ;;  %v12092_v10 = vpack.c.bf16 %v510_v52, %v510_v52  ;;  %v1327_v11 = vsel %vm1279_vm11, %v1322_v58, %v1326_v48  ;;  %v11636_v14 = vld [vmem:[#allocation2 + $0x44] ss:$0 sps:$4 sm:$0x11]  }
  0x3c   : > { %v1595_v12 = vsel %vm1586_vm9, %v1593_v57, %v1594_v62  ;;  %v12096_v13 = vcombine.low %v1073_v7, %v1074_v8  ;;  %v689_v15 = vshrl.u32 %v12049_v59, 16  ;;  %974 = vst [vmem:[#allocation2 + $0x30] sm:$0xf] %v973_v9  ;;  %1502 = vrot.lane.b32.xlu1 %v1327_v11, %s11859_s24  ;;  %v692_v17 = vshll.u32 %v12049_v59, 16  ;;  %v1122_v18 = vld [vmem:[#allocation2 + $0x3c] sm:$0xe] }
  0x3d   : > { %v1310_v16 = vor.u32 %v1309_v5, %v1305_v53  ;;  %v470_v19 = vsel %vm11949_vm7, 0, %v469_v4  ;;  %v732_v20 = vshrl.u32 %v12053_v61, 16  ;;  %v1348_v23 = vshll.u32 %v11636_v14, 16  ;;  %v993_v48 = vld [vmem:[#allocation2 + $0x54] sm:$0xf]  ;;  %v516_v62 = vld [vmem:[%s11987_s22 + $0x88] sm:$0xff] }
  0x3e   : > { %v1341_v21 = vshrl.u32 %v12096_v13, 16  ;;  %v1343_v22 = vshll.u32 %v12096_v13, 16  ;;  %v691_v24 = vrot.slane %v689_v15, 7  ;;  %471 = vst [vmem:[#allocation2 + $0x5c] sm:$0x1] %v470_v19  ;;  %v10670_v30 = vcombine.low %v1122_v18, %v1074_v8  ;;  %v513_v18 = vld [vmem:[%s11987_s22 + $0x70] sm:$0xff] }
  0x3f   : > { %v1315_v27 = vsel %vm1279_vm11, %v1310_v16, %v1314_v6  ;;  %v1603_v31 = vrot.slane %v11636_v14, 1  ;;  %v734_v32 = vrot.slane %v732_v20, 7  ;;  %v1350_v33 = vrot.slane %v1348_v23, 1  ;;  %v425_v53 = vld [vmem:[#allocation2 + $0x6c] sm:$0x1]  ;;  %v514_v19 = vld [vmem:[%s11987_s22 + $0x78] sm:$0xff] }
  0x40   : > { %1500 = vrot.lane.b32.xlu0 %v1315_v27, %s11859_s24  ;;  %v1345_v59 = vrot.slane %v1343_v22, 1  ;;  %v694_v34 = vor.u32 %v692_v17, %v691_v24  ;;  %v696_v36 = vrot.slane %v691_v24, 4  ;;  %1647 = vrot.lane.b32.xlu1 %v1598_v60, %s11858_s23  ;;  %v1602_v38 = vrot.slane %v10670_v30, 1  ;;  %v475_v54 = vld [vmem:[#allocation2 + $0x74] sm:$0x1]  ;;  %v515_v60 = vld [vmem:[%s11987_s22 + $0x80] sm:$0xff] }
  0x41   : > { %v735_v39 = vshll.u32 %v12053_v61, 16  ;;  %v738_v40 = vrot.slane %v734_v32, 4  ;;  %v740_v42 = vshrl.u32 %v12071_v29, 16  ;;  %v743_v47 = vshll.u32 %v12071_v29, 16  ;;  %v422_v8 = vld [vmem:[#allocation2 + $0x60] sm:$0x1] }
  0x42   : > { %v1346_v44 = vor.u32 %v1345_v59, %v1341_v21  ;;  %v695_v45 = vsel %vm12015_vm12, %v687_v63, %v694_v34  ;;  %v977_v46 = vsel %vm11938_vm3, %v696_v36, %v976_v28  ;;  %v1604_v61 = vsel %vm1586_vm9, %v1602_v38, %v1603_v31  ;;  %v519_v38 = vld [vmem:[%s11987_s22 + $0xa0] sm:$0xff] }
  0x43   : > { %975 = vst.msk [vmem:[#allocation2 + $0x34] sm:$0xf] %vm388_vm0, %v695_v45  ;;  %978 = vst [vmem:[#allocation2 + $0x38] sm:$0x1] %v977_v46  ;;  %v737_v49 = vor.u32 %v735_v39, %v734_v32  ;;  %v742_v51 = vrot.slane %v740_v42, 7  ;;  %v417_v52 = vsel %vm11938_vm3, 0, %v416_v37  ;;  %v11314_v17 = vpack.c.bf16 %v515_v60, %v515_v60 }
  0x44   : > { %1645 = vrot.lane.b32.xlu0 %v1595_v12, %s11858_s23  ;;  %v1351_v55 = vsel %vm1279_vm11, %v1346_v44, %v1350_v33  ;;  %418 = vst [vmem:[#allocation2 + $0x48] sm:$0x1] %v417_v52  ;;  %v467_v29 = vsel %vm11949_vm7, 0, %v466_v43  ;;  %v715_v57 = vshrl.u32 %v12076_v35, 16  ;;  %v718_v58 = vshll.u32 %v12076_v35, 16 }
  0x45   : > { %1506 = vrot.lane.b32.xlu1 %v1351_v55, %s11859_s24  ;;  %v745_v63 = vor.u32 %v743_v47, %v742_v51  ;;  %v747_v4 = vrot.slane %v742_v51, 4  ;;  %v994_v5 = vsel %vm12009_vm10, %v737_v49, %v993_v48  ;;  %v997_v6 = vld [vmem:[#allocation2 + $0x5c] sm:$0x1]  ;;  %468 = vst [vmem:[#allocation2 + $0x50] sm:$0x1] %v467_v29  ;;  %v723_v7 = vshrl.u32 %v12092_v10, 16 }
  0x46   : > { %995 = vst [vmem:[#allocation2 + $0x54] sm:$0xf] %v994_v5  ;;  %v717_v9 = vrot.slane %v715_v57, 7  ;;  %v726_v35 = vshll.u32 %v12092_v10, 16  ;;  %v426_v11 = vsel %vm11938_vm3, 0, %v425_v53  ;;  %v476_v12 = vsel %vm11949_vm7, 0, %v475_v54 }
  0x47   : > { %v746_v14 = vsel %vm12015_vm12, %v738_v40, %v745_v63  ;;  %v998_v15 = vsel %vm11938_vm3, %v747_v4, %v997_v6  ;;  %v725_v16 = vrot.slane %v723_v7, 7  ;;  %427 = vst [vmem:[#allocation2 + $0x6c] sm:$0x1] %v426_v11  ;;  %477 = vst [vmem:[#allocation2 + $0x74] sm:$0x1] %v476_v12  ;;  %v11315_v23 = vpack.c.bf16 %v516_v62, %v516_v62 }
  0x48   : > { %v1071_v20 = vld [vmem:[#allocation2 + $0x30] sm:$0xf]  ;;  %996 = vst.msk [vmem:[#allocation2 + $0x58] sm:$0xf] %vm388_vm0, %v746_v14  ;;  %999 = vst [vmem:[#allocation2 + $0x5c] sm:$0x1] %v998_v15  ;;  %v720_v21 = vor.u32 %v718_v58, %v717_v9  ;;  %v12147_v36 = vpack.c.bf16 %v513_v18, %v513_v18  ;;  %v12149_v37 = vpack.c.bf16 %v514_v19, %v514_v19 }
  0x49   : > { %v1121_v10 = vld [vmem:[#allocation2 + $0x30] sm:$0xe]  ;;  %v721_v22 = vrot.slane %v717_v9, 4  ;;  %v423_v24 = vsel %vm11938_vm3, 0, %v422_v8  ;;  %1651 = vrot.lane.b32.xlu1 %v1604_v61, %s11858_s23  ;;  %v728_v27 = vor.u32 %v726_v35, %v725_v16  ;;  %v730_v28 = vrot.slane %v725_v16, 4  ;;  %v520_v8 = vld [vmem:[%s11987_s22 + $0xa8] sm:$0xff] }
  0x4a   : > { %v766_v30 = vshrl.u32 %v11314_v17, 16  ;;  %v769_v31 = vshll.u32 %v11314_v17, 16  ;;  %424 = vst [vmem:[#allocation2 + $0x60] sm:$0x1] %v423_v24  ;;  %v472_v32 = vld [vmem:[#allocation2 + $0x68] sm:$0x1]  ;;  %v12167_v9 = vpack.c.bf16 %v519_v38, %v519_v38 }
  0x4b   : > { %v1072_v59 = vld [vmem:[#allocation2 + $0x34] sm:$0xf]  ;;  %v774_v33 = vshrl.u32 %v11315_v23, 16  ;;  %v777_v34 = vshll.u32 %v11315_v23, 16  ;;  %v729_v43 = vsel %vm12015_vm12, %v721_v22, %v728_v27  ;;  %v986_v44 = vld [vmem:[#allocation2 + $0x48] sm:$0xf] }
  0x4c   : > { %v12152_v39 = vcombine.low %v1071_v20, %v1072_v59  ;;  %v11638_v40 = vld [vmem:[#allocation2 + $0x38] ss:$0 sps:$4 sm:$0x11]   ;;  %v10669_v42 = vcombine.low %v1121_v10, %v1072_v59  ;;  %v768_v45 = vrot.slane %v766_v30, 7  ;;  %v987_v46 = vsel %vm12009_vm10, %v720_v21, %v986_v44  ;;  %989 = vst.msk [vmem:[#allocation2 + $0x4c] sm:$0xf] %vm388_vm0, %v729_v43 }
  0x4d   : > { %v990_v47 = vld [vmem:[#allocation2 + $0x50] sm:$0x1]  ;;  %v776_v48 = vrot.slane %v774_v33, 7  ;;  %v473_v61 = vsel %vm11949_vm7, 0, %v472_v32  ;;  %v749_v49 = vshrl.u32 %v12147_v36, 16  ;;  %v1336_v53 = vshll.u32 %v11638_v40, 16 }
  0x4e   : > { %v1329_v51 = vshrl.u32 %v12152_v39, 16  ;;  %v1331_v52 = vshll.u32 %v12152_v39, 16  ;;  %v1599_v54 = vrot.slane %v10669_v42, 1  ;;  %v1077_v55 = vld [vmem:[#allocation2 + $0x54] sm:$0xf]  ;;  %v1600_v29 = vrot.slane %v11638_v40, 1 }
  0x4f   : > { %988 = vst [vmem:[#allocation2 + $0x48] sm:$0xf] %v987_v46  ;;  %474 = vst [vmem:[#allocation2 + $0x68] sm:$0x1] %v473_v61  ;;  %v991_v57 = vsel %vm11938_vm3, %v730_v28, %v990_v47  ;;  %v1124_v58 = vld [vmem:[#allocation2 + $0x54] sm:$0xe]  ;;  %v771_v60 = vor.u32 %v769_v31, %v768_v45  ;;  %v779_v7 = vor.u32 %v777_v34, %v776_v48 }
  0x50   : > { %v772_v62 = vrot.slane %v768_v45, 4  ;;  %v1007_v63 = vld [vmem:[#allocation2 + $0x6c] sm:$0xf]  ;;  %v1333_v4 = vrot.slane %v1331_v52, 1  ;;  %v1338_v5 = vrot.slane %v1336_v53, 1  ;;  %v517_v35 = vld [vmem:[%s11987_s22 + $0x90] sm:$0xff]  ;;  %v1601_v11 = vsel %vm1586_vm9, %v1599_v54, %v1600_v29 }
  0x51   : > { %v1078_v6 = vld [vmem:[#allocation2 + $0x58] sm:$0xf]  ;;  %992 = vst [vmem:[#allocation2 + $0x50] sm:$0x1] %v991_v57  ;;  %v781_v16 = vrot.slane %v776_v48, 4  ;;  %v1008_v20 = vsel %vm12009_vm10, %v771_v60, %v1007_v63  ;;  %v12177_v10 = vrot.slane %v749_v49, 7  ;;  %v12189_v43 = vpack.c.bf16 %v520_v8, %v520_v8 }
  0x52   : > { %v12171_v12 = vcombine.low %v1077_v55, %v1078_v6  ;;  %v11641_v14 = vld [vmem:[#allocation2 + $0x5c] ss:$0 sps:$4 sm:$0x11]   ;;  %v10672_v15 = vcombine.low %v1124_v58, %v1078_v6  ;;  %v1011_v17 = vld [vmem:[#allocation2 + $0x74] sm:$0x1]  ;;  %v1334_v18 = vor.u32 %v1333_v4, %v1329_v51  ;;  %v780_v19 = vsel %vm12015_vm12, %v772_v62, %v779_v7  ;;  %v523_v22 = vld [vmem:[%s11987_s22 + $0xc0] sm:$0xff] }
  0x53   : > { %v518_v21 = vld [vmem:[%s11987_s22 + $0x98] sm:$0xff]  ;;  %v1372_v27 = vshll.u32 %v11641_v14, 16  ;;  %1009 = vst [vmem:[#allocation2 + $0x6c] sm:$0xf] %v1008_v20  ;;  %1010 = vst.msk [vmem:[#allocation2 + $0x70] sm:$0xf] %vm388_vm0, %v780_v19  ;;  %v1012_v59 = vsel %vm11938_vm3, %v781_v16, %v1011_v17  ;;  %v12191_v44 = vpack.c.bf16 %v517_v35, %v517_v35  ;;  %v12201_v55 = vpack.c.bf16 %v523_v22, %v523_v22 }
  0x54   : > { %v1365_v23 = vshrl.u32 %v12171_v12, 16  ;;  %v1367_v24 = vshll.u32 %v12171_v12, 16  ;;  %v1608_v28 = vrot.slane %v10672_v15, 1  ;;  %v1339_v30 = vsel %vm1279_vm11, %v1334_v18, %v1338_v5  ;;  %v1076_v31 = vld [vmem:[#allocation2 + $0x4c] sm:$0xf] }
  0x55   : > { %v1609_v32 = vrot.slane %v11641_v14, 1  ;;  %v752_v33 = vshll.u32 %v12147_v36, 16  ;;  %1504 = vrot.lane.b32.xlu0 %v1339_v30, %s11859_s24  ;;  %v1374_v38 = vrot.slane %v1372_v27, 1  ;;  %1013 = vst [vmem:[#allocation2 + $0x74] sm:$0x1] %v1012_v59  ;;  %v524_v49 = vld [vmem:[%s11987_s22 + $0xc8] sm:$0xff]  ;;  %v12199_v54 = vpack.c.bf16 %v518_v21, %v518_v21 }
  0x56   : > { %v1369_v34 = vrot.slane %v1367_v24, 1  ;;  %v1075_v40 = vld [vmem:[#allocation2 + $0x48] sm:$0xf]  ;;  %v1000_v61 = vld [vmem:[#allocation2 + $0x60] sm:$0xf]  ;;  %v755_v53 = vrot.slane %v12177_v10, 4  ;;  %v12212_v16 = vpack.c.bf16 %v524_v49, %v524_v49 }
  0x57   : > { %v1123_v42 = vld [vmem:[#allocation2 + $0x48] sm:$0xe]  ;;  %v12193_v45 = vcombine.low %v1075_v40, %v1076_v31  ;;  %v1610_v46 = vsel %vm1586_vm9, %v1608_v28, %v1609_v32  ;;  %v754_v48 = vor.u32 %v752_v33, %v12177_v10  ;;  %v431_v36 = vld [vmem:[#allocation2 + $0x84] sm:$0x1]  ;;  %v757_v60 = vshrl.u32 %v12149_v37, 16  ;;  %v521_v33 = vld [vmem:[%s11987_s22 + $0xb0] sm:$0xff] }
  0x58   : > { %v10671_v47 = vcombine.low %v1123_v42, %v1076_v31  ;;  %v1370_v51 = vor.u32 %v1369_v34, %v1365_v23  ;;  %v11643_v52 = vld [vmem:[#allocation2 + $0x50] ss:$0 sps:$4 sm:$0x11]   ;;  %v760_v5 = vshll.u32 %v12149_v37, 16  ;;  %v481_v6 = vld [vmem:[#allocation2 + $0x8c] sm:$0x1] }
  0x59   : > { %v1353_v29 = vshrl.u32 %v12193_v45, 16  ;;  %v1355_v57 = vshll.u32 %v12193_v45, 16  ;;  %1649 = vrot.lane.b32.xlu0 %v1601_v11, %s11858_s23  ;;  %v1360_v63 = vshll.u32 %v11643_v52, 16  ;;  %v1606_v4 = vrot.slane %v11643_v52, 1  ;;  %v1004_v37 = vld [vmem:[#allocation2 + $0x68] sm:$0x1] }
  0x5a   : > { %v1605_v58 = vrot.slane %v10671_v47, 1  ;;  %v1375_v62 = vsel %vm1279_vm11, %v1370_v51, %v1374_v38  ;;  %v1081_v8 = vld [vmem:[#allocation2 + $0x6c] sm:$0xf]  ;;  %v1082_v35 = vld [vmem:[#allocation2 + $0x70] sm:$0xf]  ;;  %v759_v14 = vrot.slane %v757_v60, 7  ;;  %v1001_v15 = vsel %vm12009_vm10, %v754_v48, %v1000_v61 }
  0x5b   : > { %1510 = vrot.lane.b32.xlu1 %v1375_v62, %s11859_s24  ;;  %v1357_v7 = vrot.slane %v1355_v57, 1  ;;  %v1362_v17 = vrot.slane %v1360_v63, 1  ;;  %v12215_v18 = vcombine.low %v1081_v8, %v1082_v35  ;;  %1002 = vst [vmem:[#allocation2 + $0x60] sm:$0xf] %v1001_v15  ;;  %v1126_v19 = vld [vmem:[#allocation2 + $0x6c] sm:$0xe] }
  0x5c   : > { %v1607_v11 = vsel %vm1586_vm9, %v1605_v58, %v1606_v4  ;;  %v432_v20 = vsel %vm11938_vm3, 0, %v431_v36  ;;  %v11646_v21 = vld [vmem:[#allocation2 + $0x74] ss:$0 sps:$4 sm:$0x11]   ;;  %v762_v22 = vor.u32 %v760_v5, %v759_v14  ;;  %v764_v23 = vrot.slane %v759_v14, 4 }
  0x5d   : > { %v1358_v10 = vor.u32 %v1357_v7, %v1353_v29  ;;  %v10674_v24 = vcombine.low %v1126_v19, %v1082_v35  ;;  %433 = vst [vmem:[#allocation2 + $0x84] sm:$0x1] %v432_v20  ;;  %v428_v27 = vld [vmem:[#allocation2 + $0x78] sm:$0x1]  ;;  %v1389_v28 = vshrl.u32 %v12215_v18, 16  ;;  %v1391_v30 = vshll.u32 %v12215_v18, 16 }
  0x5e   : > { %v482_v31 = vsel %vm11949_vm7, 0, %v481_v6  ;;  %v800_v32 = vshrl.u32 %v12167_v9, 16  ;;  %v478_v59 = vld [vmem:[#allocation2 + $0x80] sm:$0x1]  ;;  %v1396_v38 = vshll.u32 %v11646_v21, 16  ;;  %v763_v40 = vsel %vm12015_vm12, %v755_v53, %v762_v22 }
  0x5f   : > { %v1363_v34 = vsel %vm1279_vm11, %v1358_v10, %v1362_v17  ;;  %1655 = vrot.lane.b32.xlu1 %v1610_v46, %s11858_s23  ;;  %v1005_v42 = vsel %vm11938_vm3, %v764_v23, %v1004_v37  ;;  %483 = vst [vmem:[#allocation2 + $0x8c] sm:$0x1] %v482_v31  ;;  %v1393_v47 = vrot.slane %v1391_v30, 1  ;;  %1003 = vst.msk [vmem:[#allocation2 + $0x64] sm:$0xf] %vm388_vm0, %v763_v40  ;;  %v1614_v48 = vrot.slane %v10674_v24, 1 }
  0x60   : > { %1508 = vrot.lane.b32.xlu0 %v1363_v34, %s11859_s24  ;;  %1006 = vst [vmem:[#allocation2 + $0x68] sm:$0x1] %v1005_v42  ;;  %v1615_v61 = vrot.slane %v11646_v21, 1  ;;  %v802_v36 = vrot.slane %v800_v32, 7  ;;  %v1398_v49 = vrot.slane %v1396_v38, 1  ;;  %v803_v46 = vshll.u32 %v12167_v9, 16 }
  0x61   : > { %v808_v51 = vshrl.u32 %v12189_v43, 16  ;;  %v811_v52 = vshll.u32 %v12189_v43, 16  ;;  %v437_v53 = vld [vmem:[#allocation2 + $0x9c] sm:$0x1]  ;;  %v487_v29 = vld [vmem:[#allocation2 + $0xa4] sm:$0x1]  ;;  %v1394_v57 = vor.u32 %v1393_v47, %v1389_v28  ;;  %v12241_v7 = vpack.c.bf16 %v521_v33, %v521_v33 }
  0x62   : > { %v1616_v58 = vsel %vm1586_vm9, %v1614_v48, %v1615_v61  ;;  %v806_v60 = vrot.slane %v802_v36, 4  ;;  %v429_v62 = vsel %vm11938_vm3, 0, %v428_v27  ;;  %v1079_v63 = vld [vmem:[#allocation2 + $0x60] sm:$0xf]  ;;  %v805_v5 = vor.u32 %v803_v46, %v802_v36  ;;  %v434_v47 = vld [vmem:[#allocation2 + $0x90] sm:$0x1] }
  0x63   : > { %v1125_v4 = vld [vmem:[#allocation2 + $0x60] sm:$0xe]  ;;  %v810_v6 = vrot.slane %v808_v51, 7  ;;  %430 = vst [vmem:[#allocation2 + $0x78] sm:$0x1] %v429_v62  ;;  %v479_v9 = vsel %vm11949_vm7, 0, %v478_v59  ;;  %v1399_v43 = vsel %vm1279_vm11, %v1394_v57, %v1398_v49 }
  0x64   : > { %1653 = vrot.lane.b32.xlu0 %v1607_v11, %s11858_s23  ;;  %v1021_v8 = vld [vmem:[#allocation2 + $0x84] sm:$0xf]  ;;  %480 = vst [vmem:[#allocation2 + $0x80] sm:$0x1] %v479_v9  ;;  %v783_v35 = vshrl.u32 %v12191_v44, 16  ;;  %v786_v14 = vshll.u32 %v12191_v44, 16  ;;  %1514 = vrot.lane.b32.xlu1 %v1399_v43, %s11859_s24 }
  0x65   : > { %v791_v15 = vshrl.u32 %v12199_v54, 16  ;;  %v813_v17 = vor.u32 %v811_v52, %v810_v6  ;;  %v815_v37 = vrot.slane %v810_v6, 4  ;;  %v1022_v19 = vsel %vm12009_vm10, %v805_v5, %v1021_v8  ;;  %v484_v48 = vld [vmem:[#allocation2 + $0x98] sm:$0x1] }
  0x66   : > { %v794_v20 = vshll.u32 %v12199_v54, 16  ;;  %1023 = vst [vmem:[#allocation2 + $0x84] sm:$0xf] %v1022_v19  ;;  %v1025_v11 = vld [vmem:[#allocation2 + $0x8c] sm:$0x1]  ;;  %v785_v10 = vrot.slane %v783_v35, 7 }
  0x67   : > { %v793_v21 = vrot.slane %v791_v15, 7  ;;  %v438_v22 = vsel %vm11938_vm3, 0, %v437_v53  ;;  %v488_v44 = vsel %vm11949_vm7, 0, %v487_v29  ;;  %v1080_v23 = vld [vmem:[#allocation2 + $0x64] sm:$0xf]  ;;  %v814_v24 = vsel %vm12015_vm12, %v806_v60, %v813_v17 }
  0x68   : > { %v1026_v27 = vsel %vm11938_vm3, %v815_v37, %v1025_v11  ;;  %439 = vst [vmem:[#allocation2 + $0x9c] sm:$0x1] %v438_v22  ;;  %489 = vst [vmem:[#allocation2 + $0xa4] sm:$0x1] %v488_v44  ;;  %v834_v54 = vshrl.u32 %v12201_v55, 16  ;;  %v837_v28 = vshll.u32 %v12201_v55, 16  ;;  %v12262_v30 = vcombine.low %v1079_v63, %v1080_v23  ;;  %1659 = vrot.lane.b32.xlu1 %v1616_v58, %s11858_s23 }
  0x69   : > { %v11648_v31 = vld [vmem:[#allocation2 + $0x68] ss:$0 sps:$4 sm:$0x11]   ;;  %v10673_v32 = vcombine.low %v1125_v4, %v1080_v23  ;;  %1024 = vst.msk [vmem:[#allocation2 + $0x88] sm:$0xf] %vm388_vm0, %v814_v24  ;;  %v788_v59 = vor.u32 %v786_v14, %v785_v10  ;;  %v789_v33 = vrot.slane %v785_v10, 4  ;;  %v796_v34 = vor.u32 %v794_v20, %v793_v21 }
  0x6a   : > { %1027 = vst [vmem:[#allocation2 + $0x8c] sm:$0x1] %v1026_v27  ;;  %v798_v38 = vrot.slane %v793_v21, 4  ;;  %v836_v40 = vrot.slane %v834_v54, 7  ;;  %v842_v42 = vshrl.u32 %v12212_v16, 16  ;;  %v522_v55 = vld [vmem:[%s11987_s22 + $0xb8] sm:$0xff] }
  0x6b   : > { %v1377_v61 = vshrl.u32 %v12262_v30, 16  ;;  %v1379_v36 = vshll.u32 %v12262_v30, 16  ;;  %v1384_v49 = vshll.u32 %v11648_v31, 16  ;;  %v1611_v46 = vrot.slane %v10673_v32, 1  ;;  %v1014_v51 = vld [vmem:[#allocation2 + $0x78] sm:$0xf] }
  0x6c   : > { %v1612_v52 = vrot.slane %v11648_v31, 1  ;;  %v797_v53 = vsel %vm12015_vm12, %v789_v33, %v796_v34  ;;  %v1015_v29 = vsel %vm12009_vm10, %v788_v59, %v1014_v51  ;;  %v1018_v57 = vld [vmem:[#allocation2 + $0x80] sm:$0x1]  ;;  %v839_v58 = vor.u32 %v837_v28, %v836_v40  ;;  %v528_v11 = vld [vmem:[%s11987_s22 + $0xe8] sm:$0xff]  ;;  %v525_v24 = vld [vmem:[%s11987_s22 + $0xd0] sm:$0xff] }
  0x6d   : > { %v527_v60 = vld [vmem:[%s11987_s22 + $0xe0] sm:$0xff]  ;;  %v1381_v62 = vrot.slane %v1379_v36, 1  ;;  %v1386_v63 = vrot.slane %v1384_v49, 1  ;;  %1016 = vst [vmem:[#allocation2 + $0x78] sm:$0xf] %v1015_v29  ;;  %v1019_v4 = vsel %vm11938_vm3, %v798_v38, %v1018_v57  ;;  %v840_v5 = vrot.slane %v836_v40, 4 }
  0x6e   : > { %1017 = vst.msk [vmem:[#allocation2 + $0x7c] sm:$0xf] %vm388_vm0, %v797_v53  ;;  %v1613_v6 = vsel %vm1586_vm9, %v1611_v46, %v1612_v52  ;;  %v1085_v9 = vld [vmem:[#allocation2 + $0x84] sm:$0xf]  ;;  %1020 = vst [vmem:[#allocation2 + $0x80] sm:$0x1] %v1019_v4  ;;  %v12280_v14 = vpack.c.bf16 %v522_v55, %v522_v55  ;;  %v12287_v10 = vpack.c.bf16 %v527_v60, %v527_v60 }
  0x6f   : > { %v1128_v43 = vld [vmem:[#allocation2 + $0x84] sm:$0xe]  ;;  %v844_v8 = vrot.slane %v842_v42, 7  ;;  %v845_v35 = vshll.u32 %v12212_v16, 16  ;;  %v1382_v15 = vor.u32 %v1381_v62, %v1377_v61  ;;  %v1035_v17 = vld [vmem:[#allocation2 + $0x9c] sm:$0xf]  ;;  %v12307_v51 = vpack.c.bf16 %v528_v11, %v528_v11 }
  0x70   : > { %v1039_v37 = vld [vmem:[#allocation2 + $0xa4] sm:$0x1]  ;;  %v435_v19 = vsel %vm11938_vm3, 0, %v434_v47  ;;  %v485_v20 = vsel %vm11949_vm7, 0, %v484_v48  ;;  %v1086_v21 = vld [vmem:[#allocation2 + $0x88] sm:$0xf]  ;;  %v1036_v16 = vsel %vm12009_vm10, %v839_v58, %v1035_v17  ;;  %v12311_v60 = vpack.c.bf16 %v525_v24, %v525_v24 }
  0x71   : > { %v847_v22 = vor.u32 %v845_v35, %v844_v8  ;;  %v849_v44 = vrot.slane %v844_v8, 4  ;;  %436 = vst [vmem:[#allocation2 + $0x90] sm:$0x1] %v435_v19  ;;  %486 = vst [vmem:[#allocation2 + $0x98] sm:$0x1] %v485_v20  ;;  %v817_v23 = vshrl.u32 %v12241_v7, 16  ;;  %v1387_v27 = vsel %vm1279_vm11, %v1382_v15, %v1386_v63 }
  0x72   : > { %v12294_v54 = vcombine.low %v1085_v9, %v1086_v21  ;;  %v11651_v28 = vld [vmem:[#allocation2 + $0x8c] ss:$0 sps:$4 sm:$0x11]   ;;  %v10676_v31 = vcombine.low %v1128_v43, %v1086_v21  ;;  %1037 = vst [vmem:[#allocation2 + $0x9c] sm:$0xf] %v1036_v16  ;;  %v820_v32 = vshll.u32 %v12241_v7, 16  ;;  %1512 = vrot.lane.b32.xlu0 %v1387_v27, %s11859_s24 }
  0x73   : > { %v848_v59 = vsel %vm12015_vm12, %v840_v5, %v847_v22  ;;  %v1040_v33 = vsel %vm11938_vm3, %v849_v44, %v1039_v37  ;;  %v819_v34 = vrot.slane %v817_v23, 7  ;;  %v825_v38 = vshrl.u32 %v12280_v14, 16  ;;  %v526_v40 = vld [vmem:[%s11987_s22 + $0xd8] sm:$0xff]  ;;  %v443_v58 = vld [vmem:[#allocation2 + $0xb4] sm:$0x1] }
  0x74   : > { %v1413_v42 = vshrl.u32 %v12294_v54, 16  ;;  %v1415_v47 = vshll.u32 %v12294_v54, 16  ;;  %v1420_v48 = vshll.u32 %v11651_v28, 16  ;;  %v1620_v55 = vrot.slane %v10676_v31, 1  ;;  %1038 = vst.msk [vmem:[#allocation2 + $0xa0] sm:$0xf] %vm388_vm0, %v848_v59 }
  0x75   : > { %1041 = vst [vmem:[#allocation2 + $0xa4] sm:$0x1] %v1040_v33  ;;  %v1083_v7 = vld [vmem:[#allocation2 + $0x78] sm:$0xf]  ;;  %v1084_v61 = vld [vmem:[#allocation2 + $0x7c] sm:$0xf]  ;;  %v822_v49 = vor.u32 %v820_v32, %v819_v34  ;;  %v12318_v19 = vpack.c.bf16 %v526_v40, %v526_v40 }
  0x76   : > { %v1621_v36 = vrot.slane %v11651_v28, 1  ;;  %v823_v46 = vrot.slane %v819_v34, 4  ;;  %v1417_v52 = vrot.slane %v1415_v47, 1  ;;  %v1422_v53 = vrot.slane %v1420_v48, 1  ;;  %v1127_v57 = vld [vmem:[#allocation2 + $0x78] sm:$0xe]  ;;  %1657 = vrot.lane.b32.xlu0 %v1613_v6, %s11858_s23 }
  0x77   : > { %v12309_v29 = vcombine.low %v1083_v7, %v1084_v61  ;;  %v11653_v62 = vld [vmem:[#allocation2 + $0x80] ss:$0 sps:$4 sm:$0x11]   ;;  %v10675_v4 = vcombine.low %v1127_v57, %v1084_v61  ;;  %v827_v5 = vrot.slane %v825_v38, 7  ;;  %v828_v9 = vshll.u32 %v12280_v14, 16  ;;  %v529_v57 = vld [vmem:[%s11987_s22 + $0xf0] sm:$0xff] }
  0x78   : > { %v1622_v63 = vsel %vm1586_vm9, %v1620_v55, %v1621_v36  ;;  %v1418_v43 = vor.u32 %v1417_v52, %v1413_v42  ;;  %v1028_v15 = vld [vmem:[#allocation2 + $0x90] sm:$0xf]  ;;  %v1032_v17 = vld [vmem:[#allocation2 + $0x98] sm:$0x1]  ;;  %v493_v37 = vld [vmem:[#allocation2 + $0xbc] sm:$0x1] }
  0x79   : > { %v1401_v8 = vshrl.u32 %v12309_v29, 16  ;;  %v1403_v35 = vshll.u32 %v12309_v29, 16  ;;  %v1408_v20 = vshll.u32 %v11653_v62, 16  ;;  %v1617_v11 = vrot.slane %v10675_v4, 1  ;;  %v1089_v21 = vld [vmem:[#allocation2 + $0x9c] sm:$0xf] }
  0x7a   : > { %v1618_v6 = vrot.slane %v11653_v62, 1  ;;  %v830_v22 = vor.u32 %v828_v9, %v827_v5  ;;  %v1423_v44 = vsel %vm1279_vm11, %v1418_v43, %v1422_v53  ;;  %v832_v23 = vrot.slane %v827_v5, 4  ;;  %v1130_v24 = vld [vmem:[#allocation2 + $0x9c] sm:$0xe]  ;;  %v440_v33 = vld [vmem:[#allocation2 + $0xa8] sm:$0x1] }
  0x7b   : > { %v1405_v16 = vrot.slane %v1403_v35, 1  ;;  %v1029_v14 = vsel %vm12009_vm10, %v822_v49, %v1028_v15  ;;  %1518 = vrot.lane.b32.xlu1 %v1423_v44, %s11859_s24  ;;  %v1410_v27 = vrot.slane %v1408_v20, 1  ;;  %v1090_v31 = vld [vmem:[#allocation2 + $0xa0] sm:$0xf]  ;;  %v444_v59 = vsel %vm11938_vm3, 0, %v443_v58 }
  0x7c   : > { %v1619_v28 = vsel %vm1586_vm9, %v1617_v11, %v1618_v6  ;;  %v831_v32 = vsel %vm12015_vm12, %v823_v46, %v830_v22  ;;  %1030 = vst [vmem:[#allocation2 + $0x90] sm:$0xf] %v1029_v14  ;;  %v12329_v38 = vcombine.low %v1089_v21, %v1090_v31  ;;  %v11656_v40 = vld [vmem:[#allocation2 + $0xa4] ss:$0 sps:$4 sm:$0x11]   ;;  %v1033_v42 = vsel %vm11938_vm3, %v832_v23, %v1032_v17 }
  0x7d   : > { %v1406_v34 = vor.u32 %v1405_v16, %v1401_v8  ;;  %1031 = vst.msk [vmem:[#allocation2 + $0x94] sm:$0xf] %vm388_vm0, %v831_v32  ;;  %v10678_v47 = vcombine.low %v1130_v24, %v1090_v31  ;;  %445 = vst [vmem:[#allocation2 + $0xb4] sm:$0x1] %v444_v59  ;;  %v494_v48 = vsel %vm11949_vm7, 0, %v493_v37  ;;  %v868_v55 = vshrl.u32 %v12287_v10, 16 }
  0x7e   : > { %1034 = vst [vmem:[#allocation2 + $0x98] sm:$0x1] %v1033_v42  ;;  %v871_v7 = vshll.u32 %v12287_v10, 16  ;;  %v876_v61 = vshrl.u32 %v12307_v51, 16  ;;  %v490_v36 = vld [vmem:[#allocation2 + $0xb0] sm:$0x1]  ;;  %v12356_v24 = vpack.c.bf16 %v529_v57, %v529_v57 }
  0x7f   : > { %v1411_v49 = vsel %vm1279_vm11, %v1406_v34, %v1410_v27  ;;  %v1437_v46 = vshrl.u32 %v12329_v38, 16  ;;  %v1439_v52 = vshll.u32 %v12329_v38, 16  ;;  %v1444_v53 = vshll.u32 %v11656_v40, 16  ;;  %495 = vst [vmem:[#allocation2 + $0xbc] sm:$0x1] %v494_v48  ;;  %1663 = vrot.lane.b32.xlu1 %v1622_v63, %s11858_s23  ;;  %v530_v37 = vld [vmem:[%s11987_s22 + $0xf8] sm:$0xff] }
  0x80   : > { %1516 = vrot.lane.b32.xlu0 %v1411_v49, %s11859_s24  ;;  %v1626_v58 = vrot.slane %v10678_v47, 1  ;;  %v1627_v62 = vrot.slane %v11656_v40, 1  ;;  %v870_v10 = vrot.slane %v868_v55, 7  ;;  %v878_v4 = vrot.slane %v876_v61, 7  ;;  %v496_v49 = vld [vmem:[#allocation2 + $0xc8] sm:$0x1] }
  0x81   : > { %v1441_v5 = vrot.slane %v1439_v52, 1  ;;  %v1446_v9 = vrot.slane %v1444_v53, 1  ;;  %v879_v43 = vshll.u32 %v12307_v51, 16  ;;  %v441_v8 = vsel %vm11938_vm3, 0, %v440_v33  ;;  %v11665_v33 = vld [vmem:[%s16771_s1] sm:$0x3f]  }
  0x82   : > { %v873_v35 = vor.u32 %v871_v7, %v870_v10  ;;  %v874_v15 = vrot.slane %v870_v10, 4  ;;  %v883_v17 = vrot.slane %v878_v4, 4  ;;  %442 = vst [vmem:[#allocation2 + $0xa8] sm:$0x1] %v441_v8  ;;  %v491_v21 = vsel %vm11949_vm7, 0, %v490_v36 }
  0x83   : > { %v1442_v20 = vor.u32 %v1441_v5, %v1437_v46  ;;  %v1087_v11 = vld [vmem:[#allocation2 + $0x90] sm:$0xf]  ;;  %v881_v63 = vor.u32 %v879_v43, %v878_v4  ;;  %v851_v22 = vshrl.u32 %v12311_v60, 16  ;;  %v1628_v44 = vsel %vm1586_vm9, %v1626_v58, %v1627_v62  ;;  %492 = vst [vmem:[#allocation2 + $0xb0] sm:$0x1] %v491_v21 }
  0x84   : > { %v1129_v6 = vld [vmem:[#allocation2 + $0x90] sm:$0xe]  ;;  %1661 = vrot.lane.b32.xlu0 %v1619_v28, %s11858_s23  ;;  %v1088_v51 = vld [vmem:[#allocation2 + $0x94] sm:$0xf]  ;;  %v854_v23 = vshll.u32 %v12311_v60, 16  ;;  %v859_v14 = vshrl.u32 %v12318_v19, 16  ;;  %v11329_v46 = vpack.c.bf16 %v530_v37, %v530_v37 }
  0x85   : > { %v1049_v16 = vld [vmem:[#allocation2 + $0xb4] sm:$0xf]  ;;  %v1447_v27 = vsel %vm1279_vm11, %v1442_v20, %v1446_v9  ;;  %v12359_v31 = vcombine.low %v1087_v11, %v1088_v51  ;;  %v11658_v32 = vld [vmem:[#allocation2 + $0x98] ss:$0 sps:$4 sm:$0x11]   ;;  %v10677_v59 = vcombine.low %v1129_v6, %v1088_v51  ;;  %v882_v28 = vsel %vm12015_vm12, %v874_v15, %v881_v63 }
  0x86   : > { %v11670_v60 = vld [vmem:[%s16771_s1 + $0x8] sm:$0x3f]   ;;  %1522 = vrot.lane.b32.xlu1 %v1447_v27, %s11859_s24  ;;  %v1050_v34 = vsel %vm12009_vm10, %v873_v35, %v1049_v16  ;;  %1052 = vst.msk [vmem:[#allocation2 + $0xb8] sm:$0xf] %vm388_vm0, %v882_v28  ;;  %v1053_v40 = vld [vmem:[#allocation2 + $0xbc] sm:$0x1] }
  0x87   : > { %v853_v42 = vrot.slane %v851_v22, 7  ;;  %v861_v47 = vrot.slane %v859_v14, 7  ;;  %v862_v48 = vshll.u32 %v12318_v19, 16  ;;  %v1425_v55 = vshrl.u32 %v12359_v31, 16  ;;  %1051 = vst [vmem:[#allocation2 + $0xb4] sm:$0xf] %v1050_v34 }
  0x88   : > { %v1427_v7 = vshll.u32 %v12359_v31, 16  ;;  %v1432_v61 = vshll.u32 %v11658_v32, 16  ;;  %v446_v36 = vld [vmem:[#allocation2 + $0xc0] sm:$0x1]  ;;  %v1623_v52 = vrot.slane %v10677_v59, 1  ;;  %v1054_v53 = vsel %vm11938_vm3, %v883_v17, %v1053_v40 }
  0x89   : > { %v856_v57 = vor.u32 %v854_v23, %v853_v42  ;;  %v857_v58 = vrot.slane %v853_v42, 4  ;;  %1055 = vst [vmem:[#allocation2 + $0xbc] sm:$0x1] %v1054_v53  ;;  %v864_v4 = vor.u32 %v862_v48, %v861_v47  ;;  %v866_v19 = vrot.slane %v861_v47, 4  ;;  %v1042_v5 = vld [vmem:[#allocation2 + $0xa8] sm:$0xf] }
  0x8a   : > { %v1429_v62 = vrot.slane %v1427_v7, 1  ;;  %v1434_v10 = vrot.slane %v1432_v61, 1  ;;  %1667 = vrot.lane.b32.xlu1 %v1628_v44, %s11858_s23  ;;  %v1624_v9 = vrot.slane %v11658_v32, 1  ;;  %vm1794_vm13 = vcmask 1045504   ;;  %v1046_v15 = vld [vmem:[#allocation2 + $0xb0] sm:$0x1] }
  0x8b   : > { %v1043_v43 = vsel %vm12009_vm10, %v856_v57, %v1042_v5  ;;  %v865_v35 = vsel %vm12015_vm12, %v857_v58, %v864_v4  ;;  %11598 = vmatprep.subr.msk.bf16.mxu0 %vm1794_vm13, %v11665_v33  ;;  %v1967_v17 = vsel %vm1794_vm13, %v11665_v33, 0  ;;  %v1097_v37 = vld [vmem:[#allocation2 + $0xcc] sm:$0xf]  ;;  %v12385_v20 = vld [vmem:[#allocation2 + $0xd4] ss:$0 sps:$4 sm:$0x11]   ;;  %11597 = vmatprep.subr.msk.bf16.mxu1 %vm1794_vm13, %v11670_v60  ;;  %v1047_v11 = vsel %vm11938_vm3, %v866_v19, %v1046_v15 }
  0x8c   : > { %v1430_v8 = vor.u32 %v1429_v62, %v1425_v55  ;;  %1044 = vst [vmem:[#allocation2 + $0xa8] sm:$0xf] %v1043_v43  ;;  %1045 = vst.msk [vmem:[#allocation2 + $0xac] sm:$0xf] %vm388_vm0, %v865_v35  ;;  %11466 = vmatpush3.bf16.msra.mxu0 %v1967_v17  ;;  %v447_v6 = vsel %vm11938_vm3, 0, %v446_v36  ;;  %v497_v63 = vsel %vm11949_vm7, 0, %v496_v49  ;;  %v1625_v14 = vsel %vm1586_vm9, %v1623_v52, %v1624_v9 }
  0x8d   : > { %v885_v21 = vshrl.u32 %v12356_v24, 16  ;;  %v1094_v51 = vld [vmem:[#allocation2 + $0xb8] sm:$0xf]  ;;  %1048 = vst [vmem:[#allocation2 + $0xb0] sm:$0x1] %v1047_v11  ;;  %v893_v44 = vshrl.u32 %v11329_v46, 16 }
  0x8e   : > { %v1435_v22 = vsel %vm1279_vm11, %v1430_v8, %v1434_v10  ;;  %448 = vst [vmem:[#allocation2 + $0xc0] sm:$0x1] %v447_v6  ;;  %498 = vst [vmem:[#allocation2 + $0xc8] sm:$0x1] %v497_v63  ;;  %v896_v16 = vshll.u32 %v11329_v46, 16  ;;  %v888_v59 = vshll.u32 %v12356_v24, 16 }
  0x8f   : > { %v12397_v23 = vld [vmem:[#allocation2 + $0xd0] sm:$0xf]  ;;  %1520 = vrot.lane.b32.xlu0 %v1435_v22, %s11859_s24  ;;  %v1093_v27 = vld [vmem:[#allocation2 + $0xb4] sm:$0xf]  ;;  %v887_v2 = vrot.slane %v885_v21, 7  ;;  %v895_v34 = vrot.slane %v893_v44, 7 }
  0x90   : > { %v1132_v32 = vld [vmem:[#allocation2 + $0xb4] sm:$0xe]  ;;  %v12402_v28 = vcombine.low %v1093_v27, %v1094_v51  ;;  %v1796_v40 = vsel %vm1794_vm13, %v11670_v60, 0  ;;  %v11661_v42 = vld [vmem:[#allocation2 + $0xbc] ss:$0 sps:$4 sm:$0x11]   ;;  %v12406_v48 = vcombine.low %v1097_v37, %v12397_v23 }
  0x91   : > { %v10680_v33 = vcombine.low %v1132_v32, %v1094_v51  ;;  %v891_v47 = vrot.slane %v887_v2, 4  ;;  %11432 = vmatpush3.bf16.msra.mxu1 %v1796_v40  ;;  %v1134_v55 = vld [vmem:[#allocation2 + $0xcc] sm:$0xe]  ;;  %v898_v36 = vor.u32 %v896_v16, %v895_v34  ;;  %v1492_v24 = vshll.u32 %v12385_v20, 16 }
  0x92   : > { %v1461_v7 = vshrl.u32 %v12402_v28, 16  ;;  %v1463_v61 = vshll.u32 %v12402_v28, 16  ;;  %3846 = vmatprep.subr.bf16.mxu1 %v16782_v0  ;;  %v1468_v49 = vshll.u32 %v11661_v42, 16  ;;  %v890_v53 = vor.u32 %v888_v59, %v887_v2 }
  0x93   : > { %1665 = vrot.lane.b32.xlu0 %v1625_v14, %s11858_s23  ;;  %v1091_v60 = vld [vmem:[#allocation2 + $0xa8] sm:$0xf]  ;;  %v1632_v46 = vrot.slane %v10680_v33, 1  ;;  %v1092_v58 = vld [vmem:[#allocation2 + $0xac] sm:$0xf]  ;;  %v1633_v62 = vrot.slane %v11661_v42, 1  ;;  %v899_v10 = vsel %vm12015_vm12, %v891_v47, %v898_v36  ;;  %v10682_v11 = vcombine.low %v1134_v55, %v12397_v23  ;;  %v1642_v36 = vpop.permute.xlu1 %1641 }
  0x94   : > { %v1131_v52 = vld [vmem:[#allocation2 + $0xa8] sm:$0xe]  ;;  %v1465_v57 = vrot.slane %v1463_v61, 1  ;;  %v900_v4 = vrot.slane %v895_v34, 4  ;;  %v1470_v19 = vrot.slane %v1468_v49, 1  ;;  %v12415_v5 = vcombine.low %v1091_v60, %v1092_v58 }
  0x95   : > { %v11663_v9 = vld [vmem:[#allocation2 + $0xb0] ss:$0 sps:$4 sm:$0x11]   ;;  %v10679_v43 = vcombine.low %v1131_v52, %v1092_v58  ;;  %vm1677_vm14 = vcmask 31744   ;;  %1059 = vst.msk [vmem:[#allocation2 + $0xc4] sm:$0xf] %vm388_vm0, %v899_v10  ;;  %v1634_v33 = vsel %vm1586_vm9, %v1632_v46, %v1633_v62  ;;  %vm12588_vm0 = vmand %vm2410_vm6, %vm449_vm4 }
  0x96   : > { %v1466_v8 = vor.u32 %v1465_v57, %v1461_v7  ;;  %vm1714_vm15 = vcmask 64512   ;;  %v1056_v35 = vld [vmem:[#allocation2 + $0xc0] sm:$0xf]  ;;  %v1060_v15 = vld [vmem:[#allocation2 + $0xc8] sm:$0x1]  ;;  %v1485_v17 = vshrl.u32 %v12406_v48, 16 }
  0x97   : > { %v1487_v37 = vshll.u32 %v12406_v48, 16  ;;  %v1449_v6 = vshrl.u32 %v12415_v5, 16  ;;  %v1451_v63 = vshll.u32 %v12415_v5, 16  ;;  %v1456_v21 = vshll.u32 %v11663_v9, 16  ;;  %v11673_v23 = vld [vmem:[%s16771_s1 + $0x10] sm:$0x3f]   ;;  %v1497_v61 = vpop.permute.xlu0 %1496 }
  0x98   : > { %vm1761_vm1 = vcmask 97280   ;;  %v1494_v22 = vrot.slane %v1492_v24, 1  ;;  %v1471_v51 = vsel %vm1279_vm11, %v1466_v8, %v1470_v19  ;;  %v1629_v44 = vrot.slane %v10679_v43, 1  ;;  %11599 = vmatprep.subr.msk.bf16.mxu0 %vm1794_vm13, %v11673_v23 }
  0x99   : > { %v1057_v16 = vsel %vm12009_vm10, %v890_v53, %v1056_v35  ;;  %v1061_v14 = vsel %vm11938_vm3, %v900_v4, %v1060_v15  ;;  %1526 = vrot.lane.b32.xlu1 %v1471_v51, %s11859_s24  ;;  %v1453_v27 = vrot.slane %v1451_v63, 1  ;;  %v1458_v32 = vrot.slane %v1456_v21, 1  ;;  %vm12594_vm3 = vmand %vm2410_vm6, %vm399_vm2 }
  0x9a   : > { %v1630_v2 = vrot.slane %v11663_v9, 1  ;;  %1058 = vst [vmem:[#allocation2 + $0xc0] sm:$0xf] %v1057_v16  ;;  %1062 = vst [vmem:[#allocation2 + $0xc8] sm:$0x1] %v1061_v14  ;;  %v1489_v59 = vrot.slane %v1487_v37, 1 }
  0x9b   : > { %v1638_v34 = vrot.slane %v10682_v11, 1  ;;  %v1639_v50 = vrot.slane %v12385_v20, 1  ;;  %v1454_v1 = vor.u32 %v1453_v27, %v1449_v6  ;;  %v1679_v20 = vsel %vm1677_vm14, %v11992_v25, %v1497_v61  ;;  %vm12772_vm6 = vmand %vm2407_vm5, %vm449_vm4 }
  0x9c   : > { %v1490_v40 = vor.u32 %v1489_v59, %v1485_v17  ;;  %v1096_v42 = vld [vmem:[#allocation2 + $0xc4] sm:$0xf]  ;;  %v1631_v7 = vsel %vm1586_vm9, %v1629_v44, %v1630_v2  ;;  %v1716_v60 = vsel %vm1714_vm15, %v1679_v20, %v1642_v36  ;;  %v2141_v10 = vsel %vm1794_vm13, %v11673_v23, 0 }
  0x9d   : > { %v1459_v47 = vsel %vm1279_vm11, %v1454_v1, %v1458_v32  ;;  %1671 = vrot.lane.b32.xlu1 %v1634_v33, %s11858_s23  ;;  %11467 = vmatprep.mubr.msk.bf16.mxu0 %vm1761_vm1, %v1716_v60  ;;  %v1640_v57 = vsel %vm1586_vm9, %v1638_v34, %v1639_v50  ;;  %vm3622_vm4 = vcmask 523264   ;;  %vm5444_vm7 = vcmask 1041409  }
  0x9e   : > { %1524 = vrot.lane.b32.xlu0 %v1459_v47, %s11859_s24  ;;  %v1495_v55 = vsel %vm1279_vm11, %v1490_v40, %v1494_v22  ;;  %vm5447_vm8 = vcmask 1042434   ;;  %vm5450_vm10 = vcmask 1043459   ;;  %vm5453_vm13 = vcmask 1044484  }
  0xa1   : > { %v1095_v24 = vld [vmem:[#allocation2 + $0xc0] sm:$0xf]  ;;  %v11667_v52 = vld [vmem:[#allocation2 + $0xc8] ss:$0 sps:$4 sm:$0x11]   ;;  %1530 = vrot.lane.b32.xlu1 %v1495_v55, %s11859_s24 }
  0xa2   : > { %v1133_v49 = vld [vmem:[#allocation2 + $0xc0] sm:$0xe]  ;;  %v12443_v46 = vcombine.low %v1095_v24, %v1096_v42  ;;  %1669 = vrot.lane.b32.xlu0 %v1631_v7, %s11858_s23  ;;  %v1480_v62 = vshll.u32 %v11667_v52, 16  ;;  %v1636_v19 = vrot.slane %v11667_v52, 1 }
  0xa3   : > { %v10681_v53 = vcombine.low %v1133_v49, %v1096_v42 }
  0xa4   : > { %v1473_v58 = vshrl.u32 %v12443_v46, 16  ;;  %v1475_v25 = vshll.u32 %v12443_v46, 16  ;;  %v1482_v43 = vrot.slane %v1480_v62, 1 }
  0xa5   : > { %v1635_v4 = vrot.slane %v10681_v53, 1  ;;  %1675 = vrot.lane.b32.xlu1 %v1640_v57, %s11858_s23 }
  0xa6   : > { %v1477_v9 = vrot.slane %v1475_v25, 1  ;;  %v1644_v17 = vpop.permute.xlu1 %1643 }
  0xa7   : > { %v1637_v15 = vsel %vm1586_vm9, %v1635_v4, %v1636_v19 }
  0xa8   : > { %v1478_v8 = vor.u32 %v1477_v9, %v1473_v58 }
  0xaa   : > { %v1483_v35 = vsel %vm1279_vm11, %v1478_v8, %v1482_v43 }
  0xab   : > { %1528 = vrot.lane.b32.xlu0 %v1483_v35, %s11859_s24  ;;  %v1499_v37 = vpop.permute.xlu0 %1498 }
  0xac   : > { %v1681_v11 = vsel %vm1677_vm14, %v12055_v3, %v1499_v37 }
  0xad   : > { %v1718_v6 = vsel %vm1714_vm15, %v1681_v11, %v1644_v17 }
  0xae   : > { %11433 = vmatprep.mubr.msk.bf16.mxu1 %vm1761_vm1, %v1718_v6  ;;  %11468 = vmatmul.mubr.msk.bf16.vlgmr.msra.gmra.mrb[0].mxu0 %vm1761_vm1, %v1718_v6  ;;  %v1503_v63 = vpop.permute.xlu1 %1502 }
  0xaf   : > { %1673 = vrot.lane.b32.xlu0 %v1637_v15, %s11858_s23  ;;  %11500 = vmatpush3.bf16.msra.mxu0 %v2141_v10  ;;  %v1685_v22 = vsel %vm1677_vm14, %v12068_v26, %v1503_v63 }
  0xb0   : > { %4343 = vmatprep.subr.bf16.mxu0 %v16782_v0 }
  0xb2   : > { %v1501_v21 = vpop.permute.xlu0 %1500  ;;  %v1648_v51 = vpop.permute.xlu1 %1647 }
  0xb3   : > { %v1683_v44 = vsel %vm1677_vm14, %v12080_v41, %v1501_v21  ;;  %v12471_v14 = vsel %vm1714_vm15, %v1685_v22, %v1648_v51  ;;  %v11706_v51 = vld [vmem:[%s16773_s3 + $0xc0] sm:$0xff]  }
  0xb6   : > { %v1646_v16 = vpop.permute.xlu0 %1645 }
  0xb7   : > { %v12468_v3 = vsel %vm1714_vm15, %v1683_v44, %v1646_v16  ;;  %v1507_v26 = vpop.permute.xlu1 %1506  ;;  %v16900_v44 = vmov 0  ;;  %v2422_v16 = vld [vmem:[#allocation3 + $0x18] sm:$0x1] }
  0xb8   : > { %11434 = vmatmul.mubr.msk.bf16.vlgmr.msra.gmra.mrb[0].mxu1 %vm1761_vm1, %v12468_v3  ;;  %11471 = vmatprep.mubr.msk.bf16.mxu0 %vm1761_vm1, %v12468_v3  ;;  %v1689_v27 = vsel %vm1677_vm14, %v12096_v13, %v1507_v26  ;;  %v16901_v44 = vsel %vm12594_vm3, 4294967295, %v16900_v44  ;;  %v2471_v26 = vld [vmem:[#allocation3 + $0x20] sm:$0x1] }
  0xb9   : > { %11437 = vmatprep.mubr.msk.bf16.mxu1 %vm1761_vm1, %v12471_v14  ;;  %11472 = vmatmul.mubr.msk.bf16.gmra.mrb[4].mxu0 %vm1761_vm1, %v12471_v14  ;;  %16902 = vst [vmem:[#allocation5_spill] sm:$0xff] %v16901_v44 }
  0xbb   : > { %v1652_v23 = vpop.permute.xlu1 %1651 }
  0xbc   : > { %v12489_v33 = vsel %vm1714_vm15, %v1689_v27, %v1652_v23  ;;  %v2468_v23 = vld [vmem:[#allocation3 + $0x14] sm:$0x1] }
  0xbd   : > { %v2469_v27 = vsel %vm12588_vm0, 0, %v2468_v23 }
  0xbe   : > { %2470 = vst [vmem:[#allocation3 + $0x14] sm:$0x1] %v2469_v27  ;;  %v2455_v27 = vld [vmem:[#allocation3 + $0x9c] sm:$0x1] }
  0xc7   : > { %v1505_v41 = vpop.permute.xlu0 %1504 }
  0xc8   : > { %v1687_v32 = vsel %vm1677_vm14, %v12152_v39, %v1505_v41  ;;  %v2472_v41 = vsel %vm12588_vm0, 0, %v2471_v26  ;;  %v2458_v26 = vld [vmem:[#allocation3 + $0xa8] sm:$0x1] }
  0xc9   : > { %2473 = vst [vmem:[#allocation3 + $0x20] sm:$0x1] %v2472_v41  ;;  %v2459_v41 = vsel %vm12594_vm3, 0, %v2458_v26 }
  0xca   : > { %2460 = vst [vmem:[#allocation3 + $0xa8] sm:$0x1] %v2459_v41 }
  0xcb   : > { %v1650_v2 = vpop.permute.xlu0 %1649 }
  0xcc   : > { %v12486_v59 = vsel %vm1714_vm15, %v1687_v32, %v1650_v2  ;;  %v2428_v32 = vld [vmem:[#allocation3 + $0x30] sm:$0x1] }
  0xcd   : > { %11438 = vmatmul.mubr.msk.bf16.gmra.mrb[4].mxu1 %vm1761_vm1, %v12486_v59  ;;  %11475 = vmatprep.mubr.msk.bf16.mxu0 %vm1761_vm1, %v12486_v59  ;;  %v1511_v34 = vpop.permute.xlu1 %1510  ;;  %v2429_v2 = vsel %vm12594_vm3, 0, %v2428_v32 }
  0xce   : > { %11441 = vmatprep.mubr.msk.bf16.mxu1 %vm1761_vm1, %v12489_v33  ;;  %11476 = vmatmul.mubr.msk.bf16.gmra.mrb[8].mxu0 %vm1761_vm1, %v12489_v33  ;;  %v1693_v39 = vsel %vm1677_vm14, %v12171_v12, %v1511_v34  ;;  %2430 = vst [vmem:[#allocation3 + $0x30] sm:$0x1] %v2429_v2  ;;  %v2477_v34 = vld [vmem:[#allocation3 + $0x38] sm:$0x1]  ;;  %v2456_v2 = vsel %vm12594_vm3, 0, %v2455_v27 }
  0xcf   : > { %2457 = vst [vmem:[#allocation3 + $0x9c] sm:$0x1] %v2456_v2 }
  0xd1   : > { %v1656_v50 = vpop.permute.xlu1 %1655 }
  0xd2   : > { %v1509_v13 = vpop.permute.xlu0 %1508  ;;  %v12507_v47 = vsel %vm1714_vm15, %v1693_v39, %v1656_v50  ;;  %v2474_v39 = vld [vmem:[#allocation3 + $0x2c] sm:$0x1] }
  0xd3   : > { %v1691_v1 = vsel %vm1677_vm14, %v12193_v45, %v1509_v13  ;;  %v2478_v13 = vsel %vm12588_vm0, 0, %v2477_v34  ;;  %v2475_v50 = vsel %vm12588_vm0, 0, %v2474_v39 }
  0xd4   : > { %2479 = vst [vmem:[#allocation3 + $0x38] sm:$0x1] %v2478_v13  ;;  %2476 = vst [vmem:[#allocation3 + $0x2c] sm:$0x1] %v2475_v50 }
  0xd6   : > { %v1654_v40 = vpop.permute.xlu0 %1653  ;;  %v1515_v12 = vpop.permute.xlu1 %1514 }
  0xd7   : > { %v12504_v42 = vsel %vm1714_vm15, %v1691_v1, %v1654_v40  ;;  %v1697_v55 = vsel %vm1677_vm14, %v12215_v18, %v1515_v12  ;;  %v2434_v1 = vld [vmem:[#allocation3 + $0x48] sm:$0x1] }
  0xd8   : > { %11442 = vmatmul.mubr.msk.bf16.gmra.mrb[8].mxu1 %vm1761_vm1, %v12504_v42  ;;  %11479 = vmatprep.mubr.msk.bf16.mxu0 %vm1761_vm1, %v12504_v42  ;;  %v2435_v40 = vsel %vm12594_vm3, 0, %v2434_v1  ;;  %v2464_v1 = vld [vmem:[#allocation3 + $0xc0] sm:$0x1] }
  0xd9   : > { %11445 = vmatprep.mubr.msk.bf16.mxu1 %vm1761_vm1, %v12507_v47  ;;  %11480 = vmatmul.mubr.msk.bf16.gmra.mrb[12].mxu0 %vm1761_vm1, %v12507_v47  ;;  %2436 = vst [vmem:[#allocation3 + $0x48] sm:$0x1] %v2435_v40  ;;  %v2465_v40 = vsel %vm12594_vm3, 0, %v2464_v1 }
  0xda   : > { %v1660_v7 = vpop.permute.xlu1 %1659  ;;  %2466 = vst [vmem:[#allocation3 + $0xc0] sm:$0x1] %v2465_v40 }
  0xdb   : > { %v1734_v24 = vsel %vm1714_vm15, %v1697_v55, %v1660_v7 }
  0xe4   : > { %v1513_v45 = vpop.permute.xlu0 %1512 }
  0xe5   : > { %v1695_v61 = vsel %vm1677_vm14, %v12262_v30, %v1513_v45  ;;  %v2483_v45 = vld [vmem:[#allocation3 + $0x50] sm:$0x1] }
  0xe6   : > { %v2484_v7 = vsel %vm12588_vm0, 0, %v2483_v45 }
  0xe7   : > { %2485 = vst [vmem:[#allocation3 + $0x50] sm:$0x1] %v2484_v7 }
  0xe8   : > { %v1658_v36 = vpop.permute.xlu0 %1657 }
  0xe9   : > { %v1732_v20 = vsel %vm1714_vm15, %v1695_v61, %v1658_v36  ;;  %v2480_v61 = vld [vmem:[#allocation3 + $0x44] sm:$0x1] }
  0xea   : > { %11446 = vmatmul.mubr.msk.bf16.gmra.mrb[12].mxu1 %vm1761_vm1, %v1732_v20  ;;  %11483 = vmatprep.mubr.msk.bf16.mxu0 %vm1761_vm1, %v1732_v20 }
  0xeb   : > { %11449 = vmatprep.mubr.msk.bf16.mxu1 %vm1761_vm1, %v1734_v24  ;;  %11484 = vmatmul.mubr.msk.bf16.gmra.mrb[16].mxu0 %vm1761_vm1, %v1734_v24 }
  0xed   : > { %v1519_v49 = vpop.permute.xlu1 %1518 }
  0xee   : > { %v1701_v18 = vsel %vm1677_vm14, %v12294_v54, %v1519_v49  ;;  %v2440_v49 = vld [vmem:[#allocation3 + $0x60] sm:$0x1] }
  0xf1   : > { %v1664_v52 = vpop.permute.xlu1 %1663 }
  0xf2   : > { %v1517_v60 = vpop.permute.xlu0 %1516  ;;  %v1738_v58 = vsel %vm1714_vm15, %v1701_v18, %v1664_v52  ;;  %v2437_v18 = vld [vmem:[#allocation3 + $0x54] sm:$0x1] }
  0xf3   : > { %v1699_v30 = vsel %vm1677_vm14, %v12309_v29, %v1517_v60  ;;  %v2441_v60 = vsel %vm12594_vm3, 0, %v2440_v49  ;;  %v2438_v52 = vsel %vm12594_vm3, 0, %v2437_v18  ;;  %v2510_v18 = vld [vmem:[#allocation3 + $0xbc] sm:$0x1] }
  0xf4   : > { %2442 = vst [vmem:[#allocation3 + $0x60] sm:$0x1] %v2441_v60  ;;  %2439 = vst [vmem:[#allocation3 + $0x54] sm:$0x1] %v2438_v52  ;;  %v2511_v52 = vsel %vm12588_vm0, 0, %v2510_v18 }
  0xf5   : > { %2512 = vst [vmem:[#allocation3 + $0xbc] sm:$0x1] %v2511_v52 }
  0xf6   : > { %v1662_v53 = vpop.permute.xlu0 %1661 }
  0xf7   : > { %v1736_v57 = vsel %vm1714_vm15, %v1699_v30, %v1662_v53  ;;  %v2489_v30 = vld [vmem:[#allocation3 + $0x68] sm:$0x1] }
  0xf8   : > { %11450 = vmatmul.mubr.msk.bf16.gmra.mrb[16].mxu1 %vm1761_vm1, %v1736_v57  ;;  %11487 = vmatprep.mubr.msk.bf16.mxu0 %vm1761_vm1, %v1736_v57  ;;  %v1523_v25 = vpop.permute.xlu1 %1522  ;;  %v2490_v53 = vsel %vm12588_vm0, 0, %v2489_v30 }
  0xf9   : > { %11453 = vmatprep.mubr.msk.bf16.mxu1 %vm1761_vm1, %v1738_v58  ;;  %11488 = vmatmul.mubr.msk.bf16.gmra.mrb[20].mxu0 %vm1761_vm1, %v1738_v58  ;;  %v1705_v54 = vsel %vm1677_vm14, %v12329_v38, %v1523_v25  ;;  %2491 = vst [vmem:[#allocation3 + $0x68] sm:$0x1] %v2490_v53 }
  0xfc   : > { %v1668_v10 = vpop.permute.xlu1 %1667 }
  0xfd   : > { %v1742_v9 = vsel %vm1714_vm15, %v1705_v54, %v1668_v10 }
 0x101   : > { %v1521_v62 = vpop.permute.xlu0 %1520 }
 0x102   : > { %v1703_v29 = vsel %vm1677_vm14, %v12359_v31, %v1521_v62  ;;  %v2446_v62 = vld [vmem:[#allocation3 + $0x78] sm:$0x1] }
 0x103   : > { %v2447_v10 = vsel %vm12594_vm3, 0, %v2446_v62 }
 0x104   : > { %2448 = vst [vmem:[#allocation3 + $0x78] sm:$0x1] %v2447_v10  ;;  %v12721_v10 = vld [vmem:[%s16772_s2] ss:$0 sm:$0xff] }
 0x105   : > { %v1666_v4 = vpop.permute.xlu0 %1665 }
 0x106   : > { %v1740_v19 = vsel %vm1714_vm15, %v1703_v29, %v1666_v4 }
 0x107   : > { %11454 = vmatmul.mubr.msk.bf16.gmra.mrb[20].mxu1 %vm1761_vm1, %v1740_v19  ;;  %11491 = vmatprep.mubr.msk.bf16.mxu0 %vm1761_vm1, %v1740_v19 }
 0x108   : > { %11457 = vmatprep.mubr.msk.bf16.mxu1 %vm1761_vm1, %v1742_v9  ;;  %11492 = vmatmul.mubr.msk.bf16.gmra.mrb[24].mxu0 %vm1761_vm1, %v1742_v9 }
 0x10b   : > { %v1527_v43 = vpop.permute.xlu1 %1526 }
 0x10c   : > { %v1709_v38 = vsel %vm1677_vm14, %v12402_v28, %v1527_v43  ;;  %v2495_v43 = vld [vmem:[#allocation3 + $0x80] sm:$0x1] }
 0x10f   : > { %v1672_v35 = vpop.permute.xlu1 %1671 }
 0x110   : > { %v1525_v8 = vpop.permute.xlu0 %1524  ;;  %v1746_v37 = vsel %vm1714_vm15, %v1709_v38, %v1672_v35 }
 0x111   : > { %v1707_v31 = vsel %vm1677_vm14, %v12415_v5, %v1525_v8  ;;  %v2496_v8 = vsel %vm12588_vm0, 0, %v2495_v43  ;;  %v11707_v43 = vld [vmem:[%s16773_s3 + $0x60] sm:$0xff]  }
 0x112   : > { %2497 = vst [vmem:[#allocation3 + $0x80] sm:$0x1] %v2496_v8  ;;  %3847 = vmatpush1.bf16.msra.mxu1 %v11707_v43 }
 0x113   : > { %3848 = vmatprep.subr.bf16.mxu1 %v16782_v0 }
 0x114   : > { %v1670_v15 = vpop.permute.xlu0 %1669 }
 0x115   : > { %v1744_v17 = vsel %vm1714_vm15, %v1707_v31, %v1670_v15  ;;  %v2492_v15 = vld [vmem:[#allocation3 + $0x74] sm:$0x1] }
 0x116   : > { %11458 = vmatmul.mubr.msk.bf16.gmra.mrb[24].mxu1 %vm1761_vm1, %v1744_v17  ;;  %11495 = vmatprep.mubr.msk.bf16.mxu0 %vm1761_vm1, %v1744_v17 }
 0x117   : > { %11461 = vmatprep.mubr.msk.bf16.mxu1 %vm1761_vm1, %v1746_v37  ;;  %11496 = vmatmul.mubr.msk.bf16.gmra.mrb[28].mxu0 %vm1761_vm1, %v1746_v37 }
 0x118   : > { %11501 = vmatprep.mubr.msk.bf16.mxu0 %vm1761_vm1, %v12468_v3  ;;  %v2419_v3 = vld [vmem:[#allocation3 + $0xc] sm:$0x1] }
 0x11d   : > { %v1529_v28 = vpop.permute.xlu0 %1528 }
 0x11e   : > { %v1711_v5 = vsel %vm1677_vm14, %v12443_v46, %v1529_v28  ;;  %v1531_v46 = vpop.permute.xlu1 %1530  ;;  %v2452_v28 = vld [vmem:[#allocation3 + $0x90] sm:$0x1] }
 0x11f   : > { %11502 = vmatmul.mubr.msk.bf16.vlgmr.msra.gmra.mrb[0].mxu0 %vm1761_vm1, %v12471_v14  ;;  %v1713_v63 = vsel %vm1677_vm14, %v12406_v48, %v1531_v46  ;;  %v2423_v48 = vsel %vm12594_vm3, 0, %v2422_v16  ;;  %v2420_v14 = vsel %vm12594_vm3, 0, %v2419_v3  ;;  %v2501_v46 = vld [vmem:[#allocation3 + $0x98] sm:$0x1]  ;;  %vm5456_vm14 = vcmask 1045509  }
 0x120   : > { %11505 = vmatprep.mubr.msk.bf16.mxu0 %vm1761_vm1, %v12486_v59  ;;  %2424 = vst [vmem:[#allocation3 + $0x18] sm:$0x1] %v2423_v48  ;;  %2421 = vst [vmem:[#allocation3 + $0xc] sm:$0x1] %v2420_v14  ;;  %v2425_v59 = vld [vmem:[#allocation3 + $0x24] sm:$0x1]  ;;  %4344 = vmatpush1.bf16.msra.mxu0 %v11706_v51 }
 0x121   : > { %v1674_v11 = vpop.permute.xlu0 %1673  ;;  %4345 = vmatprep.subr.bf16.mxu0 %v16782_v0 }
 0x122   : > { %v1748_v6 = vsel %vm1714_vm15, %v1711_v5, %v1674_v11  ;;  %v1676_v21 = vpop.permute.xlu1 %1675  ;;  %v2453_v5 = vsel %vm12594_vm3, 0, %v2452_v28  ;;  %v2449_v11 = vld [vmem:[#allocation3 + $0x84] sm:$0x1] }
 0x123   : > { %11462 = vmatmul.mubr.msk.bf16.gmra.mrb[28].mxu1 %vm1761_vm1, %v1748_v6  ;;  %v1750_v22 = vsel %vm1714_vm15, %v1713_v63, %v1676_v21  ;;  %2454 = vst [vmem:[#allocation3 + $0x90] sm:$0x1] %v2453_v5  ;;  %v2502_v63 = vsel %vm12588_vm0, 0, %v2501_v46  ;;  %v2498_v21 = vld [vmem:[#allocation3 + $0x8c] sm:$0x1]  ;;  %vm5459_vm15 = vcmask 1046534  }
 0x124   : > { %2503 = vst [vmem:[#allocation3 + $0x98] sm:$0x1] %v2502_v63  ;;  %v2499_v16 = vsel %vm12588_vm0, 0, %v2498_v21 }
 0x125   : > { %2500 = vst [vmem:[#allocation3 + $0x8c] sm:$0x1] %v2499_v16 }
 0x127   : > { %11506 = vmatmul.mubr.msk.bf16.gmra.mrb[4].mxu0 %vm1761_vm1, %v12489_v33  ;;  %v2426_v33 = vsel %vm12594_vm3, 0, %v2425_v59  ;;  %v2507_v59 = vld [vmem:[#allocation3 + $0xb0] sm:$0x1] }
 0x128   : > { %11509 = vmatprep.mubr.msk.bf16.mxu0 %vm1761_vm1, %v12504_v42  ;;  %2427 = vst [vmem:[#allocation3 + $0x24] sm:$0x1] %v2426_v33  ;;  %v2431_v42 = vld [vmem:[#allocation3 + $0x3c] sm:$0x1]  ;;  %v2504_v33 = vld [vmem:[#allocation3 + $0xa4] sm:$0x1] }
 0x129   : > { %v2432_v12 = vsel %vm12594_vm3, 0, %v2431_v42  ;;  %v2508_v13 = vsel %vm12588_vm0, 0, %v2507_v59  ;;  %v2505_v39 = vsel %vm12588_vm0, 0, %v2504_v33  ;;  %v11711_v33 = vld [vmem:[%s16773_s3 + $0x70] sm:$0xff]  }
 0x12a   : > { %2433 = vst [vmem:[#allocation3 + $0x3c] sm:$0x1] %v2432_v12  ;;  %2509 = vst [vmem:[#allocation3 + $0xb0] sm:$0x1] %v2508_v13  ;;  %v2461_v12 = vld [vmem:[#allocation3 + $0xb4] sm:$0x1] }
 0x12b   : > { %2506 = vst [vmem:[#allocation3 + $0xa4] sm:$0x1] %v2505_v39  ;;  %v2462_v7 = vsel %vm12594_vm3, 0, %v2461_v12 }
 0x12c   : > { %2463 = vst [vmem:[#allocation3 + $0xb4] sm:$0x1] %v2462_v7 }
 0x12f   : > { %11510 = vmatmul.mubr.msk.bf16.gmra.mrb[8].mxu0 %vm1761_vm1, %v12507_v47 }
 0x130   : > { %11513 = vmatprep.mubr.msk.bf16.mxu0 %vm1761_vm1, %v1732_v20  ;;  %v2481_v20 = vsel %vm12588_vm0, 0, %v2480_v61 }
 0x131   : > { %2482 = vst [vmem:[#allocation3 + $0x44] sm:$0x1] %v2481_v20  ;;  %v2513_v20 = vld [vmem:[#allocation3 + $0xc8] sm:$0x1] }
 0x132   : > { %v2514_v60 = vsel %vm12588_vm0, 0, %v2513_v20 }
 0x133   : > { %2515 = vst [vmem:[#allocation3 + $0xc8] sm:$0x1] %v2514_v60 }
 0x137   : > { %11514 = vmatmul.mubr.msk.bf16.gmra.mrb[12].mxu0 %vm1761_vm1, %v1734_v24 }
 0x138   : > { %11517 = vmatprep.mubr.msk.bf16.mxu0 %vm1761_vm1, %v1736_v57  ;;  %v2486_v57 = vld [vmem:[#allocation3 + $0x5c] sm:$0x1] }
 0x13f   : > { %11518 = vmatmul.mubr.msk.bf16.gmra.mrb[16].mxu0 %vm1761_vm1, %v1738_v58  ;;  %v2487_v58 = vsel %vm12588_vm0, 0, %v2486_v57 }
 0x140   : > { %11521 = vmatprep.mubr.msk.bf16.mxu0 %vm1761_vm1, %v1740_v19  ;;  %2488 = vst [vmem:[#allocation3 + $0x5c] sm:$0x1] %v2487_v58  ;;  %v2443_v19 = vld [vmem:[#allocation3 + $0x6c] sm:$0x1] }
 0x147   : > { %11522 = vmatmul.mubr.msk.bf16.gmra.mrb[20].mxu0 %vm1761_vm1, %v1742_v9  ;;  %v2444_v9 = vsel %vm12594_vm3, 0, %v2443_v19 }
 0x148   : > { %11525 = vmatprep.mubr.msk.bf16.mxu0 %vm1761_vm1, %v1744_v17  ;;  %2445 = vst [vmem:[#allocation3 + $0x6c] sm:$0x1] %v2444_v9 }
 0x14f   : > { %11526 = vmatmul.mubr.msk.bf16.gmra.mrb[24].mxu0 %vm1761_vm1, %v1746_v37  ;;  %v2493_v37 = vsel %vm12588_vm0, 0, %v2492_v15  ;;  %vm6555_vm0 = vcmask 1040384  }
 0x150   : > { %11529 = vmatprep.mubr.msk.bf16.mxu0 %vm1761_vm1, %v1748_v6  ;;  %2494 = vst [vmem:[#allocation3 + $0x74] sm:$0x1] %v2493_v37  ;;  %v2450_v6 = vsel %vm12594_vm3, 0, %v2449_v11 }
 0x151   : > { %2451 = vst [vmem:[#allocation3 + $0x84] sm:$0x1] %v2450_v6  ;;  %v11709_v6 = vld [vmem:[%s16773_s3 + $0x68] sm:$0xff]  }
 0x152   : > { %3849 = vmatpush1.bf16.msra.mxu1 %v11709_v6 }
 0x153   : > { %3850 = vmatprep.subr.bf16.mxu1 %v16782_v0 }
 0x156   : > { %3851 = vmatpush1.bf16.msra.mxu1 %v11711_v33  ;;  %v2945_v33 = vld [vmem:[#allocation3 + $0x20] sm:$0x1] }
 0x157   : > { %11530 = vmatmul.mubr.msk.bf16.gmra.mrb[28].mxu0 %vm1761_vm1, %v1750_v22  ;;  %3852 = vmatprep.subr.bf16.mxu1 %v16782_v0  ;;  %vm5462_vm1 = vcmask 1047559  }
 0x18b   : > { %v12616_v47 = vpop.f32.mrb[0].mxu1 }
 0x18c   : > { %v12620_v55 = vpop.f32.mrb[1].mxu1 }
 0x18d   : > { %v12624_v36 = vpop.f32.mrb[2].mxu1 }
 0x18e   : > { %v12628_v24 = vpop.f32.mrb[3].mxu1 }
 0x1a0   : > { %v12638_v25 = vpop.f32.mrb[4].mxu1 }
 0x1a1   : > { %v12640_v54 = vpop.f32.mrb[5].mxu1 }
 0x1a2   : > { %v12644_v29 = vpop.f32.mrb[6].mxu1 }
 0x1a3   : > { %v12646_v4 = vpop.f32.mrb[7].mxu1 }
 0x1ab   : > { %v12652_v38 = vpop.f32.mrb[8].mxu1 }
 0x1ac   : > { %v12654_v35 = vpop.f32.mrb[9].mxu1 }
 0x1ad   : > { %v12656_v31 = vpop.f32.mrb[10].mxu1 }
 0x1ae   : > { %v12658_v17 = vpop.f32.mrb[11].mxu1 }
 0x1bd   : > { %v12668_v22 = vpop.f32.mrb[12].mxu1 }
 0x1be   : > { %v12672_v48 = vpop.f32.mrb[13].mxu1 }
 0x1bf   : > { %v12674_v3 = vpop.f32.mrb[14].mxu1 }
 0x1c0   : > { %v12676_v14 = vpop.f32.mrb[15].mxu1 }
 0x1cb   : > { %v12680_v23 = vpop.f32.mrb[16].mxu1 }
 0x1cc   : > { %v12682_v32 = vpop.f32.mrb[17].mxu1 }
 0x1cd   : > { %v12686_v34 = vpop.f32.mrb[18].mxu1 }
 0x1ce   : > { %v12692_v50 = vpop.f32.mrb[19].mxu1 }
 0x1da   : > { %v12696_v42 = vpop.f32.mrb[20].mxu1 }
 0x1db   : > { %v12698_v45 = vpop.f32.mrb[21].mxu1 }
 0x1dc   : > { %v12702_v61 = vpop.f32.mrb[22].mxu1 }
 0x1dd   : > { %v12704_v49 = vpop.f32.mrb[23].mxu1 }
 0x1e9   : > { %v12710_v30 = vpop.f32.mrb[24].mxu1 }
 0x1ea   : > { %v12712_v53 = vpop.f32.mrb[25].mxu1 }
 0x1eb   : > { %v12714_v57 = vpop.f32.mrb[26].mxu1 }
 0x1ec   : > { %v12716_v58 = vpop.f32.mrb[27].mxu1 }
 0x1f2   : > { %v11503_v62 = vpop.f32.mrb[0].mxu0 }
 0x1f3   : > { %v11533_v19 = vadd.f32 %v11503_v62, %v12616_v47  ;;  %v2177_v9 = vpop.f32.mrb[1].mxu0  ;;  %v11708_v47 = vld [vmem:[%s16773_s3 + $0xc8] sm:$0xff]  }
 0x1f4   : > { %v11534_v8 = vadd.f32 %v2177_v9, %v12620_v55  ;;  %v11504_v15 = vpop.f32.mrb[2].mxu0  ;;  %4346 = vmatpush1.bf16.msra.mxu0 %v11708_v47 }
 0x1f5   : > { %v2345_v37 = vadd.f32 %v11533_v19, %v12721_v10  ;;  %v11535_v28 = vadd.f32 %v11504_v15, %v12624_v36  ;;  %v2180_v5 = vpop.f32.mrb[3].mxu0  ;;  %4347 = vmatprep.subr.bf16.mxu0 %v16782_v0 }
 0x1f6   : > { %v12733_v11 = vpop.f32.mrb[28].mxu1  ;;  %v2343_v55 = vadd.f32 %v11534_v8, %v12721_v10  ;;  %v11536_v46 = vadd.f32 %v2180_v5, %v12628_v24  ;;  %v11710_v24 = vld [vmem:[%s16773_s3 + $0xd0] sm:$0xff]  }
 0x1f7   : > { %v12743_v63 = vpop.f32.mrb[29].mxu1  ;;  %v2377_v36 = vmax.f32 %v2345_v37, 0.0  ;;  %v2346_v21 = vadd.f32 %v11535_v28, %v12721_v10  ;;  %v11712_v28 = vld [vmem:[%s16773_s3 + $0xd8] sm:$0xff]   ;;  %v2941_v5 = vld [vmem:[#allocation3 + $0x18] sm:$0xf] }
 0x1f8   : > { %v12748_v16 = vpop.f32.mrb[30].mxu1  ;;  %v2375_v26 = vmax.f32 %v2343_v55, 0.0  ;;  %v2344_v41 = vadd.f32 %v11536_v46, %v12721_v10  ;;  %4348 = vmatpush1.bf16.msra.mxu0 %v11710_v24 }
 0x1f9   : > { %v12751_v27 = vpop.f32.mrb[31].mxu1  ;;  %v11332_v2 = vpack.c.bf16 %v2377_v36, %v2377_v36  ;;  %v2378_v59 = vmax.f32 %v2346_v21, 0.0  ;;  %4349 = vmatprep.subr.bf16.mxu0 %v16782_v0 }
 0x1fa   : > { %v11330_v13 = vpack.c.bf16 %v2375_v26, %v2375_v26  ;;  %v2376_v39 = vmax.f32 %v2344_v41, 0.0  ;;  %v11507_v1 = vpop.f32.mrb[4].mxu0  ;;  %v2934_v26 = vld [vmem:[#allocation3 + $0xc] sm:$0xf] }
 0x1fb   : > { %v2630_v40 = vshrl.u32 %v11332_v2, 16  ;;  %v2633_v12 = vshll.u32 %v11332_v2, 16  ;;  %v11333_v7 = vpack.c.bf16 %v2378_v59, %v2378_v59  ;;  %v11537_v20 = vadd.f32 %v11507_v1, %v12638_v25  ;;  %v2193_v60 = vpop.f32.mrb[5].mxu0  ;;  %v11713_v25 = vld [vmem:[%s16773_s3 + $0x78] sm:$0xff]  }
 0x1fc   : > { %v2613_v18 = vshrl.u32 %v11330_v13, 16  ;;  %v2616_v52 = vshll.u32 %v11330_v13, 16  ;;  %v11331_v62 = vpack.c.bf16 %v2376_v39, %v2376_v39  ;;  %v11538_v19 = vadd.f32 %v2193_v60, %v12640_v54  ;;  %v11508_v9 = vpop.f32.mrb[6].mxu0  ;;  %4350 = vmatpush1.bf16.msra.mxu0 %v11712_v28  ;;  %3853 = vmatpush1.bf16.msra.mxu1 %v11713_v25 }
 0x1fd   : > { %v2632_v51 = vrot.slane %v2630_v40, 7  ;;  %v2638_v43 = vshrl.u32 %v11333_v7, 16  ;;  %v2641_v8 = vshll.u32 %v11333_v7, 16  ;;  %v2349_v15 = vadd.f32 %v11537_v20, %v12721_v10  ;;  %v2196_v37 = vpop.f32.mrb[7].mxu0  ;;  %v2938_v20 = vld [vmem:[#allocation3 + $0x14] sm:$0x1]  ;;  %4351 = vmatprep.subr.bf16.mxu0 %v16782_v0  ;;  %3854 = vmatprep.subr.bf16.mxu1 %v16782_v0 }
 0x1fe   : > { %v16903_v54 = vmov 0  ;;  %v2615_v47 = vrot.slane %v2613_v18, 7  ;;  %v2621_v6 = vshrl.u32 %v11331_v62, 16  ;;  %v2624_v55 = vshll.u32 %v11331_v62, 16  ;;  %v11715_v18 = vld [vmem:[%s16773_s3 + $0x80] sm:$0xff]  }
 0x1ff   : > { %v16904_v54 = vsel %vm12772_vm6, 4294967295, %v16903_v54  ;;  %v2347_v46 = vadd.f32 %v11538_v19, %v12721_v10  ;;  %v2635_v36 = vor.u32 %v2633_v12, %v2632_v51  ;;  %v2636_v21 = vrot.slane %v2632_v51, 4  ;;  %v11714_v12 = vld [vmem:[%s16773_s3 + $0xe0] sm:$0xff]  }
 0x200   : > { %16905 = vst [vmem:[#allocation6_spill] sm:$0xff] %v16904_v54  ;;  %v2640_v41 = vrot.slane %v2638_v43, 7  ;;  %v2381_v2 = vmax.f32 %v2349_v15, 0.0  ;;  %v2618_v59 = vor.u32 %v2616_v52, %v2615_v47  ;;  %v2619_v24 = vrot.slane %v2615_v47, 4  ;;  %4352 = vmatpush1.bf16.msra.mxu0 %v11714_v12  ;;  %3855 = vmatpush1.bf16.msra.mxu1 %v11715_v18 }
 0x201   : > { %v2623_v13 = vrot.slane %v2621_v6, 7  ;;  %v2379_v39 = vmax.f32 %v2347_v46, 0.0  ;;  %v2942_v1 = vsel %vm12772_vm6, %v2635_v36, %v2941_v5  ;;  %4353 = vmatprep.subr.bf16.mxu0 %v16782_v0  ;;  %3856 = vmatprep.subr.bf16.mxu1 %v16782_v0 }
 0x202   : > { %v2643_v40 = vor.u32 %v2641_v8, %v2640_v41  ;;  %v2645_v7 = vrot.slane %v2640_v41, 4  ;;  %v11336_v60 = vpack.c.bf16 %v2381_v2, %v2381_v2  ;;  %2943 = vst [vmem:[#allocation3 + $0x18] sm:$0xf] %v2942_v1  ;;  %v2935_v52 = vsel %vm12772_vm6, %v2618_v59, %v2934_v26  ;;  %v11511_v43 = vpop.f32.mrb[8].mxu0  ;;  %v2948_v1 = vld [vmem:[#allocation3 + $0x24] sm:$0xf] }
 0x203   : > { %v2626_v62 = vor.u32 %v2624_v55, %v2623_v13  ;;  %v2628_v19 = vrot.slane %v2623_v13, 4  ;;  %v11334_v51 = vpack.c.bf16 %v2379_v39, %v2379_v39  ;;  %2936 = vst [vmem:[#allocation3 + $0xc] sm:$0xf] %v2935_v52  ;;  %v2209_v5 = vpop.f32.mrb[9].mxu0  ;;  %v11539_v26 = vadd.f32 %v11508_v9, %v12644_v29  ;;  %v2955_v13 = vld [vmem:[#allocation3 + $0x30] sm:$0xf] }
 0x204   : > { %v2644_v8 = vsel %vm12015_vm12, %v2636_v21, %v2643_v40  ;;  %v2946_v15 = vsel %vm12594_vm3, %v2645_v7, %v2945_v33  ;;  %v2664_v28 = vshrl.u32 %v11336_v60, 16  ;;  %v2667_v25 = vshll.u32 %v11336_v60, 16  ;;  %v11512_v36 = vpop.f32.mrb[10].mxu0  ;;  %v11717_v33 = vld [vmem:[%s16773_s3 + $0x88] sm:$0xff]  }
 0x205   : > { %2944 = vst.msk [vmem:[#allocation3 + $0x1c] sm:$0xf] %vm2407_vm5, %v2644_v8  ;;  %2947 = vst [vmem:[#allocation3 + $0x20] sm:$0x1] %v2946_v15  ;;  %v2627_v47 = vsel %vm12015_vm12, %v2619_v24, %v2626_v62  ;;  %v2939_v6 = vsel %vm12594_vm3, %v2628_v19, %v2938_v20  ;;  %v2647_v55 = vshrl.u32 %v11334_v51, 16  ;;  %v2650_v46 = vshll.u32 %v11334_v51, 16  ;;  %3857 = vmatpush1.bf16.msra.mxu1 %v11717_v33 }
 0x206   : > { %2937 = vst.msk [vmem:[#allocation3 + $0x10] sm:$0xf] %vm2407_vm5, %v2627_v47  ;;  %2940 = vst [vmem:[#allocation3 + $0x14] sm:$0x1] %v2939_v6  ;;  %v12801_v21 = vrot.slane %v2664_v28, 7  ;;  %v11540_v41 = vadd.f32 %v2196_v37, %v12646_v4  ;;  %v11541_v2 = vadd.f32 %v11511_v43, %v12652_v38  ;;  %v2212_v59 = vpop.f32.mrb[11].mxu0  ;;  %v11542_v29 = vadd.f32 %v2209_v5, %v12654_v35 }
 0x207   : > { %v11716_v24 = vld [vmem:[%s16773_s3 + $0xe8] sm:$0xff]   ;;  %v12812_v39 = vrot.slane %v2647_v55, 7  ;;  %v11543_v4 = vadd.f32 %v11512_v36, %v12656_v31  ;;  %v11544_v38 = vadd.f32 %v2212_v59, %v12658_v17  ;;  %v2350_v40 = vadd.f32 %v11539_v26, %v12721_v10  ;;  %v11718_v62 = vld [vmem:[%s16773_s3 + $0xf0] sm:$0xff]   ;;  %3858 = vmatprep.subr.bf16.mxu1 %v16782_v0  ;;  %v11720_v59 = vld [vmem:[%s16773_s3 + $0xf8] sm:$0xff]  }
 0x208   : > { %v2669_v9 = vor.u32 %v2667_v25, %v12801_v21  ;;  %v2670_v37 = vrot.slane %v12801_v21, 4  ;;  %v2348_v7 = vadd.f32 %v11540_v41, %v12721_v10  ;;  %v2353_v31 = vadd.f32 %v11541_v2, %v12721_v10  ;;  %4354 = vmatpush1.bf16.msra.mxu0 %v11716_v24  ;;  %v11719_v19 = vld [vmem:[%s16773_s3 + $0x90] sm:$0xff]  }
 0x209   : > { %v2652_v20 = vor.u32 %v2650_v46, %v12812_v39  ;;  %v2653_v35 = vrot.slane %v12812_v39, 4  ;;  %v2351_v17 = vadd.f32 %v11542_v29, %v12721_v10  ;;  %v2382_v12 = vmax.f32 %v2350_v40, 0.0  ;;  %4355 = vmatprep.subr.bf16.mxu0 %v16782_v0  ;;  %3859 = vmatpush1.bf16.msra.mxu1 %v11719_v19 }
 0x20a   : > { %v2956_v60 = vsel %vm12772_vm6, %v2669_v9, %v2955_v13  ;;  %v2380_v18 = vmax.f32 %v2348_v7, 0.0  ;;  %v2354_v52 = vadd.f32 %v11543_v4, %v12721_v10  ;;  %v2385_v43 = vmax.f32 %v2353_v31, 0.0  ;;  %v11515_v28 = vpop.f32.mrb[12].mxu0  ;;  %3860 = vmatprep.subr.bf16.mxu1 %v16782_v0  ;;  %v2959_v7 = vld [vmem:[#allocation3 + $0x38] sm:$0x1] }
 0x20b   : > { %2957 = vst [vmem:[#allocation3 + $0x30] sm:$0xf] %v2956_v60  ;;  %v2949_v51 = vsel %vm12772_vm6, %v2652_v20, %v2948_v1  ;;  %v2383_v8 = vmax.f32 %v2351_v17, 0.0  ;;  %v2352_v15 = vadd.f32 %v11544_v38, %v12721_v10  ;;  %v11337_v25 = vpack.c.bf16 %v2382_v12, %v2382_v12  ;;  %v2225_v55 = vpop.f32.mrb[13].mxu0  ;;  %v2952_v60 = vld [vmem:[#allocation3 + $0x2c] sm:$0x1] }
 0x20c   : > { %2950 = vst [vmem:[#allocation3 + $0x24] sm:$0xf] %v2949_v51  ;;  %v11335_v5 = vpack.c.bf16 %v2380_v18, %v2380_v18  ;;  %v2386_v47 = vmax.f32 %v2354_v52, 0.0  ;;  %v11545_v6 = vadd.f32 %v11515_v28, %v12668_v22  ;;  %v11340_v46 = vpack.c.bf16 %v2385_v43, %v2385_v43  ;;  %v12843_v2 = vpop.f32.mrb[14].mxu0  ;;  %4356 = vmatpush1.bf16.msra.mxu0 %v11718_v62  ;;  %v11721_v22 = vld [vmem:[%s16773_s3 + $0x98] sm:$0xff]  }
 0x20d   : > { %v11338_v36 = vpack.c.bf16 %v2383_v8, %v2383_v8  ;;  %v2384_v26 = vmax.f32 %v2352_v15, 0.0  ;;  %v11546_v41 = vadd.f32 %v2225_v55, %v12672_v48  ;;  %v2672_v24 = vshrl.u32 %v11337_v25, 16  ;;  %v12848_v4 = vpop.f32.mrb[15].mxu0  ;;  %4357 = vmatprep.subr.bf16.mxu0 %v16782_v0  ;;  %v2969_v18 = vld [vmem:[#allocation3 + $0x48] sm:$0xf]  ;;  %3861 = vmatpush1.bf16.msra.mxu1 %v11721_v22 }
 0x20e   : > { %v2675_v33 = vshll.u32 %v11337_v25, 16  ;;  %v2655_v13 = vshrl.u32 %v11335_v5, 16  ;;  %v2658_v29 = vshll.u32 %v11335_v5, 16  ;;  %v2698_v38 = vshrl.u32 %v11340_v46, 16  ;;  %v2962_v28 = vld [vmem:[#allocation3 + $0x3c] sm:$0xf]  ;;  %3862 = vmatprep.subr.bf16.mxu1 %v16782_v0 }
 0x20f   : > { %v2701_v48 = vshll.u32 %v11340_v46, 16  ;;  %v2681_v9 = vshrl.u32 %v11338_v36, 16  ;;  %v2684_v1 = vshll.u32 %v11338_v36, 16  ;;  %v2674_v40 = vrot.slane %v2672_v24, 7  ;;  %v11722_v25 = vld [vmem:[%s16773_s3 + $0x100] sm:$0xff]  }
 0x210   : > { %v2657_v20 = vrot.slane %v2655_v13, 7  ;;  %v12855_v31 = vpack.c.bf16 %v2386_v47, %v2386_v47  ;;  %v12857_v17 = vpack.c.bf16 %v2384_v26, %v2384_v26  ;;  %v12859_v12 = vrot.slane %v2698_v38, 7  ;;  %4358 = vmatpush1.bf16.msra.mxu0 %v11720_v59  ;;  %v11723_v5 = vld [vmem:[%s16773_s3 + $0xa0] sm:$0xff]   ;;  %v12893_v13 = vld [vmem:[#allocation3 + $0x20] ss:$0 sps:$4 sm:$0x11]  }
 0x211   : > { %v12861_v52 = vrot.slane %v2681_v9, 7  ;;  %v2357_v62 = vadd.f32 %v11545_v6, %v12721_v10  ;;  %v2355_v19 = vadd.f32 %v11546_v41, %v12721_v10  ;;  %v2677_v51 = vor.u32 %v2675_v33, %v2674_v40  ;;  %4359 = vmatprep.subr.bf16.mxu0 %v16782_v0  ;;  %v12891_v33 = vld [vmem:[#allocation3 + $0x1c] sm:$0xf]  ;;  %v3102_v22 = vld [vmem:[#allocation3 + $0x18] sm:$0xe]  ;;  %3863 = vmatpush1.bf16.msra.mxu1 %v11723_v5 }
 0x212   : > { %v2679_v43 = vrot.slane %v2674_v40, 4  ;;  %v2660_v8 = vor.u32 %v2658_v29, %v2657_v20  ;;  %v2662_v15 = vrot.slane %v2657_v20, 4  ;;  %v2703_v47 = vor.u32 %v2701_v48, %v12859_v12  ;;  %v12875_v36 = vpop.f32.mrb[16].mxu0  ;;  %v11724_v48 = vld [vmem:[%s16773_s3 + $0x108] sm:$0xff]   ;;  %3864 = vmatprep.subr.bf16.mxu1 %v16782_v0 }
 0x213   : > { %v2704_v6 = vrot.slane %v12859_v12, 4  ;;  %v2686_v55 = vor.u32 %v2684_v1, %v12861_v52  ;;  %v2687_v46 = vrot.slane %v12861_v52, 4  ;;  %v2678_v26 = vsel %vm12015_vm12, %v2670_v37, %v2677_v51  ;;  %v12895_v29 = vpop.f32.mrb[17].mxu0 }
 0x214   : > { %v2960_v41 = vsel %vm12594_vm3, %v2679_v43, %v2959_v7  ;;  %v2661_v59 = vsel %vm12015_vm12, %v2653_v35, %v2660_v8  ;;  %v2953_v24 = vsel %vm12594_vm3, %v2662_v15, %v2952_v60  ;;  %2958 = vst.msk [vmem:[#allocation3 + $0x34] sm:$0xf] %vm2407_vm5, %v2678_v26  ;;  %v2970_v21 = vsel %vm12772_vm6, %v2703_v47, %v2969_v18  ;;  %v12905_v38 = vpop.f32.mrb[18].mxu0  ;;  %v11727_v26 = vld [vmem:[%s16773_s3 + $0xb0] sm:$0xff]  }
 0x215   : > { %2961 = vst [vmem:[#allocation3 + $0x38] sm:$0x1] %v2960_v41  ;;  %2951 = vst.msk [vmem:[#allocation3 + $0x28] sm:$0xf] %vm2407_vm5, %v2661_v59  ;;  %v2963_v39 = vsel %vm12772_vm6, %v2686_v55, %v2962_v28  ;;  %v2706_v37 = vshrl.u32 %v12855_v31, 16  ;;  %v2709_v35 = vshll.u32 %v12855_v31, 16  ;;  %4360 = vmatpush1.bf16.msra.mxu0 %v11722_v25  ;;  %v11547_v12 = vadd.f32 %v12843_v2, %v12674_v3 }
 0x216   : > { %2954 = vst [vmem:[#allocation3 + $0x2c] sm:$0x1] %v2953_v24  ;;  %2971 = vst [vmem:[#allocation3 + $0x48] sm:$0xf] %v2970_v21  ;;  %v2689_v9 = vshrl.u32 %v12857_v17, 16  ;;  %v2692_v1 = vshll.u32 %v12857_v17, 16  ;;  %v11548_v18 = vadd.f32 %v12848_v4, %v12676_v14  ;;  %v10809_v51 = vcombine.low %v3102_v22, %v12891_v33  ;;  %4361 = vmatprep.subr.bf16.mxu0 %v16782_v0 }
 0x217   : > { %2964 = vst [vmem:[#allocation3 + $0x3c] sm:$0xf] %v2963_v39  ;;  %v2389_v40 = vmax.f32 %v2357_v62, 0.0  ;;  %v2387_v7 = vmax.f32 %v2355_v19, 0.0  ;;  %v12912_v20 = vpop.f32.mrb[19].mxu0  ;;  %v11725_v31 = vld [vmem:[%s16773_s3 + $0xa8] sm:$0xff]   ;;  %v2358_v3 = vadd.f32 %v11547_v12, %v12721_v10 }
 0x218   : > { %v2708_v60 = vrot.slane %v2706_v37, 7  ;;  %v2973_v17 = vld [vmem:[#allocation3 + $0x50] sm:$0x1]  ;;  %v2691_v62 = vrot.slane %v2689_v9, 7  ;;  %v3575_v8 = vrot.slane %v12893_v13, 1  ;;  %v2356_v2 = vadd.f32 %v11548_v18, %v12721_v10  ;;  %3865 = vmatpush1.bf16.msra.mxu1 %v11725_v31  ;;  %v11726_v55 = vld [vmem:[%s16773_s3 + $0x110] sm:$0xff]  }
 0x219   : > { %v11344_v19 = vpack.c.bf16 %v2389_v40, %v2389_v40  ;;  %v11342_v43 = vpack.c.bf16 %v2387_v7, %v2387_v7  ;;  %v2966_v25 = vld [vmem:[#allocation3 + $0x44] sm:$0x1]  ;;  %4362 = vmatpush1.bf16.msra.mxu0 %v11724_v48  ;;  %v2983_v24 = vld [vmem:[#allocation3 + $0x60] sm:$0xf]  ;;  %v12937_v37 = vld [vmem:[#allocation3 + $0x10] sm:$0xf]  ;;  %3866 = vmatprep.subr.bf16.mxu1 %v16782_v0 }
 0x21a   : > { %v2711_v15 = vor.u32 %v2709_v35, %v2708_v60  ;;  %v2713_v28 = vrot.slane %v2708_v60, 4  ;;  %v2694_v14 = vor.u32 %v2692_v1, %v2691_v62  ;;  %v2696_v4 = vrot.slane %v2691_v62, 4  ;;  %v12939_v35 = vpop.f32.mrb[20].mxu0  ;;  %4363 = vmatprep.subr.bf16.mxu0 %v16782_v0  ;;  %v2976_v9 = vld [vmem:[#allocation3 + $0x54] sm:$0xf] }
 0x21b   : > { %v2732_v5 = vshrl.u32 %v11344_v19, 16  ;;  %v2735_v47 = vshll.u32 %v11344_v19, 16  ;;  %v2715_v21 = vshrl.u32 %v11342_v43, 16  ;;  %v2718_v39 = vshll.u32 %v11342_v43, 16  ;;  %v3101_v40 = vld [vmem:[#allocation3 + $0xc] sm:$0xe] }
 0x21c   : > { %v2712_v41 = vsel %vm12015_vm12, %v2704_v6, %v2711_v15  ;;  %v2974_v59 = vsel %vm12594_vm3, %v2713_v28, %v2973_v17  ;;  %v2695_v6 = vsel %vm12015_vm12, %v2687_v46, %v2694_v14  ;;  %v2967_v22 = vsel %vm12594_vm3, %v2696_v4, %v2966_v25  ;;  %v12952_v7 = vpop.f32.mrb[21].mxu0  ;;  %v12962_v62 = vld [vmem:[#allocation3 + $0x14] ss:$0 sps:$4 sm:$0x11]   ;;  %3867 = vmatpush1.bf16.msra.mxu1 %v11727_v26 }
 0x21d   : > { %2972 = vst.msk [vmem:[#allocation3 + $0x4c] sm:$0xf] %vm2407_vm5, %v2712_v41  ;;  %2975 = vst [vmem:[#allocation3 + $0x50] sm:$0x1] %v2974_v59  ;;  %v12950_v48 = vrot.slane %v2732_v5, 7  ;;  %v2390_v1 = vmax.f32 %v2358_v3, 0.0  ;;  %v11549_v46 = vadd.f32 %v12875_v36, %v12680_v23  ;;  %v10808_v19 = vcombine.low %v3101_v40, %v12937_v37  ;;  %4364 = vmatpush1.bf16.msra.mxu0 %v11726_v55 }
 0x21e   : > { %2965 = vst.msk [vmem:[#allocation3 + $0x40] sm:$0xf] %vm2407_vm5, %v2695_v6  ;;  %2968 = vst [vmem:[#allocation3 + $0x44] sm:$0x1] %v2967_v22  ;;  %v12955_v31 = vrot.slane %v2715_v21, 7  ;;  %v2388_v60 = vmax.f32 %v2356_v2, 0.0  ;;  %4365 = vmatprep.subr.bf16.mxu0 %v16782_v0  ;;  %3868 = vmatprep.subr.bf16.mxu1 %v16782_v0 }
 0x21f   : > { %v3574_v52 = vrot.slane %v10809_v51, 1  ;;  %v12959_v12 = vpop.f32.mrb[22].mxu0  ;;  %v2737_v18 = vor.u32 %v2735_v47, %v12950_v48  ;;  %v11345_v17 = vpack.c.bf16 %v2390_v1, %v2390_v1  ;;  %v11728_v51 = vld [vmem:[%s16773_s3 + $0x118] sm:$0xff]   ;;  %v2738_v36 = vrot.slane %v12950_v48, 4  ;;  %v3050_v21 = vld [vmem:[#allocation3 + $0x18] sm:$0xf] }
 0x220   : > { %v12965_v43 = vpop.f32.mrb[23].mxu0  ;;  %v11729_v23 = vld [vmem:[%s16773_s3 + $0xb8] sm:$0xff]   ;;  %v2720_v15 = vor.u32 %v2718_v39, %v12955_v31  ;;  %v11343_v28 = vpack.c.bf16 %v2388_v60, %v2388_v60  ;;  %v2721_v2 = vrot.slane %v12955_v31, 4  ;;  %v2361_v4 = vadd.f32 %v11549_v46, %v12721_v10  ;;  %v2987_v39 = vld [vmem:[#allocation3 + $0x68] sm:$0x1] }
 0x221   : > { %v12976_v25 = vsel %vm1586_vm9, %v3574_v52, %v3575_v8  ;;  %v2984_v3 = vsel %vm12772_vm6, %v2737_v18, %v2983_v24  ;;  %v2740_v14 = vshrl.u32 %v11345_v17, 16  ;;  %v2743_v5 = vshll.u32 %v11345_v17, 16  ;;  %4366 = vmatpush1.bf16.msra.mxu0 %v11728_v51  ;;  %3869 = vmatpush1.bf16.msra.mxu1 %v11729_v23 }
 0x222   : > { %10941 = vmatprep.mubr.msk.bf16.mxu0 %vm3622_vm4, %v12976_v25  ;;  %2985 = vst [vmem:[#allocation3 + $0x60] sm:$0xf] %v2984_v3  ;;  %v2977_v8 = vsel %vm12772_vm6, %v2720_v15, %v2976_v9  ;;  %v2723_v47 = vshrl.u32 %v11343_v28, 16  ;;  %v3571_v55 = vrot.slane %v10808_v19, 1  ;;  %v2393_v41 = vmax.f32 %v2361_v4, 0.0  ;;  %v12996_v1 = vpop.f32.mrb[24].mxu0  ;;  %4082 = vmatprep.subr.bf16.mxu1 %v16782_v0 }
 0x223   : > { %2978 = vst [vmem:[#allocation3 + $0x54] sm:$0xf] %v2977_v8  ;;  %v2742_v26 = vrot.slane %v2740_v14, 7  ;;  %v3572_v59 = vrot.slane %v12962_v62, 1  ;;  %v11550_v24 = vadd.f32 %v12895_v29, %v12682_v32  ;;  %v2726_v22 = vshll.u32 %v11343_v28, 16  ;;  %9652 = vmatprep.subr.bf16.mxu0 %v16782_v0  ;;  %v13003_v52 = vpop.f32.mrb[25].mxu0 }
 0x224   : > { %v2725_v6 = vrot.slane %v2723_v47, 7  ;;  %v11551_v48 = vadd.f32 %v12905_v38, %v12686_v34  ;;  %v12994_v9 = vcombine.low %v3050_v21, %v12891_v33  ;;  %v2980_v29 = vld [vmem:[#allocation3 + $0x5c] sm:$0x1]  ;;  %v11348_v31 = vpack.c.bf16 %v2393_v41, %v2393_v41  ;;  %v13009_v18 = vpop.f32.mrb[26].mxu0  ;;  %v3048_v47 = vld [vmem:[#allocation3 + $0xc] sm:$0xf] }
 0x225   : > { %v2745_v40 = vor.u32 %v2743_v5, %v2742_v26  ;;  %v2747_v32 = vrot.slane %v2742_v26, 4  ;;  %v13001_v60 = vsel %vm1586_vm9, %v3571_v55, %v3572_v59  ;;  %v2359_v33 = vadd.f32 %v11550_v24, %v12721_v10  ;;  %v13016_v15 = vpop.f32.mrb[27].mxu0  ;;  %v2997_v55 = vld [vmem:[#allocation3 + $0x78] sm:$0xf] }
 0x226   : > { %16906 = vst [vmem:[#allocation7_spill] sm:$0xff] %v13001_v60  ;;  %v2728_v46 = vor.u32 %v2726_v22, %v2725_v6  ;;  %v2730_v34 = vrot.slane %v2725_v6, 4  ;;  %10861 = vmatprep.mubr.msk.bf16.mxu1 %vm3622_vm4, %v13001_v60  ;;  %v2362_v38 = vadd.f32 %v11551_v48, %v12721_v10  ;;  %v2766_v51 = vshrl.u32 %v11348_v31, 16  ;;  %v11731_v0 = vld [vmem:[#allocation3 + $0x8] ss:$0 sps:$4 sm:$0x11]  }
 0x227   : > { %v2746_v17 = vsel %vm12015_vm12, %v2738_v36, %v2745_v40  ;;  %v2988_v19 = vsel %vm12594_vm3, %v2747_v32, %v2987_v39  ;;  %v3294_v23 = vshll.u32 %v12893_v13, 16  ;;  %v2391_v14 = vmax.f32 %v2359_v33, 0.0 }
 0x228   : > { %2986 = vst.msk [vmem:[#allocation3 + $0x64] sm:$0xf] %vm2407_vm5, %v2746_v17  ;;  %2989 = vst [vmem:[#allocation3 + $0x68] sm:$0x1] %v2988_v19  ;;  %v2729_v28 = vsel %vm12015_vm12, %v2721_v2, %v2728_v46  ;;  %v2981_v3 = vsel %vm12594_vm3, %v2730_v34, %v2980_v29  ;;  %v2394_v4 = vmax.f32 %v2362_v38, 0.0  ;;  %v2768_v36 = vrot.slane %v2766_v51, 7 }
 0x229   : > { %2979 = vst.msk [vmem:[#allocation3 + $0x58] sm:$0xf] %vm2407_vm5, %v2729_v28  ;;  %2982 = vst [vmem:[#allocation3 + $0x5c] sm:$0x1] %v2981_v3  ;;  %v2769_v8 = vshll.u32 %v11348_v31, 16  ;;  %v3287_v13 = vshrl.u32 %v12994_v9, 16  ;;  %v11346_v26 = vpack.c.bf16 %v2391_v14, %v2391_v14  ;;  %v11552_v2 = vadd.f32 %v12912_v20, %v12692_v50 }
 0x22a   : > { %v3289_v5 = vshll.u32 %v12994_v9, 16  ;;  %v11349_v41 = vpack.c.bf16 %v2394_v4, %v2394_v4  ;;  %v13029_v59 = vcombine.low %v3048_v47, %v12937_v37  ;;  %v2772_v21 = vrot.slane %v2768_v36, 4  ;;  %v13032_v29 = vpop.f32.mrb[28].mxu0  ;;  %v2990_v46 = vld [vmem:[#allocation3 + $0x6c] sm:$0xf] }
 0x22b   : > { %v2771_v24 = vor.u32 %v2769_v8, %v2768_v36  ;;  %v3296_v6 = vrot.slane %v3294_v23, 1  ;;  %v2749_v22 = vshrl.u32 %v11346_v26, 16  ;;  %v2752_v48 = vshll.u32 %v11346_v26, 16  ;;  %v13037_v37 = vpop.f32.mrb[29].mxu0  ;;  %v3001_v51 = vld [vmem:[#allocation3 + $0x80] sm:$0x1] }
 0x22c   : > { %v3291_v39 = vrot.slane %v3289_v5, 1  ;;  %v2774_v40 = vshrl.u32 %v11349_v41, 16  ;;  %v3282_v32 = vshll.u32 %v12962_v62, 16  ;;  %v2777_v34 = vshll.u32 %v11349_v41, 16  ;;  %v13041_v62 = vpop.f32.mrb[30].mxu0 }
 0x22d   : > { %v2998_v31 = vsel %vm12772_vm6, %v2771_v24, %v2997_v55  ;;  %v2360_v20 = vadd.f32 %v11552_v2, %v12721_v10  ;;  %v2751_v33 = vrot.slane %v2749_v22, 7  ;;  %v3275_v17 = vshrl.u32 %v13029_v59, 16  ;;  %v13048_v4 = vpop.f32.mrb[31].mxu0  ;;  %v13053_v2 = vld [vmem:[#allocation3 + $0x34] sm:$0xf] }
 0x22e   : > { %v3292_v50 = vor.u32 %v3291_v39, %v3287_v13  ;;  %2999 = vst [vmem:[#allocation3 + $0x78] sm:$0xf] %v2998_v31  ;;  %v2776_v38 = vrot.slane %v2774_v40, 7  ;;  %v3277_v19 = vshll.u32 %v13029_v59, 16  ;;  %v11553_v3 = vadd.f32 %v12939_v35, %v12696_v42  ;;  %v3054_v40 = vld [vmem:[#allocation3 + $0x30] sm:$0xf] }
 0x22f   : > { %v2392_v28 = vmax.f32 %v2360_v20, 0.0  ;;  %v11554_v14 = vadd.f32 %v12952_v7, %v12698_v45  ;;  %v2754_v36 = vor.u32 %v2752_v48, %v2751_v33  ;;  %v3284_v5 = vrot.slane %v3282_v32, 1  ;;  %v13063_v24 = vld [vmem:[#allocation3 + $0x38] ss:$0 sps:$4 sm:$0x11]  }
 0x230   : > { %v3297_v23 = vsel %vm1279_vm11, %v3292_v50, %v3296_v6  ;;  %v2779_v8 = vor.u32 %v2777_v34, %v2776_v38  ;;  %v2781_v13 = vrot.slane %v2776_v38, 4  ;;  %v3279_v55 = vrot.slane %v3277_v19, 1  ;;  %v2994_v20 = vld [vmem:[#allocation3 + $0x74] sm:$0x1] }
 0x231   : > { %3482 = vrot.lane.b32.xlu1 %v3297_v23, %s11860_s30  ;;  %v11347_v47 = vpack.c.bf16 %v2392_v28, %v2392_v28  ;;  %v2365_v26 = vadd.f32 %v11553_v3, %v12721_v10  ;;  %v2363_v41 = vadd.f32 %v11554_v14, %v12721_v10  ;;  %v2991_v42 = vsel %vm12772_vm6, %v2754_v36, %v2990_v46 }
 0x232   : > { %v2780_v45 = vsel %vm12015_vm12, %v2772_v21, %v2779_v8  ;;  %v3002_v35 = vsel %vm12594_vm3, %v2781_v13, %v3001_v51  ;;  %v11555_v7 = vadd.f32 %v12959_v12, %v12702_v61  ;;  %v2755_v39 = vrot.slane %v2751_v33, 4  ;;  %2992 = vst [vmem:[#allocation3 + $0x6c] sm:$0xf] %v2991_v42 }
 0x233   : > { %3000 = vst.msk [vmem:[#allocation3 + $0x7c] sm:$0xf] %vm2407_vm5, %v2780_v45  ;;  %3003 = vst [vmem:[#allocation3 + $0x80] sm:$0x1] %v3002_v35  ;;  %v2757_v6 = vshrl.u32 %v11347_v47, 16  ;;  %v3280_v22 = vor.u32 %v3279_v55, %v3275_v17  ;;  %v2397_v48 = vmax.f32 %v2365_v26, 0.0  ;;  %v13068_v46 = vcombine.low %v3054_v40, %v13053_v2 }
 0x234   : > { %v2760_v32 = vshll.u32 %v11347_v47, 16  ;;  %v2395_v31 = vmax.f32 %v2363_v41, 0.0  ;;  %v2366_v21 = vadd.f32 %v11555_v7, %v12721_v10  ;;  %v11556_v50 = vadd.f32 %v12965_v43, %v12704_v49  ;;  %v3011_v55 = vld [vmem:[#allocation3 + $0x90] sm:$0xf]  ;;  %v3052_v41 = vld [vmem:[#allocation3 + $0x24] sm:$0xf] }
 0x235   : > { %v2759_v34 = vrot.slane %v2757_v6, 7  ;;  %v3285_v61 = vsel %vm1279_vm11, %v3280_v22, %v3284_v5  ;;  %v11352_v12 = vpack.c.bf16 %v2397_v48, %v2397_v48  ;;  %v3313_v17 = vshll.u32 %v13068_v46, 16  ;;  %v13077_v5 = vld [vmem:[#allocation3 + $0x28] sm:$0xf]  ;;  %v3004_v48 = vld [vmem:[#allocation3 + $0x84] sm:$0xf] }
 0x236   : > { %3480 = vrot.lane.b32.xlu0 %v3285_v61, %s11860_s30  ;;  %v11350_v33 = vpack.c.bf16 %v2395_v31, %v2395_v31  ;;  %v2398_v38 = vmax.f32 %v2366_v21, 0.0  ;;  %v3318_v19 = vshll.u32 %v13063_v24, 16  ;;  %v3311_v3 = vshrl.u32 %v13068_v46, 16  ;;  %v13086_v6 = vld [vmem:[#allocation3 + $0x2c] ss:$0 sps:$4 sm:$0x11]  }
 0x237   : > { %v2762_v51 = vor.u32 %v2760_v32, %v2759_v34  ;;  %v2764_v23 = vrot.slane %v2759_v34, 4  ;;  %v2800_v28 = vshrl.u32 %v11352_v12, 16  ;;  %v2803_v14 = vshll.u32 %v11352_v12, 16 }
 0x238   : > { %v2783_v36 = vshrl.u32 %v11350_v33, 16  ;;  %v11353_v8 = vpack.c.bf16 %v2398_v38, %v2398_v38  ;;  %v3315_v13 = vrot.slane %v3313_v17, 1  ;;  %v2786_v26 = vshll.u32 %v11350_v33, 16 }
 0x239   : > { %v2763_v49 = vsel %vm12015_vm12, %v2755_v39, %v2762_v51  ;;  %v2995_v43 = vsel %vm12594_vm3, %v2764_v23, %v2994_v20  ;;  %v2802_v47 = vrot.slane %v2800_v28, 7  ;;  %v3320_v7 = vrot.slane %v3318_v19, 1  ;;  %v3015_v20 = vld [vmem:[#allocation3 + $0x98] sm:$0x1] }
 0x23a   : > { %2993 = vst.msk [vmem:[#allocation3 + $0x70] sm:$0xf] %vm2407_vm5, %v2763_v49  ;;  %2996 = vst [vmem:[#allocation3 + $0x74] sm:$0x1] %v2995_v43  ;;  %v13084_v42 = vrot.slane %v2783_v36, 7  ;;  %v2808_v45 = vshrl.u32 %v11353_v8, 16  ;;  %v3316_v35 = vor.u32 %v3315_v13, %v3311_v3  ;;  %v2364_v40 = vadd.f32 %v11556_v50, %v12721_v10 }
 0x23b   : > { %v2805_v22 = vor.u32 %v2803_v14, %v2802_v47  ;;  %v2811_v39 = vshll.u32 %v11353_v8, 16  ;;  %v13090_v32 = vcombine.low %v3052_v41, %v13077_v5  ;;  %v2806_v31 = vrot.slane %v2802_v47, 4  ;;  %v13102_v28 = vld [vmem:[#allocation3 + $0x50] ss:$0 sps:$4 sm:$0x11]  }
 0x23c   : > { %v2788_v21 = vor.u32 %v2786_v26, %v13084_v42  ;;  %v2810_v34 = vrot.slane %v2808_v45, 7  ;;  %v3321_v61 = vsel %vm1279_vm11, %v3316_v35, %v3320_v7  ;;  %v2396_v33 = vmax.f32 %v2364_v40, 0.0  ;;  %v13108_v13 = vld [vmem:[#allocation3 + $0x4c] sm:$0xf] }
 0x23d   : > { %v3012_v12 = vsel %vm12772_vm6, %v2805_v22, %v3011_v55  ;;  %3486 = vrot.lane.b32.xlu1 %v3321_v61, %s11860_s30  ;;  %v3299_v38 = vshrl.u32 %v13090_v32, 16  ;;  %v3301_v50 = vshll.u32 %v13090_v32, 16  ;;  %v3306_v23 = vshll.u32 %v13086_v6, 16  ;;  %v3008_v40 = vld [vmem:[#allocation3 + $0x8c] sm:$0x1] }
 0x23e   : > { %3013 = vst [vmem:[#allocation3 + $0x90] sm:$0xf] %v3012_v12  ;;  %v3005_v17 = vsel %vm12772_vm6, %v2788_v21, %v3004_v48  ;;  %v2813_v19 = vor.u32 %v2811_v39, %v2810_v34  ;;  %v2815_v51 = vrot.slane %v2810_v34, 4  ;;  %v11351_v3 = vpack.c.bf16 %v2396_v33, %v2396_v33 }
 0x23f   : > { %3006 = vst [vmem:[#allocation3 + $0x84] sm:$0xf] %v3005_v17  ;;  %v3303_v14 = vrot.slane %v3301_v50, 1  ;;  %v11557_v36 = vadd.f32 %v12996_v1, %v12710_v30  ;;  %v11558_v8 = vadd.f32 %v13003_v52, %v12712_v53  ;;  %v3308_v47 = vrot.slane %v3306_v23, 1  ;;  %v3058_v52 = vld [vmem:[#allocation3 + $0x48] sm:$0xf] }
 0x240   : > { %v2814_v49 = vsel %vm12015_vm12, %v2806_v31, %v2813_v19  ;;  %v3016_v43 = vsel %vm12594_vm3, %v2815_v51, %v3015_v20  ;;  %v11559_v55 = vadd.f32 %v13009_v18, %v12714_v57  ;;  %v2791_v26 = vshrl.u32 %v11351_v3, 16 }
 0x241   : > { %3014 = vst.msk [vmem:[#allocation3 + $0x94] sm:$0xf] %vm2407_vm5, %v2814_v49  ;;  %3017 = vst [vmem:[#allocation3 + $0x98] sm:$0x1] %v3016_v43  ;;  %v2794_v30 = vshll.u32 %v11351_v3, 16  ;;  %v3304_v1 = vor.u32 %v3303_v14, %v3299_v38  ;;  %v2369_v53 = vadd.f32 %v11557_v36, %v12721_v10  ;;  %v2367_v41 = vadd.f32 %v11558_v8, %v12721_v10 }
 0x242   : > { %v2370_v45 = vadd.f32 %v11559_v55, %v12721_v10  ;;  %v13121_v35 = vcombine.low %v3058_v52, %v13108_v13  ;;  %v3342_v7 = vshll.u32 %v13102_v28, 16  ;;  %v2793_v22 = vrot.slane %v2791_v26, 7  ;;  %v13138_v3 = vld [vmem:[#allocation3 + $0x44] ss:$0 sps:$4 sm:$0x11]  }
 0x243   : > { %v3309_v57 = vsel %vm1279_vm11, %v3304_v1, %v3308_v47  ;;  %v2401_v18 = vmax.f32 %v2369_v53, 0.0  ;;  %v11560_v48 = vadd.f32 %v13016_v15, %v12716_v58  ;;  %v2789_v39 = vrot.slane %v13084_v42, 4  ;;  %v13132_v58 = vld [vmem:[#allocation3 + $0x40] sm:$0xf] }
 0x244   : > { %3484 = vrot.lane.b32.xlu0 %v3309_v57, %s11860_s30  ;;  %v2399_v31 = vmax.f32 %v2367_v41, 0.0  ;;  %v2402_v21 = vmax.f32 %v2370_v45, 0.0  ;;  %v3337_v34 = vshll.u32 %v13121_v35, 16  ;;  %v2796_v61 = vor.u32 %v2794_v30, %v2793_v22  ;;  %v3025_v30 = vld [vmem:[#allocation3 + $0xa8] sm:$0xf] }
 0x245   : > { %v2798_v12 = vrot.slane %v2793_v22, 4  ;;  %v11356_v20 = vpack.c.bf16 %v2401_v18, %v2401_v18  ;;  %v3335_v33 = vshrl.u32 %v13121_v35, 16  ;;  %v2368_v19 = vadd.f32 %v11560_v48, %v12721_v10  ;;  %v3056_v10 = vld [vmem:[#allocation3 + $0x3c] sm:$0xf]  ;;  %v3029_v22 = vld [vmem:[#allocation3 + $0xb0] sm:$0x1] }
 0x246   : > { %v11354_v38 = vpack.c.bf16 %v2399_v31, %v2399_v31  ;;  %v11357_v50 = vpack.c.bf16 %v2402_v21, %v2402_v21  ;;  %v3339_v17 = vrot.slane %v3337_v34, 1  ;;  %v2797_v15 = vsel %vm12015_vm12, %v2789_v39, %v2796_v61  ;;  %v13149_v34 = vld [vmem:[#allocation3 + $0x68] ss:$0 sps:$4 sm:$0x11]  }
 0x247   : > { %v3009_v42 = vsel %vm12594_vm3, %v2798_v12, %v3008_v40  ;;  %v2834_v51 = vshrl.u32 %v11356_v20, 16  ;;  %v3344_v23 = vrot.slane %v3342_v7, 1  ;;  %3007 = vst.msk [vmem:[#allocation3 + $0x88] sm:$0xf] %vm2407_vm5, %v2797_v15  ;;  %v2837_v14 = vshll.u32 %v11356_v20, 16 }
 0x248   : > { %3010 = vst [vmem:[#allocation3 + $0x8c] sm:$0x1] %v3009_v42  ;;  %v2817_v36 = vshrl.u32 %v11354_v38, 16  ;;  %v2820_v8 = vshll.u32 %v11354_v38, 16  ;;  %v2842_v49 = vshrl.u32 %v11357_v50, 16  ;;  %v2845_v47 = vshll.u32 %v11357_v50, 16 }
 0x249   : > { %v2836_v43 = vrot.slane %v2834_v51, 7  ;;  %v3340_v55 = vor.u32 %v3339_v17, %v3335_v33  ;;  %v2400_v26 = vmax.f32 %v2368_v19, 0.0  ;;  %v13142_v52 = vcombine.low %v3056_v10, %v13132_v58  ;;  %v3018_v7 = vld [vmem:[#allocation3 + $0x9c] sm:$0xf]  ;;  %v13153_v20 = vld [vmem:[#allocation3 + $0x64] sm:$0xf] }
 0x24a   : > { %v2819_v1 = vrot.slane %v2817_v36, 7  ;;  %v2844_v53 = vrot.slane %v2842_v49, 7  ;;  %v11561_v41 = vadd.f32 %v13032_v29, %v12733_v11  ;;  %v3330_v48 = vshll.u32 %v13138_v3, 16  ;;  %v11847_v42 = vld [vmem:[%s16772_s2] ss:$0 sm:$0xff] }
 0x24b   : > { %v2839_v45 = vor.u32 %v2837_v14, %v2836_v43  ;;  %v3345_v57 = vsel %vm1279_vm11, %v3340_v55, %v3344_v23  ;;  %v11355_v18 = vpack.c.bf16 %v2400_v26, %v2400_v26  ;;  %v2840_v39 = vrot.slane %v2836_v43, 4  ;;  %v3062_v14 = vld [vmem:[#allocation3 + $0x60] sm:$0xf]  ;;  %v3022_v36 = vld [vmem:[#allocation3 + $0xa4] sm:$0x1] }
 0x24c   : > { %v2822_v40 = vor.u32 %v2820_v8, %v2819_v1  ;;  %v2847_v31 = vor.u32 %v2845_v47, %v2844_v53  ;;  %v2849_v21 = vrot.slane %v2844_v53, 4  ;;  %3490 = vrot.lane.b32.xlu1 %v3345_v57, %s11860_s30  ;;  %v2823_v11 = vrot.slane %v2819_v1, 4 }
 0x24d   : > { %v3026_v61 = vsel %vm12772_vm6, %v2839_v45, %v3025_v30  ;;  %v2825_v29 = vshrl.u32 %v11355_v18, 16  ;;  %v2828_v12 = vshll.u32 %v11355_v18, 16  ;;  %v3325_v17 = vshll.u32 %v13142_v52, 16 }
 0x24e   : > { %3027 = vst [vmem:[#allocation3 + $0xa8] sm:$0xf] %v3026_v61  ;;  %v3019_v33 = vsel %vm12772_vm6, %v2822_v40, %v3018_v7  ;;  %v2848_v38 = vsel %vm12015_vm12, %v2840_v39, %v2847_v31  ;;  %v3030_v50 = vsel %vm12594_vm3, %v2849_v21, %v3029_v22  ;;  %v3323_v15 = vshrl.u32 %v13142_v52, 16  ;;  %v13180_v7 = vld [vmem:[#allocation3 + $0x58] sm:$0xf] }
 0x24f   : > { %3020 = vst [vmem:[#allocation3 + $0x9c] sm:$0xf] %v3019_v33  ;;  %3028 = vst.msk [vmem:[#allocation3 + $0xac] sm:$0xf] %vm2407_vm5, %v2848_v38  ;;  %v2827_v19 = vrot.slane %v2825_v29, 7  ;;  %v2373_v51 = vadd.f32 %v11847_v42, %v11561_v41  ;;  %v11562_v23 = vadd.f32 %v13037_v37, %v12743_v63  ;;  %v3327_v8 = vrot.slane %v3325_v17, 1 }
 0x250   : > { %3031 = vst [vmem:[#allocation3 + $0xb0] sm:$0x1] %v3030_v50  ;;  %v11563_v49 = vadd.f32 %v13041_v62, %v12748_v16  ;;  %v13172_v10 = vcombine.low %v3062_v14, %v13153_v20  ;;  %v3366_v43 = vshll.u32 %v13149_v34, 16  ;;  %v3332_v53 = vrot.slane %v3330_v48, 1 }
 0x251   : > { %v2830_v47 = vor.u32 %v2828_v12, %v2827_v19  ;;  %v2832_v55 = vrot.slane %v2827_v19, 4  ;;  %v2405_v26 = vmax.f32 %v2373_v51, 0.0  ;;  %v2371_v30 = vadd.f32 %v11847_v42, %v11562_v23  ;;  %v13182_v22 = vld [vmem:[#allocation3 + $0x5c] ss:$0 sps:$4 sm:$0x11]  }
 0x252   : > { %v3328_v1 = vor.u32 %v3327_v8, %v3323_v15  ;;  %v2374_v41 = vadd.f32 %v11847_v42, %v11563_v49  ;;  %v3361_v63 = vshll.u32 %v13172_v10, 16  ;;  %v3359_v48 = vshrl.u32 %v13172_v10, 16  ;;  %v3039_v12 = vld [vmem:[#allocation3 + $0xc0] sm:$0xf]  ;;  %v13194_v23 = vld [vmem:[#allocation3 + $0x7c] sm:$0xf] }
 0x253   : > { %v2831_v37 = vsel %vm12015_vm12, %v2823_v11, %v2830_v47  ;;  %v3023_v16 = vsel %vm12594_vm3, %v2832_v55, %v3022_v36  ;;  %v11360_v62 = vpack.c.bf16 %v2405_v26, %v2405_v26  ;;  %v2403_v45 = vmax.f32 %v2371_v30, 0.0  ;;  %v3060_v11 = vld [vmem:[#allocation3 + $0x54] sm:$0xf]  ;;  %v3043_v55 = vld [vmem:[#allocation3 + $0xc8] sm:$0x1] }
 0x254   : > { %3021 = vst.msk [vmem:[#allocation3 + $0xa0] sm:$0xf] %vm2407_vm5, %v2831_v37  ;;  %3024 = vst [vmem:[#allocation3 + $0xa4] sm:$0x1] %v3023_v16  ;;  %v3333_v57 = vsel %vm1279_vm11, %v3328_v1, %v3332_v53  ;;  %v2406_v18 = vmax.f32 %v2374_v41, 0.0  ;;  %v3363_v39 = vrot.slane %v3361_v63, 1  ;;  %v11564_v61 = vadd.f32 %v13048_v4, %v12751_v27 }
 0x255   : > { %3488 = vrot.lane.b32.xlu0 %v3333_v57, %s11860_s30  ;;  %v2868_v40 = vshrl.u32 %v11360_v62, 16  ;;  %v11358_v31 = vpack.c.bf16 %v2403_v45, %v2403_v45  ;;  %v3368_v21 = vrot.slane %v3366_v43, 1  ;;  %v2871_v29 = vshll.u32 %v11360_v62, 16  ;;  %v3032_v36 = vld [vmem:[#allocation3 + $0xb4] sm:$0xf] }
 0x256   : > { %v11361_v33 = vpack.c.bf16 %v2406_v18, %v2406_v18  ;;  %v3364_v38 = vor.u32 %v3363_v39, %v3359_v48  ;;  %v13191_v50 = vcombine.low %v3060_v11, %v13180_v7  ;;  %v2372_v15 = vadd.f32 %v11847_v42, %v11564_v61  ;;  %v3066_v4 = vld [vmem:[#allocation3 + $0x78] sm:$0xf]  ;;  %v13199_v42 = vld [vmem:[#allocation3 + $0x80] ss:$0 sps:$4 sm:$0x11]  }
 0x257   : > { %v2870_v17 = vrot.slane %v2868_v40, 7  ;;  %v2851_v19 = vshrl.u32 %v11358_v31, 16  ;;  %v3354_v51 = vshll.u32 %v13182_v22, 16  ;;  %v2854_v14 = vshll.u32 %v11358_v31, 16  ;;  %v13205_v37 = vld [vmem:[#allocation3 + $0x70] sm:$0xf] }
 0x258   : > { %v2876_v8 = vshrl.u32 %v11361_v33, 16  ;;  %v2879_v49 = vshll.u32 %v11361_v33, 16  ;;  %v3369_v27 = vsel %vm1279_vm11, %v3364_v38, %v3368_v21  ;;  %v2404_v26 = vmax.f32 %v2372_v15, 0.0  ;;  %v13209_v18 = vld [vmem:[#allocation3 + $0x74] ss:$0 sps:$4 sm:$0x11]  }
 0x259   : > { %v2873_v43 = vor.u32 %v2871_v29, %v2870_v17  ;;  %v2853_v47 = vrot.slane %v2851_v19, 7  ;;  %3494 = vrot.lane.b32.xlu1 %v3369_v27, %s11860_s30  ;;  %v3347_v30 = vshrl.u32 %v13191_v50, 16  ;;  %v2874_v1 = vrot.slane %v2870_v17, 4  ;;  %v13212_v21 = vld [vmem:[#allocation3 + $0x94] sm:$0xf] }
 0x25a   : > { %v2878_v53 = vrot.slane %v2876_v8, 7  ;;  %v3349_v41 = vshll.u32 %v13191_v50, 16  ;;  %v13203_v63 = vcombine.low %v3066_v4, %v13194_v23  ;;  %v11359_v45 = vpack.c.bf16 %v2404_v26, %v2404_v26  ;;  %v13217_v33 = vld [vmem:[#allocation3 + $0x98] ss:$0 sps:$4 sm:$0x11]  }
 0x25b   : > { %v3040_v16 = vsel %vm12772_vm6, %v2873_v43, %v3039_v12  ;;  %v2856_v62 = vor.u32 %v2854_v14, %v2853_v47  ;;  %v3356_v57 = vrot.slane %v3354_v51, 1  ;;  %v3036_v19 = vld [vmem:[#allocation3 + $0xbc] sm:$0x1]  ;;  %v3390_v51 = vshll.u32 %v13199_v42, 16  ;;  %v3064_v14 = vld [vmem:[#allocation3 + $0x6c] sm:$0xf] }
 0x25c   : > { %3041 = vst [vmem:[#allocation3 + $0xc0] sm:$0xf] %v3040_v16  ;;  %v2881_v48 = vor.u32 %v2879_v49, %v2878_v53  ;;  %v2883_v39 = vrot.slane %v2878_v53, 4  ;;  %v3351_v40 = vrot.slane %v3349_v41, 1  ;;  %v3383_v31 = vshrl.u32 %v13203_v63, 16 }
 0x25d   : > { %v3033_v61 = vsel %vm12772_vm6, %v2856_v62, %v3032_v36  ;;  %v2859_v11 = vshrl.u32 %v11359_v45, 16  ;;  %v2862_v29 = vshll.u32 %v11359_v45, 16  ;;  %v3385_v12 = vshll.u32 %v13203_v63, 16  ;;  %v3070_v8 = vld [vmem:[#allocation3 + $0x90] sm:$0xf] }
 0x25e   : > { %3034 = vst [vmem:[#allocation3 + $0xb4] sm:$0xf] %v3033_v61  ;;  %v2882_v38 = vsel %vm12015_vm12, %v2874_v1, %v2881_v48  ;;  %v3044_v17 = vsel %vm12594_vm3, %v2883_v39, %v3043_v55  ;;  %v3352_v15 = vor.u32 %v3351_v40, %v3347_v30  ;;  %v13226_v27 = vcombine.low %v3064_v14, %v13205_v37  ;;  %v13229_v43 = vld [vmem:[#allocation3 + $0x8c] ss:$0 sps:$4 sm:$0x11]  }
 0x25f   : > { %3042 = vst.msk [vmem:[#allocation3 + $0xc4] sm:$0xf] %vm2407_vm5, %v2882_v38  ;;  %3045 = vst [vmem:[#allocation3 + $0xc8] sm:$0x1] %v3044_v17  ;;  %v2861_v36 = vrot.slane %v2859_v11, 7  ;;  %v3387_v49 = vrot.slane %v3385_v12, 1  ;;  %v13233_v1 = vcombine.low %v3070_v8, %v13212_v21 }
 0x260   : > { %v3378_v4 = vshll.u32 %v13209_v18, 16  ;;  %v2857_v26 = vrot.slane %v2853_v47, 4  ;;  %v3357_v55 = vsel %vm1279_vm11, %v3352_v15, %v3356_v57  ;;  %v3392_v30 = vrot.slane %v3390_v51, 1  ;;  %v13235_v53 = vld [vmem:[#allocation3 + $0x88] sm:$0xf] }
 0x261   : > { %v13237_v41 = vld [vmem:[#allocation3 + $0xac] sm:$0xf]  ;;  %v2864_v16 = vor.u32 %v2862_v29, %v2861_v36  ;;  %v2866_v62 = vrot.slane %v2861_v36, 4  ;;  %3492 = vrot.lane.b32.xlu0 %v3357_v55, %s11860_s30  ;;  %v3388_v45 = vor.u32 %v3387_v49, %v3383_v31  ;;  %v3414_v48 = vshll.u32 %v13217_v33, 16  ;;  %v3068_v39 = vld [vmem:[#allocation3 + $0x84] sm:$0xf] }
 0x262   : > { %v13241_v40 = vld [vmem:[#allocation3 + $0xb0] ss:$0 sps:$4 sm:$0x11]   ;;  %v3371_v47 = vshrl.u32 %v13226_v27, 16  ;;  %v3373_v57 = vshll.u32 %v13226_v27, 16  ;;  %v3409_v61 = vshll.u32 %v13233_v1, 16  ;;  %v13259_v36 = vcombine.low %v3068_v39, %v13235_v53 }
 0x263   : > { %v13246_v11 = vld [vmem:[#allocation3 + $0xa0] sm:$0xf]  ;;  %v2865_v29 = vsel %vm12015_vm12, %v2857_v26, %v2864_v16  ;;  %v3037_v12 = vsel %vm12594_vm3, %v2866_v62, %v3036_v19  ;;  %v3393_v31 = vsel %vm1279_vm11, %v3388_v45, %v3392_v30  ;;  %v3380_v38 = vrot.slane %v3378_v4, 1  ;;  %v3074_v17 = vld [vmem:[#allocation3 + $0xa8] sm:$0xf] }
 0x264   : > { %v13253_v15 = vld [vmem:[#allocation3 + $0xa4] ss:$0 sps:$4 sm:$0x11]   ;;  %3035 = vst.msk [vmem:[#allocation3 + $0xb8] sm:$0xf] %vm2407_vm5, %v2865_v29  ;;  %3498 = vrot.lane.b32.xlu1 %v3393_v31, %s11860_s30  ;;  %v3375_v51 = vrot.slane %v3373_v57, 1  ;;  %v13263_v4 = vcombine.low %v3074_v17, %v13237_v41 }
 0x265   : > { %3038 = vst [vmem:[#allocation3 + $0xbc] sm:$0x1] %v3037_v12  ;;  %v3407_v14 = vshrl.u32 %v13233_v1, 16  ;;  %v3411_v8 = vrot.slane %v3409_v61, 1  ;;  %v3072_v49 = vld [vmem:[#allocation3 + $0x9c] sm:$0xf] }
 0x266   : > { %v3416_v19 = vrot.slane %v3414_v48, 1  ;;  %v3402_v26 = vshll.u32 %v13229_v43, 16  ;;  %v13266_v55 = vcombine.low %v3072_v49, %v13246_v11  ;;  %v3376_v30 = vor.u32 %v3375_v51, %v3371_v47  ;;  %v13270_v57 = vld [vmem:[#allocation3 + $0xc4] sm:$0xf]  ;;  %v3078_v61 = vld [vmem:[#allocation3 + $0xc0] sm:$0xf] }
 0x267   : > { %v3412_v16 = vor.u32 %v3411_v8, %v3407_v14  ;;  %v3397_v62 = vshll.u32 %v13259_v36, 16  ;;  %v3438_v45 = vshll.u32 %v13241_v40, 16  ;;  %16907 = vst [vmem:[#allocation8_spill] sm:$0xff] %v13270_v57  ;;  %v3433_v39 = vshll.u32 %v13263_v4, 16 }
 0x268   : > { %v3426_v48 = vshll.u32 %v13253_v15, 16  ;;  %v3381_v29 = vsel %vm1279_vm11, %v3376_v30, %v3380_v38  ;;  %v3395_v31 = vshrl.u32 %v13259_v36, 16  ;;  %v13277_v47 = vld [vmem:[#allocation3 + $0xc8] ss:$0 sps:$4 sm:$0x11]   ;;  %v3431_v51 = vshrl.u32 %v13263_v4, 16 }
 0x269   : > { %v3417_v12 = vsel %vm1279_vm11, %v3412_v16, %v3416_v19  ;;  %v3399_v17 = vrot.slane %v3397_v62, 1  ;;  %16908 = vst [vmem:[#allocation9_spill] sm:$0xff] %v13277_v47  ;;  %3496 = vrot.lane.b32.xlu0 %v3381_v29, %s11860_s30  ;;  %v3435_v14 = vrot.slane %v3433_v39, 1  ;;  %v3421_v8 = vshll.u32 %v13266_v55, 16  ;;  %v3076_v62 = vld [vmem:[#allocation3 + $0xb4] sm:$0xf] }
 0x26a   : > { %3502 = vrot.lane.b32.xlu1 %v3417_v12, %s11860_s30  ;;  %v13284_v49 = vcombine.low %v3078_v61, %v13270_v57  ;;  %v3404_v30 = vrot.slane %v3402_v26, 1  ;;  %v3440_v19 = vrot.slane %v3438_v45, 1  ;;  %v3419_v16 = vshrl.u32 %v13266_v55, 16 }
 0x26b   : > { %v3400_v38 = vor.u32 %v3399_v17, %v3395_v31  ;;  %v3436_v44 = vor.u32 %v3435_v14, %v3431_v51  ;;  %v3423_v56 = vrot.slane %v3421_v8, 1  ;;  %v3462_v12 = vshll.u32 %v13277_v47, 16  ;;  %v13289_v54 = vld [vmem:[#allocation3 + $0xb8] sm:$0xf]  ;;  %v3046_v14 = vld [vmem:[#allocation3] sm:$0xf] }
 0x26c   : > { %v3457_v29 = vshll.u32 %v13284_v49, 16  ;;  %v3428_v60 = vrot.slane %v3426_v48, 1  ;;  %v13293_v61 = vcombine.low %v3076_v62, %v13289_v54  ;;  %v13295_v26 = vld [vmem:[#allocation3 + $0xbc] ss:$0 sps:$4 sm:$0x11]   ;;  %v3455_v17 = vshrl.u32 %v13284_v49, 16 }
 0x26d   : > { %v3405_v39 = vsel %vm1279_vm11, %v3400_v38, %v3404_v30  ;;  %v3441_v45 = vsel %vm1279_vm11, %v3436_v44, %v3440_v19  ;;  %v3424_v31 = vor.u32 %v3423_v56, %v3419_v16  ;;  %v3047_v8 = vld [vmem:[#allocation3 + $0x4] sm:$0xf]  ;;  %v3450_v48 = vshll.u32 %v13295_v26, 16 }
 0x26e   : > { %3500 = vrot.lane.b32.xlu0 %v3405_v39, %s11860_s30  ;;  %v3459_v51 = vrot.slane %v3457_v29, 1  ;;  %3506 = vrot.lane.b32.xlu1 %v3441_v45, %s11860_s30  ;;  %v3445_v38 = vshll.u32 %v13293_v61, 16  ;;  %v3464_v47 = vrot.slane %v3462_v12, 1  ;;  %v3443_v39 = vshrl.u32 %v13293_v61, 16 }
 0x26f   : > { %v3429_v30 = vsel %vm1279_vm11, %v3424_v31, %v3428_v60  ;;  %v13305_v44 = vcombine.low %v3046_v14, %v3047_v8  ;;  %v3270_v56 = vshll.u32 %v11731_v0, 16  ;;  %v3452_v29 = vrot.slane %v3450_v48, 1 }
 0x270   : > { %v3460_v62 = vor.u32 %v3459_v51, %v3455_v17  ;;  %v3447_v57 = vrot.slane %v3445_v38, 1  ;;  %v3578_v48 = vrot.slane %v13086_v6, 1  ;;  %v11735_v6 = vld [vmem:[%s16773_s3] sm:$0xff]  }
 0x271   : > { %v3263_v45 = vshrl.u32 %v13305_v44, 16  ;;  %v3265_v60 = vshll.u32 %v13305_v44, 16  ;;  %v3272_v17 = vrot.slane %v3270_v56, 1 }
 0x272   : > { %3504 = vrot.lane.b32.xlu0 %v3429_v30, %s11860_s30  ;;  %v3465_v19 = vsel %vm1279_vm11, %v3460_v62, %v3464_v47  ;;  %v3448_v16 = vor.u32 %v3447_v57, %v3443_v39  ;;  %v3103_v47 = vld [vmem:[#allocation3 + $0x24] sm:$0xe]  ;;  %v3100_v62 = vld [vmem:[#allocation3] sm:$0xe] }
 0x273   : > { %3510 = vrot.lane.b32.xlu1 %v3465_v19, %s11860_s30  ;;  %v3267_v31 = vrot.slane %v3265_v60, 1  ;;  %v10810_v38 = vcombine.low %v3103_v47, %v13077_v5  ;;  %v10807_v56 = vcombine.low %v3100_v62, %v3047_v8  ;;  %v3569_v19 = vrot.slane %v11731_v0, 1  ;;  %v11738_v8 = vld [vmem:[%s16773_s3 + $0x8] sm:$0xff]  }
 0x274   : > { %v3453_v12 = vsel %vm1279_vm11, %v3448_v16, %v3452_v29  ;;  %v13344_v60 = vld [vmem:[#allocation3 + $0xd0] sm:$0xf] }
 0x275   : > { %v3268_v51 = vor.u32 %v3267_v31, %v3263_v45  ;;  %v3577_v57 = vrot.slane %v10810_v38, 1  ;;  %v3568_v5 = vrot.slane %v10807_v56, 1  ;;  %v3080_v45 = vld [vmem:[#allocation3 + $0xcc] sm:$0xf]  ;;  %v3104_v47 = vld [vmem:[#allocation3 + $0x30] sm:$0xe] }
 0x276   : > { %3508 = vrot.lane.b32.xlu0 %v3453_v12, %s11860_s30  ;;  %v16909_v12 = vmov 0   ;;  %v13348_v31 = vcombine.low %v3080_v45, %v13344_v60  ;;  %v11740_v38 = vld [vmem:[%s16773_s3 + $0x10] sm:$0xff]   ;;  %v11742_v56 = vld [vmem:[%s16773_s3 + $0x18] sm:$0xff]   ;;  %v11743_v45 = vld [vmem:[%s16773_s3 + $0x20] sm:$0xff]  }
 0x277   : > { %v3273_v14 = vsel %vm1279_vm11, %v3268_v51, %v3272_v17  ;;  %v13324_v16 = vsel %vm1586_vm9, %v3577_v57, %v3578_v48  ;;  %v13332_v29 = vsel %vm1586_vm9, %v3568_v5, %v3569_v19  ;;  %v10811_v57 = vcombine.low %v3104_v47, %v13053_v2 }
 0x278   : > { %v3467_v17 = vshrl.u32 %v13348_v31, 16  ;;  %v3469_v51 = vshll.u32 %v13348_v31, 16  ;;  %v3581_v5 = vrot.slane %v13063_v24, 1  ;;  %v3584_v47 = vrot.slane %v13138_v3, 1 }
 0x279   : > { %v3580_v19 = vrot.slane %v10811_v57, 1 }
 0x27a   : > { %3478 = vrot.lane.b32.xlu0 %v3273_v14, %s11860_s30  ;;  %v3471_v48 = vrot.slane %v3469_v51, 1 }
 0x27b   : > { %v13379_v24 = vsel %vm1586_vm9, %v3580_v19, %v3581_v5  ;;  %v3107_v5 = vld [vmem:[#allocation3 + $0x54] sm:$0xe] }
 0x27c   : > { %v3472_v62 = vor.u32 %v3471_v48, %v3467_v17  ;;  %v3106_v48 = vld [vmem:[#allocation3 + $0x48] sm:$0xe] }
 0x27d   : > { %v10813_v3 = vcombine.low %v3106_v48, %v13108_v13  ;;  %v11749_v13 = vld [vmem:[%s16773_s3 + $0x40] sm:$0xff]  }
 0x27e   : > { %v3109_v48 = vld [vmem:[#allocation3 + $0x6c] sm:$0xe] }
 0x2a3   : > { %v3483_v30 = vpop.permute.xlu1 %3482 }
 0x2a4   : > { %v13320_v39 = vsel %vm3622_vm4, %v12994_v9, %v3483_v30 }
 0x2a5   : > { %4376 = vmatmul.mubr.bf16.vlgmr.msra.gmra.mrb[32].mxu0 %v13320_v39 }
 0x2a6   : > { %10942 = vmatprep.mubr.msk.bf16.mxu0 %vm3622_vm4, %v13324_v16 }
 0x2a8   : > { %v3481_v9 = vpop.permute.xlu0 %3480 }
 0x2a9   : > { %v13336_v0 = vsel %vm3622_vm4, %v13029_v59, %v3481_v9  ;;  %v13350_v59 = vld [vmem:[#allocation3 + $0xd4] ss:$0 sps:$4 sm:$0x11]  }
 0x2aa   : > { %3879 = vmatmul.mubr.bf16.vlgmr.msra.gmra.mrb[32].mxu1 %v13336_v0  ;;  %v3474_v14 = vshll.u32 %v13350_v59, 16 }
 0x2ab   : > { %10862 = vmatprep.mubr.msk.bf16.mxu1 %vm3622_vm4, %v12976_v25  ;;  %4083 = vmatpush1.bf16.msra.mxu1 %v11735_v6 }
 0x2ac   : > { %4084 = vmatprep.subr.bf16.mxu1 %v16909_v12  ;;  %v3476_v30 = vrot.slane %v3474_v14, 1 }
 0x2ae   : > { %v3477_v2 = vsel %vm1279_vm11, %v3472_v62, %v3476_v30  ;;  %v3586_v30 = vrot.slane %v10813_v3, 1  ;;  %v3587_v62 = vrot.slane %v13102_v28, 1  ;;  %v10814_v28 = vcombine.low %v3107_v5, %v13180_v7  ;;  %v11751_v7 = vld [vmem:[%s16773_s3 + $0x50] sm:$0xff]  }
 0x2af   : > { %4085 = vmatpush1.bf16.msra.mxu1 %v11738_v8  ;;  %3512 = vrot.lane.b32.xlu1 %v3477_v2, %s11860_s30  ;;  %v3105_v8 = vld [vmem:[#allocation3 + $0x3c] sm:$0xe]  ;;  %v3487_v51 = vpop.permute.xlu1 %3486 }
 0x2b0   : > { %4086 = vmatprep.subr.bf16.mxu1 %v16909_v12  ;;  %v10812_v17 = vcombine.low %v3105_v8, %v13132_v58  ;;  %v13395_v58 = vsel %vm3622_vm4, %v13068_v46, %v3487_v51  ;;  %v11748_v46 = vld [vmem:[%s16773_s3 + $0x38] sm:$0xff]   ;;  %v13426_v2 = vsel %vm1586_vm9, %v3586_v30, %v3587_v62  ;;  %v3589_v8 = vrot.slane %v10814_v28, 1 }
 0x2b2   : > { %3887 = vmatmul.mubr.bf16.gmra.mrb[36].mxu1 %v13320_v39  ;;  %v3583_v14 = vrot.slane %v10812_v17, 1 }
 0x2b3   : > { %10863 = vmatprep.mubr.msk.bf16.mxu1 %vm3622_vm4, %v13324_v16  ;;  %4087 = vmatpush1.bf16.msra.mxu1 %v11740_v38  ;;  %v11746_v38 = vld [vmem:[%s16773_s3 + $0x30] sm:$0xff]  }
 0x2b4   : > { %4088 = vmatprep.subr.bf16.mxu1 %v16909_v12  ;;  %v13402_v57 = vsel %vm1586_vm9, %v3583_v14, %v3584_v47 }
 0x2b6   : > { %v3485_v6 = vpop.permute.xlu0 %3484 }
 0x2b7   : > { %v13372_v9 = vsel %vm3622_vm4, %v13090_v32, %v3485_v6  ;;  %4089 = vmatpush1.bf16.msra.mxu1 %v11742_v56  ;;  %v11745_v32 = vld [vmem:[%s16773_s3 + $0x28] sm:$0xff]  }
 0x2b8   : > { %4384 = vmatmul.mubr.bf16.gmra.mrb[36].mxu0 %v13372_v9  ;;  %4090 = vmatprep.subr.bf16.mxu1 %v16909_v12 }
 0x2b9   : > { %10943 = vmatprep.mubr.msk.bf16.mxu0 %vm3622_vm4, %v13379_v24 }
 0x2ba   : > { %3895 = vmatmul.mubr.bf16.gmra.mrb[40].mxu1 %v13372_v9 }
 0x2bb   : > { %10864 = vmatprep.mubr.msk.bf16.mxu1 %vm3622_vm4, %v13379_v24  ;;  %4091 = vmatpush1.bf16.msra.mxu1 %v11743_v45  ;;  %v3590_v45 = vrot.slane %v13182_v22, 1 }
 0x2bc   : > { %4092 = vmatprep.subr.bf16.mxu1 %v16909_v12 }
 0x2bd   : > { %v13449_v51 = vsel %vm1586_vm9, %v3589_v8, %v3590_v45 }
 0x2be   : > { %v3491_v6 = vpop.permute.xlu1 %3490 }
 0x2bf   : > { %4093 = vmatpush1.bf16.msra.mxu1 %v11745_v32  ;;  %v13444_v17 = vsel %vm3622_vm4, %v13121_v35, %v3491_v6  ;;  %v3108_v32 = vld [vmem:[#allocation3 + $0x60] sm:$0xe] }
 0x2c0   : > { %4392 = vmatmul.mubr.bf16.gmra.mrb[40].mxu0 %v13395_v58  ;;  %4094 = vmatprep.subr.bf16.mxu1 %v16909_v12  ;;  %v10815_v14 = vcombine.low %v3108_v32, %v13153_v20  ;;  %v11752_v35 = vld [vmem:[%s16773_s3 + $0x58] sm:$0xff]  }
 0x2c1   : > { %10944 = vmatprep.mubr.msk.bf16.mxu0 %vm3622_vm4, %v13402_v57 }
 0x2c2   : > { %3903 = vmatmul.mubr.bf16.gmra.mrb[44].mxu1 %v13395_v58  ;;  %v3592_v47 = vrot.slane %v10815_v14, 1 }
 0x2c3   : > { %10865 = vmatprep.mubr.msk.bf16.mxu1 %vm3622_vm4, %v13402_v57  ;;  %4095 = vmatpush1.bf16.msra.mxu1 %v11746_v38  ;;  %v3593_v38 = vrot.slane %v13149_v34, 1 }
 0x2c4   : > { %4096 = vmatprep.subr.bf16.mxu1 %v16909_v12 }
 0x2c5   : > { %v13468_v3 = vsel %vm1586_vm9, %v3592_v47, %v3593_v38 }
 0x2c7   : > { %v3489_v56 = vpop.permute.xlu0 %3488  ;;  %4097 = vmatpush1.bf16.msra.mxu1 %v11748_v46  ;;  %v10816_v46 = vcombine.low %v3109_v48, %v13205_v37 }
 0x2c8   : > { %v13421_v19 = vsel %vm3622_vm4, %v13142_v52, %v3489_v56  ;;  %4098 = vmatprep.subr.bf16.mxu1 %v16909_v12  ;;  %v11750_v52 = vld [vmem:[%s16773_s3 + $0x48] sm:$0xff]   ;;  %v3110_v56 = vld [vmem:[#allocation3 + $0x78] sm:$0xe] }
 0x2c9   : > { %4400 = vmatmul.mubr.bf16.gmra.mrb[44].mxu0 %v13421_v19  ;;  %v3595_v30 = vrot.slane %v10816_v46, 1  ;;  %v3114_v46 = vld [vmem:[#allocation3 + $0xa8] sm:$0xe] }
 0x2ca   : > { %10945 = vmatprep.mubr.msk.bf16.mxu0 %vm3622_vm4, %v13426_v2  ;;  %3911 = vmatmul.mubr.bf16.gmra.mrb[48].mxu1 %v13421_v19 }
 0x2cb   : > { %10866 = vmatprep.mubr.msk.bf16.mxu1 %vm3622_vm4, %v13426_v2  ;;  %4099 = vmatpush1.bf16.msra.mxu1 %v11749_v13  ;;  %v3495_v34 = vpop.permute.xlu1 %3494  ;;  %v10817_v13 = vcombine.low %v3110_v56, %v13194_v23  ;;  %v3115_v56 = vld [vmem:[#allocation3 + $0xb4] sm:$0xe] }
 0x2cc   : > { %4100 = vmatprep.subr.bf16.mxu1 %v16909_v12  ;;  %v13479_v62 = vsel %vm3622_vm4, %v13172_v10, %v3495_v34  ;;  %v3599_v10 = vrot.slane %v13199_v42, 1  ;;  %v10821_v34 = vcombine.low %v3114_v46, %v13237_v41 }
 0x2cd   : > { %v3598_v5 = vrot.slane %v10817_v13, 1  ;;  %v10822_v13 = vcombine.low %v3115_v56, %v13289_v54 }
 0x2cf   : > { %4101 = vmatpush1.bf16.msra.mxu1 %v11750_v52  ;;  %v3111_v52 = vld [vmem:[#allocation3 + $0x84] sm:$0xe]  ;;  %v13498_v23 = vsel %vm1586_vm9, %v3598_v5, %v3599_v10  ;;  %v3116_v10 = vld [vmem:[#allocation3 + $0xc0] sm:$0xe] }
 0x2d0   : > { %4102 = vmatprep.subr.bf16.mxu1 %v16909_v12  ;;  %v10818_v6 = vcombine.low %v3111_v52, %v13235_v53  ;;  %v16910_v52 = vld [vmem:[#allocation8_spill] sm:$0xff] }
 0x2d1   : > { %4408 = vmatmul.mubr.bf16.gmra.mrb[48].mxu0 %v13444_v17 }
 0x2d2   : > { %10946 = vmatprep.mubr.msk.bf16.mxu0 %vm3622_vm4, %v13449_v51  ;;  %3919 = vmatmul.mubr.bf16.gmra.mrb[52].mxu1 %v13444_v17  ;;  %v3601_v8 = vrot.slane %v10818_v6, 1  ;;  %v10823_v6 = vcombine.low %v3116_v10, %v16910_v52 }
 0x2d3   : > { %10867 = vmatprep.mubr.msk.bf16.mxu1 %vm3622_vm4, %v13449_v51  ;;  %4103 = vmatpush1.bf16.msra.mxu1 %v11751_v7  ;;  %v3493_v22 = vpop.permute.xlu0 %3492  ;;  %v3112_v7 = vld [vmem:[#allocation3 + $0x90] sm:$0xe] }
 0x2d4   : > { %4104 = vmatprep.subr.bf16.mxu1 %v16909_v12  ;;  %v13464_v20 = vsel %vm3622_vm4, %v13191_v50, %v3493_v22  ;;  %v3596_v50 = vrot.slane %v13209_v18, 1  ;;  %v10819_v32 = vcombine.low %v3112_v7, %v13212_v21  ;;  %v3113_v22 = vld [vmem:[#allocation3 + $0x9c] sm:$0xe] }
 0x2d5   : > { %v10820_v47 = vcombine.low %v3113_v22, %v13246_v11 }
 0x2d6   : > { %v13483_v37 = vsel %vm1586_vm9, %v3595_v30, %v3596_v50  ;;  %v3499_v42 = vpop.permute.xlu1 %3498  ;;  %v3604_v14 = vrot.slane %v10819_v32, 1  ;;  %v3610_v30 = vrot.slane %v10821_v34, 1 }
 0x2d7   : > { %4105 = vmatpush1.bf16.msra.mxu1 %v11752_v35  ;;  %v13509_v45 = vsel %vm3622_vm4, %v13203_v63, %v3499_v42  ;;  %v3605_v63 = vrot.slane %v13217_v33, 1  ;;  %v3607_v38 = vrot.slane %v10820_v47, 1  ;;  %v3616_v42 = vrot.slane %v10823_v6, 1 }
 0x2d9   : > { %4416 = vmatmul.mubr.bf16.gmra.mrb[52].mxu0 %v13464_v20  ;;  %v13528_v21 = vsel %vm1586_vm9, %v3604_v14, %v3605_v63  ;;  %v3117_v63 = vld [vmem:[#allocation3 + $0xcc] sm:$0xe] }
 0x2da   : > { %10947 = vmatprep.mubr.msk.bf16.mxu0 %vm3622_vm4, %v13468_v3  ;;  %3927 = vmatmul.mubr.bf16.gmra.mrb[56].mxu1 %v13464_v20  ;;  %v10824_v47 = vcombine.low %v3117_v63, %v13344_v60 }
 0x2db   : > { %10868 = vmatprep.mubr.msk.bf16.mxu1 %vm3622_vm4, %v13468_v3  ;;  %v3497_v18 = vpop.permute.xlu0 %3496 }
 0x2dc   : > { %v13494_v28 = vsel %vm3622_vm4, %v13226_v27, %v3497_v18  ;;  %v3602_v27 = vrot.slane %v13229_v43, 1  ;;  %v3503_v33 = vpop.permute.xlu1 %3502  ;;  %v3613_v18 = vrot.slane %v10822_v13, 1 }
 0x2dd   : > { %v13539_v48 = vsel %vm3622_vm4, %v13233_v1, %v3503_v33  ;;  %v3611_v1 = vrot.slane %v13241_v40, 1  ;;  %v3620_v33 = vrot.slane %v13350_v59, 1 }
 0x2de   : > { %v13513_v53 = vsel %vm1586_vm9, %v3601_v8, %v3602_v27 }
 0x2df   : > { %v13558_v41 = vsel %vm1586_vm9, %v3610_v30, %v3611_v1 }
 0x2e0   : > { %v3501_v43 = vpop.permute.xlu0 %3500  ;;  %v3507_v40 = vpop.permute.xlu1 %3506 }
 0x2e1   : > { %4424 = vmatmul.mubr.bf16.gmra.mrb[56].mxu0 %v13479_v62  ;;  %v13524_v35 = vsel %vm3622_vm4, %v13259_v36, %v3501_v43  ;;  %v3608_v36 = vrot.slane %v13253_v15, 1  ;;  %v13569_v5 = vsel %vm3622_vm4, %v13263_v4, %v3507_v40  ;;  %v16911_v4 = vld [vmem:[#allocation9_spill] sm:$0xff] }
 0x2e2   : > { %10948 = vmatprep.mubr.msk.bf16.mxu0 %vm3622_vm4, %v13483_v37  ;;  %3935 = vmatmul.mubr.bf16.gmra.mrb[60].mxu1 %v13479_v62  ;;  %v3617_v8 = vrot.slane %v16911_v4, 1 }
 0x2e3   : > { %10869 = vmatprep.mubr.msk.bf16.mxu1 %vm3622_vm4, %v13483_v37  ;;  %v13543_v11 = vsel %vm1586_vm9, %v3607_v38, %v3608_v36  ;;  %v3619_v38 = vrot.slane %v10824_v47, 1  ;;  %v16912_v36 = vld [vmem:[#allocation7_spill] sm:$0xff] }
 0x2e4   : > { %v3505_v15 = vpop.permute.xlu0 %3504  ;;  %v3618_v7 = vsel %vm1586_vm9, %v3616_v42, %v3617_v8 }
 0x2e5   : > { %v13554_v50 = vsel %vm3622_vm4, %v13266_v55, %v3505_v15  ;;  %v3614_v55 = vrot.slane %v13295_v26, 1  ;;  %v3511_v32 = vpop.permute.xlu1 %3510 }
 0x2e6   : > { %v3672_v43 = vsel %vm3622_vm4, %v13284_v49, %v3511_v32 }
 0x2e7   : > { %v13573_v54 = vsel %vm1586_vm9, %v3613_v18, %v3614_v55 }
 0x2e8   : > { %v3509_v26 = vpop.permute.xlu0 %3508 }
 0x2e9   : > { %4432 = vmatmul.mubr.bf16.gmra.mrb[60].mxu0 %v13494_v28  ;;  %v13584_v27 = vsel %vm3622_vm4, %v13293_v61, %v3509_v26 }
 0x2ea   : > { %10949 = vmatprep.mubr.msk.bf16.mxu0 %vm3622_vm4, %v13498_v23  ;;  %3943 = vmatmul.mubr.bf16.gmra.mrb[64].mxu1 %v13494_v28 }
 0x2eb   : > { %10870 = vmatprep.mubr.msk.bf16.mxu1 %vm3622_vm4, %v13498_v23 }
 0x2ec   : > { %v3479_v61 = vpop.permute.xlu0 %3478 }
 0x2ed   : > { %v3624_v14 = vsel %vm3622_vm4, %v13305_v44, %v3479_v61  ;;  %v11757_v44 = vld [vmem:[%s16775_s5] ss:$8 sps:$4 sm:$0xff]  }
 0x2f1   : > { %4440 = vmatmul.mubr.bf16.gmra.mrb[64].mxu0 %v13509_v45 }
 0x2f2   : > { %10950 = vmatprep.mubr.msk.bf16.mxu0 %vm3622_vm4, %v13513_v53  ;;  %3951 = vmatmul.mubr.bf16.gmra.mrb[68].mxu1 %v13509_v45 }
 0x2f3   : > { %10871 = vmatprep.mubr.msk.bf16.mxu1 %vm3622_vm4, %v13513_v53 }
 0x2f9   : > { %4448 = vmatmul.mubr.bf16.gmra.mrb[68].mxu0 %v13524_v35 }
 0x2fa   : > { %10951 = vmatprep.mubr.msk.bf16.mxu0 %vm3622_vm4, %v13528_v21  ;;  %3959 = vmatmul.mubr.bf16.gmra.mrb[72].mxu1 %v13524_v35 }
 0x2fb   : > { %10872 = vmatprep.mubr.msk.bf16.mxu1 %vm3622_vm4, %v13528_v21 }
 0x301   : > { %4456 = vmatmul.mubr.bf16.gmra.mrb[72].mxu0 %v13539_v48 }
 0x302   : > { %10952 = vmatprep.mubr.msk.bf16.mxu0 %vm3622_vm4, %v13543_v11  ;;  %3967 = vmatmul.mubr.bf16.gmra.mrb[76].mxu1 %v13539_v48 }
 0x303   : > { %10873 = vmatprep.mubr.msk.bf16.mxu1 %vm3622_vm4, %v13543_v11 }
 0x309   : > { %4464 = vmatmul.mubr.bf16.gmra.mrb[76].mxu0 %v13554_v50 }
 0x30a   : > { %10953 = vmatprep.mubr.msk.bf16.mxu0 %vm3622_vm4, %v13558_v41  ;;  %3975 = vmatmul.mubr.bf16.gmra.mrb[80].mxu1 %v13554_v50 }
 0x30b   : > { %10874 = vmatprep.mubr.msk.bf16.mxu1 %vm3622_vm4, %v13558_v41 }
 0x311   : > { %4472 = vmatmul.mubr.bf16.gmra.mrb[80].mxu0 %v13569_v5 }
 0x312   : > { %10954 = vmatprep.mubr.msk.bf16.mxu0 %vm3622_vm4, %v13573_v54  ;;  %3983 = vmatmul.mubr.bf16.gmra.mrb[84].mxu1 %v13569_v5 }
 0x313   : > { %10875 = vmatprep.mubr.msk.bf16.mxu1 %vm3622_vm4, %v13573_v54 }
 0x319   : > { %4480 = vmatmul.mubr.bf16.gmra.mrb[84].mxu0 %v13584_v27 }
 0x31a   : > { %10955 = vmatprep.mubr.msk.bf16.mxu0 %vm3622_vm4, %v3618_v7  ;;  %3991 = vmatmul.mubr.bf16.gmra.mrb[88].mxu1 %v13584_v27 }
 0x31b   : > { %10876 = vmatprep.mubr.msk.bf16.mxu1 %vm3622_vm4, %v3618_v7 }
 0x321   : > { %4488 = vmatmul.mubr.bf16.gmra.mrb[88].mxu0 %v3672_v43  ;;  %v3513_v22 = vpop.permute.xlu1 %3512 }
 0x322   : > { %3999 = vmatmul.mubr.bf16.gmra.mrb[92].mxu1 %v3672_v43  ;;  %v3675_v49 = vsel %vm3622_vm4, %v13348_v31, %v3513_v22 }
 0x323   : > { %10889 = vmatprep.mubr.msk.bf16.mxu1 %vm3622_vm4, %v13332_v29  ;;  %v3621_v29 = vsel %vm1586_vm9, %v3619_v38, %v3620_v33 }
 0x324   : > { %10956 = vmatprep.mubr.msk.bf16.mxu0 %vm3622_vm4, %v3621_v29  ;;  %v11760_v29 = vld [vmem:[%s16775_s5 + $0x10] ss:$8 sps:$4 sm:$0xff]  }
 0x329   : > { %4496 = vmatmul.mubr.bf16.gmra.mrb[92].mxu0 %v3675_v49 }
 0x32a   : > { %4115 = vmatmul.mubr.bf16.vlgmr.msra.gmra.mrb[96].mxu1 %v3624_v14 }
 0x32b   : > { %10890 = vmatprep.mubr.msk.bf16.mxu1 %vm3622_vm4, %v16912_v36 }
 0x332   : > { %4123 = vmatmul.mubr.bf16.gmra.mrb[100].mxu1 %v13336_v0 }
 0x333   : > { %10891 = vmatprep.mubr.msk.bf16.mxu1 %vm3622_vm4, %v12976_v25 }
 0x33a   : > { %4131 = vmatmul.mubr.bf16.gmra.mrb[104].mxu1 %v13320_v39  ;;  %v11759_v39 = vld [vmem:[%s16775_s5 + $0x4] ss:$8 sps:$4 sm:$0xff]  }
 0x33b   : > { %10892 = vmatprep.mubr.msk.bf16.mxu1 %vm3622_vm4, %v13324_v16  ;;  %5618 = vmatprep.subr.bf16.mxu1 %v11759_v39 }
 0x33c   : > { %5619 = vmatpush1.bf16.msra.mxu1 %v11757_v44  ;;  %v11762_v44 = vld [vmem:[%s16775_s5 + $0x14] ss:$8 sps:$4 sm:$0xff]  }
 0x33d   : > { %5620 = vmatprep.subr.bf16.mxu1 %v11762_v44 }
 0x340   : > { %5621 = vmatpush1.bf16.msra.mxu1 %v11760_v29 }
 0x342   : > { %4139 = vmatmul.mubr.bf16.gmra.mrb[108].mxu1 %v13372_v9 }
 0x343   : > { %10893 = vmatprep.mubr.msk.bf16.mxu1 %vm3622_vm4, %v13379_v24 }
 0x34a   : > { %4147 = vmatmul.mubr.bf16.gmra.mrb[112].mxu1 %v13395_v58 }
 0x34b   : > { %10894 = vmatprep.mubr.msk.bf16.mxu1 %vm3622_vm4, %v13402_v57 }
 0x352   : > { %4155 = vmatmul.mubr.bf16.gmra.mrb[116].mxu1 %v13421_v19 }
 0x353   : > { %10895 = vmatprep.mubr.msk.bf16.mxu1 %vm3622_vm4, %v13426_v2 }
 0x35a   : > { %4163 = vmatmul.mubr.bf16.gmra.mrb[120].mxu1 %v13444_v17 }
 0x35b   : > { %10896 = vmatprep.mubr.msk.bf16.mxu1 %vm3622_vm4, %v13449_v51 }
 0x362   : > { %4171 = vmatmul.mubr.bf16.gmra.mrb[124].mxu1 %v13464_v20 }
 0x363   : > { %10897 = vmatprep.mubr.msk.bf16.mxu1 %vm3622_vm4, %v13468_v3 }
 0x36a   : > { %4179 = vmatmul.mubr.bf16.gmra.mrb[128].mxu1 %v13479_v62 }
 0x36b   : > { %10898 = vmatprep.mubr.msk.bf16.mxu1 %vm3622_vm4, %v13483_v37 }
 0x372   : > { %4187 = vmatmul.mubr.bf16.gmra.mrb[132].mxu1 %v13494_v28 }
 0x373   : > { %10899 = vmatprep.mubr.msk.bf16.mxu1 %vm3622_vm4, %v13498_v23 }
 0x378   : > { %v13632_v25 = vpop.f32.mrb[32].mxu0 }
 0x379   : > { %v4379_v16 = vpop.f32.mrb[33].mxu0 }
 0x37a   : > { %v13640_v0 = vpop.f32.mrb[34].mxu0  ;;  %4195 = vmatmul.mubr.bf16.gmra.mrb[136].mxu1 %v13509_v45 }
 0x37b   : > { %v4382_v60 = vpop.f32.mrb[35].mxu0  ;;  %10900 = vmatprep.mubr.msk.bf16.mxu1 %vm3622_vm4, %v13513_v53 }
 0x37d   : > { %v13645_v31 = vpop.f32.mrb[32].mxu1 }
 0x37e   : > { %v3882_v59 = vpop.f32.mrb[33].mxu1 }
 0x37f   : > { %v13647_v9 = vpop.f32.mrb[34].mxu1 }
 0x380   : > { %v3885_v24 = vpop.f32.mrb[35].mxu1 }
 0x382   : > { %4203 = vmatmul.mubr.bf16.gmra.mrb[140].mxu1 %v13524_v35 }
 0x383   : > { %10901 = vmatprep.mubr.msk.bf16.mxu1 %vm3622_vm4, %v13528_v21 }
 0x385   : > { %v13652_v58 = vpop.f32.mrb[36].mxu1 }
 0x386   : > { %v3890_v57 = vpop.f32.mrb[37].mxu1 }
 0x387   : > { %v13654_v19 = vpop.f32.mrb[38].mxu1 }
 0x388   : > { %v3893_v2 = vpop.f32.mrb[39].mxu1 }
 0x38a   : > { %4211 = vmatmul.mubr.bf16.gmra.mrb[144].mxu1 %v13539_v48 }
 0x38b   : > { %v13657_v17 = vpop.f32.mrb[36].mxu0  ;;  %10902 = vmatprep.mubr.msk.bf16.mxu1 %vm3622_vm4, %v13543_v11 }
 0x38c   : > { %v4387_v51 = vpop.f32.mrb[37].mxu0 }
 0x38d   : > { %v13661_v20 = vpop.f32.mrb[38].mxu0  ;;  %v13663_v3 = vpop.f32.mrb[40].mxu1 }
 0x38e   : > { %v4390_v62 = vpop.f32.mrb[39].mxu0  ;;  %v3898_v37 = vpop.f32.mrb[41].mxu1 }
 0x38f   : > { %v13665_v28 = vpop.f32.mrb[42].mxu1 }
 0x390   : > { %v3901_v23 = vpop.f32.mrb[43].mxu1 }
 0x392   : > { %4219 = vmatmul.mubr.bf16.gmra.mrb[148].mxu1 %v13554_v50 }
 0x393   : > { %v13668_v45 = vpop.f32.mrb[40].mxu0  ;;  %10903 = vmatprep.mubr.msk.bf16.mxu1 %vm3622_vm4, %v13558_v41 }
 0x394   : > { %v4395_v53 = vpop.f32.mrb[41].mxu0 }
 0x395   : > { %v13672_v35 = vpop.f32.mrb[42].mxu0  ;;  %v13674_v21 = vpop.f32.mrb[44].mxu1 }
 0x396   : > { %v4398_v48 = vpop.f32.mrb[43].mxu0  ;;  %v3906_v46 = vpop.f32.mrb[45].mxu1 }
 0x397   : > { %v13676_v11 = vpop.f32.mrb[46].mxu1 }
 0x398   : > { %v3909_v34 = vpop.f32.mrb[47].mxu1 }
 0x39a   : > { %4227 = vmatmul.mubr.bf16.gmra.mrb[152].mxu1 %v13569_v5 }
 0x39b   : > { %10904 = vmatprep.mubr.msk.bf16.mxu1 %vm3622_vm4, %v13573_v54 }
 0x39c   : > { %v13681_v15 = vpop.f32.mrb[44].mxu0 }
 0x39d   : > { %v4403_v30 = vpop.f32.mrb[45].mxu0  ;;  %v13683_v1 = vpop.f32.mrb[48].mxu1 }
 0x39e   : > { %v13685_v50 = vpop.f32.mrb[46].mxu0  ;;  %v3914_v56 = vpop.f32.mrb[49].mxu1  ;;  %v11763_v30 = vld [vmem:[%s16775_s5 + $0x20] ss:$8 sps:$4 sm:$0xff]  }
 0x39f   : > { %v4406_v41 = vpop.f32.mrb[47].mxu0  ;;  %v13687_v13 = vpop.f32.mrb[50].mxu1  ;;  %v11765_v56 = vld [vmem:[%s16775_s5 + $0x24] ss:$8 sps:$4 sm:$0xff]  }
 0x3a0   : > { %v3917_v40 = vpop.f32.mrb[51].mxu1  ;;  %5622 = vmatprep.subr.bf16.mxu1 %v11765_v56 }
 0x3a1   : > { %v11768_v40 = vld [vmem:[%s16775_s5 + $0x34] ss:$8 sps:$4 sm:$0xff]   ;;  %5623 = vmatpush1.bf16.msra.mxu1 %v11763_v30 }
 0x3a2   : > { %4235 = vmatmul.mubr.bf16.gmra.mrb[156].mxu1 %v13584_v27  ;;  %5624 = vmatprep.subr.bf16.mxu1 %v11768_v40 }
 0x3a3   : > { %5650 = vmatprep.mubr.bf16.mxu1 %v16909_v12 }
 0x3a4   : > { %v13691_v18 = vpop.f32.mrb[48].mxu0 }
 0x3a5   : > { %v4411_v55 = vpop.f32.mrb[49].mxu0  ;;  %v13693_v5 = vpop.f32.mrb[52].mxu1 }
 0x3a6   : > { %v13695_v10 = vpop.f32.mrb[50].mxu0  ;;  %v3922_v54 = vpop.f32.mrb[53].mxu1  ;;  %v11766_v55 = vld [vmem:[%s16775_s5 + $0x30] ss:$8 sps:$4 sm:$0xff]  }
 0x3a7   : > { %v4414_v52 = vpop.f32.mrb[51].mxu0  ;;  %v13697_v6 = vpop.f32.mrb[54].mxu1  ;;  %5625 = vmatpush1.bf16.msra.mxu1 %v11766_v55 }
 0x3a8   : > { %v3925_v26 = vpop.f32.mrb[55].mxu1  ;;  %9888 = vmatprep.subr.bf16.mxu1 %v16909_v12 }
 0x3ac   : > { %v13699_v42 = vpop.f32.mrb[52].mxu0 }
 0x3ad   : > { %v4419_v4 = vpop.f32.mrb[53].mxu0  ;;  %v13701_v8 = vpop.f32.mrb[56].mxu1 }
 0x3ae   : > { %v13703_v27 = vpop.f32.mrb[54].mxu0  ;;  %v3930_v7 = vpop.f32.mrb[57].mxu1 }
 0x3af   : > { %v4422_v32 = vpop.f32.mrb[55].mxu0  ;;  %v13705_v43 = vpop.f32.mrb[58].mxu1 }
 0x3b0   : > { %v3933_v61 = vpop.f32.mrb[59].mxu1 }
 0x3b4   : > { %v13707_v14 = vpop.f32.mrb[56].mxu0 }
 0x3b5   : > { %v4427_v63 = vpop.f32.mrb[57].mxu0  ;;  %v13709_v22 = vpop.f32.mrb[60].mxu1 }
 0x3b6   : > { %v13711_v47 = vpop.f32.mrb[58].mxu0  ;;  %v3938_v33 = vpop.f32.mrb[61].mxu1 }
 0x3b7   : > { %v4430_v38 = vpop.f32.mrb[59].mxu0  ;;  %v13713_v36 = vpop.f32.mrb[62].mxu1 }
 0x3b8   : > { %v3941_v49 = vpop.f32.mrb[63].mxu1 }
 0x3bc   : > { %v13721_v39 = vpop.f32.mrb[60].mxu0 }
 0x3bd   : > { %v4435_v16 = vpop.f32.mrb[61].mxu0  ;;  %v13723_v60 = vpop.f32.mrb[64].mxu1 }
 0x3be   : > { %v13725_v59 = vpop.f32.mrb[62].mxu0  ;;  %v3946_v24 = vpop.f32.mrb[65].mxu1 }
 0x3bf   : > { %v4438_v57 = vpop.f32.mrb[63].mxu0  ;;  %v13727_v2 = vpop.f32.mrb[66].mxu1 }
 0x3c0   : > { %v3949_v51 = vpop.f32.mrb[67].mxu1 }
 0x3c4   : > { %v13729_v62 = vpop.f32.mrb[64].mxu0 }
 0x3c5   : > { %v4443_v37 = vpop.f32.mrb[65].mxu0  ;;  %v13731_v23 = vpop.f32.mrb[68].mxu1 }
 0x3c6   : > { %v13733_v53 = vpop.f32.mrb[66].mxu0  ;;  %v3954_v48 = vpop.f32.mrb[69].mxu1 }
 0x3c7   : > { %v4446_v46 = vpop.f32.mrb[67].mxu0  ;;  %v13735_v34 = vpop.f32.mrb[70].mxu1 }
 0x3c8   : > { %v3957_v41 = vpop.f32.mrb[71].mxu1 }
 0x3cc   : > { %v13749_v54 = vpop.f32.mrb[68].mxu0 }
 0x3cd   : > { %v4451_v52 = vpop.f32.mrb[69].mxu0  ;;  %v13751_v26 = vpop.f32.mrb[72].mxu1 }
 0x3ce   : > { %v13753_v4 = vpop.f32.mrb[70].mxu0  ;;  %v3962_v7 = vpop.f32.mrb[73].mxu1 }
 0x3cf   : > { %v4454_v32 = vpop.f32.mrb[71].mxu0  ;;  %v13755_v61 = vpop.f32.mrb[74].mxu1 }
 0x3d0   : > { %16913 = vst [vmem:[#allocation8_spill] sm:$0xff] %v13755_v61  ;;  %v3965_v63 = vpop.f32.mrb[75].mxu1 }
 0x3d4   : > { %v13758_v33 = vpop.f32.mrb[72].mxu0 }
 0x3d5   : > { %16914 = vst [vmem:[#allocation9_spill] sm:$0xff] %v13758_v33  ;;  %v4459_v38 = vpop.f32.mrb[73].mxu0  ;;  %v13760_v49 = vpop.f32.mrb[76].mxu1 }
 0x3d6   : > { %16915 = vst [vmem:[#allocation7_spill] sm:$0xff] %v13760_v49  ;;  %v13762_v29 = vpop.f32.mrb[74].mxu0  ;;  %v3970_v44 = vpop.f32.mrb[77].mxu1 }
 0x3d7   : > { %16916 = vst [vmem:[#allocation10_spill] sm:$0xff] %v13762_v29  ;;  %v4462_v16 = vpop.f32.mrb[75].mxu0  ;;  %v13764_v24 = vpop.f32.mrb[78].mxu1 }
 0x3d8   : > { %16917 = vst [vmem:[#allocation11_spill] sm:$0xff] %v13764_v24  ;;  %v3973_v57 = vpop.f32.mrb[79].mxu1 }
 0x3dc   : > { %v13766_v51 = vpop.f32.mrb[76].mxu0 }
 0x3dd   : > { %16918 = vst [vmem:[#allocation12_spill] sm:$0xff] %v13766_v51  ;;  %v4467_v37 = vpop.f32.mrb[77].mxu0  ;;  %v13768_v48 = vpop.f32.mrb[80].mxu1 }
 0x3de   : > { %16919 = vst [vmem:[#allocation13_spill] sm:$0xff] %v13768_v48  ;;  %v13770_v46 = vpop.f32.mrb[78].mxu0  ;;  %v3978_v30 = vpop.f32.mrb[81].mxu1  ;;  %v11861_v48 = vmov 1983009808  }
 0x3df   : > { %16920 = vst [vmem:[#allocation14_spill] sm:$0xff] %v13770_v46  ;;  %v4470_v56 = vpop.f32.mrb[79].mxu0  ;;  %v13772_v41 = vpop.f32.mrb[82].mxu1 }
 0x3e0   : > { %16921 = vst [vmem:[#allocation15_spill] sm:$0xff] %v13772_v41  ;;  %v3981_v40 = vpop.f32.mrb[83].mxu1 }
 0x3e4   : > { %v13774_v55 = vpop.f32.mrb[80].mxu0 }
 0x3e5   : > { %16922 = vst [vmem:[#allocation16_spill] sm:$0xff] %v13774_v55  ;;  %v4475_v52 = vpop.f32.mrb[81].mxu0  ;;  %v13776_v7 = vpop.f32.mrb[84].mxu1 }
 0x3e6   : > { %16923 = vst [vmem:[#allocation17_spill] sm:$0xff] %v13776_v7  ;;  %v13778_v32 = vpop.f32.mrb[82].mxu0  ;;  %v3986_v63 = vpop.f32.mrb[85].mxu1 }
 0x3e7   : > { %16924 = vst [vmem:[#allocation18_spill] sm:$0xff] %v13778_v32  ;;  %v4478_v38 = vpop.f32.mrb[83].mxu0  ;;  %v13780_v44 = vpop.f32.mrb[86].mxu1 }
 0x3e8   : > { %16925 = vst [vmem:[#allocation19_spill] sm:$0xff] %v13780_v44  ;;  %v3989_v16 = vpop.f32.mrb[87].mxu1 }
 0x3ec   : > { %v13782_v57 = vpop.f32.mrb[84].mxu0 }
 0x3ed   : > { %16926 = vst [vmem:[#allocation20_spill] sm:$0xff] %v13782_v57  ;;  %v4483_v37 = vpop.f32.mrb[85].mxu0  ;;  %v13784_v30 = vpop.f32.mrb[88].mxu1 }
 0x3ee   : > { %16927 = vst [vmem:[#allocation21_spill] sm:$0xff] %v13784_v30  ;;  %v13786_v56 = vpop.f32.mrb[86].mxu0  ;;  %v3994_v40 = vpop.f32.mrb[89].mxu1 }
 0x3ef   : > { %16928 = vst [vmem:[#allocation22_spill] sm:$0xff] %v13786_v56  ;;  %v4486_v41 = vpop.f32.mrb[87].mxu0  ;;  %v13788_v55 = vpop.f32.mrb[90].mxu1 }
 0x3f0   : > { %16929 = vst [vmem:[#allocation23_spill] sm:$0xff] %v13788_v55  ;;  %v3997_v52 = vpop.f32.mrb[91].mxu1 }
 0x3f4   : > { %v13790_v7 = vpop.f32.mrb[88].mxu0 }
 0x3f5   : > { %16930 = vst [vmem:[#allocation24_spill] sm:$0xff] %v13790_v7  ;;  %v4491_v32 = vpop.f32.mrb[89].mxu0  ;;  %v13792_v63 = vpop.f32.mrb[92].mxu1 }
 0x3f6   : > { %16931 = vst [vmem:[#allocation25_spill] sm:$0xff] %v13792_v63  ;;  %v13794_v38 = vpop.f32.mrb[90].mxu0  ;;  %v4002_v16 = vpop.f32.mrb[93].mxu1  ;;  %v4643_v63 = vlaneseq }
 0x3f7   : > { %16932 = vst [vmem:[#allocation26_spill] sm:$0xff] %v13794_v38  ;;  %v4494_v44 = vpop.f32.mrb[91].mxu0  ;;  %v13796_v57 = vpop.f32.mrb[94].mxu1  ;;  %v4641_v38 = vunpack.c.l.s4 %v11861_v48 }
 0x3f8   : > { %16933 = vst [vmem:[#allocation27_spill] sm:$0xff] %v13796_v57  ;;  %v4005_v37 = vpop.f32.mrb[95].mxu1  ;;  %v13805_v44 = vld [vmem:[%s16774_s4] ss:$0 sm:$0xff] }
 0x3f9   : > { %v13808_v37 = vshrl.u32 %v4643_v63, 7 }
 0x3fb   : > { %16934 = vst [vmem:[#allocation28_spill] sm:$0xff] %v13808_v37 }
 0x3fd   : > { %v4116_v30 = vpop.f32.mrb[96].mxu1 }
 0x3fe   : > { %v4117_v56 = vadd.f32 %v4116_v30, %v13645_v31  ;;  %v4118_v40 = vpop.f32.mrb[97].mxu1 }
 0x3ff   : > { %v4119_v41 = vpop.f32.mrb[98].mxu1 }
 0x400   : > { %v4504_v55 = vadd.f32 %v13632_v25, %v4117_v56  ;;  %v4120_v52 = vadd.f32 %v4119_v41, %v13647_v9  ;;  %v4121_v7 = vpop.f32.mrb[99].mxu1 }
 0x402   : > { %v4505_v32 = vadd.f32 %v13640_v0, %v4120_v52  ;;  %v4543_v9 = vadd.f32 %v13805_v44, %v4504_v55  ;;  %v4642_v0 = vunpack.c.0.s8 %v4641_v38 }
 0x404   : > { %v4544_v40 = vadd.f32 %v13805_v44, %v4505_v32  ;;  %v4575_v57 = vmax.f32 %v4543_v9, 0.0  ;;  %v13817_v63 = vsub.s32 %v4642_v0, %v13808_v37  ;;  %v13821_v32 = vpop.f32.mrb[92].mxu0 }
 0x405   : > { %v4124_v16 = vpop.f32.mrb[100].mxu1  ;;  %16935 = vst [vmem:[#allocation29_spill] sm:$0xff] %v13821_v32 }
 0x406   : > { %v4125_v31 = vadd.f32 %v4124_v16, %v13652_v58  ;;  %v4126_v30 = vpop.f32.mrb[101].mxu1 }
 0x407   : > { %v4127_v25 = vpop.f32.mrb[102].mxu1  ;;  %v4576_v30 = vmax.f32 %v4544_v40, 0.0 }
 0x408   : > { %v4506_v7 = vadd.f32 %v13657_v17, %v4125_v31  ;;  %v4128_v56 = vadd.f32 %v4127_v25, %v13654_v19  ;;  %v4129_v48 = vpop.f32.mrb[103].mxu1 }
 0x409   : > { %v4499_v48 = vpop.f32.mrb[93].mxu0 }
 0x40a   : > { %v4545_v41 = vadd.f32 %v13805_v44, %v4506_v7  ;;  %v4507_v52 = vadd.f32 %v13661_v20, %v4128_v56 }
 0x40c   : > { %v4577_v58 = vmax.f32 %v4545_v41, 0.0  ;;  %v4546_v16 = vadd.f32 %v13805_v44, %v4507_v52 }
 0x40d   : > { %v4132_v55 = vpop.f32.mrb[104].mxu1 }
 0x40e   : > { %v4607_v17 = vmax.f32 %v4575_v57, %v4577_v58  ;;  %v4578_v38 = vmax.f32 %v4546_v16, 0.0  ;;  %v4133_v19 = vadd.f32 %v4132_v55, %v13663_v3  ;;  %v4134_v31 = vpop.f32.mrb[105].mxu1 }
 0x40f   : > { %v4135_v25 = vpop.f32.mrb[106].mxu1 }
 0x410   : > { %v4639_v7 = vcombine.high %v4607_v17, %v4607_v17  ;;  %v4646_v20 = vrot.slane %v4607_v17, %v13817_v63  ;;  %v4608_v9 = vmax.f32 %v4576_v30, %v4578_v38  ;;  %v4508_v56 = vadd.f32 %v13668_v45, %v4133_v19  ;;  %v4137_v0 = vpop.f32.mrb[107].mxu1 }
 0x411   : > { %v4136_v41 = vadd.f32 %v4135_v25, %v13665_v28 }
 0x412   : > { %v4653_v40 = vrot.slane %v4639_v7, %v13817_v63  ;;  %v4654_v57 = vcombine.high %v4646_v20, %v4646_v20  ;;  %v10958_v52 = vrot.slane %v4646_v20, 9  ;;  %v4656_v58 = vcombine.high %v4608_v9, %v4608_v9 }
 0x413   : > { %v4663_v3 = vrot.slane %v4608_v9, %v13817_v63  ;;  %v4509_v16 = vadd.f32 %v13672_v35, %v4136_v41 }
 0x414   : > { %v4655_v55 = vcombine.high %v4653_v40, %v4653_v40  ;;  %v10959_v31 = vrot.slane %v4654_v57, 9  ;;  %v10960_v17 = vrot.slane %v4653_v40, 9  ;;  %v5167_v30 = vmax.f32 %v4646_v20, %v10958_v52 }
 0x415   : > { %v4670_v45 = vrot.slane %v4656_v58, %v13817_v63  ;;  %v4671_v38 = vcombine.high %v4663_v3, %v4663_v3  ;;  %v10962_v19 = vrot.slane %v4663_v3, 9  ;;  %v4140_v28 = vpop.f32.mrb[108].mxu1 }
 0x416   : > { %v10961_v25 = vrot.slane %v4655_v55, 9  ;;  %v5168_v7 = vmax.f32 %v4654_v57, %v10959_v31  ;;  %v5169_v0 = vmax.f32 %v4653_v40, %v10960_v17  ;;  %v4142_v48 = vpop.f32.mrb[109].mxu1  ;;  %v5231_v20 = vpack.c.bf16 %v5167_v30, %v5167_v30 }
 0x417   : > { %v4672_v37 = vcombine.high %v4670_v45, %v4670_v45  ;;  %v10963_v9 = vrot.slane %v4671_v38, 9  ;;  %v10964_v32 = vrot.slane %v4670_v45, 9  ;;  %v5171_v35 = vmax.f32 %v4663_v3, %v10962_v19  ;;  %v4143_v41 = vpop.f32.mrb[110].mxu1 }
 0x418   : > { %v5170_v46 = vmax.f32 %v4655_v55, %v10961_v25  ;;  %v5232_v52 = vpack.c.bf16 %v5168_v7, %v5168_v7  ;;  %v5233_v51 = vpack.c.bf16 %v5169_v0, %v5169_v0  ;;  %v4145_v58 = vpop.f32.mrb[111].mxu1  ;;  %v4547_v17 = vadd.f32 %v13805_v44, %v4508_v56  ;;  %v13831_v55 = vpop.f32.mrb[94].mxu0 }
 0x419   : > { %v10965_v24 = vrot.slane %v4672_v37, 9  ;;  %v5172_v49 = vmax.f32 %v4671_v38, %v10963_v9  ;;  %v5173_v29 = vmax.f32 %v4670_v45, %v10964_v32  ;;  %v5235_v33 = vpack.c.bf16 %v5171_v35, %v5171_v35  ;;  %v4502_v58 = vpop.f32.mrb[95].mxu0 }
 0x41a   : > { %v5234_v40 = vpack.c.bf16 %v5170_v46, %v5170_v46  ;;  %v5380_v57 = vunpack.c.l.b16 %v5232_v52  ;;  %v5381_v31 = vunpack.c.l.b16 %v5233_v51  ;;  %v5379_v30 = vunpack.c.l.b16 %v5231_v20 }
 0x41b   : > { %v5174_v48 = vmax.f32 %v4672_v37, %v10965_v24  ;;  %v5236_v3 = vpack.c.bf16 %v5172_v49, %v5172_v49  ;;  %v5237_v19 = vpack.c.bf16 %v5173_v29, %v5173_v29  ;;  %v5383_v61 = vunpack.c.l.b16 %v5235_v33 }
 0x41c   : > { %v5382_v25 = vunpack.c.l.b16 %v5234_v40  ;;  %v5443_v7 = vrot.slane %v5380_v57, 7  ;;  %v5446_v0 = vrot.slane %v5381_v31, 6  ;;  %v4548_v46 = vadd.f32 %v13805_v44, %v4509_v16 }
 0x41d   : > { %v5238_v38 = vpack.c.bf16 %v5174_v48, %v5174_v48  ;;  %v5384_v32 = vunpack.c.l.b16 %v5236_v3  ;;  %v5385_v45 = vunpack.c.l.b16 %v5237_v19  ;;  %v4148_v9 = vpop.f32.mrb[112].mxu1  ;;  %v4141_v49 = vadd.f32 %v4140_v28, %v13674_v21 }
 0x41e   : > { %v5445_v51 = vsel %vm5444_vm7, %v5443_v7, %v5379_v30  ;;  %v5449_v56 = vrot.slane %v5382_v25, 5  ;;  %v4144_v33 = vadd.f32 %v4143_v41, %v13676_v11  ;;  %v4150_v29 = vpop.f32.mrb[113].mxu1  ;;  %v5452_v35 = vrot.slane %v5383_v61, 4 }
 0x41f   : > { %v5448_v24 = vsel %vm5447_vm8, %v5446_v0, %v5445_v51  ;;  %v5386_v37 = vunpack.c.l.b16 %v5238_v38  ;;  %v5455_v20 = vrot.slane %v5384_v32, 3  ;;  %v4151_v52 = vpop.f32.mrb[114].mxu1  ;;  %v4510_v57 = vadd.f32 %v13681_v15, %v4141_v49 }
 0x420   : > { %v5451_v40 = vsel %vm5450_vm10, %v5449_v56, %v5448_v24  ;;  %v4511_v16 = vadd.f32 %v13685_v50, %v4144_v33  ;;  %v4149_v31 = vadd.f32 %v4148_v9, %v13683_v1  ;;  %v4153_v48 = vpop.f32.mrb[115].mxu1  ;;  %v5458_v28 = vrot.slane %v5385_v45, 2 }
 0x421   : > { %v5454_v21 = vsel %vm5453_vm13, %v5452_v35, %v5451_v40  ;;  %v5461_v11 = vrot.slane %v5386_v37, 1  ;;  %v4152_v41 = vadd.f32 %v4151_v52, %v13687_v13  ;;  %v4549_v61 = vadd.f32 %v13805_v44, %v4510_v57 }
 0x422   : > { %v5457_v3 = vsel %vm5456_vm14, %v5455_v20, %v5454_v21  ;;  %v4550_v19 = vadd.f32 %v13805_v44, %v4511_v16  ;;  %v4512_v30 = vadd.f32 %v13691_v18, %v4149_v31  ;;  %v4579_v15 = vmax.f32 %v4547_v17, 0.0 }
 0x423   : > { %v4513_v50 = vadd.f32 %v13695_v10, %v4152_v41  ;;  %v5460_v1 = vsel %vm5459_vm15, %v5458_v28, %v5457_v3  ;;  %v4580_v25 = vmax.f32 %v4548_v46, 0.0  ;;  %v4581_v7 = vmax.f32 %v4549_v61, 0.0 }
 0x424   : > { %v4582_v0 = vmax.f32 %v4550_v19, 0.0  ;;  %v13851_v58 = vsel %vm5462_vm1, %v5461_v11, %v5460_v1  ;;  %v4551_v46 = vadd.f32 %v13805_v44, %v4512_v30 }
 0x425   : > { %v4156_v13 = vpop.f32.mrb[116].mxu1  ;;  %v4609_v38 = vmax.f32 %v4579_v15, %v4581_v7  ;;  %v13862_v40 = vadd.f32 %v13805_v44, %v4513_v50 }
 0x426   : > { %v4610_v32 = vmax.f32 %v4580_v25, %v4582_v0  ;;  %v4157_v45 = vadd.f32 %v4156_v13, %v13693_v5  ;;  %v4158_v9 = vpop.f32.mrb[117].mxu1 }
 0x427   : > { %v4159_v51 = vpop.f32.mrb[118].mxu1  ;;  %v4673_v56 = vcombine.high %v4609_v38, %v4609_v38  ;;  %v4680_v18 = vrot.slane %v4609_v38, %v13817_v63 }
 0x428   : > { %v4690_v17 = vcombine.high %v4610_v32, %v4610_v32  ;;  %v4697_v10 = vrot.slane %v4610_v32, %v13817_v63  ;;  %v4161_v49 = vpop.f32.mrb[119].mxu1  ;;  %v4514_v33 = vadd.f32 %v13699_v42, %v4157_v45  ;;  %v4160_v29 = vadd.f32 %v4159_v51, %v13697_v6 }
 0x429   : > { %v4687_v24 = vrot.slane %v4673_v56, %v13817_v63  ;;  %v4688_v37 = vcombine.high %v4680_v18, %v4680_v18  ;;  %v10966_v35 = vrot.slane %v4680_v18, 9  ;;  %v4583_v32 = vmax.f32 %v4551_v46, 0.0 }
 0x42a   : > { %v4704_v5 = vrot.slane %v4690_v17, %v13817_v63  ;;  %v4705_v20 = vcombine.high %v4697_v10, %v4697_v10  ;;  %v10970_v52 = vrot.slane %v4697_v10, 9  ;;  %v4515_v57 = vadd.f32 %v13703_v27, %v4160_v29 }
 0x42b   : > { %v4689_v16 = vcombine.high %v4687_v24, %v4687_v24  ;;  %v10967_v31 = vrot.slane %v4688_v37, 9  ;;  %v10968_v48 = vrot.slane %v4687_v24, 9  ;;  %v5175_v21 = vmax.f32 %v4680_v18, %v10966_v35 }
 0x42c   : > { %v4706_v42 = vcombine.high %v4704_v5, %v4704_v5  ;;  %v10971_v28 = vrot.slane %v4705_v20, 9  ;;  %v10972_v6 = vrot.slane %v4704_v5, 9  ;;  %v5179_v11 = vmax.f32 %v4697_v10, %v10970_v52 }
 0x42d   : > { %v4164_v41 = vpop.f32.mrb[120].mxu1  ;;  %v10969_v3 = vrot.slane %v4689_v16, 9  ;;  %v5176_v61 = vmax.f32 %v4688_v37, %v10967_v31  ;;  %v5177_v19 = vmax.f32 %v4687_v24, %v10968_v48  ;;  %v4553_v30 = vadd.f32 %v13805_v44, %v4514_v33 }
 0x42e   : > { %v4166_v15 = vpop.f32.mrb[121].mxu1  ;;  %v5239_v1 = vpack.c.bf16 %v5175_v21, %v5175_v21  ;;  %v10973_v50 = vrot.slane %v4706_v42, 9  ;;  %v5180_v25 = vmax.f32 %v4705_v20, %v10971_v28  ;;  %v5243_v7 = vpack.c.bf16 %v5179_v11, %v5179_v11 }
 0x42f   : > { %v4167_v27 = vpop.f32.mrb[122].mxu1  ;;  %v5178_v0 = vmax.f32 %v4689_v16, %v10969_v3  ;;  %v5240_v13 = vpack.c.bf16 %v5176_v61, %v5176_v61  ;;  %v5241_v38 = vpack.c.bf16 %v5177_v19, %v5177_v19  ;;  %v5181_v9 = vmax.f32 %v4704_v5, %v10972_v6 }
 0x430   : > { %v4169_v45 = vpop.f32.mrb[123].mxu1  ;;  %v5182_v51 = vmax.f32 %v4706_v42, %v10973_v50  ;;  %v5244_v56 = vpack.c.bf16 %v5180_v25, %v5180_v25  ;;  %v5391_v18 = vunpack.c.l.b16 %v5243_v7  ;;  %v4585_v29 = vmax.f32 %v4553_v30, 0.0 }
 0x431   : > { %v5242_v17 = vpack.c.bf16 %v5178_v0, %v5178_v0  ;;  %v5388_v10 = vunpack.c.l.b16 %v5240_v13  ;;  %v5389_v49 = vunpack.c.l.b16 %v5241_v38  ;;  %v5387_v33 = vunpack.c.l.b16 %v5239_v1 }
 0x432   : > { %v5392_v24 = vunpack.c.l.b16 %v5244_v56  ;;  %v4584_v37 = vmax.f32 %v13862_v40, 0.0  ;;  %v4611_v16 = vmax.f32 %v4583_v32, %v4585_v29  ;;  %v5245_v31 = vpack.c.bf16 %v5181_v9, %v5181_v9 }
 0x433   : > { %v5390_v35 = vunpack.c.l.b16 %v5242_v17  ;;  %v5464_v20 = vrot.slane %v5388_v10, 7  ;;  %v5466_v52 = vrot.slane %v5389_v49, 6  ;;  %v5246_v48 = vpack.c.bf16 %v5182_v51, %v5182_v51 }
 0x434   : > { %v5470_v46 = vrot.slane %v5391_v18, 4  ;;  %v4554_v5 = vadd.f32 %v13805_v44, %v4515_v57  ;;  %v4707_v6 = vcombine.high %v4611_v16, %v4611_v16  ;;  %v4714_v11 = vrot.slane %v4611_v16, %v13817_v63 }
 0x435   : > { %v4172_v21 = vpop.f32.mrb[124].mxu1  ;;  %v5465_v42 = vsel %vm5444_vm7, %v5464_v20, %v5387_v33  ;;  %v5468_v28 = vrot.slane %v5390_v35, 5  ;;  %v5472_v40 = vrot.slane %v5392_v24, 3  ;;  %v4165_v30 = vadd.f32 %v4164_v41, %v13701_v8 }
 0x436   : > { %v4174_v3 = vpop.f32.mrb[125].mxu1  ;;  %v5467_v61 = vsel %vm5447_vm8, %v5466_v52, %v5465_v42  ;;  %v4586_v19 = vmax.f32 %v4554_v5, 0.0  ;;  %v4721_v50 = vrot.slane %v4707_v6, %v13817_v63  ;;  %v4722_v57 = vcombine.high %v4714_v11, %v4714_v11 }
 0x437   : > { %v4175_v15 = vpop.f32.mrb[126].mxu1  ;;  %v5469_v1 = vsel %vm5450_vm10, %v5468_v28, %v5467_v61  ;;  %v10974_v25 = vrot.slane %v4714_v11, 9  ;;  %v4516_v38 = vadd.f32 %v13707_v14, %v4165_v30  ;;  %v4168_v32 = vadd.f32 %v4167_v27, %v13705_v43 }
 0x438   : > { %v4177_v7 = vpop.f32.mrb[127].mxu1  ;;  %v5471_v0 = vsel %vm5453_vm13, %v5470_v46, %v5469_v1  ;;  %v4612_v13 = vmax.f32 %v4584_v37, %v4586_v19  ;;  %v4723_v9 = vcombine.high %v4721_v50, %v4721_v50  ;;  %v10975_v51 = vrot.slane %v4722_v57, 9 }
 0x439   : > { %v5473_v45 = vsel %vm5456_vm14, %v5472_v40, %v5471_v0  ;;  %v10976_v8 = vrot.slane %v4721_v50, 9  ;;  %v5183_v41 = vmax.f32 %v4714_v11, %v10974_v25  ;;  %v4517_v29 = vadd.f32 %v13711_v47, %v4168_v32 }
 0x43a   : > { %v4724_v56 = vcombine.high %v4612_v13, %v4612_v13  ;;  %v4731_v18 = vrot.slane %v4612_v13, %v13817_v63  ;;  %v10977_v17 = vrot.slane %v4723_v9, 9  ;;  %v5184_v10 = vmax.f32 %v4722_v57, %v10975_v51 }
 0x43b   : > { %v5185_v49 = vmax.f32 %v4721_v50, %v10976_v8  ;;  %v5393_v33 = vunpack.c.l.b16 %v5245_v31  ;;  %v5394_v24 = vunpack.c.l.b16 %v5246_v48  ;;  %v5247_v35 = vpack.c.bf16 %v5183_v41, %v5183_v41 }
 0x43c   : > { %v4738_v14 = vrot.slane %v4724_v56, %v13817_v63  ;;  %v4739_v37 = vcombine.high %v4731_v18, %v4731_v18  ;;  %v5186_v27 = vmax.f32 %v4723_v9, %v10977_v17  ;;  %v5248_v20 = vpack.c.bf16 %v5184_v10, %v5184_v10 }
 0x43d   : > { %v4180_v43 = vpop.f32.mrb[128].mxu1  ;;  %v4555_v52 = vadd.f32 %v13805_v44, %v4516_v38  ;;  %v5249_v46 = vpack.c.bf16 %v5185_v49, %v5185_v49  ;;  %v10978_v5 = vrot.slane %v4731_v18, 9  ;;  %v5474_v3 = vrot.slane %v5393_v33, 2 }
 0x43e   : > { %v4182_v16 = vpop.f32.mrb[129].mxu1  ;;  %v10979_v28 = vrot.slane %v4739_v37, 9  ;;  %v10980_v6 = vrot.slane %v4738_v14, 9  ;;  %v5250_v47 = vpack.c.bf16 %v5186_v27, %v5186_v27  ;;  %v4173_v31 = vadd.f32 %v4172_v21, %v13709_v22 }
 0x43f   : > { %v4183_v42 = vpop.f32.mrb[130].mxu1  ;;  %v5476_v48 = vrot.slane %v5394_v24, 1  ;;  %v5395_v61 = vunpack.c.l.b16 %v5247_v35  ;;  %v5396_v40 = vunpack.c.l.b16 %v5248_v20  ;;  %v4587_v19 = vmax.f32 %v4555_v52, 0.0 }
 0x440   : > { %v4185_v11 = vpop.f32.mrb[131].mxu1  ;;  %v13883_v30 = vunpack.c.l.b16 %v5249_v46  ;;  %v13885_v1 = vcombine.high %v4738_v14, %v4738_v14  ;;  %v5187_v50 = vmax.f32 %v4731_v18, %v10978_v5  ;;  %v4518_v57 = vadd.f32 %v13721_v39, %v4173_v31 }
 0x441   : > { %v5188_v25 = vmax.f32 %v4739_v37, %v10979_v28  ;;  %v13888_v7 = vmax.f32 %v4738_v14, %v10980_v6  ;;  %v4556_v0 = vadd.f32 %v13805_v44, %v4517_v29  ;;  %v4176_v13 = vadd.f32 %v4175_v15, %v13713_v36 }
 0x442   : > { %v13892_v38 = vunpack.c.l.b16 %v5250_v47  ;;  %v4557_v22 = vadd.f32 %v13805_v44, %v4518_v57  ;;  %v5475_v21 = vsel %vm5459_vm15, %v5474_v3, %v5473_v45  ;;  %v4181_v32 = vadd.f32 %v4180_v43, %v13723_v60 }
 0x443   : > { %v5478_v51 = vrot.slane %v5396_v40, 7  ;;  %v4519_v8 = vadd.f32 %v13725_v59, %v4176_v13  ;;  %v5477_v39 = vsel %vm5462_vm1, %v5476_v48, %v5475_v21  ;;  %v4184_v41 = vadd.f32 %v4183_v42, %v13727_v2 }
 0x444   : > { %v5251_v18 = vpack.c.bf16 %v5187_v50, %v5187_v50  ;;  %v4589_v17 = vmax.f32 %v4557_v22, 0.0  ;;  %v5562_v36 = vpack.c.b16 %v5477_v39, %v13851_v58  ;;  %v4520_v15 = vadd.f32 %v13729_v62, %v4181_v32 }
 0x445   : > { %v4188_v9 = vpop.f32.mrb[132].mxu1  ;;  %v4558_v45 = vadd.f32 %v13805_v44, %v4519_v8  ;;  %v4521_v60 = vadd.f32 %v13733_v53, %v4184_v41  ;;  %v5480_v33 = vrot.slane %v13883_v30, 6  ;;  %v5252_v2 = vpack.c.bf16 %v5188_v25, %v5188_v25 }
 0x446   : > { %v4190_v56 = vpop.f32.mrb[133].mxu1  ;;  %v4189_v49 = vadd.f32 %v4188_v9, %v13731_v23  ;;  %v4588_v24 = vmax.f32 %v4556_v0, 0.0  ;;  %v4613_v14 = vmax.f32 %v4587_v19, %v4589_v17  ;;  %11030 = vmatmul.mubr.msk.bf16.vlgmr.msra.gmra.mrb[160].mxu1 %vm3622_vm4, %v5562_v36  ;;  %v4559_v62 = vadd.f32 %v13805_v44, %v4520_v15 }
 0x447   : > { %v4191_v10 = vpop.f32.mrb[134].mxu1  ;;  %v4590_v58 = vmax.f32 %v4558_v45, 0.0  ;;  %5660 = vmatprep.mubr.bf16.mxu1 %v16909_v12  ;;  %v13913_v23 = vsel %vm5444_vm7, %v5478_v51, %v5395_v61  ;;  %v5253_v53 = vpack.c.bf16 %v13888_v7, %v13888_v7  ;;  %v5482_v35 = vrot.slane %v13892_v38, 5 }
 0x448   : > { %v4192_v59 = vadd.f32 %v4191_v10, %v13735_v34  ;;  %v4193_v29 = vpop.f32.mrb[135].mxu1  ;;  %v4522_v37 = vadd.f32 %v13749_v54, %v4189_v49  ;;  %v4741_v34 = vcombine.high %v4613_v14, %v4613_v14  ;;  %v4748_v27 = vrot.slane %v4613_v14, %v13817_v63 }
 0x449   : > { %v13919_v20 = vunpack.c.l.b16 %v5251_v18  ;;  %v4614_v52 = vmax.f32 %v4588_v24, %v4590_v58  ;;  %v13922_v16 = vunpack.c.l.b16 %v5252_v2  ;;  %v10981_v42 = vrot.slane %v13885_v1, 9 }
 0x44a   : > { %v4523_v43 = vadd.f32 %v13753_v4, %v4192_v59  ;;  %v4561_v54 = vadd.f32 %v13805_v44, %v4522_v37  ;;  %v4755_v4 = vrot.slane %v4741_v34, %v13817_v63  ;;  %v4756_v46 = vcombine.high %v4748_v27, %v4748_v27 }
 0x44b   : > { %v4758_v28 = vcombine.high %v4614_v52, %v4614_v52  ;;  %v4765_v6 = vrot.slane %v4614_v52, %v13817_v63  ;;  %v4591_v11 = vmax.f32 %v4559_v62, 0.0  ;;  %v10982_v48 = vrot.slane %v4748_v27, 9 }
 0x44c   : > { %v4593_v3 = vmax.f32 %v4561_v54, 0.0  ;;  %v4757_v31 = vcombine.high %v4755_v4, %v4755_v4  ;;  %v10983_v61 = vrot.slane %v4756_v46, 9  ;;  %v10984_v40 = vrot.slane %v4755_v4, 9 }
 0x44d   : > { %v13925_v5 = vpop.f32.mrb[136].mxu1  ;;  %v13930_v50 = vrot.slane %v4758_v28, %v13817_v63  ;;  %v4773_v57 = vcombine.high %v4765_v6, %v4765_v6  ;;  %v10986_v25 = vrot.slane %v4765_v6, 9  ;;  %v5484_v13 = vrot.slane %v13919_v20, 4 }
 0x44e   : > { %v4198_v47 = vpop.f32.mrb[137].mxu1  ;;  %v4615_v7 = vmax.f32 %v4591_v11, %v4593_v3  ;;  %v10985_v22 = vrot.slane %v4757_v31, 9  ;;  %v5192_v21 = vmax.f32 %v4756_v46, %v10983_v61  ;;  %v5193_v32 = vmax.f32 %v4755_v4, %v10984_v40 }
 0x44f   : > { %v4199_v19 = vpop.f32.mrb[138].mxu1  ;;  %v10987_v9 = vrot.slane %v4773_v57, 9  ;;  %v5195_v51 = vmax.f32 %v4765_v6, %v10986_v25  ;;  %v4560_v8 = vadd.f32 %v13805_v44, %v4521_v60  ;;  %v4562_v39 = vadd.f32 %v13805_v44, %v4523_v43 }
 0x450   : > { %v4201_v0 = vpop.f32.mrb[139].mxu1  ;;  %v5191_v41 = vmax.f32 %v4748_v27, %v10982_v48  ;;  %v5194_v56 = vmax.f32 %v4757_v31, %v10985_v22  ;;  %v10988_v18 = vrot.slane %v13930_v50, 9  ;;  %v13937_v17 = vmax.f32 %v13885_v1, %v10981_v42 }
 0x451   : > { %v5486_v36 = vrot.slane %v13922_v16, 3  ;;  %v5256_v15 = vpack.c.bf16 %v5192_v21, %v5192_v21  ;;  %v5257_v10 = vpack.c.bf16 %v5193_v32, %v5193_v32  ;;  %v4775_v45 = vcombine.high %v4615_v7, %v4615_v7 }
 0x452   : > { %v5196_v49 = vmax.f32 %v4773_v57, %v10987_v9  ;;  %v5259_v59 = vpack.c.bf16 %v5195_v51, %v5195_v51  ;;  %v4782_v29 = vrot.slane %v4615_v7, %v13817_v63  ;;  %v13943_v60 = vunpack.c.l.b16 %v5253_v53  ;;  %v16936_v7 = vld [vmem:[#allocation8_spill] sm:$0xff] }
 0x453   : > { %v5258_v24 = vpack.c.bf16 %v5194_v56, %v5194_v56  ;;  %v4592_v14 = vmax.f32 %v4560_v8, 0.0  ;;  %v4789_v58 = vrot.slane %v4775_v45, %v13817_v63  ;;  %v4594_v62 = vmax.f32 %v4562_v39, 0.0  ;;  %v16937_v39 = vld [vmem:[#allocation9_spill] sm:$0xff]  ;;  %v16938_v56 = vld [vmem:[#allocation10_spill] sm:$0xff] }
 0x454   : > { %v5255_v37 = vpack.c.bf16 %v5191_v41, %v5191_v41  ;;  %v13947_v43 = vmax.f32 %v13930_v50, %v10988_v18  ;;  %v4790_v34 = vcombine.high %v4782_v29, %v4782_v29  ;;  %v5254_v52 = vpack.c.bf16 %v13937_v17, %v13937_v17 }
 0x455   : > { %v13941_v2 = vpop.f32.mrb[140].mxu1  ;;  %v5404_v54 = vunpack.c.l.b16 %v5256_v15  ;;  %v13951_v4 = vunpack.c.l.b16 %v5257_v10  ;;  %v4791_v53 = vcombine.high %v4789_v58, %v4789_v58  ;;  %v10990_v46 = vrot.slane %v4782_v29, 9 }
 0x456   : > { %v4206_v1 = vpop.f32.mrb[141].mxu1  ;;  %v5260_v28 = vpack.c.bf16 %v5196_v49, %v5196_v49  ;;  %v13953_v6 = vunpack.c.l.b16 %v5259_v59  ;;  %v10991_v11 = vrot.slane %v4790_v34, 9  ;;  %v10992_v3 = vrot.slane %v4789_v58, 9 }
 0x457   : > { %v4207_v27 = vpop.f32.mrb[142].mxu1  ;;  %v13955_v47 = vunpack.c.l.b16 %v5258_v24  ;;  %v10993_v31 = vrot.slane %v4791_v53, 9  ;;  %v5199_v48 = vmax.f32 %v4782_v29, %v10990_v46  ;;  %v4616_v61 = vmax.f32 %v4592_v14, %v4594_v62 }
 0x458   : > { %v4209_v42 = vpop.f32.mrb[143].mxu1  ;;  %v5200_v40 = vmax.f32 %v4790_v34, %v10991_v11  ;;  %v5201_v57 = vmax.f32 %v4789_v58, %v10992_v3  ;;  %v4197_v25 = vadd.f32 %v13925_v5, %v13751_v26  ;;  %v4200_v0 = vadd.f32 %v4199_v19, %v16936_v7  ;;  %v16939_v11 = vld [vmem:[#allocation7_spill] sm:$0xff]  ;;  %v16941_v7 = vld [vmem:[#allocation12_spill] sm:$0xff] }
 0x459   : > { %v5492_v22 = vrot.slane %v5404_v54, 7  ;;  %v5202_v21 = vmax.f32 %v4791_v53, %v10993_v31  ;;  %v4792_v32 = vcombine.high %v4616_v61, %v4616_v61  ;;  %v4799_v9 = vrot.slane %v4616_v61, %v13817_v63  ;;  %v16940_v31 = vld [vmem:[#allocation11_spill] sm:$0xff] }
 0x45a   : > { %v13961_v51 = vunpack.c.l.b16 %v5260_v28  ;;  %v5264_v8 = vpack.c.bf16 %v5200_v40, %v5200_v40  ;;  %v4524_v41 = vadd.f32 %v16937_v39, %v4197_v25  ;;  %v4525_v18 = vadd.f32 %v16938_v56, %v4200_v0 }
 0x45b   : > { %v5263_v15 = vpack.c.bf16 %v5199_v48, %v5199_v48  ;;  %v5265_v10 = vpack.c.bf16 %v5201_v57, %v5201_v57  ;;  %v4806_v26 = vrot.slane %v4792_v32, %v13817_v63  ;;  %v4807_v5 = vcombine.high %v4799_v9, %v4799_v9 }
 0x45c   : > { %v5403_v45 = vunpack.c.l.b16 %v5255_v37  ;;  %v4774_v49 = vcombine.high %v13930_v50, %v13930_v50  ;;  %v5261_v59 = vpack.c.bf16 %v13947_v43, %v13947_v43  ;;  %v5266_v29 = vpack.c.bf16 %v5202_v21, %v5202_v21 }
 0x45d   : > { %v13965_v17 = vpop.f32.mrb[144].mxu1  ;;  %v5494_v14 = vrot.slane %v13951_v4, 6  ;;  %v5498_v58 = vrot.slane %v13953_v6, 4  ;;  %v13974_v62 = vunpack.c.l.b16 %v5264_v8  ;;  %v10994_v1 = vrot.slane %v4799_v9, 9 }
 0x45e   : > { %v4214_v19 = vpop.f32.mrb[145].mxu1  ;;  %v5493_v54 = vsel %vm5444_vm7, %v5492_v22, %v5403_v45  ;;  %v5496_v37 = vrot.slane %v13955_v47, 5  ;;  %v5500_v53 = vrot.slane %v13961_v51, 3  ;;  %v4563_v50 = vadd.f32 %v13805_v44, %v4524_v41  ;;  %v16942_v22 = vld [vmem:[#allocation14_spill] sm:$0xff] }
 0x45f   : > { %v4215_v24 = vpop.f32.mrb[146].mxu1  ;;  %v13980_v46 = vunpack.c.l.b16 %v5263_v15  ;;  %v13982_v43 = vunpack.c.l.b16 %v5265_v10  ;;  %v10995_v42 = vrot.slane %v4807_v5, 9  ;;  %v10996_v4 = vrot.slane %v4806_v26, 9 }
 0x460   : > { %v4217_v34 = vpop.f32.mrb[147].mxu1  ;;  %v13984_v28 = vunpack.c.l.b16 %v5266_v29  ;;  %v4564_v6 = vadd.f32 %v13805_v44, %v4525_v18  ;;  %v4205_v3 = vadd.f32 %v13941_v2, %v16939_v11  ;;  %v4208_v48 = vadd.f32 %v4207_v27, %v16940_v31 }
 0x461   : > { %v5506_v47 = vrot.slane %v13974_v62, 7  ;;  %v13991_v61 = vcombine.high %v4806_v26, %v4806_v26  ;;  %v5203_v40 = vmax.f32 %v4799_v9, %v10994_v1  ;;  %v10989_v57 = vrot.slane %v4774_v49, 9 }
 0x462   : > { %v4595_v25 = vmax.f32 %v4563_v50, 0.0  ;;  %v4526_v0 = vadd.f32 %v16941_v7, %v4205_v3  ;;  %v4527_v21 = vadd.f32 %v16942_v22, %v4208_v48  ;;  %v5402_v32 = vunpack.c.l.b16 %v5254_v52  ;;  %v16945_v48 = vld [vmem:[#allocation16_spill] sm:$0xff] }
 0x463   : > { %v5204_v8 = vmax.f32 %v4807_v5, %v10995_v42  ;;  %v13995_v39 = vmax.f32 %v4806_v26, %v10996_v4  ;;  %v5198_v41 = vmax.f32 %v4774_v49, %v10989_v57  ;;  %v5481_v2 = vsel %vm5447_vm8, %v5480_v33, %v13913_v23  ;;  %v16943_v42 = vld [vmem:[#allocation13_spill] sm:$0xff] }
 0x464   : > { %v4596_v56 = vmax.f32 %v4564_v6, 0.0  ;;  %v4565_v9 = vadd.f32 %v13805_v44, %v4526_v0  ;;  %v4566_v18 = vadd.f32 %v13805_v44, %v4527_v21  ;;  %v5483_v52 = vsel %vm5450_vm10, %v5482_v35, %v5481_v2 }
 0x465   : > { %v4220_v51 = vpop.f32.mrb[148].mxu1  ;;  %v5262_v10 = vpack.c.bf16 %v5198_v41, %v5198_v41  ;;  %v5409_v26 = vunpack.c.l.b16 %v5261_v59  ;;  %v5485_v30 = vsel %vm5453_vm13, %v5484_v13, %v5483_v52  ;;  %v5488_v33 = vrot.slane %v13943_v60, 2 }
 0x466   : > { %v4222_v27 = vpop.f32.mrb[149].mxu1  ;;  %v4597_v5 = vmax.f32 %v4565_v9, 0.0  ;;  %v4598_v19 = vmax.f32 %v4566_v18, 0.0  ;;  %v5487_v45 = vsel %vm5456_vm14, %v5486_v36, %v5485_v30  ;;  %v5490_v38 = vrot.slane %v5402_v32, 1  ;;  %v16944_v36 = vld [vmem:[#allocation15_spill] sm:$0xff] }
 0x467   : > { %v14006_v15 = vpop.f32.mrb[150].mxu1  ;;  %v5267_v49 = vpack.c.bf16 %v5203_v40, %v5203_v40  ;;  %v5410_v35 = vunpack.c.l.b16 %v5262_v10  ;;  %v5489_v29 = vsel %vm5459_vm15, %v5488_v33, %v5487_v45  ;;  %v5495_v59 = vsel %vm5447_vm8, %v5494_v14, %v5493_v54 }
 0x468   : > { %v4225_v23 = vpop.f32.mrb[151].mxu1  ;;  %v4617_v1 = vmax.f32 %v4595_v25, %v4597_v5  ;;  %v4618_v20 = vmax.f32 %v4596_v56, %v4598_v19  ;;  %v5491_v13 = vsel %vm5462_vm1, %v5490_v38, %v5489_v29  ;;  %v5497_v60 = vsel %vm5450_vm10, %v5496_v37, %v5495_v59  ;;  %v16946_v37 = vld [vmem:[#allocation18_spill] sm:$0xff] }
 0x469   : > { %v5499_v34 = vsel %vm5453_vm13, %v5498_v58, %v5497_v60  ;;  %v5502_v50 = vrot.slane %v5409_v26, 2  ;;  %v4213_v16 = vadd.f32 %v13965_v17, %v16943_v42  ;;  %v4216_v4 = vadd.f32 %v4215_v24, %v16944_v36  ;;  %v16947_v58 = vld [vmem:[#allocation17_spill] sm:$0xff] }
 0x46a   : > { %v4809_v6 = vcombine.high %v4617_v1, %v4617_v1  ;;  %v4816_v11 = vrot.slane %v4617_v1, %v13817_v63  ;;  %v4826_v3 = vcombine.high %v4618_v20, %v4618_v20  ;;  %v4833_v14 = vrot.slane %v4618_v20, %v13817_v63 }
 0x46b   : > { %v5501_v31 = vsel %vm5456_vm14, %v5500_v53, %v5499_v34  ;;  %v4528_v40 = vadd.f32 %v16945_v48, %v4213_v16  ;;  %v4529_v57 = vadd.f32 %v16946_v37, %v4216_v4  ;;  %v4221_v25 = vadd.f32 %v4220_v51, %v16947_v58 }
 0x46c   : > { %v5268_v0 = vpack.c.bf16 %v5204_v8, %v5204_v8  ;;  %v4823_v17 = vrot.slane %v4809_v6, %v13817_v63  ;;  %v4824_v24 = vcombine.high %v4816_v11, %v4816_v11  ;;  %v10998_v22 = vrot.slane %v4816_v11, 9 }
 0x46d   : > { %v4228_v54 = vpop.f32.mrb[152].mxu1  ;;  %v4840_v32 = vrot.slane %v4826_v3, %v13817_v63  ;;  %v4841_v41 = vcombine.high %v4833_v14, %v4833_v14  ;;  %v11002_v2 = vrot.slane %v4833_v14, 9  ;;  %v5503_v27 = vsel %vm5459_vm15, %v5502_v50, %v5501_v31 }
 0x46e   : > { %v4230_v7 = vpop.f32.mrb[153].mxu1  ;;  %v4825_v56 = vcombine.high %v4823_v17, %v4823_v17  ;;  %v10999_v9 = vrot.slane %v4824_v24, 9  ;;  %v11000_v18 = vrot.slane %v4823_v17, 9  ;;  %v5207_v52 = vmax.f32 %v4816_v11, %v10998_v22  ;;  %v16950_v22 = vld [vmem:[#allocation21_spill] sm:$0xff] }
 0x46f   : > { %v4231_v21 = vpop.f32.mrb[154].mxu1  ;;  %v14032_v10 = vunpack.c.l.b16 %v5267_v49  ;;  %v11003_v51 = vrot.slane %v4841_v41, 9  ;;  %v5211_v8 = vmax.f32 %v4833_v14, %v11002_v2  ;;  %v5504_v26 = vrot.slane %v5410_v35, 1  ;;  %v16949_v7 = vld [vmem:[#allocation19_spill] sm:$0xff]  ;;  %v16951_v2 = vld [vmem:[#allocation22_spill] sm:$0xff] }
 0x470   : > { %v4233_v53 = vpop.f32.mrb[155].mxu1  ;;  %v14034_v30 = vunpack.c.l.b16 %v5268_v0  ;;  %v11001_v33 = vrot.slane %v4825_v56, 9  ;;  %v5208_v23 = vmax.f32 %v4824_v24, %v10999_v9  ;;  %v5209_v5 = vmax.f32 %v4823_v17, %v11000_v18  ;;  %v16953_v18 = vld [vmem:[#allocation24_spill] sm:$0xff] }
 0x471   : > { %v5508_v19 = vrot.slane %v13982_v43, 6  ;;  %v5271_v45 = vpack.c.bf16 %v5207_v52, %v5207_v52  ;;  %v11004_v38 = vrot.slane %v4840_v32, 9  ;;  %v5505_v29 = vsel %vm5462_vm1, %v5504_v26, %v5503_v27  ;;  %v16952_v53 = vld [vmem:[#allocation23_spill] sm:$0xff] }
 0x472   : > { %v5510_v59 = vrot.slane %v13984_v28, 5  ;;  %v5272_v1 = vpack.c.bf16 %v5208_v23, %v5208_v23  ;;  %v5212_v20 = vmax.f32 %v4841_v41, %v11003_v51  ;;  %v5275_v49 = vpack.c.bf16 %v5211_v8, %v5211_v8  ;;  %v16955_v8 = vld [vmem:[#allocation27_spill] sm:$0xff] }
 0x473   : > { %v14043_v35 = vsel %vm5444_vm7, %v5506_v47, %v13980_v46  ;;  %v5210_v34 = vmax.f32 %v4825_v56, %v11001_v33  ;;  %v5273_v50 = vpack.c.bf16 %v5209_v5, %v5209_v5  ;;  %v5563_v42 = vpack.c.b16 %v5505_v29, %v5491_v13  ;;  %v16948_v46 = vld [vmem:[#allocation20_spill] sm:$0xff]  ;;  %v16956_v5 = vld [vmem:[#allocation26_spill] sm:$0xff]  ;;  %v16957_v29 = vld [vmem:[#allocation29_spill] sm:$0xff] }
 0x474   : > { %v5269_v36 = vpack.c.bf16 %v13995_v39, %v13995_v39  ;;  %v5512_v4 = vrot.slane %v14032_v10, 4  ;;  %v5514_v6 = vrot.slane %v14034_v30, 3  ;;  %v4567_v11 = vadd.f32 %v13805_v44, %v4528_v40 }
 0x475   : > { %v4236_v60 = vpop.f32.mrb[156].mxu1  ;;  %v5419_v14 = vunpack.c.l.b16 %v5271_v45  ;;  %v14050_v31 = vcombine.high %v4840_v32, %v4840_v32  ;;  %v14052_v62 = vmax.f32 %v4840_v32, %v11004_v38  ;;  %11031 = vmatmul.mubr.msk.bf16.gmra.mrb[164].mxu1 %vm3622_vm4, %v5563_v42  ;;  %v4530_v47 = vadd.f32 %v16948_v46, %v4221_v25 }
 0x476   : > { %v4238_v16 = vpop.f32.mrb[157].mxu1  ;;  %v5420_v48 = vunpack.c.l.b16 %v5272_v1  ;;  %v5276_v37 = vpack.c.bf16 %v5212_v20, %v5212_v20  ;;  %v14056_v58 = vunpack.c.l.b16 %v5275_v49  ;;  %v4224_v0 = vadd.f32 %v14006_v15, %v16949_v7  ;;  %5670 = vmatprep.mubr.bf16.mxu1 %v16909_v12  ;;  %v16954_v15 = vld [vmem:[#allocation25_spill] sm:$0xff] }
 0x477   : > { %v4239_v3 = vpop.f32.mrb[158].mxu1  ;;  %v5274_v40 = vpack.c.bf16 %v5210_v34, %v5210_v34  ;;  %v14061_v17 = vunpack.c.l.b16 %v5273_v50  ;;  %v4569_v24 = vadd.f32 %v13805_v44, %v4530_v47  ;;  %v4229_v32 = vadd.f32 %v4228_v54, %v16950_v22  ;;  %v14086_v34 = vld [vmem:[%s16774_s4] ss:$0 sm:$0xff] }
 0x478   : > { %v4241_v13 = vpop.f32.mrb[159].mxu1  ;;  %v4599_v41 = vmax.f32 %v4567_v11, 0.0  ;;  %v4568_v25 = vadd.f32 %v13805_v44, %v4529_v57  ;;  %v4531_v27 = vadd.f32 %v16951_v2, %v4224_v0  ;;  %v4232_v56 = vadd.f32 %v4231_v21, %v16952_v53 }
 0x479   : > { %v4601_v9 = vmax.f32 %v4569_v24, 0.0  ;;  %v4532_v52 = vadd.f32 %v16953_v18, %v4229_v32  ;;  %v4237_v51 = vadd.f32 %v4236_v60, %v16954_v15  ;;  %v14071_v26 = vadd.f32 %v4239_v3, %v16955_v8 }
 0x47a   : > { %v5520_v33 = vrot.slane %v5420_v48, 7  ;;  %v14073_v23 = vunpack.c.l.b16 %v5276_v37  ;;  %v4570_v54 = vadd.f32 %v13805_v44, %v4531_v27  ;;  %v4533_v45 = vadd.f32 %v16956_v5, %v4232_v56 }
 0x47b   : > { %v5277_v57 = vpack.c.bf16 %v14052_v62, %v14052_v62  ;;  %v5526_v21 = vrot.slane %v14056_v58, 4  ;;  %v4619_v38 = vmax.f32 %v4599_v41, %v4601_v9  ;;  %v4534_v1 = vadd.f32 %v16957_v29, %v4237_v51 }
 0x47c   : > { %v14081_v20 = vunpack.c.l.b16 %v5274_v40  ;;  %v4600_v49 = vmax.f32 %v4568_v25, 0.0  ;;  %v4602_v60 = vmax.f32 %v4570_v54, 0.0  ;;  %v4571_v44 = vadd.f32 %v14086_v34, %v4532_v52 }
 0x47d   : > { %v4843_v50 = vcombine.high %v4619_v38, %v4619_v38  ;;  %v4850_v42 = vrot.slane %v4619_v38, %v13817_v63  ;;  %v4573_v16 = vadd.f32 %v14086_v34, %v4534_v1  ;;  %v10997_v11 = vrot.slane %v13991_v61, 9 }
 0x47e   : > { %v14093_v3 = vsel %vm5444_vm7, %v5520_v33, %v5419_v14  ;;  %v5522_v46 = vrot.slane %v14061_v17, 6  ;;  %v5528_v47 = vrot.slane %v14073_v23, 3  ;;  %v4620_v13 = vmax.f32 %v4600_v49, %v4602_v60 }
 0x47f   : > { %v4857_v48 = vrot.slane %v4843_v50, %v13817_v63  ;;  %v4858_v37 = vcombine.high %v4850_v42, %v4850_v42  ;;  %v11006_v7 = vrot.slane %v4850_v42, 9  ;;  %v4605_v0 = vmax.f32 %v4573_v16, 0.0 }
 0x480   : > { %v4860_v40 = vcombine.high %v4620_v13, %v4620_v13  ;;  %v4867_v24 = vrot.slane %v4620_v13, %v13817_v63  ;;  %v4603_v22 = vmax.f32 %v4571_v44, 0.0  ;;  %v11005_v32 = vrot.slane %v14050_v31, 9 }
 0x481   : > { %v4859_v41 = vcombine.high %v4857_v48, %v4857_v48  ;;  %v11007_v25 = vrot.slane %v4858_v37, 9  ;;  %v11008_v14 = vrot.slane %v4857_v48, 9  ;;  %v5206_v2 = vmax.f32 %v13991_v61, %v10997_v11 }
 0x482   : > { %v4874_v27 = vrot.slane %v4860_v40, %v13817_v63  ;;  %v4875_v53 = vcombine.high %v4867_v24, %v4867_v24  ;;  %v11010_v56 = vrot.slane %v4867_v24, 9  ;;  %v4621_v9 = vmax.f32 %v4603_v22, %v4605_v0 }
 0x483   : > { %v11009_v18 = vrot.slane %v4859_v41, 9  ;;  %v5215_v52 = vmax.f32 %v4850_v42, %v11006_v7  ;;  %v5216_v15 = vmax.f32 %v4858_v37, %v11007_v25  ;;  %v5217_v51 = vmax.f32 %v4857_v48, %v11008_v14 }
 0x484   : > { %v11011_v8 = vrot.slane %v4875_v53, 9  ;;  %v11012_v33 = vrot.slane %v4874_v27, 9  ;;  %v5219_v54 = vmax.f32 %v4867_v24, %v11010_v56  ;;  %v14103_v5 = vadd.f32 %v14086_v34, %v4533_v45 }
 0x485   : > { %v5218_v38 = vmax.f32 %v4859_v41, %v11009_v18  ;;  %v5280_v29 = vpack.c.bf16 %v5216_v15, %v5216_v15  ;;  %v5281_v1 = vpack.c.bf16 %v5217_v51, %v5217_v51  ;;  %v5214_v61 = vmax.f32 %v14050_v31, %v11005_v32 }
 0x486   : > { %v5220_v49 = vmax.f32 %v4875_v53, %v11011_v8  ;;  %v5283_v60 = vpack.c.bf16 %v5219_v54, %v5219_v54  ;;  %v4877_v44 = vcombine.high %v4621_v9, %v4621_v9  ;;  %v5270_v50 = vpack.c.bf16 %v5206_v2, %v5206_v2 }
 0x487   : > { %v5524_v16 = vrot.slane %v14081_v20, 5  ;;  %v5279_v42 = vpack.c.bf16 %v5215_v52, %v5215_v52  ;;  %v4884_v11 = vrot.slane %v4621_v9, %v13817_v63  ;;  %v5417_v13 = vunpack.c.l.b16 %v5269_v36 }
 0x488   : > { %v5282_v45 = vpack.c.bf16 %v5218_v38, %v5218_v38  ;;  %v5428_v48 = vunpack.c.l.b16 %v5280_v29  ;;  %v5221_v37 = vmax.f32 %v4874_v27, %v11012_v33  ;;  %v4891_v7 = vrot.slane %v4877_v44, %v13817_v63 }
 0x489   : > { %v5429_v0 = vunpack.c.l.b16 %v5281_v1  ;;  %v5284_v31 = vpack.c.bf16 %v5220_v49, %v5220_v49  ;;  %v4604_v40 = vmax.f32 %v14103_v5, 0.0  ;;  %v4892_v24 = vcombine.high %v4884_v11, %v4884_v11 }
 0x48a   : > { %v5431_v22 = vunpack.c.l.b16 %v5283_v60  ;;  %v4893_v32 = vcombine.high %v4891_v7, %v4891_v7  ;;  %v5278_v20 = vpack.c.bf16 %v5214_v61, %v5214_v61  ;;  %v5418_v41 = vunpack.c.l.b16 %v5270_v50 }
 0x48b   : > { %v5427_v25 = vunpack.c.l.b16 %v5279_v42  ;;  %v4876_v14 = vcombine.high %v4874_v27, %v4874_v27  ;;  %v11015_v2 = vrot.slane %v4892_v24, 9  ;;  %v5425_v39 = vunpack.c.l.b16 %v5277_v57 }
 0x48c   : > { %v5430_v36 = vunpack.c.l.b16 %v5282_v45  ;;  %v5534_v53 = vrot.slane %v5428_v48, 7  ;;  %v5285_v56 = vpack.c.bf16 %v5221_v37, %v5221_v37  ;;  %v11016_v9 = vrot.slane %v4891_v7, 9 }
 0x48d   : > { %v5536_v18 = vrot.slane %v5429_v0, 6  ;;  %v5432_v52 = vunpack.c.l.b16 %v5284_v31  ;;  %v5224_v15 = vmax.f32 %v4892_v24, %v11015_v2  ;;  %v5509_v51 = vsel %vm5447_vm8, %v5508_v19, %v14043_v35 }
 0x48e   : > { %v5540_v8 = vrot.slane %v5431_v22, 4  ;;  %v11014_v33 = vrot.slane %v4884_v11, 9  ;;  %v11017_v27 = vrot.slane %v4893_v32, 9  ;;  %v5511_v62 = vsel %vm5450_vm10, %v5510_v59, %v5509_v51 }
 0x48f   : > { %v5426_v57 = vunpack.c.l.b16 %v5278_v20  ;;  %v5513_v54 = vsel %vm5453_vm13, %v5512_v4, %v5511_v62  ;;  %v5516_v38 = vrot.slane %v5417_v13, 2  ;;  %v5523_v43 = vsel %vm5447_vm8, %v5522_v46, %v14093_v3 }
 0x490   : > { %v5225_v29 = vmax.f32 %v4891_v7, %v11016_v9  ;;  %v5515_v19 = vsel %vm5456_vm14, %v5514_v6, %v5513_v54  ;;  %v5518_v35 = vrot.slane %v5418_v41, 1  ;;  %v5525_v28 = vsel %vm5450_vm10, %v5524_v16, %v5523_v43 }
 0x491   : > { %v5535_v59 = vsel %vm5444_vm7, %v5534_v53, %v5427_v25  ;;  %v5288_v1 = vpack.c.bf16 %v5224_v15, %v5224_v15  ;;  %v5517_v10 = vsel %vm5459_vm15, %v5516_v38, %v5515_v19  ;;  %v5527_v4 = vsel %vm5453_vm13, %v5526_v21, %v5525_v28 }
 0x492   : > { %v5538_v17 = vrot.slane %v5430_v36, 5  ;;  %v5519_v3 = vsel %vm5462_vm1, %v5518_v35, %v5517_v10  ;;  %v5529_v30 = vsel %vm5456_vm14, %v5528_v47, %v5527_v4  ;;  %v5530_v6 = vrot.slane %v5425_v39, 2 }
 0x493   : > { %v5223_v46 = vmax.f32 %v4884_v11, %v11014_v33  ;;  %v5226_v61 = vmax.f32 %v4893_v32, %v11017_v27  ;;  %v5532_v49 = vrot.slane %v5426_v57, 1  ;;  %v4535_v60 = vadd.f32 %v13831_v55, %v14071_v26 }
 0x494   : > { %v5289_v44 = vpack.c.bf16 %v5225_v29, %v5225_v29  ;;  %v5531_v50 = vsel %vm5459_vm15, %v5530_v6, %v5529_v30  ;;  %v11013_v58 = vrot.slane %v4876_v14, 9  ;;  %v5433_v16 = vunpack.c.l.b16 %v5285_v56 }
 0x495   : > { %v5436_v21 = vunpack.c.l.b16 %v5288_v1  ;;  %v5533_v42 = vsel %vm5462_vm1, %v5532_v49, %v5531_v50  ;;  %v4574_v13 = vadd.f32 %v14086_v34, %v4535_v60  ;;  %v5537_v23 = vsel %vm5447_vm8, %v5536_v18, %v5535_v59 }
 0x496   : > { %v5542_v47 = vrot.slane %v5432_v52, 3  ;;  %v5564_v45 = vpack.c.b16 %v5533_v42, %v5519_v3  ;;  %v5222_v11 = vmax.f32 %v4876_v14, %v11013_v58  ;;  %v5539_v48 = vsel %vm5450_vm10, %v5538_v17, %v5537_v23  ;;  %v5303_v58 = vld [vmem:[%s16776_s6] sm:$0x3] }
 0x497   : > { %v5287_v37 = vpack.c.bf16 %v5223_v46, %v5223_v46  ;;  %v4606_v7 = vmax.f32 %v4574_v13, 0.0  ;;  %v5541_v55 = vsel %vm5453_vm13, %v5540_v8, %v5539_v48  ;;  %v5544_v26 = vrot.slane %v5433_v16, 2 }
 0x498   : > { %v5290_v0 = vpack.c.bf16 %v5226_v61, %v5226_v61  ;;  %v5437_v31 = vunpack.c.l.b16 %v5289_v44  ;;  %11032 = vmatmul.mubr.msk.bf16.gmra.mrb[168].mxu1 %vm3622_vm4, %v5564_v45  ;;  %v5286_v24 = vpack.c.bf16 %v5222_v11, %v5222_v11  ;;  %v5543_v22 = vsel %vm5456_vm14, %v5542_v47, %v5541_v55  ;;  %v16958_v44 = vld [vmem:[#allocation28_spill] sm:$0xff] }
 0x499   : > { %v5548_v34 = vrot.slane %v5436_v21, 7  ;;  %v4622_v32 = vmax.f32 %v4604_v40, %v4606_v7  ;;  %5680 = vmatprep.mubr.bf16.mxu1 %v16909_v12  ;;  %v5545_v20 = vsel %vm5459_vm15, %v5544_v26, %v5543_v22  ;;  %v5435_v25 = vunpack.c.l.b16 %v5287_v37 }
 0x49a   : > { %v5434_v41 = vunpack.c.l.b16 %v5286_v24  ;;  %v5438_v39 = vunpack.c.l.b16 %v5290_v0  ;;  %v5550_v36 = vrot.slane %v5437_v31, 6  ;;  %v14169_v50 = vsub.s32 0, %v16958_v44 }
 0x49b   : > { %v4894_v14 = vcombine.high %v4622_v32, %v4622_v32  ;;  %v4901_v2 = vrot.slane %v4622_v32, %v13817_v63  ;;  %v5549_v56 = vsel %vm5444_vm7, %v5548_v34, %v5435_v25  ;;  %v5311_v16 = vsub.s32 1, %v16958_v44  ;;  %vm14701_vm7 = vmand %vm6555_vm0, %vm399_vm2 }
 0x49c   : > { %v5546_v53 = vrot.slane %v5434_v41, 1  ;;  %v5551_v33 = vsel %vm5447_vm8, %v5550_v36, %v5549_v56  ;;  %v5552_v27 = vrot.slane %v5438_v39, 5  ;;  %v11862_v21 = vmov 1966171168  }
 0x49d   : > { %v4908_v9 = vrot.slane %v4894_v14, %v13817_v63  ;;  %v4909_v18 = vcombine.high %v4901_v2, %v4901_v2  ;;  %v11018_v52 = vrot.slane %v4901_v2, 9  ;;  %v5721_v42 = vunpack.c.l.s4 %v11862_v21 }
 0x49e   : > { %v5547_v5 = vsel %vm5462_vm1, %v5546_v53, %v5545_v20  ;;  %v5553_v63 = vsel %vm5450_vm10, %v5552_v27, %v5551_v33  ;;  %v14176_v13 = vrot.slane %v5303_v58, %v14169_v50  ;;  %v14178_v23 = vrot.slane %v5303_v58, %v5311_v16 }
 0x49f   : > { %v4910_v40 = vcombine.high %v4908_v9, %v4908_v9  ;;  %v11019_v15 = vrot.slane %v4909_v18, 9  ;;  %v11020_v51 = vrot.slane %v4908_v9, 9  ;;  %v5227_v8 = vmax.f32 %v4901_v2, %v11018_v52 }
 0x4a0   : > { %v5722_v45 = vunpack.c.0.s8 %v5721_v42 }
 0x4a1   : > { %v11021_v62 = vrot.slane %v4910_v40, 9  ;;  %v5228_v57 = vmax.f32 %v4909_v18, %v11019_v15  ;;  %v5229_v54 = vmax.f32 %v4908_v9, %v11020_v51  ;;  %v5291_v38 = vpack.c.bf16 %v5227_v8, %v5227_v8 }
 0x4a2   : > { %v14185_v31 = vsub.s32 %v5722_v45, %v16958_v44 }
 0x4a3   : > { %v5292_v43 = vpack.c.bf16 %v5228_v57, %v5228_v57  ;;  %v5293_v29 = vpack.c.bf16 %v5229_v54, %v5229_v54  ;;  %v5439_v19 = vunpack.c.l.b16 %v5291_v38  ;;  %v5230_v35 = vmax.f32 %v4910_v40, %v11021_v62 }
 0x4a5   : > { %v5440_v28 = vunpack.c.l.b16 %v5292_v43  ;;  %v5441_v59 = vunpack.c.l.b16 %v5293_v29  ;;  %v5554_v1 = vrot.slane %v5439_v19, 4  ;;  %v5294_v10 = vpack.c.bf16 %v5230_v35, %v5230_v35 }
 0x4a7   : > { %v5556_v4 = vrot.slane %v5440_v28, 3  ;;  %v5442_v17 = vunpack.c.l.b16 %v5294_v10  ;;  %v5555_v3 = vsel %vm5453_vm13, %v5554_v1, %v5553_v63  ;;  %v5558_v30 = vrot.slane %v5441_v59, 2 }
 0x4a9   : > { %v5557_v6 = vsel %vm5456_vm14, %v5556_v4, %v5555_v3  ;;  %v5560_v46 = vrot.slane %v5442_v17, 1 }
 0x4aa   : > { %v5559_v61 = vsel %vm5459_vm15, %v5558_v30, %v5557_v6 }
 0x4ab   : > { %v5561_v49 = vsel %vm5462_vm1, %v5560_v46, %v5559_v61 }
 0x4ac   : > { %v5565_v60 = vpack.c.b16 %v5561_v49, %v5547_v5 }
 0x4ae   : > { %11033 = vmatmul.mubr.msk.bf16.gmra.mrb[172].mxu1 %vm3622_vm4, %v5565_v60 }
 0x519   : > { %v5652_v47 = vpop.f32.mrb[160].mxu1 }
 0x51a   : > { %v5653_v11 = vadd.f32 %v5652_v47, %v14176_v13  ;;  %v5654_v48 = vpop.f32.mrb[161].mxu1 }
 0x51b   : > { %v5655_v37 = vadd.f32 %v5654_v48, %v14178_v23  ;;  %v5656_v7 = vpop.f32.mrb[162].mxu1 }
 0x51c   : > { %v5657_v55 = vadd.f32 %v5656_v7, %v14176_v13  ;;  %v5658_v26 = vpop.f32.mrb[163].mxu1  ;;  %v5691_v24 = vmax.f32 %v5653_v11, 0.0 }
 0x51d   : > { %v5659_v0 = vadd.f32 %v5658_v26, %v14178_v23  ;;  %v5692_v34 = vmax.f32 %v5655_v37, 0.0 }
 0x51e   : > { %v5693_v22 = vmax.f32 %v5657_v55, 0.0 }
 0x51f   : > { %v5694_v32 = vmax.f32 %v5659_v0, 0.0 }
 0x520   : > { %v5707_v20 = vpack.c.bf16 %v5693_v22, %v5691_v24  ;;  %v11034_v41 = vpack.c.bf16 %v5693_v22, %v5693_v22 }
 0x521   : > { %v5708_v25 = vpack.c.bf16 %v5694_v32, %v5692_v34  ;;  %v11070_v39 = vpack.c.bf16 %v5694_v32, %v5694_v32 }
 0x522   : > { %v5726_v14 = vrot.slane %v5707_v20, %v14185_v31  ;;  %v5733_v2 = vrot.slane %v11034_v41, %v14185_v31 }
 0x523   : > { %v6632_v36 = vrot.slane %v5708_v25, %v14185_v31  ;;  %v14193_v9 = vrot.slane %v11070_v39, %v14185_v31 }
 0x524   : > { %v5742_v53 = vrot.slane %v5726_v14, %v14185_v31  ;;  %v5749_v56 = vrot.slane %v5733_v2, %v14185_v31  ;;  %v5734_v33 = vcombine.high %v5726_v14, %v5726_v14  ;;  %v5735_v1 = vcombine.high %v5733_v2, %v5733_v2 }
 0x525   : > { %v6648_v18 = vrot.slane %v6632_v36, %v14185_v31  ;;  %v14201_v27 = vrot.slane %v14193_v9, %v14185_v31  ;;  %v6640_v21 = vcombine.high %v6632_v36, %v6632_v36  ;;  %v6641_v34 = vcombine.high %v14193_v9, %v14193_v9 }
 0x526   : > { %v11038_v52 = vpack.i.b16 %v5742_v53, %v5742_v53  ;;  %v5916_v5 = vunpack.i.h.s16 %v5742_v53  ;;  %v5924_v40 = vunpack.i.h.s16 %v5749_v56  ;;  %v11042_v8 = vpack.i.b16 %v5749_v56, %v5749_v56 }
 0x527   : > { %v6822_v54 = vunpack.i.h.s16 %v6648_v18  ;;  %v11074_v43 = vpack.i.b16 %v6648_v18, %v6648_v18  ;;  %v14214_v29 = vrot.slane %v5734_v33, %v14185_v31  ;;  %v6830_v63 = vunpack.i.h.s16 %v14201_v27 }
 0x528   : > { %v14197_v15 = vrot.slane %v11038_v52, %v14169_v50  ;;  %v5980_v51 = vpack.i.b16 %v5916_v5, %v5916_v5  ;;  %v5988_v57 = vpack.i.b16 %v5924_v40, %v5924_v40  ;;  %v14211_v38 = vrot.slane %v11042_v8, %v14169_v50 }
 0x529   : > { %v6886_v35 = vpack.i.b16 %v6822_v54, %v6822_v54  ;;  %v14225_v28 = vrot.slane %v11074_v43, %v14169_v50  ;;  %v11078_v59 = vpack.i.b16 %v14201_v27, %v14201_v27  ;;  %v6894_v4 = vpack.i.b16 %v6830_v63, %v6830_v63 }
 0x52a   : > { %6363 = vrot.lane.b32.xlu0 %v14197_v15, %s11860_s30  ;;  %v14206_v62 = vrot.slane %v5980_v51, %v14169_v50  ;;  %v14219_v19 = vrot.slane %v5988_v57, %v14169_v50  ;;  %v5918_v17 = vunpack.i.h.s16 %v14214_v29  ;;  %v5764_v3 = vcombine.high %v5742_v53, %v5742_v53 }
 0x52b   : > { %v14232_v10 = vrot.slane %v6886_v35, %v14169_v50  ;;  %v14238_v30 = vrot.slane %v11078_v59, %v14169_v50  ;;  %v11039_v6 = vpack.i.b16 %v14214_v29, %v14214_v29  ;;  %v14243_v46 = vrot.slane %v5735_v1, %v14185_v31 }
 0x52c   : > { %6365 = vrot.lane.b32.xlu1 %v14206_v62, %s11860_s30  ;;  %v14248_v61 = vrot.slane %v6894_v4, %v14169_v50  ;;  %v5982_v49 = vpack.i.b16 %v5918_v17, %v5918_v17  ;;  %v5920_v60 = vunpack.i.h.s16 %v5764_v3  ;;  %v11040_v16 = vpack.i.b16 %v5764_v3, %v5764_v3 }
 0x52d   : > { %v14253_v58 = vrot.slane %v11039_v6, %v14169_v50  ;;  %v5926_v45 = vunpack.i.h.s16 %v14243_v46  ;;  %v5765_v11 = vcombine.high %v5749_v56, %v5749_v56  ;;  %v11043_v37 = vpack.i.b16 %v14243_v46, %v14243_v46 }
 0x52e   : > { %6379 = vrot.lane.b32.xlu0 %v14211_v38, %s11860_s30  ;;  %v14258_v42 = vrot.slane %v5982_v49, %v14169_v50  ;;  %v5984_v47 = vpack.i.b16 %v5920_v60, %v5920_v60  ;;  %v14264_v48 = vrot.slane %v11040_v16, %v14169_v50  ;;  %v14269_v7 = vrot.slane %v6640_v21, %v14185_v31 }
 0x52f   : > { %v5990_v26 = vpack.i.b16 %v5926_v45, %v5926_v45  ;;  %v5928_v0 = vunpack.i.h.s16 %v5765_v11  ;;  %v14279_v24 = vrot.slane %v11043_v37, %v14169_v50  ;;  %v11044_v22 = vpack.i.b16 %v5765_v11, %v5765_v11 }
 0x530   : > { %6381 = vrot.lane.b32.xlu1 %v14219_v19, %s11860_s30  ;;  %v14274_v55 = vrot.slane %v5984_v47, %v14169_v50  ;;  %v6824_v41 = vunpack.i.h.s16 %v14269_v7  ;;  %v6670_v25 = vcombine.high %v6648_v18, %v6648_v18  ;;  %v11075_v2 = vpack.i.b16 %v14269_v7, %v14269_v7 }
 0x531   : > { %v14286_v32 = vrot.slane %v5990_v26, %v14169_v50  ;;  %v5992_v20 = vpack.i.b16 %v5928_v0, %v5928_v0  ;;  %v14292_v14 = vrot.slane %v11044_v22, %v14169_v50  ;;  %v6669_v39 = vrot.slane %v6641_v34, %v14185_v31 }
 0x532   : > { %7269 = vrot.lane.b32.xlu0 %v14225_v28, %s11860_s30  ;;  %v6888_v53 = vpack.i.b16 %v6824_v41, %v6824_v41  ;;  %v6826_v56 = vunpack.i.h.s16 %v6670_v25  ;;  %v14305_v18 = vrot.slane %v11075_v2, %v14169_v50  ;;  %v11076_v52 = vpack.i.b16 %v6670_v25, %v6670_v25 }
 0x533   : > { %v14300_v36 = vrot.slane %v5992_v20, %v14169_v50  ;;  %v6832_v51 = vunpack.i.h.s16 %v6669_v39  ;;  %v6671_v43 = vcombine.high %v14201_v27, %v14201_v27  ;;  %v11079_v4 = vpack.i.b16 %v6669_v39, %v6669_v39 }
 0x534   : > { %7271 = vrot.lane.b32.xlu1 %v14232_v10, %s11860_s30  ;;  %v14312_v57 = vrot.slane %v6888_v53, %v14169_v50  ;;  %v6890_v54 = vpack.i.b16 %v6826_v56, %v6826_v56  ;;  %v14321_v1 = vrot.slane %v11076_v52, %v14169_v50  ;;  %v5766_v49 = vcombine.high %v14214_v29, %v14214_v29 }
 0x535   : > { %v6896_v6 = vpack.i.b16 %v6832_v51, %v6832_v51  ;;  %v6834_v21 = vunpack.i.h.s16 %v6671_v43  ;;  %v14333_v11 = vrot.slane %v11079_v4, %v14169_v50  ;;  %v11080_v37 = vpack.i.b16 %v6671_v43, %v6671_v43 }
 0x536   : > { %7285 = vrot.lane.b32.xlu0 %v14238_v30, %s11860_s30  ;;  %16959 = vst [vmem:[#allocation8_spill] sm:$0xff] %v14321_v1  ;;  %v14328_v16 = vrot.slane %v6890_v54, %v14169_v50  ;;  %v5922_v0 = vunpack.i.h.s16 %v5766_v49  ;;  %v5767_v22 = vcombine.high %v14243_v46, %v14243_v46  ;;  %v11041_v20 = vpack.i.b16 %v5766_v49, %v5766_v49 }
 0x537   : > { %v14338_v29 = vrot.slane %v6896_v6, %v14169_v50  ;;  %v6898_v26 = vpack.i.b16 %v6834_v21, %v6834_v21  ;;  %v14345_v34 = vrot.slane %v11080_v37, %v14169_v50  ;;  %v6672_v41 = vcombine.high %v14269_v7, %v14269_v7 }
 0x538   : > { %7287 = vrot.lane.b32.xlu1 %v14248_v61, %s11860_s30  ;;  %16960 = vst [vmem:[#allocation9_spill] sm:$0xff] %v14328_v16  ;;  %v5986_v2 = vpack.i.b16 %v5922_v0, %v5922_v0  ;;  %v5930_v53 = vunpack.i.h.s16 %v5767_v22  ;;  %v14357_v46 = vrot.slane %v11041_v20, %v14169_v50  ;;  %v11045_v56 = vpack.i.b16 %v5767_v22, %v5767_v22 }
 0x539   : > { %16961 = vst [vmem:[#allocation10_spill] sm:$0xff] %v14345_v34  ;;  %v14352_v25 = vrot.slane %v6898_v26, %v14169_v50  ;;  %v6673_v52 = vcombine.high %v6669_v39, %v6669_v39 }
 0x53a   : > { %6367 = vrot.lane.b32.xlu0 %v14253_v58, %s11860_s30  ;;  %v5994_v51 = vpack.i.b16 %v5930_v53, %v5930_v53 }
 0x53b   : > { %16962 = vst [vmem:[#allocation7_spill] sm:$0xff] %v14352_v25  ;;  %v11081_v4 = vpack.i.b16 %v6673_v52, %v6673_v52 }
 0x53c   : > { %6369 = vrot.lane.b32.xlu1 %v14258_v42, %s11860_s30 }
 0x53e   : > { %6371 = vrot.lane.b32.xlu0 %v14264_v48, %s11860_s30 }
 0x540   : > { %6373 = vrot.lane.b32.xlu1 %v14274_v55, %s11860_s30 }
 0x542   : > { %6383 = vrot.lane.b32.xlu0 %v14279_v24, %s11860_s30 }
 0x544   : > { %6385 = vrot.lane.b32.xlu1 %v14286_v32, %s11860_s30 }
 0x546   : > { %6387 = vrot.lane.b32.xlu0 %v14292_v14, %s11860_s30 }
 0x548   : > { %v5662_v9 = vpop.f32.mrb[164].mxu1  ;;  %6389 = vrot.lane.b32.xlu1 %v14300_v36, %s11860_s30 }
 0x549   : > { %v5663_v5 = vadd.f32 %v5662_v9, %v14176_v13  ;;  %v5664_v40 = vpop.f32.mrb[165].mxu1  ;;  %v6828_v9 = vunpack.i.h.s16 %v6672_v41 }
 0x54a   : > { %v5665_v8 = vadd.f32 %v5664_v40, %v14178_v23  ;;  %v5666_v33 = vpop.f32.mrb[166].mxu1  ;;  %7273 = vrot.lane.b32.xlu0 %v14305_v18, %s11860_s30  ;;  %v14363_v40 = vrot.slane %v5986_v2, %v14169_v50 }
 0x54b   : > { %v5667_v35 = vadd.f32 %v5666_v33, %v14176_v13  ;;  %v5668_v63 = vpop.f32.mrb[167].mxu1  ;;  %v5695_v17 = vmax.f32 %v5663_v5, 0.0  ;;  %v11077_v33 = vpack.i.b16 %v6672_v41, %v6672_v41  ;;  %v6892_v54 = vpack.i.b16 %v6828_v9, %v6828_v9 }
 0x54c   : > { %v5669_v59 = vadd.f32 %v5668_v63, %v14178_v23  ;;  %7275 = vrot.lane.b32.xlu1 %v14312_v57, %s11860_s30  ;;  %v5696_v60 = vmax.f32 %v5665_v8, 0.0  ;;  %v14368_v8 = vrot.slane %v11045_v56, %v14169_v50  ;;  %v6836_v63 = vunpack.i.h.s16 %v6673_v52 }
 0x54d   : > { %v5697_v3 = vmax.f32 %v5667_v35, 0.0  ;;  %v14377_v35 = vrot.slane %v5994_v51, %v14169_v50 }
 0x54e   : > { %v5698_v27 = vmax.f32 %v5669_v59, 0.0  ;;  %7277 = vrot.lane.b32.xlu0 %v14321_v1, %s11860_s30  ;;  %v14382_v59 = vrot.slane %v11077_v33, %v14169_v50 }
 0x54f   : > { %v5709_v47 = vpack.c.bf16 %v5697_v3, %v5695_v17  ;;  %v11035_v5 = vpack.c.bf16 %v5697_v3, %v5697_v3  ;;  %v14385_v3 = vrot.slane %v6892_v54, %v14169_v50 }
 0x550   : > { %v5710_v45 = vpack.c.bf16 %v5698_v27, %v5696_v60  ;;  %7279 = vrot.lane.b32.xlu1 %v14328_v16, %s11860_s30  ;;  %16963 = vst [vmem:[#allocation11_spill] sm:$0xff] %v14382_v59  ;;  %v11071_v17 = vpack.c.bf16 %v5698_v27, %v5698_v27  ;;  %v6900_v60 = vpack.i.b16 %v6836_v63, %v6836_v63 }
 0x551   : > { %v5775_v7 = vrot.slane %v5709_v47, %v14185_v31  ;;  %v14371_v39 = vrot.slane %v11035_v5, %v14185_v31  ;;  %16964 = vst [vmem:[#allocation12_spill] sm:$0xff] %v14385_v3  ;;  %v14399_v27 = vrot.slane %v11081_v4, %v14169_v50 }
 0x552   : > { %7289 = vrot.lane.b32.xlu0 %v14333_v11, %s11860_s30  ;;  %v14392_v49 = vrot.slane %v5710_v45, %v14185_v31  ;;  %v14402_v37 = vrot.slane %v11071_v17, %v14185_v31  ;;  %v14411_v45 = vrot.slane %v6900_v60, %v14169_v50 }
 0x553   : > { %v5791_v43 = vrot.slane %v5775_v7, %v14185_v31  ;;  %v14389_v6 = vrot.slane %v14371_v39, %v14185_v31  ;;  %16965 = vst [vmem:[#allocation14_spill] sm:$0xff] %v14399_v27  ;;  %v5783_v53 = vcombine.high %v5775_v7, %v5775_v7 }
 0x554   : > { %7291 = vrot.lane.b32.xlu1 %v14338_v29, %s11860_s30  ;;  %v14406_v26 = vrot.slane %v14392_v49, %v14185_v31  ;;  %16966 = vst [vmem:[#allocation13_spill] sm:$0xff] %v14411_v45  ;;  %v14423_v2 = vrot.slane %v14402_v37, %v14185_v31 }
 0x555   : > { %v5932_v21 = vunpack.i.h.s16 %v5791_v43  ;;  %v11046_v47 = vpack.i.b16 %v5791_v43, %v5791_v43  ;;  %v5940_v22 = vunpack.i.h.s16 %v14389_v6  ;;  %v11050_v41 = vpack.i.b16 %v14389_v6, %v14389_v6 }
 0x556   : > { %7293 = vrot.lane.b32.xlu0 %v14345_v34, %s11860_s30  ;;  %v6838_v52 = vunpack.i.h.s16 %v14406_v26  ;;  %v11082_v7 = vpack.i.b16 %v14406_v26, %v14406_v26  ;;  %v6846_v17 = vunpack.i.h.s16 %v14423_v2  ;;  %v14442_v60 = vrot.slane %v5783_v53, %v14185_v31 }
 0x557   : > { %v5996_v0 = vpack.i.b16 %v5932_v21, %v5932_v21  ;;  %v14417_v20 = vrot.slane %v11046_v47, %v14169_v50  ;;  %v6004_v9 = vpack.i.b16 %v5940_v22, %v5940_v22  ;;  %v14435_v54 = vrot.slane %v11050_v41, %v14169_v50 }
 0x558   : > { %7295 = vrot.lane.b32.xlu1 %v14352_v25, %s11860_s30  ;;  %v6902_v22 = vpack.i.b16 %v6838_v52, %v6838_v52  ;;  %v14456_v53 = vrot.slane %v11082_v7, %v14169_v50  ;;  %v6910_v52 = vpack.i.b16 %v6846_v17, %v6846_v17  ;;  %v5934_v7 = vunpack.i.h.s16 %v14442_v60 }
 0x559   : > { %16967 = vst [vmem:[#allocation15_spill] sm:$0xff] %v14417_v20  ;;  %v14428_v56 = vrot.slane %v5996_v0, %v14169_v50  ;;  %16969 = vst [vmem:[#allocation18_spill] sm:$0xff] %v14435_v54  ;;  %v14448_v0 = vrot.slane %v6004_v9, %v14169_v50 }
 0x55a   : > { %6375 = vrot.lane.b32.xlu0 %v14357_v46, %s11860_s30  ;;  %16971 = vst [vmem:[#allocation20_spill] sm:$0xff] %v14456_v53 }
 0x55b   : > { %16968 = vst [vmem:[#allocation16_spill] sm:$0xff] %v14428_v56  ;;  %16970 = vst [vmem:[#allocation17_spill] sm:$0xff] %v14448_v0 }
 0x55c   : > { %6377 = vrot.lane.b32.xlu1 %v14363_v40, %s11860_s30 }
 0x55e   : > { %6391 = vrot.lane.b32.xlu0 %v14368_v8, %s11860_s30 }
 0x560   : > { %6393 = vrot.lane.b32.xlu1 %v14377_v35, %s11860_s30 }
 0x562   : > { %7281 = vrot.lane.b32.xlu0 %v14382_v59, %s11860_s30 }
 0x564   : > { %7283 = vrot.lane.b32.xlu1 %v14385_v3, %s11860_s30 }
 0x566   : > { %7297 = vrot.lane.b32.xlu0 %v14399_v27, %s11860_s30 }
 0x568   : > { %7299 = vrot.lane.b32.xlu1 %v14411_v45, %s11860_s30 }
 0x56a   : > { %6395 = vrot.lane.b32.xlu0 %v14417_v20, %s11860_s30 }
 0x56b   : > { %v5672_v5 = vpop.f32.mrb[168].mxu1 }
 0x56c   : > { %v5673_v51 = vadd.f32 %v5672_v5, %v14176_v13  ;;  %v5674_v33 = vpop.f32.mrb[169].mxu1  ;;  %6397 = vrot.lane.b32.xlu1 %v14428_v56, %s11860_s30 }
 0x56d   : > { %v5675_v63 = vadd.f32 %v5674_v33, %v14178_v23  ;;  %v5676_v4 = vpop.f32.mrb[170].mxu1 }
 0x56e   : > { %v5677_v21 = vadd.f32 %v5676_v4, %v14176_v13  ;;  %v5678_v47 = vpop.f32.mrb[171].mxu1  ;;  %6411 = vrot.lane.b32.xlu0 %v14435_v54, %s11860_s30  ;;  %v5699_v5 = vmax.f32 %v5673_v51, 0.0  ;;  %v11086_v4 = vpack.i.b16 %v14423_v2, %v14423_v2  ;;  %v5784_v54 = vcombine.high %v14371_v39, %v14371_v39 }
 0x56f   : > { %v5679_v41 = vadd.f32 %v5678_v47, %v14178_v23  ;;  %v5700_v9 = vmax.f32 %v5675_v63, 0.0  ;;  %v5813_v47 = vcombine.high %v5791_v43, %v5791_v43  ;;  %v11047_v63 = vpack.i.b16 %v14442_v60, %v14442_v60 }
 0x570   : > { %v14451_v33 = vmax.f32 %v5677_v21, 0.0  ;;  %6413 = vrot.lane.b32.xlu1 %v14448_v0, %s11860_s30  ;;  %v14470_v21 = vrot.slane %v6902_v22, %v14169_v50  ;;  %v14479_v39 = vrot.slane %v11086_v4, %v14169_v50  ;;  %v14484_v17 = vrot.slane %v5784_v54, %v14185_v31 }
 0x571   : > { %v14462_v56 = vmax.f32 %v5679_v41, 0.0  ;;  %v14489_v43 = vrot.slane %v6910_v52, %v14169_v50  ;;  %v5998_v22 = vpack.i.b16 %v5934_v7, %v5934_v7  ;;  %v5936_v41 = vunpack.i.h.s16 %v5813_v47 }
 0x572   : > { %v14465_v51 = vpack.c.bf16 %v14451_v33, %v5699_v5  ;;  %7301 = vrot.lane.b32.xlu0 %v14456_v53, %s11860_s30  ;;  %16972 = vst [vmem:[#allocation19_spill] sm:$0xff] %v14470_v21  ;;  %16973 = vst [vmem:[#allocation21_spill] sm:$0xff] %v14479_v39  ;;  %v14494_v5 = vrot.slane %v11047_v63, %v14169_v50  ;;  %v11048_v4 = vpack.i.b16 %v5813_v47, %v5813_v47 }
 0x573   : > { %v14474_v0 = vpack.c.bf16 %v14462_v56, %v5700_v9  ;;  %16974 = vst [vmem:[#allocation22_spill] sm:$0xff] %v14489_v43  ;;  %v6689_v9 = vcombine.high %v14392_v49, %v14392_v49  ;;  %v14501_v54 = vrot.slane %v5998_v22, %v14169_v50  ;;  %v6000_v52 = vpack.i.b16 %v5936_v41, %v5936_v41 }
 0x574   : > { %7303 = vrot.lane.b32.xlu1 %v14470_v21, %s11860_s30  ;;  %16975 = vst [vmem:[#allocation23_spill] sm:$0xff] %v14494_v5  ;;  %v5942_v7 = vunpack.i.h.s16 %v14484_v17  ;;  %v14509_v47 = vrot.slane %v11048_v4, %v14169_v50  ;;  %v11051_v49 = vpack.i.b16 %v14484_v17, %v14484_v17  ;;  %v6690_v21 = vcombine.high %v14402_v37, %v14402_v37 }
 0x575   : > { %16976 = vst [vmem:[#allocation24_spill] sm:$0xff] %v14501_v54  ;;  %v14514_v63 = vrot.slane %v6689_v9, %v14185_v31  ;;  %v14519_v22 = vrot.slane %v6000_v52, %v14169_v50 }
 0x576   : > { %7317 = vrot.lane.b32.xlu0 %v14479_v39, %s11860_s30  ;;  %v5814_v39 = vcombine.high %v14389_v6, %v14389_v6  ;;  %16977 = vst [vmem:[#allocation25_spill] sm:$0xff] %v14509_v47  ;;  %v6006_v41 = vpack.i.b16 %v5942_v7, %v5942_v7  ;;  %v14524_v4 = vrot.slane %v11051_v49, %v14169_v50 }
 0x577   : > { %16978 = vst [vmem:[#allocation27_spill] sm:$0xff] %v14519_v22  ;;  %v6840_v53 = vunpack.i.h.s16 %v14514_v63  ;;  %v6719_v49 = vcombine.high %v14406_v26, %v14406_v26 }
 0x578   : > { %7319 = vrot.lane.b32.xlu1 %v14489_v43, %s11860_s30  ;;  %v5944_v6 = vunpack.i.h.s16 %v5814_v39  ;;  %16979 = vst [vmem:[#allocation26_spill] sm:$0xff] %v14524_v4  ;;  %v11052_v43 = vpack.i.b16 %v5814_v39, %v5814_v39  ;;  %v14533_v52 = vrot.slane %v6006_v41, %v14169_v50  ;;  %v11083_v41 = vpack.i.b16 %v14514_v63, %v14514_v63 }
 0x579   : > { %v6904_v26 = vpack.i.b16 %v6840_v53, %v6840_v53  ;;  %v11084_v53 = vpack.i.b16 %v6719_v49, %v6719_v49 }
 0x57a   : > { %6399 = vrot.lane.b32.xlu0 %v14494_v5, %s11860_s30  ;;  %16980 = vst [vmem:[#allocation29_spill] sm:$0xff] %v14533_v52  ;;  %v6008_v7 = vpack.i.b16 %v5944_v6, %v5944_v6  ;;  %v6718_v6 = vrot.slane %v6690_v21, %v14185_v31 }
 0x57c   : > { %6401 = vrot.lane.b32.xlu1 %v14501_v54, %s11860_s30 }
 0x57e   : > { %6403 = vrot.lane.b32.xlu0 %v14509_v47, %s11860_s30 }
 0x580   : > { %6405 = vrot.lane.b32.xlu1 %v14519_v22, %s11860_s30 }
 0x581   : > { %v5682_v9 = vpop.f32.mrb[172].mxu1 }
 0x582   : > { %v5683_v47 = vadd.f32 %v5682_v9, %v14176_v13  ;;  %v5684_v54 = vpop.f32.mrb[173].mxu1  ;;  %6415 = vrot.lane.b32.xlu0 %v14524_v4, %s11860_s30  ;;  %v14542_v9 = vrot.slane %v11052_v43, %v14169_v50 }
 0x583   : > { %v5685_v39 = vadd.f32 %v5684_v54, %v14178_v23  ;;  %v5686_v22 = vpop.f32.mrb[174].mxu1 }
 0x584   : > { %v5687_v37 = vadd.f32 %v5686_v22, %v14176_v13  ;;  %v5688_v5 = vpop.f32.mrb[175].mxu1  ;;  %6417 = vrot.lane.b32.xlu1 %v14533_v52, %s11860_s30  ;;  %16981 = vst [vmem:[#allocation28_spill] sm:$0xff] %v14542_v9  ;;  %v5703_v20 = vmax.f32 %v5683_v47, 0.0  ;;  %v14553_v13 = vrot.slane %v6008_v7, %v14169_v50  ;;  %v6842_v22 = vunpack.i.h.s16 %v6719_v49 }
 0x585   : > { %v5689_v4 = vadd.f32 %v5688_v5, %v14178_v23  ;;  %v5704_v43 = vmax.f32 %v5685_v39, 0.0  ;;  %v14563_v23 = vrot.slane %v11083_v41, %v14169_v50  ;;  %v14571_v5 = vrot.slane %v6904_v26, %v14169_v50 }
 0x586   : > { %v14548_v54 = vmax.f32 %v5687_v37, 0.0  ;;  %6419 = vrot.lane.b32.xlu0 %v14542_v9, %s11860_s30  ;;  %16982 = vst [vmem:[#allocation30_spill] sm:$0xff] %v14553_v13  ;;  %v6906_v47 = vpack.i.b16 %v6842_v22, %v6842_v22  ;;  %v14578_v7 = vrot.slane %v11084_v53, %v14169_v50  ;;  %v11087_v49 = vpack.i.b16 %v6718_v6, %v6718_v6 }
 0x587   : > { %v14555_v52 = vmax.f32 %v5689_v4, 0.0  ;;  %16983 = vst [vmem:[#allocation31_spill] sm:$0xff] %v14563_v23  ;;  %16984 = vst [vmem:[#allocation32_spill] sm:$0xff] %v14571_v5  ;;  %v6848_v4 = vunpack.i.h.s16 %v6718_v6  ;;  %v5815_v26 = vcombine.high %v14442_v60, %v14442_v60 }
 0x588   : > { %v14558_v12 = vpack.c.bf16 %v14548_v54, %v5703_v20  ;;  %6421 = vrot.lane.b32.xlu1 %v14553_v13, %s11860_s30  ;;  %v6720_v20 = vcombine.high %v14423_v2, %v14423_v2  ;;  %16985 = vst [vmem:[#allocation33_spill] sm:$0xff] %v14578_v7  ;;  %v14583_v39 = vrot.slane %v6906_v47, %v14169_v50 }
 0x589   : > { %v14566_v21 = vpack.c.bf16 %v14555_v52, %v5704_v43  ;;  %v6912_v37 = vpack.i.b16 %v6848_v4, %v6848_v4  ;;  %v14590_v2 = vrot.slane %v11087_v49, %v14169_v50  ;;  %v5938_v47 = vunpack.i.h.s16 %v5815_v26 }
 0x58a   : > { %7305 = vrot.lane.b32.xlu0 %v14563_v23, %s11860_s30  ;;  %16986 = vst [vmem:[#allocation34_spill] sm:$0xff] %v14583_v39  ;;  %v6850_v41 = vunpack.i.h.s16 %v6720_v20  ;;  %v11088_v22 = vpack.i.b16 %v6720_v20, %v6720_v20  ;;  %v5816_v4 = vcombine.high %v14484_v17, %v14484_v17  ;;  %v11049_v49 = vpack.i.b16 %v5815_v26, %v5815_v26 }
 0x58b   : > { %16987 = vst [vmem:[#allocation35_spill] sm:$0xff] %v14590_v2  ;;  %v14595_v43 = vrot.slane %v6912_v37, %v14169_v50  ;;  %v6721_v20 = vcombine.high %v14514_v63, %v14514_v63  ;;  %v6722_v26 = vcombine.high %v6718_v6, %v6718_v6  ;;  %v11036_v63 = vpack.c.bf16 %v14451_v33, %v14451_v33 }
 0x58c   : > { %7307 = vrot.lane.b32.xlu1 %v14571_v5, %s11860_s30  ;;  %v6914_v53 = vpack.i.b16 %v6850_v41, %v6850_v41  ;;  %v14602_v60 = vrot.slane %v11088_v22, %v14169_v50  ;;  %v6002_v41 = vpack.i.b16 %v5938_v47, %v5938_v47  ;;  %v14614_v17 = vrot.slane %v11049_v49, %v14169_v50 }
 0x58d   : > { %16988 = vst [vmem:[#allocation36_spill] sm:$0xff] %v14595_v43  ;;  %v11053_v22 = vpack.i.b16 %v5816_v4, %v5816_v4  ;;  %v6852_v49 = vunpack.i.h.s16 %v6722_v26 }
 0x58e   : > { %7309 = vrot.lane.b32.xlu0 %v14578_v7, %s11860_s30  ;;  %16989 = vst [vmem:[#allocation37_spill] sm:$0xff] %v14602_v60  ;;  %v14609_v37 = vrot.slane %v6914_v53, %v14169_v50  ;;  %16991 = vst [vmem:[#allocation39_spill] sm:$0xff] %v14614_v17  ;;  %v6844_v7 = vunpack.i.h.s16 %v6721_v20  ;;  %v14623_v53 = vrot.slane %v6002_v41, %v14169_v50 }
 0x58f   : > { %v14630_v6 = vrot.slane %v11053_v22, %v14169_v50  ;;  %v11072_v41 = vpack.c.bf16 %v14462_v56, %v14462_v56  ;;  %v6730_v56 = vrot.slane %v14474_v0, %v14185_v31 }
 0x590   : > { %7311 = vrot.lane.b32.xlu1 %v14583_v39, %s11860_s30  ;;  %16990 = vst [vmem:[#allocation38_spill] sm:$0xff] %v14609_v37  ;;  %v5946_v39 = vunpack.i.h.s16 %v5816_v4  ;;  %16992 = vst [vmem:[#allocation40_spill] sm:$0xff] %v14623_v53  ;;  %v11085_v4 = vpack.i.b16 %v6721_v20, %v6721_v20  ;;  %v6908_v33 = vpack.i.b16 %v6844_v7, %v6844_v7 }
 0x591   : > { %16993 = vst [vmem:[#allocation41_spill] sm:$0xff] %v14630_v6  ;;  %v11089_v20 = vpack.i.b16 %v6722_v26, %v6722_v26  ;;  %v11863_v26 = vmov 1935823168  }
 0x592   : > { %7321 = vrot.lane.b32.xlu0 %v14590_v2, %s11860_s30  ;;  %v6010_v47 = vpack.i.b16 %v5946_v39, %v5946_v39  ;;  %v14650_v7 = vrot.slane %v11085_v4, %v14169_v50  ;;  %v14676_v2 = vrot.slane %v6730_v56, %v14185_v31 }
 0x593   : > { %v14671_v0 = vrot.slane %v11089_v20, %v14169_v50 }
 0x594   : > { %7323 = vrot.lane.b32.xlu1 %v14595_v43, %s11860_s30  ;;  %v14643_v9 = vrot.slane %v6010_v47, %v14169_v50  ;;  %16995 = vst [vmem:[#allocation43_spill] sm:$0xff] %v14650_v7  ;;  %v14659_v47 = vrot.slane %v11072_v41, %v14185_v31 }
 0x595   : > { %16997 = vst [vmem:[#allocation45_spill] sm:$0xff] %v14671_v0 }
 0x596   : > { %7325 = vrot.lane.b32.xlu0 %v14602_v60, %s11860_s30  ;;  %v5824_v60 = vrot.slane %v14465_v51, %v14185_v31  ;;  %v5831_v51 = vrot.slane %v11036_v63, %v14185_v31  ;;  %16994 = vst [vmem:[#allocation42_spill] sm:$0xff] %v14643_v9  ;;  %v14655_v63 = vrot.slane %v6908_v33, %v14169_v50 }
 0x597   : > { %v6739_v34 = vcombine.high %v14659_v47, %v14659_v47 }
 0x598   : > { %7327 = vrot.lane.b32.xlu1 %v14609_v37, %s11860_s30  ;;  %v14634_v13 = vrot.slane %v5824_v60, %v14185_v31  ;;  %16996 = vst [vmem:[#allocation44_spill] sm:$0xff] %v14655_v63  ;;  %v5832_v41 = vcombine.high %v5824_v60, %v5824_v60  ;;  %v5833_v60 = vcombine.high %v5831_v51, %v5831_v51 }
 0x59a   : > { %6407 = vrot.lane.b32.xlu0 %v14614_v17, %s11860_s30  ;;  %v5948_v4 = vunpack.i.h.s16 %v14634_v13  ;;  %v7656_v17 = vunpack.c.l.s4 %v11863_v26  ;;  %v11054_v33 = vpack.i.b16 %v14634_v13, %v14634_v13  ;;  %v14697_v27 = vrot.slane %v5832_v41, %v14185_v31 }
 0x59b   : > { %v14719_v3 = vrot.slane %v5833_v60, %v14185_v31 }
 0x59c   : > { %v14625_v37 = vpop.permute.xlu0 %6363  ;;  %6409 = vrot.lane.b32.xlu1 %v14623_v53, %s11860_s30  ;;  %v6012_v20 = vpack.i.b16 %v5948_v4, %v5948_v4  ;;  %v7657_v5 = vunpack.c.0.s8 %v7656_v17  ;;  %v14694_v25 = vrot.slane %v11054_v33, %v14169_v50  ;;  %v11834_v4 = vld [vmem:[%s16777_s7 + $0xe8] sm:$0xff]  }
 0x59e   : > { %v14638_v39 = vpop.permute.xlu1 %6365  ;;  %6423 = vrot.lane.b32.xlu0 %v14630_v6, %s11860_s30  ;;  %v5847_v6 = vrot.slane %v5831_v51, %v14185_v31  ;;  %16999 = vst [vmem:[#allocation47_spill] sm:$0xff] %v14694_v25  ;;  %v14710_v51 = vrot.slane %v6012_v20, %v14169_v50  ;;  %v14714_v41 = vsub.s32 %v7657_v5, %v16958_v44 }
 0x59f   : > { %v6557_v5 = vsel %vm14701_vm7, %v14197_v15, %v14625_v37  ;;  %v5862_v15 = vcombine.high %v14634_v13, %v14634_v13  ;;  %v5950_v37 = vunpack.i.h.s16 %v14697_v27 }
 0x5a0   : > { %v14645_v22 = vpop.permute.xlu0 %6379  ;;  %6425 = vrot.lane.b32.xlu1 %v14643_v9, %s11860_s30  ;;  %v6916_v9 = vpack.i.b16 %v6852_v49, %v6852_v49  ;;  %v14680_v49 = vrot.slane %v14659_v47, %v14185_v31  ;;  %v11058_v45 = vpack.i.b16 %v5847_v6, %v5847_v6  ;;  %17002 = vst [vmem:[#allocation48_spill] sm:$0xff] %v14710_v51 }
 0x5a2   : > { %v14661_v53 = vpop.permute.xlu1 %6381  ;;  %7313 = vrot.lane.b32.xlu0 %v14650_v7, %s11860_s30  ;;  %v5956_v7 = vunpack.i.h.s16 %v5847_v6  ;;  %v14724_v20 = vrot.slane %v11058_v45, %v14169_v50  ;;  %v11094_v44 = vpack.i.b16 %v14680_v49, %v14680_v49  ;;  %v11055_v45 = vpack.i.b16 %v14697_v27, %v14697_v27 }
 0x5a4   : > { %v14666_v43 = vpop.permute.xlu0 %7269  ;;  %7315 = vrot.lane.b32.xlu1 %v14655_v63, %s11860_s30  ;;  %v14687_v63 = vrot.slane %v6916_v9, %v14169_v50  ;;  %v6854_v9 = vunpack.i.h.s16 %v14676_v2  ;;  %v6020_v33 = vpack.i.b16 %v5956_v7, %v5956_v7  ;;  %17003 = vst [vmem:[#allocation49_spill] sm:$0xff] %v14724_v20  ;;  %v11090_v7 = vpack.i.b16 %v14676_v2, %v14676_v2 }
 0x5a6   : > { %v14682_v26 = vpop.permute.xlu1 %7271  ;;  %7329 = vrot.lane.b32.xlu0 %v14671_v0, %s11860_s30  ;;  %16998 = vst [vmem:[#allocation46_spill] sm:$0xff] %v14687_v63  ;;  %v6738_v0 = vcombine.high %v6730_v56, %v6730_v56  ;;  %v6918_v47 = vpack.i.b16 %v6854_v9, %v6854_v9  ;;  %v5863_v9 = vcombine.high %v5847_v6, %v5847_v6 }
 0x5a7   : > { %v14762_v13 = vrot.slane %v11090_v7, %v14169_v50  ;;  %v14772_v6 = vrot.slane %v11094_v44, %v14169_v50  ;;  %v5952_v7 = vunpack.i.h.s16 %v5862_v15  ;;  %v6014_v44 = vpack.i.b16 %v5950_v37, %v5950_v37 }
 0x5a8   : > { %v14689_v23 = vpop.permute.xlu0 %7285  ;;  %7331 = vrot.lane.b32.xlu1 %v14687_v63, %s11860_s30  ;;  %v6862_v63 = vunpack.i.h.s16 %v14680_v49  ;;  %v11060_v37 = vpack.i.b16 %v5863_v9, %v5863_v9 }
 0x5a9   : > { %17005 = vst [vmem:[#allocation51_spill] sm:$0xff] %v14762_v13  ;;  %17007 = vst [vmem:[#allocation53_spill] sm:$0xff] %v14772_v6 }
 0x5aa   : > { %v14705_v17 = vpop.permute.xlu1 %7287  ;;  %6427 = vrot.lane.b32.xlu0 %v14694_v25, %s11860_s30  ;;  %v14742_v25 = vrot.slane %v6020_v33, %v14169_v50  ;;  %v6926_v59 = vpack.i.b16 %v6862_v63, %v6862_v63 }
 0x5ac   : > { %v6368_v16 = vpop.permute.xlu0 %6367  ;;  %6429 = vrot.lane.b32.xlu1 %v14710_v51, %s11860_s30  ;;  %17004 = vst [vmem:[#allocation50_spill] sm:$0xff] %v14742_v25 }
 0x5ad   : > { %v6559_v56 = vsel %vm14701_vm7, %v14253_v58, %v6368_v16  ;;  %v6558_v58 = vsel %vm14701_vm7, %v14206_v62, %v14638_v39  ;;  %v5958_v62 = vunpack.i.h.s16 %v14719_v3  ;;  %v14766_v39 = vrot.slane %v6739_v34, %v14185_v31 }
 0x5ae   : > { %v7653_v60 = vcombine.low %v6557_v5, %v6559_v56  ;;  %v6370_v51 = vpop.permute.xlu1 %6369  ;;  %6443 = vrot.lane.b32.xlu0 %v14724_v20, %s11860_s30  ;;  %v14755_v5 = vrot.slane %v6738_v0, %v14185_v31  ;;  %v11059_v34 = vpack.i.b16 %v14719_v3, %v14719_v3 }
 0x5af   : > { %v6560_v16 = vsel %vm14701_vm7, %v14258_v42, %v6370_v51  ;;  %v14769_v42 = vrot.slane %v6918_v47, %v14169_v50  ;;  %v14786_v47 = vrot.slane %v11055_v45, %v14169_v50  ;;  %v6022_v20 = vpack.i.b16 %v5958_v62, %v5958_v62 }
 0x5b0   : > { %v7654_v33 = vcombine.low %v6558_v58, %v6560_v16  ;;  %v14757_v63 = vpop.permute.xlu0 %6371  ;;  %6445 = vrot.lane.b32.xlu1 %v14742_v25, %s11860_s30  ;;  %v7661_v0 = vrot.slane %v7653_v60, %v14714_v41  ;;  %v14783_v58 = vrot.slane %v6926_v59, %v14169_v50  ;;  %v5960_v16 = vunpack.i.h.s16 %v5863_v9 }
 0x5b1   : > { %17006 = vst [vmem:[#allocation52_spill] sm:$0xff] %v14769_v42  ;;  %v6565_v59 = vsel %vm14701_vm7, %v14211_v38, %v14645_v22  ;;  %v6016_v62 = vpack.i.b16 %v5952_v7, %v5952_v7  ;;  %v14804_v1 = vrot.slane %v11059_v34, %v14169_v50  ;;  %v6566_v38 = vsel %vm14701_vm7, %v14219_v19, %v14661_v53 }
 0x5b2   : > { %v7668_v51 = vrot.slane %v7654_v33, %v14714_v41  ;;  %v14776_v56 = vpop.permute.xlu1 %6373  ;;  %7333 = vrot.lane.b32.xlu0 %v14762_v13, %s11860_s30  ;;  %17008 = vst [vmem:[#allocation54_spill] sm:$0xff] %v14783_v58  ;;  %v11056_v33 = vpack.i.b16 %v5862_v15, %v5862_v15  ;;  %v11091_v13 = vpack.i.b16 %v14755_v5, %v14755_v5 }
 0x5b3   : > { %v6768_v22 = vcombine.high %v14676_v2, %v14676_v2  ;;  %v14820_v7 = vrot.slane %v6014_v44, %v14169_v50  ;;  %v14826_v53 = vrot.slane %v6022_v20, %v14169_v50  ;;  %v14843_v20 = vrot.slane %v6016_v62, %v14169_v50 }
 0x5b4   : > { %v7669_v60 = vcombine.low %v7661_v0, %v7668_v51  ;;  %v6384_v25 = vpop.permute.xlu0 %6383  ;;  %7335 = vrot.lane.b32.xlu1 %v14769_v42, %s11860_s30  ;;  %v6856_v0 = vunpack.i.h.s16 %v14755_v5  ;;  %v14823_v19 = vrot.slane %v11056_v33, %v14169_v50  ;;  %v14832_v2 = vrot.slane %v11091_v13, %v14169_v50 }
 0x5b5   : > { %v6567_v45 = vsel %vm14701_vm7, %v14279_v24, %v6384_v25  ;;  %v6024_v25 = vpack.i.b16 %v5960_v16, %v5960_v16  ;;  %17009 = vst [vmem:[#allocation55_spill] sm:$0xff] %v14820_v7  ;;  %17012 = vst [vmem:[#allocation58_spill] sm:$0xff] %v14843_v20  ;;  %v6858_v13 = vunpack.i.h.s16 %v6768_v22  ;;  %v6864_v62 = vunpack.i.h.s16 %v14766_v39 }
 0x5b6   : > { %v7676_v51 = vrot.slane %v7669_v60, %v14714_v41  ;;  %v7749_v42 = vcombine.low %v6565_v59, %v6567_v45  ;;  %v6386_v15 = vpop.permute.xlu1 %6385  ;;  %7349 = vrot.lane.b32.xlu0 %v14772_v6, %s11860_s30  ;;  %17010 = vst [vmem:[#allocation56_spill] sm:$0xff] %v14823_v19  ;;  %v6920_v34 = vpack.i.b16 %v6856_v0, %v6856_v0 }
 0x5b7   : > { %v6568_v24 = vsel %vm14701_vm7, %v14286_v32, %v6386_v15  ;;  %v14829_v32 = vrot.slane %v11060_v37, %v14169_v50  ;;  %v14846_v33 = vrot.slane %v6024_v25, %v14169_v50  ;;  %v11095_v37 = vpack.i.b16 %v14766_v39, %v14766_v39 }
 0x5b8   : > { %v8422_v9 = vshrl.u32 %v7676_v51, 16  ;;  %v7750_v60 = vcombine.low %v6566_v38, %v6568_v24  ;;  %v14815_v59 = vpop.permute.xlu0 %6387  ;;  %7351 = vrot.lane.b32.xlu1 %v14783_v58, %s11860_s30  ;;  %v8425_v45 = vshll.u32 %v7676_v51, 16  ;;  %v7757_v15 = vrot.slane %v7749_v42, %v14714_v41 }
 0x5b9   : > { %17011 = vst [vmem:[#allocation57_spill] sm:$0xff] %v14829_v32  ;;  %17013 = vst [vmem:[#allocation59_spill] sm:$0xff] %v14846_v33  ;;  %v11037_v42 = vpack.c.bf16 %v14548_v54, %v14548_v54  ;;  %v7461_v25 = vsel %vm14701_vm7, %v14225_v28, %v14666_v43  ;;  %v11092_v54 = vpack.i.b16 %v6768_v22, %v6768_v22 }
 0x5ba   : > { %v14834_v16 = vrot.slane %v8422_v9, 7  ;;  %v7764_v44 = vrot.slane %v7750_v60, %v14714_v41  ;;  %v14838_v38 = vpop.permute.xlu1 %6389  ;;  %6431 = vrot.lane.b32.xlu0 %v14786_v47, %s11860_s30  ;;  %v8741_v9 = vld [vmem:[#allocation3 + $0xc] sm:$0xf]  ;;  %v14873_v28 = vrot.slane %v6920_v34, %v14169_v50  ;;  %v7462_v43 = vsel %vm14701_vm7, %v14232_v10, %v14682_v26 }
 0x5bb   : > { %v6922_v22 = vpack.i.b16 %v6858_v13, %v6858_v13  ;;  %v5880_v34 = vrot.slane %v11037_v42, %v14185_v31  ;;  %v6779_v10 = vrot.slane %v14566_v21, %v14185_v31  ;;  %v6928_v26 = vpack.i.b16 %v6864_v62, %v6864_v62 }
 0x5bc   : > { %v8427_v0 = vor.u32 %v8425_v45, %v14834_v16  ;;  %v7765_v51 = vcombine.low %v7757_v15, %v7764_v44  ;;  %v7274_v24 = vpop.permute.xlu0 %7273  ;;  %6433 = vrot.lane.b32.xlu1 %v14820_v7, %s11860_s30  ;;  %v14865_v45 = vcombine.high %v14680_v49, %v14680_v49  ;;  %v11838_v15 = vld [vmem:[%s16777_s7 + $0xf0] sm:$0xff]  }
 0x5bd   : > { %v7463_v60 = vsel %vm14701_vm7, %v14305_v18, %v7274_v24  ;;  %v11073_v18 = vpack.c.bf16 %v14555_v52, %v14555_v52  ;;  %v14894_v52 = vrot.slane %v11092_v54, %v14169_v50  ;;  %v5882_v54 = vcombine.high %v5880_v34, %v5880_v34 }
 0x5be   : > { %v8742_v44 = vsel %vm12772_vm6, %v8427_v0, %v8741_v9  ;;  %v7772_v58 = vrot.slane %v7765_v51, %v14714_v41  ;;  %v7701_v6 = vcombine.low %v7461_v25, %v7463_v60  ;;  %v7276_v7 = vpop.permute.xlu1 %7275  ;;  %6435 = vrot.lane.b32.xlu0 %v14823_v19, %s11860_s30  ;;  %v5873_v0 = vrot.slane %v14558_v12, %v14185_v31 }
 0x5bf   : > { %8743 = vst [vmem:[#allocation3 + $0xc] sm:$0xf] %v8742_v44  ;;  %v7464_v49 = vsel %vm14701_vm7, %v14312_v57, %v7276_v7  ;;  %17015 = vst [vmem:[#allocation6_spill] sm:$0xff] %v14894_v52  ;;  %v14897_v57 = vrot.slane %v11095_v37, %v14169_v50  ;;  %v6786_v21 = vrot.slane %v11073_v18, %v14185_v31  ;;  %v6866_v62 = vunpack.i.h.s16 %v14865_v45 }
 0x5c0   : > { %v8456_v51 = vshrl.u32 %v7772_v58, 16  ;;  %v7702_v24 = vcombine.low %v7462_v43, %v7464_v49  ;;  %v14887_v25 = vpop.permute.xlu0 %7277  ;;  %6437 = vrot.lane.b32.xlu1 %v14843_v20, %s11860_s30  ;;  %v8459_v7 = vshll.u32 %v7772_v58, 16  ;;  %v7709_v13 = vrot.slane %v7701_v6, %v14714_v41 }
 0x5c1   : > { %v14909_v60 = vrot.slane %v6922_v22, %v14169_v50  ;;  %v11096_v37 = vpack.i.b16 %v14865_v45, %v14865_v45  ;;  %v5881_v58 = vcombine.high %v5873_v0, %v5873_v0  ;;  %v14918_v49 = vrot.slane %v5873_v0, %v14185_v31  ;;  %v8755_v22 = vld [vmem:[#allocation3 + $0x24] sm:$0xf] }
 0x5c2   : > { %v14899_v12 = vrot.slane %v8456_v51, 7  ;;  %v7716_v42 = vrot.slane %v7702_v24, %v14714_v41  ;;  %v14903_v9 = vpop.permute.xlu1 %7279  ;;  %6447 = vrot.lane.b32.xlu0 %v14804_v1, %s11860_s30  ;;  %v14921_v18 = vrot.slane %v5880_v34, %v14185_v31  ;;  %v7469_v45 = vsel %vm14701_vm7, %v14238_v30, %v14689_v23 }
 0x5c3   : > { %17016 = vst [vmem:[#allocation60_spill] sm:$0xff] %v14909_v60  ;;  %v6787_v24 = vcombine.high %v6779_v10, %v6779_v10  ;;  %v6788_v34 = vcombine.high %v6786_v21, %v6786_v21  ;;  %v14936_v20 = vrot.slane %v6779_v10, %v14185_v31  ;;  %v7470_v30 = vsel %vm14701_vm7, %v14248_v61, %v14705_v17 }
 0x5c4   : > { %v8461_v6 = vor.u32 %v8459_v7, %v14899_v12  ;;  %v7717_v44 = vcombine.low %v7709_v13, %v7716_v42  ;;  %v7290_v43 = vpop.permute.xlu0 %7289  ;;  %6449 = vrot.lane.b32.xlu1 %v14826_v53, %s11860_s30  ;;  %v14946_v23 = vrot.slane %v5881_v58, %v14185_v31  ;;  %v14956_v61 = vrot.slane %v5882_v54, %v14185_v31 }
 0x5c5   : > { %v7471_v51 = vsel %vm14701_vm7, %v14333_v11, %v7290_v43  ;;  %v14959_v17 = vrot.slane %v6928_v26, %v14169_v50  ;;  %v5864_v58 = vcombine.high %v14697_v27, %v14697_v27  ;;  %v14972_v54 = vrot.slane %v6787_v24, %v14185_v31 }
 0x5c6   : > { %v8756_v7 = vsel %vm12772_vm6, %v8461_v6, %v8755_v22  ;;  %v7724_v0 = vrot.slane %v7717_v44, %v14714_v41  ;;  %v7797_v13 = vcombine.low %v7469_v45, %v7471_v51  ;;  %v7292_v42 = vpop.permute.xlu1 %7291  ;;  %6451 = vrot.lane.b32.xlu0 %v14829_v32, %s11860_s30  ;;  %v14949_v6 = vrot.slane %v6786_v21, %v14185_v31 }
 0x5c7   : > { %8757 = vst [vmem:[#allocation3 + $0x24] sm:$0xf] %v8756_v7  ;;  %v7472_v11 = vsel %vm14701_vm7, %v14338_v29, %v7292_v42  ;;  %v6930_v29 = vpack.i.b16 %v6866_v62, %v6866_v62  ;;  %v14975_v26 = vrot.slane %v6788_v34, %v14185_v31  ;;  %v14978_v27 = vrot.slane %v11096_v37, %v14169_v50  ;;  %v8748_v37 = vld [vmem:[#allocation3 + $0x18] sm:$0xf] }
 0x5c8   : > { %v8439_v44 = vshrl.u32 %v7724_v0, 16  ;;  %v7798_v43 = vcombine.low %v7470_v30, %v7472_v11  ;;  %v14951_v10 = vpop.permute.xlu0 %7293  ;;  %6453 = vrot.lane.b32.xlu1 %v14846_v33, %s11860_s30  ;;  %v8442_v21 = vshll.u32 %v7724_v0, 16  ;;  %v7805_v22 = vrot.slane %v7797_v13, %v14714_v41 }
 0x5c9   : > { %17017 = vst [vmem:[#allocation61_spill] sm:$0xff] %v14978_v27  ;;  %v14982_v62 = vcombine.high %v14719_v3, %v14719_v3  ;;  %v14989_v24 = vcombine.high %v14755_v5, %v14755_v5  ;;  %v14993_v31 = vcombine.high %v14766_v39, %v14766_v39  ;;  %v6561_v3 = vsel %vm14701_vm7, %v14264_v48, %v14757_v63 }
 0x5ca   : > { %v14963_v45 = vrot.slane %v8439_v44, 7  ;;  %v7812_v51 = vrot.slane %v7798_v43, %v14714_v41  ;;  %v14967_v7 = vpop.permute.xlu1 %7295  ;;  %7337 = vrot.lane.b32.xlu0 %v14832_v2, %s11860_s30  ;;  %v15003_v30 = vrot.slane %v6930_v29, %v14169_v50  ;;  %v11098_v5 = vpack.i.b16 %v14936_v20, %v14936_v20 }
 0x5cb   : > { %v11057_v63 = vpack.i.b16 %v5864_v58, %v5864_v58  ;;  %v5954_v29 = vunpack.i.h.s16 %v5864_v58  ;;  %v11093_v58 = vpack.i.b16 %v14989_v24, %v14989_v24  ;;  %v6872_v19 = vunpack.i.h.s16 %v14972_v54 }
 0x5cc   : > { %v8444_v0 = vor.u32 %v8442_v21, %v14963_v45  ;;  %v7813_v13 = vcombine.low %v7805_v22, %v7812_v51  ;;  %v6376_v42 = vpop.permute.xlu0 %6375  ;;  %7339 = vrot.lane.b32.xlu1 %v14873_v28, %s11860_s30  ;;  %17018 = vst [vmem:[#allocation62_spill] sm:$0xff] %v15003_v30  ;;  %v11062_v21 = vpack.i.b16 %v14918_v49, %v14918_v49 }
 0x5cd   : > { %v6563_v34 = vsel %vm14701_vm7, %v14357_v46, %v6376_v42  ;;  %v6562_v46 = vsel %vm14701_vm7, %v14274_v55, %v14776_v56  ;;  %v5962_v55 = vunpack.i.h.s16 %v14982_v62  ;;  %v6860_v42 = vunpack.i.h.s16 %v14989_v24 }
 0x5ce   : > { %v8749_v39 = vsel %vm12772_vm6, %v8444_v0, %v8748_v37  ;;  %v7820_v11 = vrot.slane %v7813_v13, %v14714_v41  ;;  %v7677_v44 = vcombine.low %v6561_v3, %v6563_v34  ;;  %7341 = vrot.lane.b32.xlu0 %v14894_v52, %s11860_s30  ;;  %v6378_v48 = vpop.permute.xlu1 %6377  ;;  %v11061_v13 = vpack.i.b16 %v14982_v62, %v14982_v62 }
 0x5cf   : > { %8750 = vst [vmem:[#allocation3 + $0x18] sm:$0xf] %v8749_v39  ;;  %v6564_v43 = vsel %vm14701_vm7, %v14363_v40, %v6378_v48  ;;  %v6569_v40 = vsel %vm14701_vm7, %v14292_v14, %v14815_v59  ;;  %v15046_v39 = vrot.slane %v11057_v63, %v14169_v50  ;;  %v6018_v24 = vpack.i.b16 %v5954_v29, %v5954_v29  ;;  %v8762_v29 = vld [vmem:[#allocation3 + $0x30] sm:$0xf] }
 0x5d0   : > { %v8473_v22 = vshrl.u32 %v7820_v11, 16  ;;  %v7678_v51 = vcombine.low %v6562_v46, %v6564_v43  ;;  %v6392_v0 = vpop.permute.xlu0 %6391  ;;  %7343 = vrot.lane.b32.xlu1 %v14909_v60, %s11860_s30  ;;  %v8476_v37 = vshll.u32 %v7820_v11, 16  ;;  %v7685_v34 = vrot.slane %v7677_v44, %v14714_v41 }
 0x5d1   : > { %v6571_v56 = vsel %vm14701_vm7, %v14368_v8, %v6392_v0  ;;  %17019 = vst [vmem:[#allocation63_spill] sm:$0xff] %v15046_v39  ;;  %v6570_v11 = vsel %vm14701_vm7, %v14300_v36, %v14838_v38  ;;  %v11097_v43 = vpack.i.b16 %v14993_v31, %v14993_v31  ;;  %v6868_v38 = vunpack.i.h.s16 %v14993_v31 }
 0x5d2   : > { %v15036_v3 = vrot.slane %v8473_v22, 7  ;;  %v7692_v62 = vrot.slane %v7678_v51, %v14714_v41  ;;  %7353 = vrot.lane.b32.xlu0 %v14897_v57, %s11860_s30  ;;  %v6394_v14 = vpop.permute.xlu1 %6393  ;;  %v7773_v59 = vcombine.low %v6569_v40, %v6571_v56  ;;  %v17021_v51 = vld [vmem:[#allocation11_spill] sm:$0xff] }
 0x5d3   : > { %v6572_v8 = vsel %vm14701_vm7, %v14377_v35, %v6394_v14  ;;  %v17020_v35 = vld [vmem:[#allocation8_spill] sm:$0xff] }
 0x5d4   : > { %v8478_v44 = vor.u32 %v8476_v37, %v15036_v3  ;;  %v7693_v48 = vcombine.low %v7685_v34, %v7692_v62  ;;  %v7282_v46 = vpop.permute.xlu0 %7281  ;;  %7355 = vrot.lane.b32.xlu1 %v14959_v17, %s11860_s30  ;;  %v7465_v63 = vsel %vm14701_vm7, %v17020_v35, %v14887_v25  ;;  %v7774_v22 = vcombine.low %v6570_v11, %v6572_v8  ;;  %v17023_v34 = vld [vmem:[#allocation9_spill] sm:$0xff]  ;;  %v17024_v8 = vld [vmem:[#allocation12_spill] sm:$0xff] }
 0x5d5   : > { %v7467_v36 = vsel %vm14701_vm7, %v17021_v51, %v7282_v46  ;;  %v15071_v25 = vrot.slane %v11061_v13, %v14169_v50  ;;  %v7466_v62 = vsel %vm14701_vm7, %v17023_v34, %v14903_v9  ;;  %v7781_v31 = vrot.slane %v7773_v59, %v14714_v41  ;;  %v17026_v9 = vld [vmem:[#allocation10_spill] sm:$0xff] }
 0x5d6   : > { %v8763_v0 = vsel %vm12772_vm6, %v8478_v44, %v8762_v29  ;;  %v7700_v40 = vrot.slane %v7693_v48, %v14714_v41  ;;  %v7725_v56 = vcombine.low %v7465_v63, %v7467_v36  ;;  %7357 = vrot.lane.b32.xlu0 %v14978_v27, %s11860_s30  ;;  %v7284_v37 = vpop.permute.xlu1 %7283  ;;  %v7788_v14 = vrot.slane %v7774_v22, %v14714_v41  ;;  %v17027_v29 = vld [vmem:[#allocation14_spill] sm:$0xff]  ;;  %v8766_v27 = vld [vmem:[#allocation3 + $0x38] sm:$0x1] }
 0x5d7   : > { %17022 = vst [vmem:[#allocation8_spill] sm:$0xff] %v15071_v25  ;;  %8764 = vst [vmem:[#allocation3 + $0x30] sm:$0xf] %v8763_v0  ;;  %v7468_v11 = vsel %vm14701_vm7, %v17024_v8, %v7284_v37  ;;  %v6026_v13 = vpack.i.b16 %v5962_v55, %v5962_v55  ;;  %v15085_v35 = vrot.slane %v11093_v58, %v14169_v50 }
 0x5d8   : > { %v8430_v44 = vshrl.u32 %v7700_v40, 16  ;;  %v7726_v48 = vcombine.low %v7466_v62, %v7468_v11  ;;  %v7298_v46 = vpop.permute.xlu0 %7297  ;;  %7359 = vrot.lane.b32.xlu1 %v15003_v30, %s11860_s30  ;;  %v7473_v59 = vsel %vm14701_vm7, %v17026_v9, %v14951_v10  ;;  %v7789_v63 = vcombine.low %v7781_v31, %v7788_v14  ;;  %v17029_v31 = vld [vmem:[#allocation13_spill] sm:$0xff]  ;;  %v17030_v14 = vld [vmem:[#allocation7_spill] sm:$0xff] }
 0x5d9   : > { %17025 = vst [vmem:[#allocation11_spill] sm:$0xff] %v15085_v35  ;;  %v7475_v22 = vsel %vm14701_vm7, %v17027_v29, %v7298_v46  ;;  %v15095_v51 = vrot.slane %v6018_v24, %v14169_v50  ;;  %v8433_v0 = vshll.u32 %v7700_v40, 16  ;;  %v7733_v55 = vrot.slane %v7725_v56, %v14714_v41 }
 0x5da   : > { %v8432_v36 = vrot.slane %v8430_v44, 7  ;;  %v7740_v58 = vrot.slane %v7726_v48, %v14714_v41  ;;  %6439 = vrot.lane.b32.xlu0 %v15046_v39, %s11860_s30  ;;  %v7300_v37 = vpop.permute.xlu1 %7299  ;;  %v8428_v10 = vrot.slane %v14834_v16, 4  ;;  %v7796_v34 = vrot.slane %v7789_v63, %v14714_v41  ;;  %v8745_v16 = vld [vmem:[#allocation3 + $0x14] sm:$0x1] }
 0x5db   : > { %17028 = vst [vmem:[#allocation9_spill] sm:$0xff] %v15095_v51  ;;  %v7821_v62 = vcombine.low %v7473_v59, %v7475_v22  ;;  %v7476_v24 = vsel %vm14701_vm7, %v17029_v31, %v7300_v37  ;;  %v7474_v40 = vsel %vm14701_vm7, %v17030_v14, %v14967_v7  ;;  %v6924_v9 = vpack.i.b16 %v6860_v42, %v6860_v42  ;;  %v11842_v22 = vld [vmem:[%s16777_s7 + $0x110] sm:$0xff]  }
 0x5dc   : > { %v8435_v56 = vor.u32 %v8433_v0, %v8432_v36  ;;  %v8437_v8 = vrot.slane %v8432_v36, 4  ;;  %v7741_v11 = vcombine.low %v7733_v55, %v7740_v58  ;;  %v15110_v44 = vpop.permute.xlu0 %6395  ;;  %6441 = vrot.lane.b32.xlu1 %v15095_v51, %s11860_s30  ;;  %v8464_v48 = vshrl.u32 %v7796_v34, 16 }
 0x5dd   : > { %v7822_v46 = vcombine.low %v7474_v40, %v7476_v24  ;;  %v15115_v59 = vrot.slane %v11097_v43, %v14169_v50  ;;  %v15127_v55 = vrot.slane %v6026_v13, %v14169_v50  ;;  %v8467_v43 = vshll.u32 %v7796_v34, 16 }
 0x5de   : > { %v8436_v29 = vsel %vm12015_vm12, %v8428_v10, %v8435_v56  ;;  %v8746_v7 = vsel %vm12594_vm3, %v8437_v8, %v8745_v16  ;;  %v7748_v36 = vrot.slane %v7741_v11, %v14714_v41  ;;  %6455 = vrot.lane.b32.xlu0 %v15071_v25, %s11860_s30  ;;  %v15124_v0 = vpop.permute.xlu1 %6397  ;;  %v8466_v42 = vrot.slane %v8464_v48, 7  ;;  %v8759_v8 = vld [vmem:[#allocation3 + $0x2c] sm:$0x1] }
 0x5df   : > { %17031 = vst [vmem:[#allocation12_spill] sm:$0xff] %v15115_v59  ;;  %17034 = vst [vmem:[#allocation10_spill] sm:$0xff] %v15127_v55  ;;  %v7829_v58 = vrot.slane %v7821_v62, %v14714_v41  ;;  %v7836_v37 = vrot.slane %v7822_v46, %v14714_v41  ;;  %v6932_v24 = vpack.i.b16 %v6868_v38, %v6868_v38  ;;  %v5964_v14 = vunpack.i.h.s16 %v14918_v49  ;;  %v17057_v25 = vld [vmem:[#allocation26_spill] sm:$0xff] }
 0x5e0   : > { %8744 = vst.msk [vmem:[#allocation3 + $0x10] sm:$0xf] %vm2407_vm5, %v8436_v29  ;;  %8747 = vst [vmem:[#allocation3 + $0x14] sm:$0x1] %v8746_v7  ;;  %v8447_v10 = vshrl.u32 %v7748_v36, 16  ;;  %v15132_v31 = vpop.permute.xlu0 %6411  ;;  %6457 = vrot.lane.b32.xlu1 %v15127_v55, %s11860_s30  ;;  %v15140_v13 = vrot.slane %v11098_v5, %v14169_v50  ;;  %v8462_v34 = vrot.slane %v14899_v12, 4  ;;  %v8469_v62 = vor.u32 %v8467_v43, %v8466_v42 }
 0x5e1   : > { %v8471_v40 = vrot.slane %v8466_v42, 4  ;;  %v7837_v56 = vcombine.low %v7829_v58, %v7836_v37  ;;  %v8450_v16 = vshll.u32 %v7748_v36, 16  ;;  %v15149_v48 = vrot.slane %v6924_v9, %v14169_v50  ;;  %v8752_v37 = vld [vmem:[#allocation3 + $0x20] sm:$0x1] }
 0x5e2   : > { %17035 = vst [vmem:[#allocation14_spill] sm:$0xff] %v15140_v13  ;;  %v8449_v11 = vrot.slane %v8447_v10, 7  ;;  %7345 = vrot.lane.b32.xlu0 %v15085_v35, %s11860_s30  ;;  %v15146_v38 = vpop.permute.xlu1 %6413  ;;  %v11066_v5 = vpack.i.b16 %v14921_v18, %v14921_v18  ;;  %v8470_v12 = vsel %vm12015_vm12, %v8462_v34, %v8469_v62  ;;  %v5972_v7 = vunpack.i.h.s16 %v14921_v18 }
 0x5e3   : > { %17036 = vst [vmem:[#allocation13_spill] sm:$0xff] %v15149_v48  ;;  %v8760_v46 = vsel %vm12594_vm3, %v8471_v40, %v8759_v8  ;;  %v7844_v29 = vrot.slane %v7837_v56, %v14714_v41  ;;  %v8445_v36 = vrot.slane %v14963_v45, 4  ;;  %8758 = vst.msk [vmem:[#allocation3 + $0x28] sm:$0xf] %vm2407_vm5, %v8470_v12  ;;  %v11063_v58 = vpack.i.b16 %v14946_v23, %v14946_v23 }
 0x5e4   : > { %8761 = vst [vmem:[#allocation3 + $0x2c] sm:$0x1] %v8760_v46  ;;  %v8452_v9 = vor.u32 %v8450_v16, %v8449_v11  ;;  %v8454_v42 = vrot.slane %v8449_v11, 4  ;;  %v15161_v43 = vpop.permute.xlu0 %7301  ;;  %7347 = vrot.lane.b32.xlu1 %v15149_v48, %s11860_s30  ;;  %v15168_v34 = vrot.slane %v6932_v24, %v14169_v50  ;;  %v15174_v45 = vrot.slane %v11062_v21, %v14169_v50  ;;  %v8908_v11 = vld [vmem:[#allocation3 + $0xc] sm:$0xe] }
 0x5e5   : > { %v8481_v10 = vshrl.u32 %v7844_v29, 16  ;;  %v6028_v62 = vpack.i.b16 %v5964_v14, %v5964_v14  ;;  %v11099_v16 = vpack.i.b16 %v14972_v54, %v14972_v54  ;;  %v15190_v21 = vcombine.high %v14918_v49, %v14918_v49 }
 0x5e6   : > { %17037 = vst [vmem:[#allocation7_spill] sm:$0xff] %v15168_v34  ;;  %17038 = vst [vmem:[#allocation4_spill] sm:$0xff] %v15174_v45  ;;  %v8453_v40 = vsel %vm12015_vm12, %v8445_v36, %v8452_v9  ;;  %v8753_v56 = vsel %vm12594_vm3, %v8454_v42, %v8752_v37  ;;  %7361 = vrot.lane.b32.xlu0 %v15115_v59, %s11860_s30  ;;  %v15182_v8 = vpop.permute.xlu1 %7303  ;;  %v8484_v12 = vshll.u32 %v7844_v29, 16  ;;  %v11786_v42 = vld [vmem:[%s16777_s7 + $0x60] sm:$0xff]  }
 0x5e7   : > { %v15184_v24 = vld [vmem:[#allocation3 + $0x10] sm:$0xf]  ;;  %8751 = vst.msk [vmem:[#allocation3 + $0x1c] sm:$0xf] %vm2407_vm5, %v8453_v40  ;;  %8754 = vst [vmem:[#allocation3 + $0x20] sm:$0x1] %v8753_v56  ;;  %v15198_v9 = vcombine.high %v14936_v20, %v14936_v20  ;;  %v15208_v49 = vrot.slane %v11066_v5, %v14169_v50  ;;  %v6036_v29 = vpack.i.b16 %v5972_v7, %v5972_v7  ;;  %v5966_v40 = vunpack.i.h.s16 %v14946_v23 }
 0x5e8   : > { %v8483_v14 = vrot.slane %v8481_v10, 7  ;;  %v15193_v46 = vld [vmem:[#allocation3 + $0x14] ss:$0 sps:$4 sm:$0x11]   ;;  %v11143_v36 = vcombine.low %v8908_v11, %v15184_v24  ;;  %v15203_v37 = vpop.permute.xlu0 %7317  ;;  %7363 = vrot.lane.b32.xlu1 %v15168_v34, %s11860_s30  ;;  %v15211_v10 = vrot.slane %v11063_v58, %v14169_v50  ;;  %v8479_v56 = vrot.slane %v15036_v3, 4  ;;  %9653 = vmatpush1.bf16.msra.mxu0 %v11786_v42 }
 0x5e9   : > { %17039 = vst [vmem:[#allocation5_spill] sm:$0xff] %v15208_v49  ;;  %v9379_v5 = vrot.slane %v15193_v46, 1  ;;  %v11067_v7 = vpack.i.b16 %v14956_v61, %v14956_v61  ;;  %v15224_v58 = vcombine.high %v14921_v18, %v14921_v18  ;;  %v5968_v3 = vunpack.i.h.s16 %v15190_v21 }
 0x5ea   : > { %17040 = vst [vmem:[#allocation64_spill] sm:$0xff] %v15211_v10  ;;  %v8486_v11 = vor.u32 %v8484_v12, %v8483_v14  ;;  %v8488_v30 = vrot.slane %v8483_v14, 4  ;;  %v9378_v59 = vrot.slane %v11143_v36, 1  ;;  %7365 = vrot.lane.b32.xlu0 %v15140_v13, %s11860_s30  ;;  %v15217_v34 = vpop.permute.xlu1 %7319  ;;  %v17041_v14 = vmov 0  }
 0x5eb   : > { %9654 = vmatprep.subr.bf16.mxu0 %v17041_v14  ;;  %v15233_v42 = vrot.slane %v6028_v62, %v14169_v50  ;;  %v6870_v13 = vunpack.i.h.s16 %v14936_v20  ;;  %v11787_v20 = vld [vmem:[%s16777_s7 + $0x68] sm:$0xff]   ;;  %v15290_v52 = vrot.slane %v11067_v7, %v14169_v50 }
 0x5ec   : > { %v8487_v12 = vsel %vm12015_vm12, %v8479_v56, %v8486_v11  ;;  %v8767_v36 = vsel %vm12594_vm3, %v8488_v30, %v8766_v27  ;;  %v6400_v18 = vpop.permute.xlu0 %6399  ;;  %6459 = vrot.lane.b32.xlu1 %v15174_v45, %s11860_s30  ;;  %v15240_v48 = vsel %vm1586_vm9, %v9378_v59, %v9379_v5  ;;  %v15243_v56 = vrot.slane %v11099_v16, %v14169_v50  ;;  %v17045_v62 = vld [vmem:[#allocation15_spill] sm:$0xff] }
 0x5ed   : > { %17042 = vst [vmem:[#allocation65_spill] sm:$0xff] %v15233_v42  ;;  %8765 = vst.msk [vmem:[#allocation3 + $0x34] sm:$0xf] %vm2407_vm5, %v8487_v12  ;;  %v11064_v27 = vpack.i.b16 %v15190_v21, %v15190_v21  ;;  %v11100_v30 = vpack.i.b16 %v15198_v9, %v15198_v9  ;;  %v6573_v11 = vsel %vm14701_vm7, %v17045_v62, %v15110_v44  ;;  %v17046_v59 = vld [vmem:[#allocation23_spill] sm:$0xff]  ;;  %11196 = vmatprep.mubr.msk.bf16.mxu0 %vm3622_vm4, %v15240_v48  ;;  %v15264_v12 = vld [vmem:[#allocation3 + $0x28] sm:$0xf] }
 0x5ee   : > { %8768 = vst [vmem:[#allocation3 + $0x38] sm:$0x1] %v8767_v36  ;;  %17043 = vst [vmem:[#allocation66_spill] sm:$0xff] %v15240_v48  ;;  %v6575_v16 = vsel %vm14701_vm7, %v17046_v59, %v6400_v18  ;;  %v15262_v21 = vrot.slane %v6036_v29, %v14169_v50  ;;  %v6030_v5 = vpack.i.b16 %v5966_v40, %v5966_v40  ;;  %v8909_v36 = vld [vmem:[#allocation3 + $0x18] sm:$0xe]  ;;  %6461 = vrot.lane.b32.xlu0 %v15233_v42, %s11860_s30  ;;  %v6402_v60 = vpop.permute.xlu1 %6401 }
 0x5ef   : > { %17044 = vst [vmem:[#allocation67_spill] sm:$0xff] %v15243_v56  ;;  %v7845_v45 = vcombine.low %v6573_v11, %v6575_v16  ;;  %v11068_v44 = vpack.i.b16 %v15224_v58, %v15224_v58  ;;  %v6032_v62 = vpack.i.b16 %v5968_v3, %v5968_v3  ;;  %v5974_v18 = vunpack.i.h.s16 %v14956_v61  ;;  %v15271_v59 = vld [vmem:[#allocation3 + $0x1c] sm:$0xf]  ;;  %9655 = vmatpush1.bf16.msra.mxu0 %v11787_v20 }
 0x5f0   : > { %17047 = vst [vmem:[#allocation15_spill] sm:$0xff] %v15262_v21  ;;  %v11788_v29 = vld [vmem:[%s16777_s7 + $0x70] sm:$0xff]   ;;  %v6934_v42 = vpack.i.b16 %v6870_v13, %v6870_v13  ;;  %9656 = vmatprep.subr.bf16.mxu0 %v17041_v14  ;;  %v11144_v3 = vcombine.low %v8909_v36, %v15271_v59  ;;  %v15285_v20 = vpop.permute.xlu0 %6403  ;;  %6475 = vrot.lane.b32.xlu1 %v15208_v49, %s11860_s30  ;;  %17050 = vst [vmem:[#allocation23_spill] sm:$0xff] %v15290_v52  ;;  %v15300_v13 = vld [vmem:[#allocation3 + $0x20] ss:$0 sps:$4 sm:$0x11]  }
 0x5f1   : > { %v17048_v40 = vld [vmem:[#allocation16_spill] sm:$0xff]  ;;  %v8910_v36 = vld [vmem:[#allocation3 + $0x24] sm:$0xe]  ;;  %v15309_v7 = vrot.slane %v6030_v5, %v14169_v50  ;;  %v15324_v5 = vrot.slane %v11068_v44, %v14169_v50 }
 0x5f2   : > { %v6574_v11 = vsel %vm14701_vm7, %v17048_v40, %v15124_v0  ;;  %v17049_v16 = vld [vmem:[#allocation24_spill] sm:$0xff]  ;;  %v15294_v0 = vcombine.high %v14946_v23, %v14946_v23  ;;  %v15306_v40 = vrot.slane %v11100_v30, %v14169_v50  ;;  %v11145_v23 = vcombine.low %v8910_v36, %v15264_v12  ;;  %6477 = vrot.lane.b32.xlu0 %v15262_v21, %s11860_s30  ;;  %v15318_v33 = vpop.permute.xlu1 %6405  ;;  %v11789_v30 = vld [vmem:[%s16777_s7 + $0x78] sm:$0xff]  }
 0x5f3   : > { %v6576_v48 = vsel %vm14701_vm7, %v17049_v16, %v6402_v60  ;;  %v15298_v60 = vcombine.high %v14972_v54, %v14972_v54  ;;  %v7853_v16 = vrot.slane %v7845_v45, %v14714_v41  ;;  %9657 = vmatpush1.bf16.msra.mxu0 %v11788_v29  ;;  %17053 = vst [vmem:[#allocation68_spill] sm:$0xff] %v15324_v5  ;;  %v17056_v29 = vld [vmem:[#allocation18_spill] sm:$0xff] }
 0x5f4   : > { %v7846_v35 = vcombine.low %v6574_v11, %v6576_v48  ;;  %v15303_v48 = vrot.slane %v11064_v27, %v14169_v50  ;;  %17052 = vst [vmem:[#allocation24_spill] sm:$0xff] %v15306_v40  ;;  %v15311_v11 = vld [vmem:[#allocation3 + $0x2c] ss:$0 sps:$4 sm:$0x11]   ;;  %v6038_v27 = vpack.i.b16 %v5974_v18, %v5974_v18  ;;  %v15327_v36 = vrot.slane %v6032_v62, %v14169_v50  ;;  %v6416_v55 = vpop.permute.xlu0 %6415 }
 0x5f5   : > { %v15330_v45 = vrot.slane %v6934_v42, %v14169_v50  ;;  %9658 = vmatprep.subr.bf16.mxu0 %v17041_v14  ;;  %6463 = vrot.lane.b32.xlu1 %v15211_v10, %s11860_s30  ;;  %v11065_v18 = vpack.i.b16 %v15294_v0, %v15294_v0  ;;  %v11101_v44 = vpack.i.b16 %v15298_v60, %v15298_v60  ;;  %v9382_v62 = vrot.slane %v15300_v13, 1 }
 0x5f6   : > { %17051 = vst [vmem:[#allocation16_spill] sm:$0xff] %v15303_v48  ;;  %v7860_v49 = vrot.slane %v7846_v35, %v14714_v41  ;;  %17054 = vst [vmem:[#allocation69_spill] sm:$0xff] %v15327_v36  ;;  %v9381_v35 = vrot.slane %v11144_v3, 1  ;;  %v6581_v42 = vsel %vm14701_vm7, %v17056_v29, %v15132_v31  ;;  %v9384_v3 = vrot.slane %v11145_v23, 1  ;;  %7369 = vrot.lane.b32.xlu0 %v15243_v56, %s11860_s30  ;;  %v6418_v51 = vpop.permute.xlu1 %6417 }
 0x5f7   : > { %17055 = vst [vmem:[#allocation70_spill] sm:$0xff] %v15330_v45  ;;  %v15352_v39 = vrot.slane %v6038_v27, %v14169_v50  ;;  %9659 = vmatpush1.bf16.msra.mxu0 %v11789_v30  ;;  %v5970_v29 = vunpack.i.h.s16 %v15294_v0  ;;  %v15366_v27 = vld [vmem:[#allocation3 + $0x34] sm:$0xf] }
 0x5f8   : > { %v7861_v21 = vcombine.low %v7853_v16, %v7860_v49  ;;  %v6583_v49 = vsel %vm14701_vm7, %v17057_v25, %v6416_v55  ;;  %v9385_v16 = vrot.slane %v15311_v11, 1  ;;  %v11790_v25 = vld [vmem:[%s16777_s7 + $0x80] sm:$0xff]   ;;  %v17059_v55 = vld [vmem:[#allocation17_spill] sm:$0xff]  ;;  %9660 = vmatprep.subr.bf16.mxu0 %v17041_v14  ;;  %v15372_v54 = vsel %vm1586_vm9, %v9381_v35, %v9382_v62  ;;  %v15374_v56 = vpop.permute.xlu0 %6419  ;;  %v8911_v62 = vld [vmem:[#allocation3 + $0x30] sm:$0xe] }
 0x5f9   : > { %v7941_v32 = vcombine.low %v6581_v42, %v6583_v49  ;;  %17058 = vst [vmem:[#allocation18_spill] sm:$0xff] %v15352_v39  ;;  %v6582_v31 = vsel %vm14701_vm7, %v17059_v55, %v15146_v38  ;;  %v15368_v42 = vld [vmem:[#allocation3 + $0x38] ss:$0 sps:$4 sm:$0x11]   ;;  %17061 = vst [vmem:[#allocation26_spill] sm:$0xff] %v15372_v54  ;;  %6467 = vrot.lane.b32.xlu1 %v15303_v48, %s11860_s30  ;;  %v15382_v38 = vrot.slane %v11101_v44, %v14169_v50 }
 0x5fa   : > { %v7868_v10 = vrot.slane %v7861_v21, %v14714_v41  ;;  %v17060_v21 = vld [vmem:[#allocation29_spill] sm:$0xff]  ;;  %v6874_v55 = vunpack.i.h.s16 %v15198_v9  ;;  %v15387_v35 = vsel %vm1586_vm9, %v9384_v3, %v9385_v16  ;;  %7373 = vrot.lane.b32.xlu0 %v15306_v40, %s11860_s30  ;;  %v11791_v9 = vld [vmem:[%s16777_s7 + $0x88] sm:$0xff]   ;;  %v6034_v44 = vpack.i.b16 %v5970_v29, %v5970_v29  ;;  %v8769_v29 = vld [vmem:[#allocation3 + $0x3c] sm:$0xf] }
 0x5fb   : > { %v6584_v23 = vsel %vm14701_vm7, %v17060_v21, %v6418_v51  ;;  %v15379_v51 = vrot.slane %v11065_v18, %v14169_v50  ;;  %17063 = vst [vmem:[#allocation29_spill] sm:$0xff] %v15382_v38  ;;  %v6876_v21 = vunpack.i.h.s16 %v15298_v60  ;;  %17064 = vst [vmem:[#allocation71_spill] sm:$0xff] %v15387_v35  ;;  %v15395_v18 = vpop.permute.xlu1 %6421  ;;  %9661 = vmatpush1.bf16.msra.mxu0 %v11790_v25  ;;  %v5976_v3 = vunpack.i.h.s16 %v15224_v58  ;;  %v17066_v35 = vld [vmem:[#allocation31_spill] sm:$0xff] }
 0x5fc   : > { %v8490_v30 = vshrl.u32 %v7868_v10, 16  ;;  %v7942_v49 = vcombine.low %v6582_v31, %v6584_v23  ;;  %v8493_v0 = vshll.u32 %v7868_v10, 16  ;;  %v7949_v23 = vrot.slane %v7941_v32, %v14714_v41  ;;  %9662 = vmatprep.subr.bf16.mxu0 %v17041_v14 }
 0x5fd   : > { %17062 = vst [vmem:[#allocation17_spill] sm:$0xff] %v15379_v51  ;;  %v11146_v10 = vcombine.low %v8911_v62, %v15366_v27  ;;  %v6936_v60 = vpack.i.b16 %v6872_v19, %v6872_v19  ;;  %v9388_v32 = vrot.slane %v15368_v42, 1  ;;  %6479 = vrot.lane.b32.xlu1 %v15290_v52, %s11860_s30  ;;  %v15409_v25 = vcombine.high %v14956_v61, %v14956_v61  ;;  %v17065_v19 = vld [vmem:[#allocation20_spill] sm:$0xff] }
 0x5fe   : > { %v15389_v31 = vrot.slane %v8490_v30, 7  ;;  %v7956_v54 = vrot.slane %v7942_v49, %v14714_v41  ;;  %v7306_v49 = vpop.permute.xlu0 %7305  ;;  %v7477_v58 = vsel %vm14701_vm7, %v17065_v19, %v15161_v43  ;;  %6465 = vrot.lane.b32.xlu0 %v15309_v7, %s11860_s30  ;;  %v6878_v52 = vunpack.i.h.s16 %v14949_v6  ;;  %v11792_v43 = vld [vmem:[%s16777_s7 + $0x90] sm:$0xff]  }
 0x5ff   : > { %v9387_v62 = vrot.slane %v11146_v10, 1  ;;  %v7308_v10 = vpop.permute.xlu1 %7307  ;;  %9663 = vmatpush1.bf16.msra.mxu0 %v11791_v9  ;;  %v8855_v9 = vld [vmem:[#allocation3 + $0xc] sm:$0xf] }
 0x600   : > { %v8495_v16 = vor.u32 %v8493_v0, %v15389_v31  ;;  %v7957_v30 = vcombine.low %v7949_v23, %v7956_v54  ;;  %v7479_v0 = vsel %vm14701_vm7, %v17066_v35, %v7306_v49  ;;  %v6938_v54 = vpack.i.b16 %v6874_v55, %v6874_v55  ;;  %v17067_v55 = vld [vmem:[#allocation19_spill] sm:$0xff]  ;;  %v17068_v35 = vld [vmem:[#allocation32_spill] sm:$0xff]  ;;  %9664 = vmatprep.subr.bf16.mxu0 %v17041_v14 }
 0x601   : > { %v6940_v23 = vpack.i.b16 %v6876_v21, %v6876_v21  ;;  %v7893_v61 = vcombine.low %v7477_v58, %v7479_v0  ;;  %v7478_v21 = vsel %vm14701_vm7, %v17067_v55, %v15182_v8  ;;  %v15436_v49 = vsel %vm1586_vm9, %v9387_v62, %v9388_v32  ;;  %6483 = vrot.lane.b32.xlu1 %v15324_v5, %s11860_s30 }
 0x602   : > { %v8770_v40 = vsel %vm12772_vm6, %v8495_v16, %v8769_v29  ;;  %v7964_v48 = vrot.slane %v7957_v30, %v14714_v41  ;;  %v7480_v16 = vsel %vm14701_vm7, %v17068_v35, %v7308_v10  ;;  %v6040_v30 = vpack.i.b16 %v5976_v3, %v5976_v3  ;;  %17069 = vst [vmem:[#allocation20_spill] sm:$0xff] %v15436_v49  ;;  %v15438_v29 = vpop.permute.xlu0 %7309  ;;  %v17072_v35 = vld [vmem:[#allocation21_spill] sm:$0xff]  ;;  %v17073_v49 = vld [vmem:[#allocation35_spill] sm:$0xff] }
 0x603   : > { %8771 = vst [vmem:[#allocation3 + $0x3c] sm:$0xf] %v8770_v40  ;;  %v7894_v58 = vcombine.low %v7478_v21, %v7480_v16  ;;  %v15443_v8 = vrot.slane %v6936_v60, %v14169_v50  ;;  %v11069_v40 = vpack.i.b16 %v15409_v25, %v15409_v25  ;;  %v15448_v3 = vcombine.low %v8855_v9, %v15184_v24  ;;  %v15465_v24 = vpop.permute.xlu1 %7311 }
 0x604   : > { %v8524_v19 = vshrl.u32 %v7964_v48, 16  ;;  %v15451_v32 = vrot.slane %v6034_v44, %v14169_v50  ;;  %v15454_v62 = vrot.slane %v6938_v54, %v14169_v50  ;;  %v15457_v0 = vrot.slane %v6940_v23, %v14169_v50  ;;  %6469 = vrot.lane.b32.xlu0 %v15327_v36, %s11860_s30  ;;  %9665 = vmatpush1.bf16.msra.mxu0 %v11792_v43  ;;  %v11795_v44 = vld [vmem:[%s16777_s7 + $0x98] sm:$0xff]  }
 0x605   : > { %17070 = vst [vmem:[#allocation31_spill] sm:$0xff] %v15443_v8  ;;  %17071 = vst [vmem:[#allocation19_spill] sm:$0xff] %v15448_v3  ;;  %v8527_v55 = vshll.u32 %v7964_v48, 16  ;;  %v7901_v60 = vrot.slane %v7893_v61, %v14714_v41  ;;  %v7908_v21 = vrot.slane %v7894_v58, %v14714_v41  ;;  %v15471_v54 = vrot.slane %v6040_v30, %v14169_v50  ;;  %v8857_v30 = vld [vmem:[#allocation3 + $0x18] sm:$0xf] }
 0x606   : > { %v15459_v10 = vrot.slane %v8524_v19, 7  ;;  %v5978_v23 = vunpack.i.h.s16 %v15409_v25  ;;  %v6942_v48 = vpack.i.b16 %v6878_v52, %v6878_v52  ;;  %v11102_v61 = vpack.i.b16 %v14949_v6, %v14949_v6  ;;  %9666 = vmatprep.subr.bf16.mxu0 %v17041_v14  ;;  %v7322_v19 = vpop.permute.xlu0 %7321  ;;  %7367 = vrot.lane.b32.xlu1 %v15330_v45, %s11860_s30  ;;  %v8859_v25 = vld [vmem:[#allocation3 + $0x24] sm:$0xf]  ;;  %v8783_v58 = vld [vmem:[#allocation3 + $0x54] sm:$0xf] }
 0x607   : > { %v7485_v43 = vsel %vm14701_vm7, %v17072_v35, %v15203_v37  ;;  %v7909_v9 = vcombine.low %v7901_v60, %v7908_v21  ;;  %v15485_v52 = vrot.slane %v11069_v40, %v14169_v50  ;;  %v7487_v5 = vsel %vm14701_vm7, %v17073_v49, %v7322_v19  ;;  %v7324_v35 = vpop.permute.xlu1 %7323  ;;  %v11798_v49 = vld [vmem:[%s16777_s7 + $0xa0] sm:$0xff]   ;;  %v17075_v19 = vld [vmem:[#allocation36_spill] sm:$0xff] }
 0x608   : > { %v8529_v16 = vor.u32 %v8527_v55, %v15459_v10  ;;  %v9084_v36 = vshll.u32 %v15448_v3, 16  ;;  %v15492_v37 = vcombine.low %v8857_v30, %v15271_v59  ;;  %v15495_v55 = vcombine.low %v8859_v25, %v15264_v12  ;;  %6481 = vrot.lane.b32.xlu0 %v15352_v39, %s11860_s30  ;;  %9667 = vmatpush1.bf16.msra.mxu0 %v11795_v44  ;;  %v17074_v59 = vld [vmem:[#allocation22_spill] sm:$0xff] }
 0x609   : > { %v7916_v21 = vrot.slane %v7909_v9, %v14714_v41  ;;  %v7989_v40 = vcombine.low %v7485_v43, %v7487_v5  ;;  %v7486_v12 = vsel %vm14701_vm7, %v17074_v59, %v15217_v34  ;;  %v6042_v5 = vpack.i.b16 %v5978_v23, %v5978_v23  ;;  %9668 = vmatprep.subr.bf16.mxu0 %v17041_v14  ;;  %v8776_v45 = vld [vmem:[#allocation3 + $0x48] sm:$0xf] }
 0x60a   : > { %v8784_v60 = vsel %vm12772_vm6, %v8529_v16, %v8783_v58  ;;  %v7488_v16 = vsel %vm14701_vm7, %v17075_v19, %v7324_v35  ;;  %v6880_v43 = vunpack.i.h.s16 %v14975_v26  ;;  %v15514_v30 = vpop.permute.xlu0 %7325  ;;  %6471 = vrot.lane.b32.xlu1 %v15379_v51, %s11860_s30  ;;  %v9089_v25 = vshll.u32 %v15193_v46, 16 }
 0x60b   : > { %8785 = vst [vmem:[#allocation3 + $0x54] sm:$0xf] %v8784_v60  ;;  %v8507_v44 = vshrl.u32 %v7916_v21, 16  ;;  %v7990_v9 = vcombine.low %v7486_v12, %v7488_v16  ;;  %v9086_v58 = vrot.slane %v9084_v36, 1  ;;  %v9096_v60 = vshll.u32 %v15492_v37, 16  ;;  %v15532_v46 = vpop.permute.xlu1 %7327  ;;  %v11801_v36 = vld [vmem:[%s16777_s7 + $0xa8] sm:$0xff]  }
 0x60c   : > { %v9108_v23 = vshll.u32 %v15495_v55, 16  ;;  %v15524_v35 = vrot.slane %v6942_v48, %v14169_v50  ;;  %v8510_v12 = vshll.u32 %v7916_v21, 16  ;;  %v7997_v19 = vrot.slane %v7989_v40, %v14714_v41  ;;  %7377 = vrot.lane.b32.xlu0 %v15382_v38, %s11860_s30  ;;  %9669 = vmatpush1.bf16.msra.mxu0 %v11798_v49 }
 0x60d   : > { %v15526_v59 = vrot.slane %v8507_v44, 7  ;;  %v8004_v16 = vrot.slane %v7990_v9, %v14714_v41  ;;  %v9082_v48 = vshrl.u32 %v15448_v3, 16  ;;  %v15539_v44 = vrot.slane %v6042_v5, %v14169_v50  ;;  %9670 = vmatprep.subr.bf16.mxu0 %v17041_v14  ;;  %v17076_v5 = vld [vmem:[#allocation25_spill] sm:$0xff] }
 0x60e   : > { %v15542_v21 = vrot.slane %v11102_v61, %v14169_v50  ;;  %v15546_v40 = vcombine.high %v14949_v6, %v14949_v6  ;;  %v6408_v34 = vpop.permute.xlu0 %6407  ;;  %7371 = vrot.lane.b32.xlu1 %v15443_v8, %s11860_s30  ;;  %v9091_v3 = vrot.slane %v9089_v25, 1  ;;  %v15552_v38 = vpack.i.b16 %v6880_v43, %v6880_v43  ;;  %v17077_v6 = vld [vmem:[#allocation39_spill] sm:$0xff] }
 0x60f   : > { %v8512_v49 = vor.u32 %v8510_v12, %v15526_v59  ;;  %v8005_v9 = vcombine.low %v7997_v19, %v8004_v16  ;;  %v6577_v61 = vsel %vm14701_vm7, %v17076_v5, %v15285_v20  ;;  %v6579_v51 = vsel %vm14701_vm7, %v17077_v6, %v6408_v34  ;;  %v6410_v43 = vpop.permute.xlu1 %6409  ;;  %v17078_v20 = vld [vmem:[#allocation27_spill] sm:$0xff]  ;;  %v17079_v34 = vld [vmem:[#allocation40_spill] sm:$0xff] }
 0x610   : > { %v9087_v39 = vor.u32 %v9086_v58, %v9082_v48  ;;  %v9098_v12 = vrot.slane %v9096_v60, 1  ;;  %v7869_v25 = vcombine.low %v6577_v61, %v6579_v51  ;;  %6473 = vrot.lane.b32.xlu0 %v15451_v32, %s11860_s30  ;;  %v9110_v8 = vrot.slane %v9108_v23, 1  ;;  %9671 = vmatpush1.bf16.msra.mxu0 %v11801_v36  ;;  %v11804_v60 = vld [vmem:[%s16777_s7 + $0xb0] sm:$0xff]   ;;  %v17081_v61 = vld [vmem:[#allocation41_spill] sm:$0xff] }
 0x611   : > { %v8777_v19 = vsel %vm12772_vm6, %v8512_v49, %v8776_v45  ;;  %v8012_v16 = vrot.slane %v8005_v9, %v14714_v41  ;;  %v6578_v5 = vsel %vm14701_vm7, %v17078_v20, %v15318_v33  ;;  %v6580_v58 = vsel %vm14701_vm7, %v17079_v34, %v6410_v43  ;;  %9672 = vmatprep.subr.bf16.mxu0 %v17041_v14  ;;  %v17080_v9 = vld [vmem:[#allocation28_spill] sm:$0xff] }
 0x612   : > { %8778 = vst [vmem:[#allocation3 + $0x48] sm:$0xf] %v8777_v19  ;;  %v9094_v45 = vshrl.u32 %v15492_v37, 16  ;;  %v9101_v51 = vshll.u32 %v15300_v13, 16  ;;  %v7870_v36 = vcombine.low %v6578_v5, %v6580_v58  ;;  %v6424_v48 = vpop.permute.xlu0 %6423  ;;  %7375 = vrot.lane.b32.xlu1 %v15454_v62, %s11860_s30  ;;  %v9106_v33 = vshrl.u32 %v15495_v55, 16 }
 0x613   : > { %v8541_v23 = vshrl.u32 %v8012_v16, 16  ;;  %v9113_v49 = vshll.u32 %v15311_v11, 16  ;;  %v6585_v13 = vsel %vm14701_vm7, %v17080_v9, %v15374_v56  ;;  %v6587_v6 = vsel %vm14701_vm7, %v17081_v61, %v6424_v48  ;;  %v6426_v11 = vpop.permute.xlu1 %6425  ;;  %v11805_v56 = vld [vmem:[%s16777_s7 + $0xb8] sm:$0xff]   ;;  %v17082_v48 = vld [vmem:[#allocation42_spill] sm:$0xff] }
 0x614   : > { %v9092_v19 = vsel %vm1279_vm11, %v9087_v39, %v9091_v3  ;;  %v9099_v43 = vor.u32 %v9098_v12, %v9094_v45  ;;  %v8544_v5 = vshll.u32 %v8012_v16, 16  ;;  %v7877_v34 = vrot.slane %v7869_v25, %v14714_v41  ;;  %9673 = vmatpush1.bf16.msra.mxu0 %v11804_v60  ;;  %v8861_v16 = vld [vmem:[#allocation3 + $0x30] sm:$0xf]  ;;  %v17083_v25 = vld [vmem:[#allocation30_spill] sm:$0xff] }
 0x615   : > { %v15591_v20 = vrot.slane %v8541_v23, 7  ;;  %v7884_v58 = vrot.slane %v7870_v36, %v14714_v41  ;;  %9287 = vrot.lane.b32.xlu0 %v9092_v19, %s11860_s30  ;;  %v7965_v9 = vcombine.low %v6585_v13, %v6587_v6  ;;  %v6588_v39 = vsel %vm14701_vm7, %v17082_v48, %v6426_v11  ;;  %9674 = vmatprep.subr.bf16.mxu0 %v17041_v14  ;;  %v17085_v6 = vld [vmem:[#allocation43_spill] sm:$0xff] }
 0x616   : > { %v9103_v3 = vrot.slane %v9101_v51, 1  ;;  %v9111_v12 = vor.u32 %v9110_v8, %v9106_v33  ;;  %v6586_v45 = vsel %vm14701_vm7, %v17083_v25, %v15395_v18  ;;  %v7314_v36 = vpop.permute.xlu0 %7313  ;;  %7379 = vrot.lane.b32.xlu1 %v15457_v0, %s11860_s30  ;;  %v15611_v13 = vcombine.low %v8861_v16, %v15366_v27  ;;  %v17084_v8 = vld [vmem:[#allocation33_spill] sm:$0xff] }
 0x617   : > { %v8546_v60 = vor.u32 %v8544_v5, %v15591_v20  ;;  %v7885_v23 = vcombine.low %v7877_v34, %v7884_v58  ;;  %v7481_v51 = vsel %vm14701_vm7, %v17084_v8, %v15438_v29  ;;  %v8790_v33 = vld [vmem:[#allocation3 + $0x60] sm:$0xf]  ;;  %v7966_v61 = vcombine.low %v6586_v45, %v6588_v39  ;;  %v7316_v58 = vpop.permute.xlu1 %7315  ;;  %v17086_v29 = vld [vmem:[#allocation34_spill] sm:$0xff] }
 0x618   : > { %v7483_v18 = vsel %vm14701_vm7, %v17085_v6, %v7314_v36  ;;  %v9104_v19 = vsel %vm1279_vm11, %v9099_v43, %v9103_v3  ;;  %v9115_v11 = vrot.slane %v9113_v49, 1  ;;  %9675 = vmatpush1.bf16.msra.mxu0 %v11805_v56  ;;  %v7482_v48 = vsel %vm14701_vm7, %v17086_v29, %v15465_v24  ;;  %v17087_v3 = vld [vmem:[#allocation44_spill] sm:$0xff]  ;;  %v17090_v8 = vld [vmem:[#allocation45_spill] sm:$0xff] }
 0x619   : > { %v8791_v5 = vsel %vm12772_vm6, %v8546_v60, %v8790_v33  ;;  %v7892_v34 = vrot.slane %v7885_v23, %v14714_v41  ;;  %v7917_v27 = vcombine.low %v7481_v51, %v7483_v18  ;;  %6485 = vrot.lane.b32.xlu0 %v15471_v54, %s11860_s30  ;;  %v7973_v43 = vrot.slane %v7965_v9, %v14714_v41  ;;  %v17089_v60 = vld [vmem:[#allocation37_spill] sm:$0xff] }
 0x61a   : > { %8792 = vst [vmem:[#allocation3 + $0x60] sm:$0xf] %v8791_v5  ;;  %v7980_v39 = vrot.slane %v7966_v61, %v14714_v41  ;;  %v7484_v16 = vsel %vm14701_vm7, %v17087_v3, %v7316_v58  ;;  %10149 = vmatprep.subr.bf16.mxu0 %v17041_v14  ;;  %v7330_v49 = vpop.permute.xlu0 %7329  ;;  %9289 = vrot.lane.b32.xlu1 %v9104_v19, %s11860_s30  ;;  %v9120_v33 = vshll.u32 %v15611_v13, 16  ;;  %v8496_v5 = vrot.slane %v15389_v31, 4  ;;  %v8773_v31 = vld [vmem:[#allocation3 + $0x44] sm:$0x1] }
 0x61b   : > { %v8498_v25 = vshrl.u32 %v7892_v34, 16  ;;  %v7918_v45 = vcombine.low %v7482_v48, %v7484_v16  ;;  %v9116_v56 = vsel %vm1279_vm11, %v9111_v12, %v9115_v11  ;;  %v17088_v24 = vpack.i.b16 %v14975_v26, %v14975_v26  ;;  %v7332_v19 = vpop.permute.xlu1 %7331  ;;  %v17091_v11 = vld [vmem:[#allocation46_spill] sm:$0xff] }
 0x61c   : > { %v7489_v23 = vsel %vm14701_vm7, %v17089_v60, %v15514_v30  ;;  %v7981_v36 = vcombine.low %v7973_v43, %v7980_v39  ;;  %v7491_v51 = vsel %vm14701_vm7, %v17090_v8, %v7330_v49  ;;  %v8501_v12 = vshll.u32 %v7892_v34, 16  ;;  %v17092_v48 = vld [vmem:[#allocation38_spill] sm:$0xff] }
 0x61d   : > { %v15642_v9 = vrot.slane %v17088_v24, %v14169_v50  ;;  %v8500_v61 = vrot.slane %v8498_v25, 7  ;;  %v7925_v6 = vrot.slane %v7917_v27, %v14714_v41  ;;  %v7932_v18 = vrot.slane %v7918_v45, %v14714_v41  ;;  %9291 = vrot.lane.b32.xlu0 %v9116_v56, %s11860_s30 }
 0x61e   : > { %v7988_v30 = vrot.slane %v7981_v36, %v14714_v41  ;;  %v8013_v58 = vcombine.low %v7489_v23, %v7491_v51  ;;  %v7492_v29 = vsel %vm14701_vm7, %v17091_v11, %v7332_v19  ;;  %v7490_v34 = vsel %vm14701_vm7, %v17092_v48, %v15532_v46  ;;  %v15664_v3 = vpop.permute.xlu0 %6427  ;;  %6487 = vrot.lane.b32.xlu1 %v15485_v52, %s11860_s30  ;;  %v8787_v11 = vld [vmem:[#allocation3 + $0x5c] sm:$0x1] }
 0x61f   : > { %v8503_v27 = vor.u32 %v8501_v12, %v8500_v61  ;;  %v8505_v43 = vrot.slane %v8500_v61, 4  ;;  %v7933_v39 = vcombine.low %v7925_v6, %v7932_v18  ;;  %v8014_v25 = vcombine.low %v7490_v34, %v7492_v29  ;;  %v15680_v60 = vpop.permute.xlu1 %6429 }
 0x620   : > { %v8532_v16 = vshrl.u32 %v7988_v30, 16  ;;  %v6882_v45 = vunpack.i.h.s16 %v15546_v40  ;;  %v15671_v49 = vcombine.high %v14975_v26, %v14975_v26  ;;  %v9122_v23 = vrot.slane %v9120_v33, 1 }
 0x621   : > { %v8504_v46 = vsel %vm12015_vm12, %v8496_v5, %v8503_v27  ;;  %v8774_v56 = vsel %vm12594_vm3, %v8505_v43, %v8773_v31  ;;  %v7940_v24 = vrot.slane %v7933_v39, %v14714_v41  ;;  %6489 = vrot.lane.b32.xlu0 %v15539_v44, %s11860_s30  ;;  %v8535_v26 = vshll.u32 %v7988_v30, 16 }
 0x622   : > { %8772 = vst.msk [vmem:[#allocation3 + $0x40] sm:$0xf] %vm2407_vm5, %v8504_v46  ;;  %8775 = vst [vmem:[#allocation3 + $0x44] sm:$0x1] %v8774_v56  ;;  %v8534_v36 = vrot.slane %v8532_v16, 7  ;;  %v8021_v8 = vrot.slane %v8013_v58, %v14714_v41  ;;  %v8028_v51 = vrot.slane %v8014_v25, %v14714_v41  ;;  %v15685_v12 = vpop.permute.xlu0 %6443  ;;  %7383 = vrot.lane.b32.xlu1 %v15524_v35, %s11860_s30  ;;  %v9118_v33 = vshrl.u32 %v15611_v13, 16 }
 0x623   : > { %v8515_v61 = vshrl.u32 %v7940_v24, 16  ;;  %v15691_v6 = vrot.slane %v15552_v38, %v14169_v50  ;;  %v9125_v18 = vshll.u32 %v15368_v42, 16  ;;  %v8530_v19 = vrot.slane %v15459_v10, 4  ;;  %v15698_v34 = vpop.permute.xlu1 %6445 }
 0x624   : > { %v8537_v5 = vor.u32 %v8535_v26, %v8534_v36  ;;  %v8539_v30 = vrot.slane %v8534_v36, 4  ;;  %v8029_v58 = vcombine.low %v8021_v8, %v8028_v51  ;;  %v8518_v48 = vshll.u32 %v7940_v24, 16  ;;  %v8780_v24 = vld [vmem:[#allocation3 + $0x50] sm:$0x1] }
 0x625   : > { %v8517_v29 = vrot.slane %v8515_v61, 7  ;;  %7381 = vrot.lane.b32.xlu0 %v15542_v21, %s11860_s30  ;;  %v9123_v27 = vor.u32 %v9122_v23, %v9118_v33  ;;  %v6884_v38 = vunpack.i.h.s16 %v15671_v49  ;;  %v11104_v39 = vpack.i.b16 %v15546_v40, %v15546_v40  ;;  %v8863_v40 = vld [vmem:[#allocation3 + $0x3c] sm:$0xf] }
 0x626   : > { %v8538_v43 = vsel %vm12015_vm12, %v8530_v19, %v8537_v5  ;;  %v8788_v42 = vsel %vm12594_vm3, %v8539_v30, %v8787_v11  ;;  %v8036_v10 = vrot.slane %v8029_v58, %v14714_v41  ;;  %v8513_v31 = vrot.slane %v15526_v59, 4  ;;  %v15710_v46 = vpop.permute.xlu0 %7333  ;;  %7387 = vrot.lane.b32.xlu1 %v15691_v6, %s11860_s30 }
 0x627   : > { %8786 = vst.msk [vmem:[#allocation3 + $0x58] sm:$0xf] %vm2407_vm5, %v8538_v43  ;;  %8789 = vst [vmem:[#allocation3 + $0x5c] sm:$0x1] %v8788_v42  ;;  %v8520_v16 = vor.u32 %v8518_v48, %v8517_v29  ;;  %v8522_v25 = vrot.slane %v8517_v29, 4  ;;  %v9127_v56 = vrot.slane %v9125_v18, 1  ;;  %v6946_v36 = vpack.i.b16 %v6882_v45, %v6882_v45  ;;  %v15722_v51 = vpop.permute.xlu1 %7335 }
 0x628   : > { %v8549_v23 = vshrl.u32 %v8036_v10, 16  ;;  %v11105_v26 = vpack.i.b16 %v15671_v49, %v15671_v49  ;;  %v6948_v33 = vpack.i.b16 %v6884_v38, %v6884_v38  ;;  %v8912_v45 = vld [vmem:[#allocation3 + $0x3c] sm:$0xe]  ;;  %v8552_v19 = vshll.u32 %v8036_v10, 16 }
 0x629   : > { %v8521_v59 = vsel %vm12015_vm12, %v8513_v31, %v8520_v16  ;;  %v8781_v8 = vsel %vm12594_vm3, %v8522_v25, %v8780_v24  ;;  %7385 = vrot.lane.b32.xlu0 %v15642_v9, %s11860_s30  ;;  %v9128_v61 = vsel %vm1279_vm11, %v9123_v27, %v9127_v56  ;;  %v8864_v18 = vld [vmem:[#allocation3 + $0x40] sm:$0xf]  ;;  %v11779_v30 = vld [vmem:[#allocation3 + $0x44] ss:$0 sps:$4 sm:$0x11]   ;;  %v15732_v29 = vrot.slane %v11104_v39, %v14169_v50 }
 0x62a   : > { %8779 = vst.msk [vmem:[#allocation3 + $0x4c] sm:$0xf] %vm2407_vm5, %v8521_v59  ;;  %8782 = vst [vmem:[#allocation3 + $0x50] sm:$0x1] %v8781_v8  ;;  %v8551_v49 = vrot.slane %v8549_v23, 7  ;;  %v15726_v5 = vcombine.low %v8863_v40, %v8864_v18  ;;  %v11147_v58 = vcombine.low %v8912_v45, %v8864_v18  ;;  %v15728_v11 = vpop.permute.xlu0 %7349  ;;  %9293 = vrot.lane.b32.xlu1 %v9128_v61, %s11860_s30  ;;  %v8547_v48 = vrot.slane %v15591_v20, 4 }
 0x62b   : > { %v8794_v27 = vld [vmem:[#allocation3 + $0x68] sm:$0x1]  ;;  %v15736_v42 = vrot.slane %v6946_v36, %v14169_v50  ;;  %v15740_v10 = vpop.permute.xlu1 %7351  ;;  %v9137_v16 = vshll.u32 %v11779_v30, 16  ;;  %v8867_v25 = vld [vmem:[#allocation3 + $0x54] sm:$0xf]  ;;  %v9391_v39 = vrot.slane %v11779_v30, 1  ;;  %v15748_v23 = vrot.slane %v11105_v26, %v14169_v50 }
 0x62c   : > { %17093 = vst [vmem:[#allocation32_spill] sm:$0xff] %v15726_v5  ;;  %v8554_v38 = vor.u32 %v8552_v19, %v8551_v49  ;;  %v8556_v43 = vrot.slane %v8551_v49, 4  ;;  %v9132_v31 = vshll.u32 %v15726_v5, 16  ;;  %v9390_v56 = vrot.slane %v11147_v58, 1  ;;  %v8914_v59 = vld [vmem:[#allocation3 + $0x54] sm:$0xe] }
 0x62d   : > { %7389 = vrot.lane.b32.xlu0 %v15732_v29, %s11860_s30  ;;  %v15751_v36 = vrot.slane %v6948_v33, %v14169_v50  ;;  %v9130_v61 = vshrl.u32 %v15726_v5, 16  ;;  %v17096_v50 = vld [vmem:[#allocation47_spill] sm:$0xff]  ;;  %v17097_v19 = vld [vmem:[#allocation48_spill] sm:$0xff] }
 0x62e   : > { %v8555_v20 = vsel %vm12015_vm12, %v8547_v48, %v8554_v38  ;;  %v8795_v24 = vsel %vm12594_vm3, %v8556_v43, %v8794_v27  ;;  %v8868_v40 = vld [vmem:[#allocation3 + $0x58] sm:$0xf]  ;;  %v6432_v8 = vpop.permute.xlu0 %6431  ;;  %7391 = vrot.lane.b32.xlu1 %v15736_v42, %s11860_s30  ;;  %v9134_v18 = vrot.slane %v9132_v31, 1  ;;  %v15759_v49 = vld [vmem:[#allocation3 + $0x5c] ss:$0 sps:$4 sm:$0x11]   ;;  %v15762_v26 = vsel %vm1586_vm9, %v9390_v56, %v9391_v39 }
 0x62f   : > { %17094 = vst [vmem:[#allocation21_spill] sm:$0xff] %v15751_v36  ;;  %8793 = vst.msk [vmem:[#allocation3 + $0x64] sm:$0xf] %vm2407_vm5, %v8555_v20  ;;  %v15757_v45 = vcombine.low %v8867_v25, %v8868_v40  ;;  %v6589_v33 = vsel %vm14701_vm7, %v17096_v50, %v15664_v3  ;;  %v6590_v30 = vsel %vm14701_vm7, %v17097_v19, %v15680_v60  ;;  %v9139_v48 = vrot.slane %v9137_v16, 1  ;;  %v8865_v27 = vld [vmem:[#allocation3 + $0x48] sm:$0xf]  ;;  %v6434_v31 = vpop.permute.xlu1 %6433 }
 0x630   : > { %8796 = vst [vmem:[#allocation3 + $0x68] sm:$0x1] %v8795_v24  ;;  %v6591_v58 = vsel %vm14701_vm7, %v14786_v47, %v6432_v8  ;;  %v8913_v38 = vld [vmem:[#allocation3 + $0x48] sm:$0xe]  ;;  %v9135_v25 = vor.u32 %v9134_v18, %v9130_v61  ;;  %v11149_v39 = vcombine.low %v8914_v59, %v8868_v40  ;;  %v17098_v20 = vld [vmem:[#allocation55_spill] sm:$0xff]  ;;  %v9161_v24 = vshll.u32 %v15759_v49, 16 }
 0x631   : > { %17095 = vst [vmem:[#allocation35_spill] sm:$0xff] %v15757_v45  ;;  %v8037_v43 = vcombine.low %v6589_v33, %v6591_v58  ;;  %7393 = vrot.lane.b32.xlu0 %v15748_v23, %s11860_s30  ;;  %v9156_v3 = vshll.u32 %v15757_v45, 16  ;;  %v8866_v56 = vld [vmem:[#allocation3 + $0x4c] sm:$0xf]  ;;  %v6592_v60 = vsel %vm14701_vm7, %v17098_v20, %v6434_v31  ;;  %v9154_v40 = vshrl.u32 %v15757_v45, 16 }
 0x632   : > { %v15782_v47 = vcombine.low %v8865_v27, %v8866_v56  ;;  %v11783_v16 = vld [vmem:[#allocation3 + $0x50] ss:$0 sps:$4 sm:$0x11]   ;;  %v11148_v8 = vcombine.low %v8913_v38, %v8866_v56  ;;  %v8038_v33 = vcombine.low %v6590_v30, %v6592_v60  ;;  %v15785_v19 = vpop.permute.xlu0 %6435  ;;  %7395 = vrot.lane.b32.xlu1 %v15751_v36, %s11860_s30  ;;  %v9140_v61 = vsel %vm1279_vm11, %v9135_v25, %v9139_v48  ;;  %v8869_v56 = vld [vmem:[#allocation3 + $0x60] sm:$0xf] }
 0x633   : > { %v8045_v50 = vrot.slane %v8037_v43, %v14714_v41  ;;  %v9158_v59 = vrot.slane %v9156_v3, 1  ;;  %v9163_v18 = vrot.slane %v9161_v24, 1  ;;  %v15795_v30 = vpop.permute.xlu1 %6437  ;;  %v9149_v31 = vshll.u32 %v11783_v16, 16  ;;  %v17100_v60 = vld [vmem:[#allocation49_spill] sm:$0xff] }
 0x634   : > { %17099 = vst [vmem:[#allocation22_spill] sm:$0xff] %v15782_v47  ;;  %v9142_v58 = vshrl.u32 %v15782_v47, 16  ;;  %v9144_v27 = vshll.u32 %v15782_v47, 16  ;;  %v8052_v38 = vrot.slane %v8038_v33, %v14714_v41  ;;  %v9393_v20 = vrot.slane %v11148_v8, 1 }
 0x635   : > { %9295 = vrot.lane.b32.xlu0 %v9140_v61, %s11860_s30  ;;  %v9159_v43 = vor.u32 %v9158_v59, %v9154_v40  ;;  %v6597_v48 = vsel %vm14701_vm7, %v17100_v60, %v15685_v12  ;;  %v9394_v24 = vrot.slane %v11783_v16, 1  ;;  %v9151_v5 = vrot.slane %v9149_v31, 1 }
 0x636   : > { %v9146_v25 = vrot.slane %v9144_v27, 1  ;;  %v8870_v3 = vld [vmem:[#allocation3 + $0x64] sm:$0xf]  ;;  %v8053_v45 = vcombine.low %v8045_v50, %v8052_v38  ;;  %v6448_v47 = vpop.permute.xlu0 %6447  ;;  %v9396_v12 = vrot.slane %v11149_v39, 1  ;;  %v17101_v27 = vld [vmem:[#allocation50_spill] sm:$0xff] }
 0x637   : > { %v9164_v33 = vsel %vm1279_vm11, %v9159_v43, %v9163_v18  ;;  %v15802_v61 = vcombine.low %v8869_v56, %v8870_v3  ;;  %v11785_v36 = vld [vmem:[#allocation3 + $0x68] ss:$0 sps:$4 sm:$0x11]   ;;  %v6599_v8 = vsel %vm14701_vm7, %v14804_v1, %v6448_v47  ;;  %v15808_v59 = vsel %vm1586_vm9, %v9393_v20, %v9394_v24  ;;  %v6450_v38 = vpop.permute.xlu1 %6449  ;;  %v8915_v24 = vld [vmem:[#allocation3 + $0x60] sm:$0xe] }
 0x638   : > { %v9147_v40 = vor.u32 %v9146_v25, %v9142_v58  ;;  %v6598_v16 = vsel %vm14701_vm7, %v17101_v27, %v15698_v34  ;;  %v8060_v50 = vrot.slane %v8053_v45, %v14714_v41  ;;  %v8133_v18 = vcombine.low %v6597_v48, %v6599_v8  ;;  %v17148_v63 = vld [vmem:[#allocation35_spill] sm:$0xff] }
 0x639   : > { %9299 = vrot.lane.b32.xlu0 %v9164_v33, %s11860_s30  ;;  %v9168_v43 = vshll.u32 %v15802_v61, 16  ;;  %v6600_v1 = vsel %vm14701_vm7, %v14826_v53, %v6450_v38  ;;  %v9173_v39 = vshll.u32 %v11785_v36, 16  ;;  %v9397_v58 = vrot.slane %v15759_v49, 1 }
 0x63a   : > { %v9152_v47 = vsel %vm1279_vm11, %v9147_v40, %v9151_v5  ;;  %v8558_v31 = vshrl.u32 %v8060_v50, 16  ;;  %v8134_v56 = vcombine.low %v6598_v16, %v6600_v1  ;;  %v15822_v34 = vpop.permute.xlu0 %6451  ;;  %v9166_v45 = vshrl.u32 %v15802_v61, 16 }
 0x63b   : > { %9297 = vrot.lane.b32.xlu1 %v9152_v47, %s11860_s30  ;;  %v9170_v20 = vrot.slane %v9168_v43, 1  ;;  %v15827_v60 = vsel %vm1586_vm9, %v9396_v12, %v9397_v58  ;;  %v8561_v53 = vshll.u32 %v8060_v50, 16  ;;  %v8141_v5 = vrot.slane %v8133_v18, %v14714_v41  ;;  %v15833_v49 = vpop.permute.xlu1 %6453  ;;  %v17102_v12 = vld [vmem:[#allocation51_spill] sm:$0xff]  ;;  %v8797_v50 = vld [vmem:[#allocation3 + $0x6c] sm:$0xf] }
 0x63c   : > { %v15829_v48 = vrot.slane %v8558_v31, 7  ;;  %v8148_v25 = vrot.slane %v8134_v56, %v14714_v41  ;;  %v9175_v8 = vrot.slane %v9173_v39, 1  ;;  %v11150_v40 = vcombine.low %v8915_v24, %v8870_v3 }
 0x63d   : > { %v9171_v33 = vor.u32 %v9170_v20, %v9166_v45  ;;  %v7493_v43 = vsel %vm14701_vm7, %v17102_v12, %v15710_v46  ;;  %v9400_v47 = vrot.slane %v11785_v36, 1  ;;  %v17103_v46 = vld [vmem:[#allocation52_spill] sm:$0xff]  ;;  %v8811_v12 = vld [vmem:[#allocation3 + $0x84] sm:$0xf] }
 0x63e   : > { %v8563_v27 = vor.u32 %v8561_v53, %v15829_v48  ;;  %v8149_v16 = vcombine.low %v8141_v5, %v8148_v25  ;;  %v7338_v38 = vpop.permute.xlu0 %7337  ;;  %v9399_v56 = vrot.slane %v11150_v40, 1  ;;  %v7494_v45 = vsel %vm14701_vm7, %v17103_v46, %v15722_v51 }
 0x63f   : > { %v7495_v18 = vsel %vm14701_vm7, %v14832_v2, %v7338_v38  ;;  %v9176_v1 = vsel %vm1279_vm11, %v9171_v33, %v9175_v8  ;;  %v7340_v31 = vpop.permute.xlu1 %7339 }
 0x640   : > { %v8798_v3 = vsel %vm12772_vm6, %v8563_v27, %v8797_v50  ;;  %v8156_v39 = vrot.slane %v8149_v16, %v14714_v41  ;;  %v8085_v58 = vcombine.low %v7493_v43, %v7495_v18  ;;  %9301 = vrot.lane.b32.xlu1 %v9176_v1, %s11860_s30  ;;  %v7496_v2 = vsel %vm14701_vm7, %v14873_v28, %v7340_v31  ;;  %v17104_v16 = vld [vmem:[#allocation53_spill] sm:$0xff] }
 0x641   : > { %8799 = vst [vmem:[#allocation3 + $0x6c] sm:$0xf] %v8798_v3  ;;  %v8086_v20 = vcombine.low %v7494_v45, %v7496_v2  ;;  %v15858_v5 = vsel %vm1586_vm9, %v9399_v56, %v9400_v47  ;;  %v7501_v38 = vsel %vm14701_vm7, %v17104_v16, %v15728_v11  ;;  %v17105_v3 = vld [vmem:[#allocation54_spill] sm:$0xff] }
 0x642   : > { %v8592_v36 = vshrl.u32 %v8156_v39, 16  ;;  %v15855_v53 = vpop.permute.xlu0 %7341  ;;  %v8595_v24 = vshll.u32 %v8156_v39, 16  ;;  %v8093_v33 = vrot.slane %v8085_v58, %v14714_v41  ;;  %v7502_v39 = vsel %vm14701_vm7, %v17105_v3, %v15740_v10 }
 0x643   : > { %v8100_v8 = vrot.slane %v8086_v20, %v14714_v41  ;;  %v15864_v51 = vpop.permute.xlu1 %7343 }
 0x644   : > { %v15860_v25 = vrot.slane %v8592_v36, 7 }
 0x645   : > { %v8101_v27 = vcombine.low %v8093_v33, %v8100_v8  ;;  %v17106_v33 = vld [vmem:[#allocation56_spill] sm:$0xff] }
 0x646   : > { %v8597_v40 = vor.u32 %v8595_v24, %v15860_v25  ;;  %v7354_v28 = vpop.permute.xlu0 %7353  ;;  %v8804_v8 = vld [vmem:[#allocation3 + $0x78] sm:$0xf] }
 0x647   : > { %v7503_v43 = vsel %vm14701_vm7, %v14897_v57, %v7354_v28  ;;  %v8108_v18 = vrot.slane %v8101_v27, %v14714_v41  ;;  %v7356_v47 = vpop.permute.xlu1 %7355 }
 0x648   : > { %v8812_v50 = vsel %vm12772_vm6, %v8597_v40, %v8811_v12  ;;  %v8181_v1 = vcombine.low %v7501_v38, %v7503_v43  ;;  %v7504_v11 = vsel %vm14701_vm7, %v14959_v17, %v7356_v47  ;;  %v6593_v17 = vsel %vm14701_vm7, %v17106_v33, %v15785_v19  ;;  %v17107_v40 = vld [vmem:[#allocation63_spill] sm:$0xff]  ;;  %v17108_v43 = vld [vmem:[#allocation58_spill] sm:$0xff] }
 0x649   : > { %8813 = vst [vmem:[#allocation3 + $0x84] sm:$0xf] %v8812_v50  ;;  %v8575_v58 = vshrl.u32 %v8108_v18, 16  ;;  %v8182_v31 = vcombine.low %v7502_v39, %v7504_v11  ;;  %v8578_v46 = vshll.u32 %v8108_v18, 16  ;;  %v6594_v50 = vsel %vm14701_vm7, %v17108_v43, %v15795_v30  ;;  %v17109_v18 = vld [vmem:[#allocation9_spill] sm:$0xff]  ;;  %v17115_v43 = vld [vmem:[#allocation11_spill] sm:$0xff] }
 0x64a   : > { %v7358_v57 = vpop.permute.xlu0 %7357  ;;  %v8189_v45 = vrot.slane %v8181_v1, %v14714_v41  ;;  %v17110_v39 = vld [vmem:[#allocation57_spill] sm:$0xff] }
 0x64b   : > { %v15884_v56 = vrot.slane %v8575_v58, 7  ;;  %v8196_v2 = vrot.slane %v8182_v31, %v14714_v41  ;;  %v15888_v36 = vpop.permute.xlu1 %7359  ;;  %v6601_v11 = vsel %vm14701_vm7, %v17110_v39, %v15822_v34  ;;  %v17111_v58 = vld [vmem:[#allocation8_spill] sm:$0xff] }
 0x64d   : > { %v8580_v20 = vor.u32 %v8578_v46, %v15884_v56  ;;  %v8197_v10 = vcombine.low %v8189_v45, %v8196_v2 }
 0x64e   : > { %v6440_v24 = vpop.permute.xlu0 %6439 }
 0x64f   : > { %v6595_v27 = vsel %vm14701_vm7, %v17107_v40, %v6440_v24  ;;  %v8805_v28 = vsel %vm12772_vm6, %v8580_v20, %v8804_v8  ;;  %v8204_v16 = vrot.slane %v8197_v10, %v14714_v41  ;;  %v6442_v12 = vpop.permute.xlu1 %6441  ;;  %v17112_v24 = vld [vmem:[#allocation10_spill] sm:$0xff] }
 0x650   : > { %v8061_v38 = vcombine.low %v6593_v17, %v6595_v27  ;;  %8806 = vst [vmem:[#allocation3 + $0x78] sm:$0xf] %v8805_v28  ;;  %v6596_v19 = vsel %vm14701_vm7, %v17109_v18, %v6442_v12  ;;  %v17113_v17 = vld [vmem:[#allocation59_spill] sm:$0xff]  ;;  %v17114_v28 = vld [vmem:[#allocation6_spill] sm:$0xff] }
 0x651   : > { %v8609_v1 = vshrl.u32 %v8204_v16, 16  ;;  %v8062_v47 = vcombine.low %v6594_v50, %v6596_v19  ;;  %v8612_v30 = vshll.u32 %v8204_v16, 16  ;;  %v6602_v34 = vsel %vm14701_vm7, %v17113_v17, %v15833_v49 }
 0x652   : > { %v6456_v3 = vpop.permute.xlu0 %6455  ;;  %v8069_v45 = vrot.slane %v8061_v38, %v14714_v41  ;;  %v7497_v16 = vsel %vm14701_vm7, %v17114_v28, %v15855_v53  ;;  %v8818_v38 = vld [vmem:[#allocation3 + $0x90] sm:$0xf] }
 0x653   : > { %v6603_v31 = vsel %vm14701_vm7, %v17111_v58, %v6456_v3  ;;  %v15915_v46 = vrot.slane %v8609_v1, 7  ;;  %v8076_v2 = vrot.slane %v8062_v47, %v14714_v41  ;;  %v6458_v20 = vpop.permute.xlu1 %6457  ;;  %v17116_v47 = vld [vmem:[#allocation60_spill] sm:$0xff] }
 0x654   : > { %v8157_v10 = vcombine.low %v6601_v11, %v6603_v31  ;;  %v6604_v33 = vsel %vm14701_vm7, %v17112_v24, %v6458_v20  ;;  %v7498_v3 = vsel %vm14701_vm7, %v17116_v47, %v15864_v51  ;;  %v17117_v11 = vld [vmem:[#allocation13_spill] sm:$0xff] }
 0x655   : > { %v8614_v8 = vor.u32 %v8612_v30, %v15915_v46  ;;  %v8077_v40 = vcombine.low %v8069_v45, %v8076_v2  ;;  %v8158_v12 = vcombine.low %v6602_v34, %v6604_v33  ;;  %v17118_v2 = vld [vmem:[#allocation61_spill] sm:$0xff]  ;;  %v17119_v33 = vld [vmem:[#allocation12_spill] sm:$0xff] }
 0x656   : > { %v7346_v27 = vpop.permute.xlu0 %7345  ;;  %v8165_v53 = vrot.slane %v8157_v10, %v14714_v41  ;;  %v7505_v20 = vsel %vm14701_vm7, %v17118_v2, %v7358_v57 }
 0x657   : > { %v7499_v50 = vsel %vm14701_vm7, %v17115_v43, %v7346_v27  ;;  %v8819_v18 = vsel %vm12772_vm6, %v8614_v8, %v8818_v38  ;;  %v8084_v49 = vrot.slane %v8077_v40, %v14714_v41  ;;  %v7348_v1 = vpop.permute.xlu1 %7347  ;;  %v8172_v39 = vrot.slane %v8158_v12, %v14714_v41  ;;  %v17120_v38 = vld [vmem:[#allocation7_spill] sm:$0xff]  ;;  %v17121_v12 = vld [vmem:[#allocation62_spill] sm:$0xff] }
 0x658   : > { %v8109_v19 = vcombine.low %v7497_v16, %v7499_v50  ;;  %8820 = vst [vmem:[#allocation3 + $0x90] sm:$0xf] %v8819_v18  ;;  %v7500_v58 = vsel %vm14701_vm7, %v17117_v11, %v7348_v1  ;;  %v8564_v27 = vrot.slane %v15829_v48, 4  ;;  %v7506_v43 = vsel %vm14701_vm7, %v17121_v12, %v15888_v36  ;;  %v8801_v1 = vld [vmem:[#allocation3 + $0x74] sm:$0x1] }
 0x659   : > { %v8566_v31 = vshrl.u32 %v8084_v49, 16  ;;  %v8110_v30 = vcombine.low %v7498_v3, %v7500_v58  ;;  %v8173_v24 = vcombine.low %v8165_v53, %v8172_v39  ;;  %v8569_v10 = vshll.u32 %v8084_v49, 16  ;;  %v8808_v12 = vld [vmem:[#allocation3 + $0x80] sm:$0x1] }
 0x65a   : > { %v7362_v45 = vpop.permute.xlu0 %7361  ;;  %v8117_v34 = vrot.slane %v8109_v19, %v14714_v41 }
 0x65b   : > { %v7507_v51 = vsel %vm14701_vm7, %v17119_v33, %v7362_v45  ;;  %v8568_v17 = vrot.slane %v8566_v31, 7  ;;  %v8124_v8 = vrot.slane %v8110_v30, %v14714_v41  ;;  %v7364_v40 = vpop.permute.xlu1 %7363  ;;  %v8180_v28 = vrot.slane %v8173_v24, %v14714_v41 }
 0x65c   : > { %v8205_v16 = vcombine.low %v7505_v20, %v7507_v51  ;;  %v7508_v57 = vsel %vm14701_vm7, %v17120_v38, %v7364_v40  ;;  %v8598_v20 = vrot.slane %v15860_v25, 4 }
 0x65d   : > { %v8571_v50 = vor.u32 %v8569_v10, %v8568_v17  ;;  %v8573_v18 = vrot.slane %v8568_v17, 4  ;;  %v8125_v49 = vcombine.low %v8117_v34, %v8124_v8  ;;  %v8600_v47 = vshrl.u32 %v8180_v28, 16  ;;  %v8815_v17 = vld [vmem:[#allocation3 + $0x8c] sm:$0x1] }
 0x65e   : > { %v15963_v19 = vpop.permute.xlu0 %7365  ;;  %v8206_v48 = vcombine.low %v7506_v43, %v7508_v57  ;;  %v8603_v58 = vshll.u32 %v8180_v28, 16  ;;  %v8213_v31 = vrot.slane %v8205_v16, %v14714_v41  ;;  %v8581_v16 = vrot.slane %v15884_v56, 4 }
 0x65f   : > { %v8572_v3 = vsel %vm12015_vm12, %v8564_v27, %v8571_v50  ;;  %v8802_v53 = vsel %vm12594_vm3, %v8573_v18, %v8801_v1  ;;  %v8132_v39 = vrot.slane %v8125_v49, %v14714_v41  ;;  %v15970_v11 = vpop.permute.xlu1 %6459  ;;  %v8602_v36 = vrot.slane %v8600_v47, 7  ;;  %v8871_v50 = vld [vmem:[#allocation3 + $0x6c] sm:$0xf] }
 0x660   : > { %8800 = vst.msk [vmem:[#allocation3 + $0x70] sm:$0xf] %vm2407_vm5, %v8572_v3  ;;  %8803 = vst [vmem:[#allocation3 + $0x74] sm:$0x1] %v8802_v53  ;;  %v8220_v30 = vrot.slane %v8206_v48, %v14714_v41  ;;  %v8916_v48 = vld [vmem:[#allocation3 + $0x6c] sm:$0xe] }
 0x661   : > { %v8583_v45 = vshrl.u32 %v8132_v39, 16  ;;  %v8605_v24 = vor.u32 %v8603_v58, %v8602_v36  ;;  %v8607_v33 = vrot.slane %v8602_v36, 4  ;;  %v8586_v34 = vshll.u32 %v8132_v39, 16 }
 0x662   : > { %v15975_v2 = vpop.permute.xlu0 %6461  ;;  %v8221_v51 = vcombine.low %v8213_v31, %v8220_v30  ;;  %v8615_v31 = vrot.slane %v15915_v46, 4  ;;  %v17122_v46 = vld [vmem:[#allocation64_spill] sm:$0xff] }
 0x663   : > { %v8585_v10 = vrot.slane %v8583_v45, 7  ;;  %v15978_v8 = vpop.permute.xlu1 %6475  ;;  %v8606_v40 = vsel %vm12015_vm12, %v8598_v20, %v8605_v24  ;;  %v8816_v27 = vsel %vm12594_vm3, %v8607_v33, %v8815_v17  ;;  %v8822_v20 = vld [vmem:[#allocation3 + $0x98] sm:$0x1]  ;;  %v8875_v17 = vld [vmem:[#allocation3 + $0x84] sm:$0xf] }
 0x664   : > { %v8228_v28 = vrot.slane %v8221_v51, %v14714_v41  ;;  %8814 = vst.msk [vmem:[#allocation3 + $0x88] sm:$0xf] %vm2407_vm5, %v8606_v40  ;;  %8817 = vst [vmem:[#allocation3 + $0x8c] sm:$0x1] %v8816_v27 }
 0x665   : > { %v8588_v25 = vor.u32 %v8586_v34, %v8585_v10  ;;  %v8590_v38 = vrot.slane %v8585_v10, 4 }
 0x666   : > { %v15987_v57 = vpop.permute.xlu0 %6477  ;;  %v8617_v43 = vshrl.u32 %v8228_v28, 16  ;;  %v8620_v3 = vshll.u32 %v8228_v28, 16 }
 0x667   : > { %v8589_v18 = vsel %vm12015_vm12, %v8581_v16, %v8588_v25  ;;  %v8809_v49 = vsel %vm12594_vm3, %v8590_v38, %v8808_v12  ;;  %v6464_v1 = vpop.permute.xlu1 %6463  ;;  %v8872_v47 = vld [vmem:[#allocation3 + $0x70] sm:$0xf]  ;;  %v11794_v39 = vld [vmem:[#allocation3 + $0x74] ss:$0 sps:$4 sm:$0x11]  }
 0x668   : > { %8807 = vst.msk [vmem:[#allocation3 + $0x7c] sm:$0xf] %vm2407_vm5, %v8589_v18  ;;  %8810 = vst [vmem:[#allocation3 + $0x80] sm:$0x1] %v8809_v49  ;;  %v8619_v56 = vrot.slane %v8617_v43, 7  ;;  %v15994_v53 = vcombine.low %v8871_v50, %v8872_v47  ;;  %v11151_v36 = vcombine.low %v8916_v48, %v8872_v47  ;;  %v9185_v51 = vshll.u32 %v11794_v39, 16 }
 0x669   : > { %v6607_v28 = vsel %vm14701_vm7, %v17122_v46, %v6464_v1  ;;  %v17124_v50 = vld [vmem:[#allocation4_spill] sm:$0xff]  ;;  %v9403_v47 = vrot.slane %v11794_v39, 1 }
 0x66a   : > { %v15996_v58 = vpop.permute.xlu0 %7369  ;;  %v8622_v30 = vor.u32 %v8620_v3, %v8619_v56  ;;  %v8624_v45 = vrot.slane %v8619_v56, 4  ;;  %v9180_v33 = vshll.u32 %v15994_v53, 16  ;;  %v9402_v27 = vrot.slane %v11151_v36, 1  ;;  %v8873_v49 = vld [vmem:[#allocation3 + $0x78] sm:$0xf] }
 0x66b   : > { %v15999_v24 = vpop.permute.xlu1 %6467  ;;  %v8876_v40 = vld [vmem:[#allocation3 + $0x88] sm:$0xf]  ;;  %v9178_v25 = vshrl.u32 %v15994_v53, 16  ;;  %v11797_v43 = vld [vmem:[#allocation3 + $0x8c] ss:$0 sps:$4 sm:$0x11]   ;;  %v6605_v18 = vsel %vm14701_vm7, %v17124_v50, %v15970_v11 }
 0x66c   : > { %v8623_v10 = vsel %vm12015_vm12, %v8615_v31, %v8622_v30  ;;  %v8823_v34 = vsel %vm12594_vm3, %v8624_v45, %v8822_v20  ;;  %v9182_v38 = vrot.slane %v9180_v33, 1  ;;  %v16013_v12 = vcombine.low %v8875_v17, %v8876_v40  ;;  %v8917_v48 = vld [vmem:[#allocation3 + $0x78] sm:$0xe]  ;;  %v17126_v11 = vld [vmem:[#allocation65_spill] sm:$0xff] }
 0x66d   : > { %8821 = vst.msk [vmem:[#allocation3 + $0x94] sm:$0xf] %vm2407_vm5, %v8623_v10  ;;  %8824 = vst [vmem:[#allocation3 + $0x98] sm:$0x1] %v8823_v34  ;;  %v9187_v36 = vrot.slane %v9185_v51, 1  ;;  %v9209_v31 = vshll.u32 %v11797_v43, 16  ;;  %v8229_v45 = vcombine.low %v6605_v18, %v6607_v28  ;;  %v16023_v17 = vsel %vm1586_vm9, %v9402_v27, %v9403_v47 }
 0x66e   : > { %v16010_v16 = vpop.permute.xlu0 %7373  ;;  %17123 = vst [vmem:[#allocation36_spill] sm:$0xff] %v16013_v12  ;;  %v9183_v3 = vor.u32 %v9182_v38, %v9178_v25  ;;  %v9204_v1 = vshll.u32 %v16013_v12, 16  ;;  %v6606_v39 = vsel %vm14701_vm7, %v17126_v11, %v15975_v2  ;;  %v9202_v46 = vshrl.u32 %v16013_v12, 16  ;;  %v8918_v38 = vld [vmem:[#allocation3 + $0x84] sm:$0xe] }
 0x66f   : > { %v6480_v56 = vpop.permute.xlu1 %6479  ;;  %v8874_v30 = vld [vmem:[#allocation3 + $0x7c] sm:$0xf]  ;;  %v11800_v33 = vld [vmem:[#allocation3 + $0x80] ss:$0 sps:$4 sm:$0x11]   ;;  %v11153_v18 = vcombine.low %v8918_v38, %v8876_v40 }
 0x670   : > { %v16020_v20 = vcombine.low %v8873_v49, %v8874_v30  ;;  %v11152_v10 = vcombine.low %v8917_v48, %v8874_v30  ;;  %v9188_v51 = vsel %vm1279_vm11, %v9183_v3, %v9187_v36  ;;  %v9206_v25 = vrot.slane %v9204_v1, 1  ;;  %v8877_v36 = vld [vmem:[#allocation3 + $0x90] sm:$0xf] }
 0x671   : > { %9303 = vrot.lane.b32.xlu0 %v9188_v51, %s11860_s30  ;;  %v9197_v50 = vshll.u32 %v11800_v33, 16  ;;  %v9211_v48 = vrot.slane %v9209_v31, 1  ;;  %v8237_v1 = vrot.slane %v8229_v45, %v14714_v41  ;;  %v17127_v30 = vld [vmem:[#allocation23_spill] sm:$0xff] }
 0x672   : > { %17125 = vst [vmem:[#allocation25_spill] sm:$0xff] %v16020_v20  ;;  %v6466_v34 = vpop.permute.xlu0 %6465  ;;  %v9192_v27 = vshll.u32 %v16020_v20, 16  ;;  %v9207_v2 = vor.u32 %v9206_v25, %v9202_v46  ;;  %v9190_v3 = vshrl.u32 %v16020_v20, 16  ;;  %v9405_v51 = vrot.slane %v11152_v10, 1 }
 0x673   : > { %v6608_v28 = vsel %vm14701_vm7, %v15309_v7, %v6466_v34  ;;  %v16036_v47 = vpop.permute.xlu1 %6483  ;;  %v6615_v7 = vsel %vm14701_vm7, %v17127_v30, %v6480_v56  ;;  %v9406_v25 = vrot.slane %v11800_v33, 1  ;;  %v9199_v38 = vrot.slane %v9197_v50, 1  ;;  %v17128_v56 = vld [vmem:[#allocation5_spill] sm:$0xff]  ;;  %v11816_v33 = vld [vmem:[%s16777_s7] sm:$0xff]  }
 0x674   : > { %v8230_v49 = vcombine.low %v6606_v39, %v6608_v28  ;;  %v9194_v11 = vrot.slane %v9192_v27, 1  ;;  %v8878_v34 = vld [vmem:[#allocation3 + $0x94] sm:$0xf]  ;;  %v9212_v39 = vsel %vm1279_vm11, %v9207_v2, %v9211_v48  ;;  %v11803_v31 = vld [vmem:[#allocation3 + $0x98] ss:$0 sps:$4 sm:$0x11]   ;;  %v6613_v10 = vsel %vm14701_vm7, %v17128_v56, %v15978_v8  ;;  %9889 = vmatpush1.bf16.msra.mxu1 %v11816_v33 }
 0x675   : > { %v16047_v46 = vcombine.low %v8877_v36, %v8878_v34  ;;  %9307 = vrot.lane.b32.xlu0 %v9212_v39, %s11860_s30  ;;  %v9408_v28 = vrot.slane %v11153_v18, 1  ;;  %v9409_v20 = vrot.slane %v11797_v43, 1  ;;  %v9221_v2 = vshll.u32 %v11803_v31, 16  ;;  %v8919_v18 = vld [vmem:[#allocation3 + $0x90] sm:$0xe]  ;;  %v17130_v39 = vld [vmem:[#allocation18_spill] sm:$0xff]  ;;  %9890 = vmatprep.subr.bf16.mxu1 %v17041_v14 }
 0x676   : > { %v8244_v12 = vrot.slane %v8230_v49, %v14714_v41  ;;  %v16044_v40 = vpop.permute.xlu0 %6469  ;;  %v9195_v45 = vor.u32 %v9194_v11, %v9190_v3  ;;  %v8325_v48 = vcombine.low %v6613_v10, %v6615_v7  ;;  %v16060_v50 = vsel %vm1586_vm9, %v9405_v51, %v9406_v25  ;;  %v17129_v7 = vld [vmem:[#allocation15_spill] sm:$0xff] }
 0x677   : > { %v9216_v30 = vshll.u32 %v16047_v46, 16  ;;  %v16063_v43 = vsel %vm1586_vm9, %v9408_v28, %v9409_v20  ;;  %v9214_v36 = vshrl.u32 %v16047_v46, 16  ;;  %v11154_v11 = vcombine.low %v8919_v18, %v8878_v34  ;;  %v17131_v34 = vld [vmem:[#allocation67_spill] sm:$0xff]  ;;  %v17132_v18 = vld [vmem:[#allocation17_spill] sm:$0xff] }
 0x678   : > { %v8245_v27 = vcombine.low %v8237_v1, %v8244_v12  ;;  %v7368_v49 = vpop.permute.xlu1 %7367  ;;  %v9200_v3 = vsel %vm1279_vm11, %v9195_v45, %v9199_v38  ;;  %v6614_v51 = vsel %vm14701_vm7, %v17129_v7, %v15987_v57  ;;  %v9412_v25 = vrot.slane %v11803_v31, 1 }
 0x679   : > { %9305 = vrot.lane.b32.xlu1 %v9200_v3, %s11860_s30  ;;  %v9218_v1 = vrot.slane %v9216_v30, 1  ;;  %v9223_v10 = vrot.slane %v9221_v2, 1  ;;  %v8333_v30 = vrot.slane %v8325_v48, %v14714_v41  ;;  %v9411_v33 = vrot.slane %v11154_v11, 1 }
 0x67a   : > { %v8252_v8 = vrot.slane %v8245_v27, %v14714_v41  ;;  %v6482_v12 = vpop.permute.xlu0 %6481  ;;  %v7511_v27 = vsel %vm14701_vm7, %v17131_v34, %v15996_v58 }
 0x67b   : > { %v6616_v20 = vsel %vm14701_vm7, %v17130_v39, %v6482_v12  ;;  %v9219_v56 = vor.u32 %v9218_v1, %v9214_v36  ;;  %v17133_v36 = vld [vmem:[#allocation14_spill] sm:$0xff]  ;;  %v16094_v48 = vsel %vm1586_vm9, %v9411_v33, %v9412_v25  ;;  %v17134_v1 = vld [vmem:[#allocation16_spill] sm:$0xff] }
 0x67c   : > { %v8626_v45 = vshrl.u32 %v8252_v8, 16  ;;  %v8326_v38 = vcombine.low %v6614_v51, %v6616_v20  ;;  %v6472_v28 = vpop.permute.xlu1 %6471  ;;  %v8629_v57 = vshll.u32 %v8252_v8, 16  ;;  %v7509_v58 = vsel %vm14701_vm7, %v17133_v36, %v15963_v19  ;;  %v8825_v19 = vld [vmem:[#allocation3 + $0x9c] sm:$0xf] }
 0x67d   : > { %v6611_v12 = vsel %vm14701_vm7, %v17132_v18, %v6472_v28  ;;  %v9224_v2 = vsel %vm1279_vm11, %v9219_v56, %v9223_v10  ;;  %v8277_v8 = vcombine.low %v7509_v58, %v7511_v27  ;;  %v6609_v11 = vsel %vm14701_vm7, %v17134_v1, %v15999_v24  ;;  %v17136_v56 = vld [vmem:[#allocation31_spill] sm:$0xff] }
 0x67e   : > { %v16081_v3 = vrot.slane %v8626_v45, 7  ;;  %v8340_v31 = vrot.slane %v8326_v38, %v14714_v41  ;;  %v7378_v7 = vpop.permute.xlu0 %7377  ;;  %9309 = vrot.lane.b32.xlu1 %v9224_v2, %s11860_s30  ;;  %v11817_v45 = vld [vmem:[%s16777_s7 + $0x8] sm:$0xff]   ;;  %v17135_v38 = vld [vmem:[#allocation70_spill] sm:$0xff]  ;;  %v8253_v28 = vcombine.low %v6609_v11, %v6611_v12  ;;  %v17138_v11 = vld [vmem:[#allocation29_spill] sm:$0xff] }
 0x67f   : > { %v7510_v25 = vsel %vm14701_vm7, %v17135_v38, %v7368_v49  ;;  %9891 = vmatpush1.bf16.msra.mxu1 %v11817_v45  ;;  %v17137_v49 = vld [vmem:[#allocation69_spill] sm:$0xff]  ;;  %v8285_v18 = vrot.slane %v8277_v8, %v14714_v41  ;;  %v17139_v38 = vld [vmem:[#allocation19_spill] sm:$0xff] }
 0x680   : > { %v8631_v51 = vor.u32 %v8629_v57, %v16081_v3  ;;  %v8341_v39 = vcombine.low %v8333_v30, %v8340_v31  ;;  %v7372_v20 = vpop.permute.xlu1 %7371  ;;  %v11819_v57 = vld [vmem:[%s16777_s7 + $0x10] sm:$0xff]   ;;  %v6610_v33 = vsel %vm14701_vm7, %v17137_v49, %v16044_v40  ;;  %9892 = vmatprep.subr.bf16.mxu1 %v17041_v14  ;;  %v8261_v1 = vrot.slane %v8253_v28, %v14714_v41  ;;  %v11818_v40 = vld [vmem:[%s16777_s7 + $0xc0] sm:$0xff]  }
 0x681   : > { %v7512_v10 = vsel %vm14701_vm7, %v17136_v56, %v7372_v20  ;;  %v17141_v49 = vld [vmem:[#allocation26_spill] sm:$0xff] }
 0x682   : > { %v8826_v24 = vsel %vm12772_vm6, %v8631_v51, %v8825_v19  ;;  %v8348_v34 = vrot.slane %v8341_v39, %v14714_v41  ;;  %v8278_v27 = vcombine.low %v7510_v25, %v7512_v10  ;;  %v6474_v30 = vpop.permute.xlu0 %6473  ;;  %v7515_v51 = vsel %vm14701_vm7, %v17138_v11, %v7378_v7  ;;  %v11820_v19 = vld [vmem:[%s16777_s7 + $0x18] sm:$0xff]   ;;  %v17140_v7 = vld [vmem:[#allocation24_spill] sm:$0xff] }
 0x683   : > { %8827 = vst [vmem:[#allocation3 + $0x9c] sm:$0xf] %v8826_v24  ;;  %v6612_v31 = vsel %vm14701_vm7, %v15451_v32, %v6474_v30  ;;  %9893 = vmatpush1.bf16.msra.mxu1 %v11819_v57  ;;  %v7513_v28 = vsel %vm14701_vm7, %v17140_v7, %v16010_v16  ;;  %v11822_v16 = vld [vmem:[%s16777_s7 + $0xc8] sm:$0xff]  }
 0x684   : > { %v8660_v12 = vshrl.u32 %v8348_v34, 16  ;;  %v8292_v2 = vrot.slane %v8278_v27, %v14714_v41  ;;  %v8254_v36 = vcombine.low %v6610_v33, %v6612_v31  ;;  %v7376_v58 = vpop.permute.xlu1 %7375  ;;  %v8663_v39 = vshll.u32 %v8348_v34, 16  ;;  %9894 = vmatprep.subr.bf16.mxu1 %v17041_v14  ;;  %v8839_v27 = vld [vmem:[#allocation3 + $0xb4] sm:$0xf] }
 0x685   : > { %v8301_v30 = vcombine.low %v7513_v28, %v7515_v51 }
 0x686   : > { %v16133_v32 = vrot.slane %v8660_v12, 7  ;;  %v8293_v20 = vcombine.low %v8285_v18, %v8292_v2  ;;  %v8268_v8 = vrot.slane %v8254_v36, %v14714_v41  ;;  %v7514_v12 = vsel %vm14701_vm7, %v15454_v62, %v7376_v58 }
 0x687   : > { %v9288_v45 = vpop.permute.xlu0 %9287  ;;  %9895 = vmatpush1.bf16.msra.mxu1 %v11820_v19  ;;  %v11823_v19 = vld [vmem:[%s16777_s7 + $0x28] sm:$0xff]  }
 0x688   : > { %v16141_v25 = vsel %vm3622_vm4, %v17139_v38, %v9288_v45  ;;  %v8665_v56 = vor.u32 %v8663_v39, %v16133_v32  ;;  %v8300_v10 = vrot.slane %v8293_v20, %v14714_v41  ;;  %v8269_v24 = vcombine.low %v8261_v1, %v8268_v8  ;;  %v7380_v34 = vpop.permute.xlu1 %7379  ;;  %9896 = vmatprep.subr.bf16.mxu1 %v17041_v14  ;;  %v8832_v38 = vld [vmem:[#allocation3 + $0xa8] sm:$0xf] }
 0x689   : > { %9685 = vmatmul.mubr.bf16.vlgmr.msra.gmra.mrb[96].mxu0 %v16141_v25  ;;  %v7516_v57 = vsel %vm14701_vm7, %v15457_v0, %v7380_v34  ;;  %v11821_v0 = vld [vmem:[%s16777_s7 + $0x20] sm:$0xff]   ;;  %v8309_v39 = vrot.slane %v8301_v30, %v14714_v41  ;;  %v17142_v30 = vld [vmem:[#allocation68_spill] sm:$0xff] }
 0x68a   : > { %11197 = vmatprep.mubr.msk.bf16.mxu0 %vm3622_vm4, %v17141_v49  ;;  %10150 = vmatpush1.bf16.msra.mxu0 %v11818_v40  ;;  %v8840_v33 = vsel %vm12772_vm6, %v8665_v56, %v8839_v27  ;;  %v8643_v31 = vshrl.u32 %v8300_v10, 16  ;;  %v8276_v18 = vrot.slane %v8269_v24, %v14714_v41  ;;  %v8302_v36 = vcombine.low %v7514_v12, %v7516_v57 }
 0x68b   : > { %v6486_v2 = vpop.permute.xlu0 %6485  ;;  %10151 = vmatprep.subr.bf16.mxu0 %v17041_v14  ;;  %8841 = vst [vmem:[#allocation3 + $0xb4] sm:$0xf] %v8840_v33  ;;  %v8646_v11 = vshll.u32 %v8300_v10, 16  ;;  %9897 = vmatpush1.bf16.msra.mxu1 %v11821_v0  ;;  %v8632_v56 = vrot.slane %v16081_v3, 4  ;;  %v6617_v57 = vsel %vm14701_vm7, %v17142_v30, %v16036_v47  ;;  %v17143_v33 = vld [vmem:[#allocation71_spill] sm:$0xff]  ;;  %v11824_v47 = vld [vmem:[%s16777_s7 + $0x30] sm:$0xff]  }
 0x68c   : > { %v8645_v1 = vrot.slane %v8643_v31, 7  ;;  %v8634_v51 = vshrl.u32 %v8276_v18, 16  ;;  %v9290_v40 = vpop.permute.xlu1 %9289  ;;  %v8316_v62 = vrot.slane %v8302_v36, %v14714_v41  ;;  %v8637_v8 = vshll.u32 %v8276_v18, 16  ;;  %9898 = vmatprep.subr.bf16.mxu1 %v17041_v14  ;;  %v11827_v30 = vld [vmem:[%s16777_s7 + $0xd0] sm:$0xff]  }
 0x68d   : > { %v16178_v28 = vsel %vm3622_vm4, %v15492_v37, %v9290_v40  ;;  %v8829_v37 = vld [vmem:[#allocation3 + $0xa4] sm:$0x1]  ;;  %v6618_v36 = vsel %vm14701_vm7, %v15471_v54, %v6486_v2 }
 0x68e   : > { %10152 = vmatpush1.bf16.msra.mxu0 %v11822_v16  ;;  %v8648_v58 = vor.u32 %v8646_v11, %v8645_v1  ;;  %v8636_v20 = vrot.slane %v8634_v51, 7  ;;  %v8317_v7 = vcombine.low %v8309_v39, %v8316_v62 }
 0x68f   : > { %v9292_v45 = vpop.permute.xlu0 %9291  ;;  %10153 = vmatprep.subr.bf16.mxu0 %v17041_v14  ;;  %9899 = vmatpush1.bf16.msra.mxu1 %v11823_v19  ;;  %v8649_v19 = vrot.slane %v8645_v1, 4 }
 0x690   : > { %v8833_v10 = vsel %vm12772_vm6, %v8648_v58, %v8832_v38  ;;  %v8639_v24 = vor.u32 %v8637_v8, %v8636_v20  ;;  %v8641_v34 = vrot.slane %v8636_v20, 4  ;;  %v6488_v27 = vpop.permute.xlu1 %6487  ;;  %v8324_v16 = vrot.slane %v8317_v7, %v14714_v41  ;;  %9900 = vmatprep.subr.bf16.mxu1 %v17041_v14 }
 0x691   : > { %9693 = vmatmul.mubr.bf16.gmra.mrb[100].mxu0 %v16178_v28  ;;  %8834 = vst [vmem:[#allocation3 + $0xa8] sm:$0xf] %v8833_v10  ;;  %v6619_v3 = vsel %vm14701_vm7, %v15485_v52, %v6488_v27  ;;  %v16214_v54 = vsel %vm3622_vm4, %v15495_v55, %v9292_v45  ;;  %v17144_v45 = vld [vmem:[#allocation20_spill] sm:$0xff]  ;;  %v11826_v27 = vld [vmem:[%s16777_s7 + $0x38] sm:$0xff]  }
 0x692   : > { %11198 = vmatprep.mubr.msk.bf16.mxu0 %vm3622_vm4, %v17143_v33  ;;  %v8640_v31 = vsel %vm12015_vm12, %v8632_v56, %v8639_v24  ;;  %v8830_v18 = vsel %vm12594_vm3, %v8641_v34, %v8829_v37  ;;  %v8349_v12 = vcombine.low %v6617_v57, %v6619_v3  ;;  %v8651_v52 = vshrl.u32 %v8324_v16, 16  ;;  %v8879_v34 = vld [vmem:[#allocation3 + $0x9c] sm:$0xf]  ;;  %10154 = vmatpush1.bf16.msra.mxu0 %v11827_v30  ;;  %v16264_v30 = vld [vmem:[#allocation3 + $0x4] sm:$0xf] }
 0x693   : > { %v6490_v0 = vpop.permute.xlu0 %6489  ;;  %8828 = vst.msk [vmem:[#allocation3 + $0xa0] sm:$0xf] %vm2407_vm5, %v8640_v31  ;;  %8831 = vst [vmem:[#allocation3 + $0xa4] sm:$0x1] %v8830_v18  ;;  %v8654_v62 = vshll.u32 %v8324_v16, 16  ;;  %9901 = vmatpush1.bf16.msra.mxu1 %v11824_v47  ;;  %10155 = vmatprep.subr.bf16.mxu0 %v17041_v14 }
 0x694   : > { %v6620_v11 = vsel %vm14701_vm7, %v15539_v44, %v6490_v0  ;;  %v7384_v40 = vpop.permute.xlu1 %7383  ;;  %v8653_v39 = vrot.slane %v8651_v52, 7  ;;  %v8357_v58 = vrot.slane %v8349_v12, %v14714_v41  ;;  %9902 = vmatprep.subr.bf16.mxu1 %v17041_v14  ;;  %v8836_v44 = vld [vmem:[#allocation3 + $0xb0] sm:$0x1]  ;;  %v8920_v3 = vld [vmem:[#allocation3 + $0x9c] sm:$0xe] }
 0x695   : > { %v8350_v51 = vcombine.low %v6618_v36, %v6620_v11  ;;  %v7518_v1 = vsel %vm14701_vm7, %v15524_v35, %v7384_v40 }
 0x696   : > { %v8656_v38 = vor.u32 %v8654_v62, %v8653_v39  ;;  %v8658_v7 = vrot.slane %v8653_v39, 4 }
 0x697   : > { %v8364_v20 = vrot.slane %v8350_v51, %v14714_v41  ;;  %v7382_v8 = vpop.permute.xlu0 %7381  ;;  %9903 = vmatpush1.bf16.msra.mxu1 %v11826_v27 }
 0x698   : > { %v7388_v56 = vpop.permute.xlu1 %7387  ;;  %v8657_v10 = vsel %vm12015_vm12, %v8649_v19, %v8656_v38  ;;  %v8837_v24 = vsel %vm12594_vm3, %v8658_v7, %v8836_v44  ;;  %9904 = vmatprep.subr.bf16.mxu1 %v17041_v14  ;;  %v11829_v19 = vld [vmem:[%s16777_s7 + $0xd8] sm:$0xff]   ;;  %v8666_v38 = vrot.slane %v16133_v32, 4  ;;  %v8843_v7 = vld [vmem:[#allocation3 + $0xbc] sm:$0x1]  ;;  %v8881_v27 = vld [vmem:[#allocation3 + $0xa8] sm:$0xf] }
 0x699   : > { %v8365_v2 = vcombine.low %v8357_v58, %v8364_v20  ;;  %9701 = vmatmul.mubr.bf16.gmra.mrb[104].mxu0 %v16214_v54  ;;  %v7520_v55 = vsel %vm14701_vm7, %v15691_v6, %v7388_v56  ;;  %8835 = vst.msk [vmem:[#allocation3 + $0xac] sm:$0xf] %vm2407_vm5, %v8657_v10  ;;  %8838 = vst [vmem:[#allocation3 + $0xb0] sm:$0x1] %v8837_v24  ;;  %v7517_v6 = vsel %vm14701_vm7, %v15542_v21, %v7382_v8  ;;  %v11828_v8 = vld [vmem:[%s16777_s7 + $0x40] sm:$0xff]  }
 0x69a   : > { %11199 = vmatprep.mubr.msk.bf16.mxu0 %vm3622_vm4, %v17144_v45  ;;  %v8374_v57 = vcombine.low %v7518_v1, %v7520_v55  ;;  %v8880_v16 = vld [vmem:[#allocation3 + $0xa0] sm:$0xf]  ;;  %v11807_v12 = vld [vmem:[#allocation3 + $0xa4] ss:$0 sps:$4 sm:$0x11]   ;;  %10156 = vmatpush1.bf16.msra.mxu0 %v11829_v19 }
 0x69b   : > { %v8372_v35 = vrot.slane %v8365_v2, %v14714_v41  ;;  %v7386_v37 = vpop.permute.xlu0 %7385  ;;  %v16244_v18 = vcombine.low %v8879_v34, %v8880_v16  ;;  %v11155_v0 = vcombine.low %v8920_v3, %v8880_v16  ;;  %v9233_v40 = vshll.u32 %v11807_v12, 16  ;;  %v8853_v10 = vld [vmem:[#allocation3] sm:$0xf]  ;;  %9905 = vmatpush1.bf16.msra.mxu1 %v11828_v8  ;;  %10157 = vmatprep.subr.bf16.mxu0 %v17041_v14 }
 0x69c   : > { %v7519_v31 = vsel %vm14701_vm7, %v15642_v9, %v7386_v37  ;;  %v9294_v36 = vpop.permute.xlu1 %9293  ;;  %v8388_v11 = vrot.slane %v8374_v57, %v14714_v41  ;;  %v9415_v20 = vrot.slane %v11807_v12, 1  ;;  %v11831_v57 = vld [vmem:[%s16777_s7 + $0x48] sm:$0xff]   ;;  %9906 = vmatprep.subr.bf16.mxu1 %v17041_v14 }
 0x69d   : > { %v8668_v47 = vshrl.u32 %v8372_v35, 16  ;;  %v8373_v52 = vcombine.low %v7517_v6, %v7519_v31  ;;  %v8671_v21 = vshll.u32 %v8372_v35, 16  ;;  %v9228_v51 = vshll.u32 %v16244_v18, 16 }
 0x69e   : > { %v9414_v58 = vrot.slane %v11155_v0, 1  ;;  %v16260_v44 = vsel %vm3622_vm4, %v15611_v13, %v9294_v36  ;;  %v9226_v2 = vshrl.u32 %v16244_v18, 16  ;;  %v9235_v35 = vrot.slane %v9233_v40, 1 }
 0x69f   : > { %v8670_v9 = vrot.slane %v8668_v47, 7  ;;  %v8381_v39 = vrot.slane %v8373_v52, %v14714_v41  ;;  %v7390_v62 = vpop.permute.xlu0 %7389  ;;  %v9230_v56 = vrot.slane %v9228_v51, 1  ;;  %v8921_v47 = vld [vmem:[#allocation3 + $0xa8] sm:$0xe]  ;;  %9907 = vmatpush1.bf16.msra.mxu1 %v11831_v57 }
 0x6a0   : > { %v7392_v34 = vpop.permute.xlu1 %7391  ;;  %v16267_v32 = vsel %vm1586_vm9, %v9414_v58, %v9415_v20  ;;  %v8882_v6 = vld [vmem:[#allocation3 + $0xac] sm:$0xf]  ;;  %v11809_v0 = vld [vmem:[#allocation3 + $0xb0] ss:$0 sps:$4 sm:$0x11]   ;;  %v7521_v36 = vsel %vm14701_vm7, %v15732_v29, %v7390_v62  ;;  %v16299_v29 = vcombine.low %v8853_v10, %v16264_v30  ;;  %v17145_v62 = vld [vmem:[#allocation21_spill] sm:$0xff]  ;;  %9908 = vmatprep.subr.bf16.mxu1 %v17041_v14 }
 0x6a1   : > { %v8673_v24 = vor.u32 %v8671_v21, %v8670_v9  ;;  %v8675_v1 = vrot.slane %v8670_v9, 4  ;;  %v8389_v55 = vcombine.low %v8381_v39, %v8388_v11  ;;  %9709 = vmatmul.mubr.bf16.gmra.mrb[108].mxu0 %v16260_v44  ;;  %v9231_v13 = vor.u32 %v9230_v56, %v9226_v2  ;;  %v11832_v52 = vld [vmem:[%s16777_s7 + $0xe0] sm:$0xff]  }
 0x6a2   : > { %11200 = vmatprep.mubr.msk.bf16.mxu0 %vm3622_vm4, %v15762_v26  ;;  %v16279_v12 = vcombine.low %v8881_v27, %v8882_v6  ;;  %v11156_v51 = vcombine.low %v8921_v47, %v8882_v6  ;;  %v7522_v9 = vsel %vm14701_vm7, %v15736_v42, %v7392_v34  ;;  %v9245_v19 = vshll.u32 %v11809_v0, 16  ;;  %10158 = vmatpush1.bf16.msra.mxu0 %v11832_v52  ;;  %v11813_v57 = vld [vmem:[#allocation3 + $0x8] ss:$0 sps:$4 sm:$0x11]   ;;  %v11836_v47 = vld [vmem:[%s16777_s7 + $0x58] sm:$0xff]  }
 0x6a3   : > { %v8674_v37 = vsel %vm12015_vm12, %v8666_v38, %v8673_v24  ;;  %v8844_v16 = vsel %vm12594_vm3, %v8675_v1, %v8843_v7  ;;  %v8396_v3 = vrot.slane %v8389_v55, %v14714_v41  ;;  %v7394_v31 = vpop.permute.xlu0 %7393  ;;  %v9236_v11 = vsel %vm1279_vm11, %v9231_v13, %v9235_v35  ;;  %10159 = vmatprep.subr.bf16.mxu0 %v17041_v14  ;;  %v17146_v1 = vld [vmem:[#allocation32_spill] sm:$0xff]  ;;  %v8846_v13 = vld [vmem:[#allocation3 + $0xc0] sm:$0xf] }
 0x6a4   : > { %8842 = vst.msk [vmem:[#allocation3 + $0xb8] sm:$0xf] %vm2407_vm5, %v8674_v37  ;;  %8845 = vst [vmem:[#allocation3 + $0xbc] sm:$0x1] %v8844_v16  ;;  %v7523_v21 = vsel %vm14701_vm7, %v15748_v23, %v7394_v31  ;;  %9311 = vrot.lane.b32.xlu0 %v9236_v11, %s11860_s30  ;;  %v7396_v58 = vpop.permute.xlu1 %7395  ;;  %v11833_v23 = vld [vmem:[%s16777_s7 + $0x50] sm:$0xff]   ;;  %v9240_v8 = vshll.u32 %v16279_v12, 16 }
 0x6a5   : > { %v8677_v40 = vshrl.u32 %v8396_v3, 16  ;;  %v8397_v39 = vcombine.low %v7521_v36, %v7523_v21  ;;  %v7524_v20 = vsel %vm14701_vm7, %v17145_v62, %v7396_v58  ;;  %v9417_v42 = vrot.slane %v11156_v51, 1  ;;  %9909 = vmatpush1.bf16.msra.mxu1 %v11833_v23  ;;  %v8883_v31 = vld [vmem:[#allocation3 + $0xb4] sm:$0xf]  ;;  %v8907_v58 = vld [vmem:[#allocation3] sm:$0xe] }
 0x6a6   : > { %v8680_v7 = vshll.u32 %v8396_v3, 16  ;;  %v8398_v2 = vcombine.low %v7522_v9, %v7524_v20  ;;  %v9418_v10 = vrot.slane %v11809_v0, 1  ;;  %v9238_v34 = vshrl.u32 %v16279_v12, 16  ;;  %10160 = vmatpush1.bf16.msra.mxu0 %v11834_v4  ;;  %v8922_v11 = vld [vmem:[#allocation3 + $0xb4] sm:$0xe]  ;;  %9910 = vmatprep.subr.bf16.mxu1 %v17041_v14 }
 0x6a7   : > { %v16309_v38 = vrot.slane %v8677_v40, 7  ;;  %v9296_v56 = vpop.permute.xlu0 %9295  ;;  %v8405_v24 = vrot.slane %v8397_v39, %v14714_v41  ;;  %v9242_v27 = vrot.slane %v9240_v8, 1  ;;  %v9247_v3 = vrot.slane %v9245_v19, 1  ;;  %10161 = vmatprep.subr.bf16.mxu0 %v17041_v14 }
 0x6a8   : > { %v16318_v55 = vsel %vm3622_vm4, %v17146_v1, %v9296_v56  ;;  %v8412_v6 = vrot.slane %v8398_v2, %v14714_v41  ;;  %v16325_v37 = vsel %vm1586_vm9, %v9417_v42, %v9418_v10  ;;  %v9072_v0 = vshll.u32 %v16299_v29, 16  ;;  %v11839_v10 = vld [vmem:[%s16777_s7 + $0xf8] sm:$0xff]   ;;  %v17147_v1 = vld [vmem:[#allocation22_spill] sm:$0xff] }
 0x6a9   : > { %v8682_v35 = vor.u32 %v8680_v7, %v16309_v38  ;;  %9717 = vmatmul.mubr.bf16.gmra.mrb[112].mxu0 %v16318_v55  ;;  %v9243_v16 = vor.u32 %v9242_v27, %v9238_v34  ;;  %v9070_v20 = vshrl.u32 %v16299_v29, 16  ;;  %v9077_v8 = vshll.u32 %v11813_v57, 16  ;;  %9911 = vmatpush1.bf16.msra.mxu1 %v11836_v47 }
 0x6aa   : > { %11201 = vmatprep.mubr.msk.bf16.mxu0 %vm3622_vm4, %v15808_v59  ;;  %v8413_v36 = vcombine.low %v8405_v24, %v8412_v6  ;;  %v11142_v19 = vcombine.low %v8907_v58, %v16264_v30  ;;  %v9074_v2 = vrot.slane %v9072_v0, 1  ;;  %v9376_v56 = vrot.slane %v11813_v57, 1  ;;  %10162 = vmatpush1.bf16.msra.mxu0 %v11838_v15 }
 0x6ab   : > { %v8847_v52 = vsel %vm12772_vm6, %v8682_v35, %v8846_v13  ;;  %v8884_v21 = vld [vmem:[#allocation3 + $0xb8] sm:$0xf]  ;;  %v9248_v51 = vsel %vm1279_vm11, %v9243_v16, %v9247_v3  ;;  %v11811_v9 = vld [vmem:[#allocation3 + $0xbc] ss:$0 sps:$4 sm:$0x11]   ;;  %10163 = vmatprep.subr.bf16.mxu0 %v17041_v14  ;;  %v9079_v57 = vrot.slane %v9077_v8, 1  ;;  %v9300_v15 = vpop.permute.xlu0 %9299 }
 0x6ac   : > { %8848 = vst [vmem:[#allocation3 + $0xc0] sm:$0xf] %v8847_v52  ;;  %v16338_v40 = vcombine.low %v8883_v31, %v8884_v21  ;;  %v11157_v39 = vcombine.low %v8922_v11, %v8884_v21  ;;  %v8420_v23 = vrot.slane %v8413_v36, %v14714_v41  ;;  %9313 = vrot.lane.b32.xlu1 %v9248_v51, %s11860_s30  ;;  %v9257_v7 = vshll.u32 %v11811_v9, 16  ;;  %v11840_v52 = vld [vmem:[%s16777_s7 + $0x100] sm:$0xff]  }
 0x6ad   : > { %v9298_v62 = vpop.permute.xlu1 %9297  ;;  %v9421_v24 = vrot.slane %v11811_v9, 1  ;;  %v9375_v13 = vrot.slane %v11142_v19, 1  ;;  %v9075_v0 = vor.u32 %v9074_v2, %v9070_v20  ;;  %v8683_v36 = vrot.slane %v16309_v38, 4  ;;  %v8850_v51 = vld [vmem:[#allocation3 + $0xc8] sm:$0x1] }
 0x6ae   : > { %v9252_v42 = vshll.u32 %v16338_v40, 16  ;;  %v8685_v41 = vshrl.u32 %v8420_v23, 16  ;;  %v9420_v4 = vrot.slane %v11157_v39, 1  ;;  %v16354_v34 = vsel %vm3622_vm4, %v17147_v1, %v9298_v62  ;;  %10164 = vmatpush1.bf16.msra.mxu0 %v11839_v10  ;;  %v11843_v10 = vld [vmem:[%s16777_s7 + $0x118] sm:$0xff]  }
 0x6af   : > { %v9250_v30 = vshrl.u32 %v16338_v40, 16  ;;  %v8688_v6 = vshll.u32 %v8420_v23, 16  ;;  %v9259_v31 = vrot.slane %v9257_v7, 1  ;;  %v9377_v47 = vsel %vm1586_vm9, %v9375_v13, %v9376_v56  ;;  %10165 = vmatprep.subr.bf16.mxu0 %v17041_v14  ;;  %v11841_v23 = vld [vmem:[%s16777_s7 + $0x108] sm:$0xff]  }
 0x6b0   : > { %v9254_v27 = vrot.slane %v9252_v42, 1  ;;  %v8687_v35 = vrot.slane %v8685_v41, 7  ;;  %v16359_v16 = vsel %vm1586_vm9, %v9420_v4, %v9421_v24  ;;  %11224 = vmatprep.mubr.msk.bf16.mxu1 %vm3622_vm4, %v9377_v47  ;;  %v9080_v38 = vsel %vm1279_vm11, %v9075_v0, %v9079_v57  ;;  %v8887_v57 = vld [vmem:[#allocation3 + $0xcc] sm:$0xf] }
 0x6b1   : > { %9725 = vmatmul.mubr.bf16.gmra.mrb[116].mxu0 %v16354_v34  ;;  %v16384_v62 = vsel %vm3622_vm4, %v17148_v63, %v9300_v15  ;;  %v16419_v0 = vld [vmem:[#allocation3 + $0xd4] ss:$0 sps:$4 sm:$0x11]  }
 0x6b2   : > { %11202 = vmatprep.mubr.msk.bf16.mxu0 %vm3622_vm4, %v15827_v60  ;;  %v9255_v3 = vor.u32 %v9254_v27, %v9250_v30  ;;  %v8690_v21 = vor.u32 %v8688_v6, %v8687_v35  ;;  %v8692_v11 = vrot.slane %v8687_v35, 4  ;;  %10166 = vmatpush1.bf16.msra.mxu0 %v11840_v52  ;;  %v9302_v8 = vpop.permute.xlu1 %9301 }
 0x6b3   : > { %10167 = vmatprep.subr.bf16.mxu0 %v17041_v14  ;;  %v8885_v20 = vld [vmem:[#allocation3 + $0xc0] sm:$0xf]  ;;  %v16402_v41 = vsel %vm3622_vm4, %v15802_v61, %v9302_v8 }
 0x6b4   : > { %v9260_v9 = vsel %vm1279_vm11, %v9255_v3, %v9259_v31  ;;  %v8691_v39 = vsel %vm12015_vm12, %v8683_v36, %v8690_v21  ;;  %v8851_v58 = vsel %vm12594_vm3, %v8692_v11, %v8850_v51  ;;  %v8923_v42 = vld [vmem:[#allocation3 + $0xc0] sm:$0xe]  ;;  %v16413_v3 = vld [vmem:[#allocation3 + $0xd0] sm:$0xf]  ;;  %v9281_v36 = vshll.u32 %v16419_v0, 16 }
 0x6b5   : > { %9315 = vrot.lane.b32.xlu0 %v9260_v9, %s11860_s30  ;;  %8849 = vst.msk [vmem:[#allocation3 + $0xc4] sm:$0xf] %vm2407_vm5, %v8691_v39  ;;  %8852 = vst [vmem:[#allocation3 + $0xc8] sm:$0x1] %v8851_v58  ;;  %v16417_v31 = vcombine.low %v8887_v57, %v16413_v3 }
 0x6b6   : > { %10168 = vmatpush1.bf16.msra.mxu0 %v11841_v23  ;;  %v9283_v11 = vrot.slane %v9281_v36, 1 }
 0x6b7   : > { %10169 = vmatprep.subr.bf16.mxu0 %v17041_v14  ;;  %v9274_v47 = vshrl.u32 %v16417_v31, 16  ;;  %v9276_v52 = vshll.u32 %v16417_v31, 16 }
 0x6b9   : > { %9285 = vrot.lane.b32.xlu0 %v9080_v38, %s11860_s30  ;;  %9733 = vmatmul.mubr.bf16.gmra.mrb[120].mxu0 %v16384_v62  ;;  %v9278_v21 = vrot.slane %v9276_v52, 1  ;;  %v17149_v38 = vld [vmem:[#allocation25_spill] sm:$0xff] }
 0x6ba   : > { %11203 = vmatprep.mubr.msk.bf16.mxu0 %vm3622_vm4, %v15858_v5  ;;  %10170 = vmatpush1.bf16.msra.mxu0 %v11842_v22  ;;  %v17150_v22 = vld [vmem:[#allocation36_spill] sm:$0xff] }
 0x6bb   : > { %10171 = vmatprep.subr.bf16.mxu0 %v17041_v14  ;;  %v9279_v51 = vor.u32 %v9278_v21, %v9274_v47 }
 0x6bc   : > { %v8886_v19 = vld [vmem:[#allocation3 + $0xc4] sm:$0xf]  ;;  %v11815_v2 = vld [vmem:[#allocation3 + $0xc8] ss:$0 sps:$4 sm:$0x11]  }
 0x6bd   : > { %v16394_v7 = vcombine.low %v8885_v20, %v8886_v19  ;;  %v11158_v56 = vcombine.low %v8923_v42, %v8886_v19  ;;  %v9269_v24 = vshll.u32 %v11815_v2, 16  ;;  %v9424_v30 = vrot.slane %v11815_v2, 1 }
 0x6be   : > { %10172 = vmatpush1.bf16.msra.mxu0 %v11843_v10  ;;  %v9284_v9 = vsel %vm1279_vm11, %v9279_v51, %v9283_v11  ;;  %v9427_v11 = vrot.slane %v16419_v0, 1 }
 0x6bf   : > { %v9264_v4 = vshll.u32 %v16394_v7, 16  ;;  %v9423_v1 = vrot.slane %v11158_v56, 1  ;;  %v9262_v27 = vshrl.u32 %v16394_v7, 16  ;;  %v9271_v61 = vrot.slane %v9269_v24, 1 }
 0x6c1   : > { %9741 = vmatmul.mubr.bf16.gmra.mrb[124].mxu0 %v16402_v41  ;;  %v9266_v13 = vrot.slane %v9264_v4, 1  ;;  %v16410_v14 = vsel %vm1586_vm9, %v9423_v1, %v9424_v30  ;;  %v17151_v4 = vld [vmem:[#allocation66_spill] sm:$0xff] }
 0x6c2   : > { %11204 = vmatprep.mubr.msk.bf16.mxu0 %vm3622_vm4, %v16023_v17 }
 0x6c3   : > { %v9267_v35 = vor.u32 %v9266_v13, %v9262_v27 }
 0x6c5   : > { %v9272_v6 = vsel %vm1279_vm11, %v9267_v35, %v9271_v61 }
 0x6c6   : > { %9317 = vrot.lane.b32.xlu1 %v9272_v6, %s11860_s30 }
 0x6ca   : > { %9319 = vrot.lane.b32.xlu1 %v9284_v9, %s11860_s30 }
 0x6e3   : > { %v9304_v39 = vpop.permute.xlu0 %9303 }
 0x6e4   : > { %v16428_v58 = vsel %vm3622_vm4, %v15994_v53, %v9304_v39 }
 0x6e5   : > { %9749 = vmatmul.mubr.bf16.gmra.mrb[128].mxu0 %v16428_v58 }
 0x6e6   : > { %11205 = vmatprep.mubr.msk.bf16.mxu0 %vm3622_vm4, %v16060_v50 }
 0x6e7   : > { %v9308_v63 = vpop.permute.xlu0 %9307 }
 0x6e8   : > { %v16442_v53 = vsel %vm3622_vm4, %v17150_v22, %v9308_v63 }
 0x6eb   : > { %v9306_v15 = vpop.permute.xlu1 %9305 }
 0x6ec   : > { %v16435_v23 = vsel %vm3622_vm4, %v17149_v38, %v9306_v15 }
 0x6ed   : > { %9757 = vmatmul.mubr.bf16.gmra.mrb[132].mxu0 %v16435_v23 }
 0x6ee   : > { %11206 = vmatprep.mubr.msk.bf16.mxu0 %vm3622_vm4, %v16063_v43 }
 0x6f0   : > { %v9310_v20 = vpop.permute.xlu1 %9309 }
 0x6f1   : > { %v16449_v8 = vsel %vm3622_vm4, %v16047_v46, %v9310_v20 }
 0x6f5   : > { %9765 = vmatmul.mubr.bf16.gmra.mrb[136].mxu0 %v16442_v53 }
 0x6f6   : > { %11207 = vmatprep.mubr.msk.bf16.mxu0 %vm3622_vm4, %v16094_v48 }
 0x6fd   : > { %9773 = vmatmul.mubr.bf16.gmra.mrb[140].mxu0 %v16449_v8 }
 0x6fe   : > { %11208 = vmatprep.mubr.msk.bf16.mxu0 %vm3622_vm4, %v16267_v32 }
 0x716   : > { %v9312_v19 = vpop.permute.xlu0 %9311 }
 0x717   : > { %v16456_v42 = vsel %vm3622_vm4, %v16244_v18, %v9312_v19 }
 0x718   : > { %9781 = vmatmul.mubr.bf16.gmra.mrb[144].mxu0 %v16456_v42 }
 0x719   : > { %11209 = vmatprep.mubr.msk.bf16.mxu0 %vm3622_vm4, %v16325_v37 }
 0x71e   : > { %v9314_v2 = vpop.permute.xlu1 %9313 }
 0x71f   : > { %v16463_v46 = vsel %vm3622_vm4, %v16279_v12, %v9314_v2 }
 0x720   : > { %9789 = vmatmul.mubr.bf16.gmra.mrb[148].mxu0 %v16463_v46 }
 0x721   : > { %11210 = vmatprep.mubr.msk.bf16.mxu0 %vm3622_vm4, %v16359_v16 }
 0x727   : > { %v9316_v56 = vpop.permute.xlu0 %9315 }
 0x728   : > { %v16470_v18 = vsel %vm3622_vm4, %v16338_v40, %v9316_v56 }
 0x729   : > { %9797 = vmatmul.mubr.bf16.gmra.mrb[152].mxu0 %v16470_v18 }
 0x72a   : > { %11211 = vmatprep.mubr.msk.bf16.mxu0 %vm3622_vm4, %v16410_v14 }
 0x72b   : > { %v9286_v10 = vpop.permute.xlu0 %9285 }
 0x72c   : > { %v9430_v12 = vsel %vm3622_vm4, %v16299_v29, %v9286_v10 }
 0x72d   : > { %9921 = vmatmul.mubr.bf16.vlgmr.msra.gmra.mrb[176].mxu1 %v9430_v12 }
 0x72e   : > { %11225 = vmatprep.mubr.msk.bf16.mxu1 %vm3622_vm4, %v17151_v4 }
 0x735   : > { %9929 = vmatmul.mubr.bf16.gmra.mrb[180].mxu1 %v16141_v25 }
 0x736   : > { %11226 = vmatprep.mubr.msk.bf16.mxu1 %vm3622_vm4, %v17141_v49 }
 0x738   : > { %v9318_v40 = vpop.permute.xlu1 %9317 }
 0x739   : > { %v16484_v24 = vsel %vm3622_vm4, %v16394_v7, %v9318_v40 }
 0x73a   : > { %9805 = vmatmul.mubr.bf16.gmra.mrb[156].mxu0 %v16484_v24 }
 0x73b   : > { %11276 = vmatprep.mubr.msk.bf16.mxu0 %vm3622_vm4, %v17141_v49 }
 0x73d   : > { %9937 = vmatmul.mubr.bf16.gmra.mrb[184].mxu1 %v16178_v28 }
 0x73e   : > { %11227 = vmatprep.mubr.msk.bf16.mxu1 %vm3622_vm4, %v17143_v33 }
 0x742   : > { %10182 = vmatmul.mubr.bf16.vlgmr.msra.gmra.mrb[160].mxu0 %v16178_v28 }
 0x743   : > { %11277 = vmatprep.mubr.msk.bf16.mxu0 %vm3622_vm4, %v17143_v33 }
 0x745   : > { %9945 = vmatmul.mubr.bf16.gmra.mrb[188].mxu1 %v16214_v54 }
 0x746   : > { %11228 = vmatprep.mubr.msk.bf16.mxu1 %vm3622_vm4, %v17144_v45 }
 0x74a   : > { %10190 = vmatmul.mubr.bf16.gmra.mrb[164].mxu0 %v16214_v54 }
 0x74b   : > { %11278 = vmatprep.mubr.msk.bf16.mxu0 %vm3622_vm4, %v17144_v45 }
 0x74d   : > { %9953 = vmatmul.mubr.bf16.gmra.mrb[192].mxu1 %v16260_v44 }
 0x74e   : > { %11229 = vmatprep.mubr.msk.bf16.mxu1 %vm3622_vm4, %v15762_v26 }
 0x752   : > { %10198 = vmatmul.mubr.bf16.gmra.mrb[168].mxu0 %v16260_v44 }
 0x753   : > { %11279 = vmatprep.mubr.msk.bf16.mxu0 %vm3622_vm4, %v15762_v26 }
 0x755   : > { %9961 = vmatmul.mubr.bf16.gmra.mrb[196].mxu1 %v16318_v55 }
 0x756   : > { %11230 = vmatprep.mubr.msk.bf16.mxu1 %vm3622_vm4, %v15808_v59 }
 0x75a   : > { %10206 = vmatmul.mubr.bf16.gmra.mrb[172].mxu0 %v16318_v55 }
 0x75b   : > { %11280 = vmatprep.mubr.msk.bf16.mxu0 %vm3622_vm4, %v15808_v59 }
 0x75c   : > { %v16511_v25 = vpop.f32.mrb[96].mxu0 }
 0x75d   : > { %v9688_v49 = vpop.f32.mrb[97].mxu0  ;;  %9969 = vmatmul.mubr.bf16.gmra.mrb[200].mxu1 %v16354_v34 }
 0x75e   : > { %v16516_v28 = vpop.f32.mrb[98].mxu0  ;;  %11231 = vmatprep.mubr.msk.bf16.mxu1 %vm3622_vm4, %v15827_v60 }
 0x75f   : > { %v9691_v26 = vpop.f32.mrb[99].mxu0 }
 0x762   : > { %10214 = vmatmul.mubr.bf16.gmra.mrb[176].mxu0 %v16354_v34 }
 0x763   : > { %11281 = vmatprep.mubr.msk.bf16.mxu0 %vm3622_vm4, %v15827_v60 }
 0x764   : > { %v16521_v33 = vpop.f32.mrb[100].mxu0 }
 0x765   : > { %v9696_v54 = vpop.f32.mrb[101].mxu0  ;;  %9977 = vmatmul.mubr.bf16.gmra.mrb[204].mxu1 %v16384_v62 }
 0x766   : > { %v16526_v59 = vpop.f32.mrb[102].mxu0  ;;  %11232 = vmatprep.mubr.msk.bf16.mxu1 %vm3622_vm4, %v15858_v5 }
 0x767   : > { %v9699_v45 = vpop.f32.mrb[103].mxu0 }
 0x76a   : > { %10222 = vmatmul.mubr.bf16.gmra.mrb[180].mxu0 %v16384_v62 }
 0x76b   : > { %11282 = vmatprep.mubr.msk.bf16.mxu0 %vm3622_vm4, %v15858_v5 }
 0x76c   : > { %v16531_v44 = vpop.f32.mrb[104].mxu0 }
 0x76d   : > { %v9704_v29 = vpop.f32.mrb[105].mxu0  ;;  %9985 = vmatmul.mubr.bf16.gmra.mrb[208].mxu1 %v16402_v41 }
 0x76e   : > { %v16536_v60 = vpop.f32.mrb[106].mxu0  ;;  %11233 = vmatprep.mubr.msk.bf16.mxu1 %vm3622_vm4, %v16023_v17 }
 0x76f   : > { %v9707_v55 = vpop.f32.mrb[107].mxu0 }
 0x772   : > { %10230 = vmatmul.mubr.bf16.gmra.mrb[184].mxu0 %v16402_v41 }
 0x773   : > { %11283 = vmatprep.mubr.msk.bf16.mxu0 %vm3622_vm4, %v16023_v17 }
 0x774   : > { %v16541_v34 = vpop.f32.mrb[108].mxu0 }
 0x775   : > { %v9712_v62 = vpop.f32.mrb[109].mxu0  ;;  %9993 = vmatmul.mubr.bf16.gmra.mrb[212].mxu1 %v16428_v58 }
 0x776   : > { %v16546_v5 = vpop.f32.mrb[110].mxu0  ;;  %11234 = vmatprep.mubr.msk.bf16.mxu1 %vm3622_vm4, %v16060_v50 }
 0x777   : > { %v9715_v7 = vpop.f32.mrb[111].mxu0 }
 0x77a   : > { %10238 = vmatmul.mubr.bf16.gmra.mrb[188].mxu0 %v16428_v58 }
 0x77b   : > { %11284 = vmatprep.mubr.msk.bf16.mxu0 %vm3622_vm4, %v16060_v50 }
 0x77c   : > { %v16551_v1 = vpop.f32.mrb[112].mxu0 }
 0x77d   : > { %v9720_v41 = vpop.f32.mrb[113].mxu0  ;;  %10001 = vmatmul.mubr.bf16.gmra.mrb[216].mxu1 %v16435_v23 }
 0x77e   : > { %v16556_v17 = vpop.f32.mrb[114].mxu0  ;;  %11235 = vmatprep.mubr.msk.bf16.mxu1 %vm3622_vm4, %v16063_v43 }
 0x77f   : > { %v9723_v30 = vpop.f32.mrb[115].mxu0 }
 0x782   : > { %10246 = vmatmul.mubr.bf16.gmra.mrb[192].mxu0 %v16435_v23 }
 0x783   : > { %11285 = vmatprep.mubr.msk.bf16.mxu0 %vm3622_vm4, %v16063_v43 }
 0x784   : > { %v16561_v27 = vpop.f32.mrb[116].mxu0 }
 0x785   : > { %v9728_v13 = vpop.f32.mrb[117].mxu0  ;;  %10009 = vmatmul.mubr.bf16.gmra.mrb[220].mxu1 %v16442_v53 }
 0x786   : > { %v16566_v50 = vpop.f32.mrb[118].mxu0  ;;  %11236 = vmatprep.mubr.msk.bf16.mxu1 %vm3622_vm4, %v16094_v48 }
 0x787   : > { %v9731_v35 = vpop.f32.mrb[119].mxu0 }
 0x78a   : > { %10254 = vmatmul.mubr.bf16.gmra.mrb[196].mxu0 %v16442_v53 }
 0x78b   : > { %11286 = vmatprep.mubr.msk.bf16.mxu0 %vm3622_vm4, %v16094_v48 }
 0x78c   : > { %v16571_v61 = vpop.f32.mrb[120].mxu0 }
 0x78d   : > { %v9736_v6 = vpop.f32.mrb[121].mxu0  ;;  %10017 = vmatmul.mubr.bf16.gmra.mrb[224].mxu1 %v16449_v8 }
 0x78e   : > { %v16576_v43 = vpop.f32.mrb[122].mxu0  ;;  %11237 = vmatprep.mubr.msk.bf16.mxu1 %vm3622_vm4, %v16267_v32 }
 0x78f   : > { %v9739_v57 = vpop.f32.mrb[123].mxu0 }
 0x792   : > { %10262 = vmatmul.mubr.bf16.gmra.mrb[200].mxu0 %v16449_v8 }
 0x793   : > { %11287 = vmatprep.mubr.msk.bf16.mxu0 %vm3622_vm4, %v16267_v32  ;;  %v8924_v32 = vld [vmem:[#allocation3 + $0xcc] sm:$0xe] }
 0x794   : > { %v16581_v47 = vpop.f32.mrb[124].mxu0  ;;  %v11159_v21 = vcombine.low %v8924_v32, %v16413_v3 }
 0x795   : > { %v9744_v52 = vpop.f32.mrb[125].mxu0  ;;  %10025 = vmatmul.mubr.bf16.gmra.mrb[228].mxu1 %v16456_v42 }
 0x796   : > { %v16586_v48 = vpop.f32.mrb[126].mxu0  ;;  %11238 = vmatprep.mubr.msk.bf16.mxu1 %vm3622_vm4, %v16325_v37 }
 0x797   : > { %v9747_v36 = vpop.f32.mrb[127].mxu0 }
 0x79a   : > { %10270 = vmatmul.mubr.bf16.gmra.mrb[204].mxu0 %v16456_v42 }
 0x79b   : > { %11288 = vmatprep.mubr.msk.bf16.mxu0 %vm3622_vm4, %v16325_v37  ;;  %v9426_v37 = vrot.slane %v11159_v21, 1 }
 0x79d   : > { %10033 = vmatmul.mubr.bf16.gmra.mrb[232].mxu1 %v16463_v46  ;;  %v9428_v51 = vsel %vm1586_vm9, %v9426_v37, %v9427_v11 }
 0x79e   : > { %11239 = vmatprep.mubr.msk.bf16.mxu1 %vm3622_vm4, %v16359_v16 }
 0x7a2   : > { %10278 = vmatmul.mubr.bf16.gmra.mrb[208].mxu0 %v16463_v46 }
 0x7a3   : > { %11289 = vmatprep.mubr.msk.bf16.mxu0 %vm3622_vm4, %v16359_v16  ;;  %v9320_v16 = vpop.permute.xlu1 %9319 }
 0x7a4   : > { %v9481_v9 = vsel %vm3622_vm4, %v16417_v31, %v9320_v16 }
 0x7a5   : > { %10041 = vmatmul.mubr.bf16.gmra.mrb[236].mxu1 %v16470_v18 }
 0x7aa   : > { %10286 = vmatmul.mubr.bf16.gmra.mrb[212].mxu0 %v16470_v18 }
 0x7ab   : > { %11290 = vmatprep.mubr.msk.bf16.mxu0 %vm3622_vm4, %v16410_v14 }
 0x7b2   : > { %10294 = vmatmul.mubr.bf16.gmra.mrb[216].mxu0 %v16484_v24 }
 0x7b3   : > { %11291 = vmatprep.mubr.msk.bf16.mxu0 %vm3622_vm4, %v9428_v51 }
 0x7b8   : > { %v16610_v39 = vpop.f32.mrb[128].mxu0 }
 0x7b9   : > { %v9752_v3 = vpop.f32.mrb[129].mxu0 }
 0x7ba   : > { %10302 = vmatmul.mubr.bf16.gmra.mrb[220].mxu0 %v9481_v9  ;;  %v16612_v58 = vpop.f32.mrb[130].mxu0 }
 0x7bb   : > { %v9755_v14 = vpop.f32.mrb[131].mxu0 }
 0x7c0   : > { %v16614_v15 = vpop.f32.mrb[132].mxu0 }
 0x7c1   : > { %v9760_v0 = vpop.f32.mrb[133].mxu0 }
 0x7c2   : > { %v16616_v38 = vpop.f32.mrb[134].mxu0 }
 0x7c3   : > { %v9763_v23 = vpop.f32.mrb[135].mxu0 }
 0x7c8   : > { %v16618_v63 = vpop.f32.mrb[136].mxu0 }
 0x7c9   : > { %v9768_v22 = vpop.f32.mrb[137].mxu0 }
 0x7ca   : > { %v16620_v53 = vpop.f32.mrb[138].mxu0 }
 0x7cb   : > { %v9771_v20 = vpop.f32.mrb[139].mxu0 }
 0x7d0   : > { %v16622_v31 = vpop.f32.mrb[140].mxu0 }
 0x7d1   : > { %v9776_v8 = vpop.f32.mrb[141].mxu0 }
 0x7d2   : > { %v16624_v19 = vpop.f32.mrb[142].mxu0 }
 0x7d3   : > { %v9779_v42 = vpop.f32.mrb[143].mxu0 }
 0x7eb   : > { %v16626_v2 = vpop.f32.mrb[144].mxu0 }
 0x7ec   : > { %v9784_v46 = vpop.f32.mrb[145].mxu0 }
 0x7ed   : > { %v16628_v56 = vpop.f32.mrb[146].mxu0 }
 0x7ee   : > { %v9787_v18 = vpop.f32.mrb[147].mxu0 }
 0x7f3   : > { %v16630_v10 = vpop.f32.mrb[148].mxu0 }
 0x7f4   : > { %v9792_v12 = vpop.f32.mrb[149].mxu0 }
 0x7f5   : > { %v16632_v4 = vpop.f32.mrb[150].mxu0 }
 0x7f6   : > { %v9795_v40 = vpop.f32.mrb[151].mxu0 }
 0x7fc   : > { %v16634_v24 = vpop.f32.mrb[152].mxu0 }
 0x7fd   : > { %v9800_v49 = vpop.f32.mrb[153].mxu0 }
 0x7fe   : > { %v16636_v26 = vpop.f32.mrb[154].mxu0 }
 0x7ff   : > { %v9803_v54 = vpop.f32.mrb[155].mxu0 }
 0x800   : > { %v9922_v45 = vpop.f32.mrb[176].mxu1 }
 0x801   : > { %v9923_v29 = vadd.f32 %v9922_v45, %v16511_v25  ;;  %v9924_v55 = vpop.f32.mrb[177].mxu1 }
 0x802   : > { %v9925_v62 = vpop.f32.mrb[178].mxu1 }
 0x803   : > { %v9926_v7 = vadd.f32 %v9925_v62, %v16516_v28  ;;  %v9927_v41 = vpop.f32.mrb[179].mxu1 }
 0x808   : > { %v9930_v30 = vpop.f32.mrb[180].mxu1 }
 0x809   : > { %v9931_v13 = vadd.f32 %v9930_v30, %v16521_v33  ;;  %v9932_v35 = vpop.f32.mrb[181].mxu1 }
 0x80a   : > { %v9933_v6 = vpop.f32.mrb[182].mxu1 }
 0x80b   : > { %v9934_v57 = vadd.f32 %v9933_v6, %v16526_v59  ;;  %v9935_v52 = vpop.f32.mrb[183].mxu1  ;;  %v16651_v59 = vld [vmem:[%s16778_s8] ss:$0 sm:$0xff] }
 0x80c   : > { %v10430_v52 = vld [vmem:[%s16780_s10] sm:$0xf] }
 0x80d   : > { %v16642_v36 = vpop.f32.mrb[156].mxu0  ;;  %10433 = vperm.xlu0 %11623, %v10430_v52  }
 0x80e   : > { %v9808_v32 = vpop.f32.mrb[157].mxu0 }
 0x80f   : > { %v16644_v21 = vpop.f32.mrb[158].mxu0 }
 0x810   : > { %v9938_v37 = vpop.f32.mrb[184].mxu1  ;;  %v9811_v11 = vpop.f32.mrb[159].mxu0 }
 0x811   : > { %v9939_v25 = vadd.f32 %v9938_v37, %v16531_v44  ;;  %v9940_v51 = vpop.f32.mrb[185].mxu1 }
 0x812   : > { %v9941_v28 = vpop.f32.mrb[186].mxu1 }
 0x813   : > { %v9942_v16 = vadd.f32 %v9941_v28, %v16536_v60  ;;  %v9943_v9 = vpop.f32.mrb[187].mxu1  ;;  %v16658_v60 = vld [vmem:[%s16779_s9] sm:$0x3] }
 0x814   : > { %11429 = vmatprep.mubr.msk.bf16.mxu1 %vm3622_vm4, %v16658_v60 }
 0x815   : > { %v10183_v33 = vpop.f32.mrb[160].mxu0 }
 0x816   : > { %v10310_v3 = vadd.f32 %v10183_v33, %v9923_v29  ;;  %v10185_v14 = vpop.f32.mrb[161].mxu0 }
 0x817   : > { %v10186_v23 = vpop.f32.mrb[162].mxu0 }
 0x818   : > { %v9946_v0 = vpop.f32.mrb[188].mxu1  ;;  %v10349_v22 = vadd.f32 %v16651_v59, %v10310_v3  ;;  %v10311_v20 = vadd.f32 %v10186_v23, %v9926_v7  ;;  %v10188_v42 = vpop.f32.mrb[163].mxu0 }
 0x819   : > { %v9947_v44 = vadd.f32 %v9946_v0, %v16541_v34  ;;  %v9948_v8 = vpop.f32.mrb[189].mxu1 }
 0x81a   : > { %v9949_v46 = vpop.f32.mrb[190].mxu1  ;;  %v10350_v18 = vadd.f32 %v16651_v59, %v10311_v20  ;;  %v10381_v49 = vmax.f32 %v10349_v22, 0.0 }
 0x81b   : > { %v9950_v12 = vadd.f32 %v9949_v46, %v16546_v5  ;;  %v9951_v40 = vpop.f32.mrb[191].mxu1 }
 0x81c   : > { %v10382_v54 = vmax.f32 %v10350_v18, 0.0 }
 0x81d   : > { %v10191_v34 = vpop.f32.mrb[164].mxu0 }
 0x81e   : > { %v16664_v45 = vpack.c.bf16 %v10382_v54, %v10381_v49  ;;  %v10312_v29 = vadd.f32 %v10191_v34, %v9931_v13  ;;  %v10193_v55 = vpop.f32.mrb[165].mxu0 }
 0x81f   : > { %v10194_v7 = vpop.f32.mrb[166].mxu0 }
 0x820   : > { %v9954_v62 = vpop.f32.mrb[192].mxu1  ;;  %v10351_v41 = vadd.f32 %v16651_v59, %v10312_v29  ;;  %v10313_v35 = vadd.f32 %v10194_v7, %v9934_v57  ;;  %v10196_v5 = vpop.f32.mrb[167].mxu0 }
 0x821   : > { %v9955_v30 = vadd.f32 %v9954_v62, %v16551_v1  ;;  %v9956_v6 = vpop.f32.mrb[193].mxu1 }
 0x822   : > { %v9957_v32 = vpop.f32.mrb[194].mxu1  ;;  %v10352_v37 = vadd.f32 %v16651_v59, %v10313_v35  ;;  %v10383_v51 = vmax.f32 %v10351_v41, 0.0 }
 0x823   : > { %v9958_v13 = vadd.f32 %v9957_v32, %v16556_v17  ;;  %v9959_v11 = vpop.f32.mrb[195].mxu1 }
 0x824   : > { %v10384_v28 = vmax.f32 %v10352_v37, 0.0 }
 0x825   : > { %v10199_v9 = vpop.f32.mrb[168].mxu0 }
 0x826   : > { %v16673_v33 = vpack.c.bf16 %v10384_v28, %v10383_v51  ;;  %v10314_v1 = vadd.f32 %v10199_v9, %v9939_v25  ;;  %v10201_v57 = vpop.f32.mrb[169].mxu0 }
 0x827   : > { %v10202_v14 = vpop.f32.mrb[170].mxu0 }
 0x828   : > { %v9962_v3 = vpop.f32.mrb[196].mxu1  ;;  %v10353_v0 = vadd.f32 %v16651_v59, %v10314_v1  ;;  %v10315_v22 = vadd.f32 %v10202_v14, %v9942_v16  ;;  %v10204_v8 = vpop.f32.mrb[171].mxu0 }
 0x829   : > { %v9963_v23 = vadd.f32 %v9962_v3, %v16561_v27  ;;  %v9964_v20 = vpop.f32.mrb[197].mxu1 }
 0x82a   : > { %v9965_v42 = vpop.f32.mrb[198].mxu1  ;;  %v10354_v17 = vadd.f32 %v16651_v59, %v10315_v22  ;;  %v10385_v40 = vmax.f32 %v10353_v0, 0.0 }
 0x82b   : > { %v9966_v46 = vadd.f32 %v9965_v42, %v16566_v50  ;;  %v9967_v18 = vpop.f32.mrb[199].mxu1 }
 0x82c   : > { %v10386_v49 = vmax.f32 %v10354_v17, 0.0 }
 0x82d   : > { %v10207_v54 = vpop.f32.mrb[172].mxu0 }
 0x82e   : > { %v16679_v25 = vpack.c.bf16 %v10386_v49, %v10385_v40  ;;  %v10316_v34 = vadd.f32 %v10207_v54, %v9947_v44  ;;  %v10209_v29 = vpop.f32.mrb[173].mxu0 }
 0x82f   : > { %v10210_v62 = vpop.f32.mrb[174].mxu0 }
 0x830   : > { %v9970_v55 = vpop.f32.mrb[200].mxu1  ;;  %v10355_v27 = vadd.f32 %v16651_v59, %v10316_v34  ;;  %v10317_v7 = vadd.f32 %v10210_v62, %v9950_v12  ;;  %v10212_v35 = vpop.f32.mrb[175].mxu0 }
 0x831   : > { %v9971_v16 = vadd.f32 %v9970_v55, %v16571_v61  ;;  %v9972_v41 = vpop.f32.mrb[201].mxu1 }
 0x832   : > { %v9973_v6 = vpop.f32.mrb[202].mxu1  ;;  %v10356_v50 = vadd.f32 %v16651_v59, %v10317_v7  ;;  %v10387_v32 = vmax.f32 %v10355_v27, 0.0 }
 0x833   : > { %v9974_v5 = vadd.f32 %v9973_v6, %v16576_v43  ;;  %v9975_v52 = vpop.f32.mrb[203].mxu1 }
 0x834   : > { %v10388_v37 = vmax.f32 %v10356_v50, 0.0 }
 0x835   : > { %v10215_v11 = vpop.f32.mrb[176].mxu0 }
 0x836   : > { %v16685_v44 = vpack.c.bf16 %v10388_v37, %v10387_v32  ;;  %v10318_v51 = vadd.f32 %v10215_v11, %v9955_v30  ;;  %v10217_v28 = vpop.f32.mrb[177].mxu0 }
 0x837   : > { %v10218_v1 = vpop.f32.mrb[178].mxu0 }
 0x838   : > { %v9978_v9 = vpop.f32.mrb[204].mxu1  ;;  %v10357_v61 = vadd.f32 %v16651_v59, %v10318_v51  ;;  %v10319_v57 = vadd.f32 %v10218_v1, %v9958_v13  ;;  %v10220_v14 = vpop.f32.mrb[179].mxu0 }
 0x839   : > { %v9979_v12 = vadd.f32 %v9978_v9, %v16581_v47  ;;  %v9980_v3 = vpop.f32.mrb[205].mxu1 }
 0x83a   : > { %v9981_v0 = vpop.f32.mrb[206].mxu1  ;;  %v10358_v43 = vadd.f32 %v16651_v59, %v10319_v57  ;;  %v10389_v8 = vmax.f32 %v10357_v61, 0.0 }
 0x83b   : > { %v9982_v22 = vadd.f32 %v9981_v0, %v16586_v48  ;;  %v9983_v20 = vpop.f32.mrb[207].mxu1 }
 0x83c   : > { %v10390_v42 = vmax.f32 %v10358_v43, 0.0 }
 0x83d   : > { %v10223_v17 = vpop.f32.mrb[180].mxu0 }
 0x83e   : > { %v16691_v30 = vpack.c.bf16 %v10390_v42, %v10389_v8  ;;  %v10320_v18 = vadd.f32 %v10223_v17, %v9963_v23  ;;  %v10225_v40 = vpop.f32.mrb[181].mxu0 }
 0x83f   : > { %v10226_v54 = vpop.f32.mrb[182].mxu0 }
 0x840   : > { %v9986_v49 = vpop.f32.mrb[208].mxu1  ;;  %v10359_v47 = vadd.f32 %v16651_v59, %v10320_v18  ;;  %v10321_v34 = vadd.f32 %v10226_v54, %v9966_v46  ;;  %v10228_v55 = vpop.f32.mrb[183].mxu0 }
 0x841   : > { %v9987_v13 = vadd.f32 %v9986_v49, %v16610_v39  ;;  %v9988_v29 = vpop.f32.mrb[209].mxu1 }
 0x842   : > { %v9989_v62 = vpop.f32.mrb[210].mxu1  ;;  %v10360_v48 = vadd.f32 %v16651_v59, %v10321_v34  ;;  %v10391_v41 = vmax.f32 %v10359_v47, 0.0 }
 0x843   : > { %v9990_v27 = vadd.f32 %v9989_v62, %v16612_v58  ;;  %v9991_v7 = vpop.f32.mrb[211].mxu1 }
 0x844   : > { %v10392_v35 = vmax.f32 %v10360_v48, 0.0 }
 0x845   : > { %v10231_v6 = vpop.f32.mrb[184].mxu0 }
 0x846   : > { %v16697_v23 = vpack.c.bf16 %v10392_v35, %v10391_v41  ;;  %v10322_v50 = vadd.f32 %v10231_v6, %v9971_v16  ;;  %v10233_v52 = vpop.f32.mrb[185].mxu0 }
 0x847   : > { %v10234_v37 = vpop.f32.mrb[186].mxu0 }
 0x848   : > { %v9994_v32 = vpop.f32.mrb[212].mxu1  ;;  %v10361_v39 = vadd.f32 %v16651_v59, %v10322_v50  ;;  %v10323_v11 = vadd.f32 %v10234_v37, %v9974_v5  ;;  %v10236_v28 = vpop.f32.mrb[187].mxu0 }
 0x849   : > { %v9995_v46 = vadd.f32 %v9994_v32, %v16614_v15  ;;  %v9996_v51 = vpop.f32.mrb[213].mxu1 }
 0x84a   : > { %v9997_v9 = vpop.f32.mrb[214].mxu1  ;;  %v10362_v58 = vadd.f32 %v16651_v59, %v10323_v11  ;;  %v10393_v57 = vmax.f32 %v10361_v39, 0.0 }
 0x84b   : > { %v9998_v1 = vadd.f32 %v9997_v9, %v16616_v38  ;;  %v9999_v61 = vpop.f32.mrb[215].mxu1 }
 0x84c   : > { %v10394_v3 = vmax.f32 %v10362_v58, 0.0 }
 0x84d   : > { %v10239_v14 = vpop.f32.mrb[188].mxu0 }
 0x84e   : > { %v16703_v16 = vpack.c.bf16 %v10394_v3, %v10393_v57  ;;  %v10324_v0 = vadd.f32 %v10239_v14, %v9979_v12  ;;  %v10241_v43 = vpop.f32.mrb[189].mxu0 }
 0x84f   : > { %v10242_v8 = vpop.f32.mrb[190].mxu0 }
 0x850   : > { %v10002_v20 = vpop.f32.mrb[216].mxu1  ;;  %v10363_v15 = vadd.f32 %v16651_v59, %v10324_v0  ;;  %v10325_v42 = vadd.f32 %v10242_v8, %v9982_v22  ;;  %v10244_v18 = vpop.f32.mrb[191].mxu0 }
 0x851   : > { %v10003_v5 = vadd.f32 %v10002_v20, %v16618_v63  ;;  %v10004_v17 = vpop.f32.mrb[217].mxu1 }
 0x852   : > { %v10005_v40 = vpop.f32.mrb[218].mxu1  ;;  %v10364_v38 = vadd.f32 %v16651_v59, %v10325_v42  ;;  %v10395_v47 = vmax.f32 %v10363_v15, 0.0 }
 0x853   : > { %v10006_v49 = vadd.f32 %v10005_v40, %v16620_v53  ;;  %v10007_v54 = vpop.f32.mrb[219].mxu1 }
 0x854   : > { %v10396_v34 = vmax.f32 %v10364_v38, 0.0 }
 0x855   : > { %v10247_v29 = vpop.f32.mrb[192].mxu0 }
 0x856   : > { %v16709_v12 = vpack.c.bf16 %v10396_v34, %v10395_v47  ;;  %v10326_v55 = vadd.f32 %v10247_v29, %v9987_v13  ;;  %v10249_v62 = vpop.f32.mrb[193].mxu0 }
 0x857   : > { %v10250_v7 = vpop.f32.mrb[194].mxu0 }
 0x858   : > { %v10010_v48 = vpop.f32.mrb[220].mxu1  ;;  %v10365_v63 = vadd.f32 %v16651_v59, %v10326_v55  ;;  %v10327_v41 = vadd.f32 %v10250_v7, %v9990_v27  ;;  %v10252_v6 = vpop.f32.mrb[195].mxu0 }
 0x859   : > { %v10011_v22 = vadd.f32 %v10010_v48, %v16622_v31  ;;  %v10012_v35 = vpop.f32.mrb[221].mxu1 }
 0x85a   : > { %v10013_v50 = vpop.f32.mrb[222].mxu1  ;;  %v10366_v53 = vadd.f32 %v16651_v59, %v10327_v41  ;;  %v10397_v37 = vmax.f32 %v10365_v63, 0.0 }
 0x85b   : > { %v10014_v52 = vadd.f32 %v10013_v50, %v16624_v19  ;;  %v10015_v32 = vpop.f32.mrb[223].mxu1  ;;  %v10440_v19 = vsel %vm3622_vm4, %v16664_v45, 0 }
 0x85c   : > { %v10398_v39 = vmax.f32 %v10366_v53, 0.0 }
 0x85d   : > { %v10255_v11 = vpop.f32.mrb[196].mxu0 }
 0x85e   : > { %v10422_v13 = vpack.c.bf16 %v10398_v39, %v10397_v37  ;;  %v10328_v51 = vadd.f32 %v10255_v11, %v9995_v46  ;;  %v10257_v28 = vpop.f32.mrb[197].mxu0 }
 0x85f   : > { %v10258_v58 = vpop.f32.mrb[198].mxu0 }
 0x860   : > { %v10018_v9 = vpop.f32.mrb[224].mxu1  ;;  %v10367_v61 = vadd.f32 %v16651_v59, %v10328_v51  ;;  %v10329_v27 = vadd.f32 %v10258_v58, %v9998_v1  ;;  %v10260_v3 = vpop.f32.mrb[199].mxu0  ;;  %11600 = vmatprep.subr.msk.bf16.mxu1 %vm3622_vm4, %v10422_v13 }
 0x861   : > { %v10019_v31 = vadd.f32 %v10018_v9, %v16626_v2  ;;  %v10020_v57 = vpop.f32.mrb[225].mxu1  ;;  %11414 = vmatpush3.bf16.xpose.msra.mxu1 %v10440_v19 }
 0x862   : > { %v10021_v14 = vpop.f32.mrb[226].mxu1  ;;  %v10368_v0 = vadd.f32 %v16651_v59, %v10329_v27  ;;  %v10399_v20 = vmax.f32 %v10367_v61, 0.0 }
 0x863   : > { %v10022_v46 = vadd.f32 %v10021_v14, %v16628_v56  ;;  %v10023_v43 = vpop.f32.mrb[227].mxu1  ;;  %v10443_v56 = vsel %vm3622_vm4, %v16673_v33, 0 }
 0x864   : > { %v10400_v8 = vmax.f32 %v10368_v0, 0.0 }
 0x865   : > { %v10263_v15 = vpop.f32.mrb[200].mxu0 }
 0x866   : > { %v10423_v42 = vpack.c.bf16 %v10400_v8, %v10399_v20  ;;  %v10330_v2 = vadd.f32 %v10263_v15, %v10003_v5  ;;  %v10265_v1 = vpop.f32.mrb[201].mxu0 }
 0x867   : > { %v10266_v18 = vpop.f32.mrb[202].mxu0 }
 0x868   : > { %v10026_v17 = vpop.f32.mrb[228].mxu1  ;;  %v10369_v40 = vadd.f32 %v16651_v59, %v10330_v2  ;;  %v10331_v45 = vadd.f32 %v10266_v18, %v10006_v49  ;;  %v10268_v47 = vpop.f32.mrb[203].mxu0  ;;  %11601 = vmatprep.subr.msk.bf16.mxu1 %vm3622_vm4, %v10423_v42 }
 0x869   : > { %v10027_v38 = vadd.f32 %v10026_v17, %v16630_v10  ;;  %v10028_v54 = vpop.f32.mrb[229].mxu1  ;;  %11416 = vmatpush3.bf16.xpose.msra.mxu1 %v10443_v56 }
 0x86a   : > { %v10029_v34 = vpop.f32.mrb[230].mxu1  ;;  %v10370_v29 = vadd.f32 %v16651_v59, %v10331_v45  ;;  %v10401_v62 = vmax.f32 %v10369_v40, 0.0 }
 0x86b   : > { %v10030_v5 = vadd.f32 %v10029_v34, %v16632_v4  ;;  %v10031_v55 = vpop.f32.mrb[231].mxu1  ;;  %v10446_v4 = vsel %vm3622_vm4, %v16679_v25, 0 }
 0x86c   : > { %v10402_v48 = vmax.f32 %v10370_v29, 0.0 }
 0x86d   : > { %v10271_v7 = vpop.f32.mrb[204].mxu0 }
 0x86e   : > { %v10424_v63 = vpack.c.bf16 %v10402_v48, %v10401_v62  ;;  %v10332_v10 = vadd.f32 %v10271_v7, %v10011_v22  ;;  %v10273_v49 = vpop.f32.mrb[205].mxu0  ;;  %v10455_v62 = vsel %vm3622_vm4, %v16697_v23, 0 }
 0x86f   : > { %v10274_v35 = vpop.f32.mrb[206].mxu0 }
 0x870   : > { %v10034_v41 = vpop.f32.mrb[232].mxu1  ;;  %v10371_v6 = vadd.f32 %v16651_v59, %v10332_v10  ;;  %v10333_v33 = vadd.f32 %v10274_v35, %v10014_v52  ;;  %v10276_v32 = vpop.f32.mrb[207].mxu0  ;;  %11602 = vmatprep.subr.msk.bf16.mxu1 %vm3622_vm4, %v10424_v63 }
 0x871   : > { %v10035_v50 = vadd.f32 %v10034_v41, %v16634_v24  ;;  %v10036_v53 = vpop.f32.mrb[233].mxu1  ;;  %11418 = vmatpush3.bf16.xpose.msra.mxu1 %v10446_v4 }
 0x872   : > { %v10037_v37 = vpop.f32.mrb[234].mxu1  ;;  %v10372_v39 = vadd.f32 %v16651_v59, %v10333_v33  ;;  %v10403_v13 = vmax.f32 %v10371_v6, 0.0  ;;  %v10458_v33 = vsel %vm3622_vm4, %v16703_v16, 0 }
 0x873   : > { %v10038_v22 = vadd.f32 %v10037_v37, %v16636_v26  ;;  %v10039_v11 = vpop.f32.mrb[235].mxu1  ;;  %v10449_v26 = vsel %vm3622_vm4, %v16685_v44, 0  ;;  %v10452_v44 = vsel %vm3622_vm4, %v16691_v30, 0 }
 0x874   : > { %v10404_v51 = vmax.f32 %v10372_v39, 0.0  ;;  %v10461_v39 = vsel %vm3622_vm4, %v16709_v12, 0 }
 0x875   : > { %v10279_v28 = vpop.f32.mrb[208].mxu0 }
 0x876   : > { %v10425_v9 = vpack.c.bf16 %v10404_v51, %v10403_v13  ;;  %v10334_v24 = vadd.f32 %v10279_v28, %v10019_v31  ;;  %v10281_v52 = vpop.f32.mrb[209].mxu0 }
 0x877   : > { %v10282_v61 = vpop.f32.mrb[210].mxu0 }
 0x878   : > { %v10042_v58 = vpop.f32.mrb[236].mxu1  ;;  %v10373_v27 = vadd.f32 %v16651_v59, %v10334_v24  ;;  %v10335_v25 = vadd.f32 %v10282_v61, %v10022_v46  ;;  %v10284_v19 = vpop.f32.mrb[211].mxu0  ;;  %11603 = vmatprep.subr.msk.bf16.mxu1 %vm3622_vm4, %v10425_v9 }
 0x879   : > { %v10043_v57 = vadd.f32 %v10042_v58, %v16642_v36  ;;  %v10044_v3 = vpop.f32.mrb[237].mxu1  ;;  %11420 = vmatpush3.bf16.xpose.msra.mxu1 %v10449_v26 }
 0x87a   : > { %v10045_v14 = vpop.f32.mrb[238].mxu1  ;;  %v10374_v0 = vadd.f32 %v16651_v59, %v10335_v25  ;;  %v10405_v20 = vmax.f32 %v10373_v27, 0.0 }
 0x87b   : > { %v10046_v31 = vadd.f32 %v10045_v14, %v16644_v21  ;;  %v10047_v43 = vpop.f32.mrb[239].mxu1 }
 0x87c   : > { %v10406_v8 = vmax.f32 %v10374_v0, 0.0 }
 0x87d   : > { %v10287_v15 = vpop.f32.mrb[212].mxu0 }
 0x87e   : > { %v10426_v42 = vpack.c.bf16 %v10406_v8, %v10405_v20  ;;  %v10336_v36 = vadd.f32 %v10287_v15, %v10027_v38  ;;  %v10289_v46 = vpop.f32.mrb[213].mxu0 }
 0x87f   : > { %v10290_v2 = vpop.f32.mrb[214].mxu0 }
 0x880   : > { %v10375_v1 = vadd.f32 %v16651_v59, %v10336_v36  ;;  %v10337_v17 = vadd.f32 %v10290_v2, %v10030_v5  ;;  %v10292_v18 = vpop.f32.mrb[215].mxu0  ;;  %11604 = vmatprep.subr.msk.bf16.mxu1 %vm3622_vm4, %v10426_v42 }
 0x881   : > { %11422 = vmatpush3.bf16.xpose.msra.mxu1 %v10452_v44 }
 0x882   : > { %v10376_v21 = vadd.f32 %v16651_v59, %v10337_v17  ;;  %v10407_v40 = vmax.f32 %v10375_v1, 0.0 }
 0x884   : > { %v10408_v45 = vmax.f32 %v10376_v21, 0.0 }
 0x885   : > { %v10295_v54 = vpop.f32.mrb[216].mxu0 }
 0x886   : > { %v10427_v47 = vpack.c.bf16 %v10408_v45, %v10407_v40  ;;  %v10338_v56 = vadd.f32 %v10295_v54, %v10035_v50  ;;  %v10297_v38 = vpop.f32.mrb[217].mxu0 }
 0x887   : > { %v10298_v34 = vpop.f32.mrb[218].mxu0 }
 0x888   : > { %v10377_v29 = vadd.f32 %v16651_v59, %v10338_v56  ;;  %v10339_v55 = vadd.f32 %v10298_v34, %v10038_v22  ;;  %v10300_v5 = vpop.f32.mrb[219].mxu0  ;;  %11605 = vmatprep.subr.msk.bf16.mxu1 %vm3622_vm4, %v10427_v47 }
 0x889   : > { %11424 = vmatpush3.bf16.xpose.msra.mxu1 %v10455_v62 }
 0x88a   : > { %v10378_v30 = vadd.f32 %v16651_v59, %v10339_v55  ;;  %v10409_v48 = vmax.f32 %v10377_v29, 0.0 }
 0x88c   : > { %v10410_v7 = vmax.f32 %v10378_v30, 0.0  ;;  %v10434_v22 = vpop.permute.xlu0 %10433 }
 0x88d   : > { %v10303_v63 = vpop.f32.mrb[220].mxu0 }
 0x88e   : > { %v10428_v10 = vpack.c.bf16 %v10410_v7, %v10409_v48  ;;  %v10340_v49 = vadd.f32 %v10303_v63, %v10043_v57  ;;  %v10305_v41 = vpop.f32.mrb[221].mxu0 }
 0x88f   : > { %v10306_v35 = vpop.f32.mrb[222].mxu0 }
 0x890   : > { %v10379_v6 = vadd.f32 %v16651_v59, %v10340_v49  ;;  %v10341_v50 = vadd.f32 %v10306_v35, %v10046_v31  ;;  %11606 = vmatprep.subr.msk.bf16.mxu1 %vm3622_vm4, %v10428_v10  ;;  %v10308_v23 = vpop.f32.mrb[223].mxu0 }
 0x891   : > { %11426 = vmatpush3.bf16.xpose.msra.mxu1 %v10458_v33 }
 0x892   : > { %v10380_v53 = vadd.f32 %v16651_v59, %v10341_v50  ;;  %v10411_v32 = vmax.f32 %v10379_v6, 0.0 }
 0x894   : > { %v10412_v4 = vmax.f32 %v10380_v53, 0.0 }
 0x896   : > { %v10429_v37 = vpack.c.bf16 %v10412_v4, %v10411_v32 }
 0x898   : > { %11607 = vmatprep.subr.msk.bf16.mxu1 %vm3622_vm4, %v10429_v37 }
 0x899   : > { %11428 = vmatpush3.bf16.xpose.msra.mxu1 %v10461_v39 }
 0x8a0   : > { %11430 = vmatmul.mubr.msk.bf16.vlgmr.msra.gmra.mrb[240].mxu1 %vm3622_vm4, %v16658_v60 }
 0x973   : > { %v10521_v11 = vpop.f32.mrb[240].mxu1 }
 0x974   : > { %v10523_v16 = vpop.f32.mrb[241].mxu1  ;;  %v10522_v13 = vadd.f32 %v10521_v11, %v10434_v22 }
 0x975   : > { %v10525_v51 = vpop.f32.mrb[242].mxu1  ;;  %v10524_v28 = vadd.f32 %v10523_v16, %v10434_v22 }
 0x976   : > { %v10526_v59 = vpop.f32.mrb[243].mxu1 }
 0x977   : > { %v10530_v9 = vcombine.low %v10522_v13, %v10524_v28 }
 0x979   : > { %10532 = vst [vmem:[%s386_s12] sm:$0xff] %v10530_v9 }
 0x97a PF: > { %s21_s17 = sadd.s32 1, %s11855_s17  }
 0x97b   : > { %p18_p4 = scmp.ge.s32.totalorder %s21_s17, 4  }
 0x97d   :  { %20 = sbr.rel (!%p18_p4) target bundleno = 1 (0x1), region = 104 }

</bundles_post_ra>
